<compile_context>
chip_gen: v7x
topology: tpu7x:2x2x1
jax: 0.10.0
libtpu: 0.0.40
codegen_flags: <defaults>
</compile_context>

<pallas_src>
import math
from functools import partial

import jax
import jax.numpy as jnp
from jax.experimental import pallas as pl
from jax.experimental.pallas import tpu as pltpu

F32 = jnp.float32
BF16 = jnp.bfloat16
BN_EPS = 1e-5

TM_MAX = 128   # M tile (output positions); 128 is safe/efficient across v5e/v6e/v7x
TN_MAX = 256   # Cout tile; keeps outputs lane-dense and splits Cout=512 across 2 tiles


def _round_up(x, m):
    return ((x + m - 1) // m) * m


# ----------------------------------------------------------------------------------
# Pallas kernels
# ----------------------------------------------------------------------------------

def _tap_matmul_kernel(*refs, relu, has_res):
    """acc += sum_g x[g] @ w[g]; epilogue: + shift (+ residual), optional ReLU."""
    if has_res:
        x_ref, w_ref, shift_ref, res_ref, o_ref, acc_ref = refs
    else:
        x_ref, w_ref, shift_ref, o_ref, acc_ref = refs
        res_ref = None

    @pl.when(pl.program_id(2) == 0)
    def _():
        acc_ref[...] = jnp.zeros_like(acc_ref)

    g_taps = x_ref.shape[0]  # static (block shape)
    part = jnp.dot(x_ref[0], w_ref[0], preferred_element_type=jnp.float32)
    for g in range(1, g_taps):  # static unroll over grouped taps
        part = part + jnp.dot(x_ref[g], w_ref[g], preferred_element_type=jnp.float32)
    acc_ref[...] += part

    @pl.when(pl.program_id(2) == pl.num_programs(2) - 1)
    def _():
        out = acc_ref[...] + shift_ref[...]
        if has_res:
            out = out + res_ref[...].astype(jnp.float32)
        if relu:
            out = jnp.maximum(out, 0.0)
        o_ref[...] = out.astype(o_ref.dtype)


def _maxpool_kernel(p_ref, o_ref):
    # p_ref: (Kwin, TM, C) -> max over window axis; lane-dense (C-last) output.
    o_ref[...] = jnp.max(p_ref[...].astype(jnp.float32), axis=0).astype(o_ref.dtype)


def _avgpool_kernel(x_ref, o_ref, acc_ref, *, inv_count):
    @pl.when(pl.program_id(0) == 0)
    def _():
        acc_ref[...] = jnp.zeros_like(acc_ref)

    acc_ref[...] += jnp.sum(x_ref[...].astype(jnp.float32), axis=1)

    @pl.when(pl.program_id(0) == pl.num_programs(0) - 1)
    def _():
        o_ref[...] = (acc_ref[...] * inv_count).astype(o_ref.dtype)


# ----------------------------------------------------------------------------------
# Fused tap-matmul wrapper (conv+BN+residual+ReLU and the FC layer)
# ----------------------------------------------------------------------------------

def tap_matmul(x_taps, w_taps, shift, res, *, group, relu, out_dtype):
    """x_taps: (T, M, Kc) bf16, w_taps: (T, Kc, Cout) bf16, shift: (1, Cout) f32,
    res: (M, Cout) or None.  Returns (M, Cout) in out_dtype."""
    T, M, Kc = x_taps.shape
    Cout = w_taps.shape[2]
    assert T % group == 0

    TM = min(TM_MAX, _round_up(M, 8))
    Mp = pl.cdiv(M, TM) * TM
    TN = Cout if Cout <= TN_MAX else TN_MAX
    Cp = pl.cdiv(Cout, TN) * TN

    if Mp != M:
        x_taps = jnp.pad(x_taps, ((0, 0), (0, Mp - M), (0, 0)))
    if Cp != Cout:
        w_taps = jnp.pad(w_taps, ((0, 0), (0, 0), (0, Cp - Cout)))
        shift = jnp.pad(shift, ((0, 0), (0, Cp - Cout)))
    has_res = res is not None
    if has_res and (Mp != M or Cp != Cout):
        res = jnp.pad(res, ((0, Mp - M), (0, Cp - Cout)))

    in_specs = [
        pl.BlockSpec((group, TM, Kc), lambda i, j, t: (t, i, 0)),
        pl.BlockSpec((group, Kc, TN), lambda i, j, t: (t, 0, j)),
        pl.BlockSpec((1, TN), lambda i, j, t: (0, j)),
    ]
    args = [x_taps, w_taps, shift]
    if has_res:
        in_specs.append(pl.BlockSpec((TM, TN), lambda i, j, t: (i, j)))
        args.append(res)

    out = pl.pallas_call(
        partial(_tap_matmul_kernel, relu=relu, has_res=has_res),
        out_shape=jax.ShapeDtypeStruct((Mp, Cp), out_dtype),
        grid_spec=pltpu.PrefetchScalarGridSpec(
            num_scalar_prefetch=0,
            grid=(Mp // TM, Cp // TN, T // group),
            in_specs=in_specs,
            out_specs=pl.BlockSpec((TM, TN), lambda i, j, t: (i, j)),
            scratch_shapes=[pltpu.VMEM((TM, TN), jnp.float32)],
        ),
        compiler_params=pltpu.CompilerParams(
            dimension_semantics=("parallel", "parallel", "arbitrary")),
    )(*args)
    if Mp != M or Cp != Cout:
        out = out[:M, :Cout]
    return out


# ----------------------------------------------------------------------------------
# Glue: tap extraction (strided slices), conv / pool wrappers
# ----------------------------------------------------------------------------------

def extract_taps(x, ksize, stride, padding, dilation, pad_value=0.0):
    """x: (N, D, H, W, C) -> ((T, N*Do*Ho*Wo, C), (Do, Ho, Wo)), T = kd*kh*kw."""
    N, D, H, W, C = x.shape
    kd, kh, kw = ksize
    sd, sh, sw = stride
    pd, ph, pw = padding
    dd, dh, dw = dilation
    Do = (D + 2 * pd - dd * (kd - 1) - 1) // sd + 1
    Ho = (H + 2 * ph - dh * (kh - 1) - 1) // sh + 1
    Wo = (W + 2 * pw - dw * (kw - 1) - 1) // sw + 1
    xp = jnp.pad(x, ((0, 0), (pd, pd), (ph, ph), (pw, pw), (0, 0)),
                 constant_values=pad_value)
    M = N * Do * Ho * Wo
    taps = []
    for a in range(kd):
        for b in range(kh):
            for c in range(kw):
                sl = xp[:,
                        a * dd: a * dd + sd * (Do - 1) + 1: sd,
                        b * dh: b * dh + sh * (Ho - 1) + 1: sh,
                        c * dw: c * dw + sw * (Wo - 1) + 1: sw,
                        :]
                taps.append(sl.reshape(M, C))
    return jnp.stack(taps, axis=0), (Do, Ho, Wo)


def conv3d_bn_act(x, conv, *, k, stride, padding, dilation, relu, residual=None):
    """x: (N, D, H, W, Cin) bf16; conv = {'w': (k^3, Cin, Cout) bf16, 'shift': (1, Cout)}."""
    N = x.shape[0]
    Cout = conv["w"].shape[2]
    taps, (Do, Ho, Wo) = extract_taps(
        x, (k,) * 3, (stride,) * 3, (padding,) * 3, (dilation,) * 3)
    M = N * Do * Ho * Wo
    res = None if residual is None else residual.reshape(M, Cout)
    out = tap_matmul(taps, conv["w"], conv["shift"], res,
                     group=k, relu=relu, out_dtype=BF16)
    return out.reshape(N, Do, Ho, Wo, Cout)


def maxpool3d(x, *, k, stride, padding):
    N, _, _, _, C = x.shape
    # -inf padding: for k=3, s=2, p=1 every window contains a real element.
    taps, (Do, Ho, Wo) = extract_taps(
        x, (k,) * 3, (stride,) * 3, (padding,) * 3, (1, 1, 1), pad_value=-jnp.inf)
    Kwin, M, _ = taps.shape
    TMp = min(256, _round_up(M, 8))
    Mp = pl.cdiv(M, TMp) * TMp
    if Mp != M:
        taps = jnp.pad(taps, ((0, 0), (0, Mp - M), (0, 0)))
    out = pl.pallas_call(
        _maxpool_kernel,
        out_shape=jax.ShapeDtypeStruct((Mp, C), x.dtype),
        grid_spec=pltpu.PrefetchScalarGridSpec(
            num_scalar_prefetch=0,
            grid=(Mp // TMp,),
            in_specs=[pl.BlockSpec((Kwin, TMp, C), lambda i: (0, i, 0))],
            out_specs=pl.BlockSpec((TMp, C), lambda i: (i, 0)),
        ),
        compiler_params=pltpu.CompilerParams(dimension_semantics=("parallel",)),
    )(taps)
    return out[:M].reshape(N, Do, Ho, Wo, C)


def global_avg_pool(x):
    """x: (N, D, H, W, C) -> (N, C) float32  (adaptive_avg_pool3d to (1,1,1))."""
    N, D, H, W, C = x.shape
    S = D * H * W
    xs = x.reshape(N, S, C)
    TS = min(512, S)
    Sp = pl.cdiv(S, TS) * TS
    if Sp != S:
        xs = jnp.pad(xs, ((0, 0), (0, Sp - S), (0, 0)))  # zeros don't change the sum
    return pl.pallas_call(
        partial(_avgpool_kernel, inv_count=1.0 / float(S)),
        out_shape=jax.ShapeDtypeStruct((N, C), jnp.float32),
        grid_spec=pltpu.PrefetchScalarGridSpec(
            num_scalar_prefetch=0,
            grid=(Sp // TS,),
            in_specs=[pl.BlockSpec((N, TS, C), lambda s: (0, s, 0))],
            out_specs=pl.BlockSpec((N, C), lambda s: (0, 0)),
            scratch_shapes=[pltpu.VMEM((N, C), jnp.float32)],
        ),
        compiler_params=pltpu.CompilerParams(dimension_semantics=("arbitrary",)),
    )(xs)


# ----------------------------------------------------------------------------------
# Parameter init (deterministic, matches module __init__; BasicBlock, expansion=1)
# ----------------------------------------------------------------------------------

def _fold_bn_conv(key, k, cin, cout, cin_pad=None):
    """Kaiming-normal conv weight with inference-mode BN folded in.
    Returns {'w': (k^3, cin[_pad], cout) bf16 tap-major weight, 'shift': (1, cout) f32}."""
    fan_out = cout * k * k * k
    std = math.sqrt(2.0 / fan_out)  # kaiming_normal_(mode='fan_out')
    w = jax.random.normal(key, (k, k, k, cin, cout), F32) * std
    # Fold eval-mode BN with module-init stats (gamma=1, beta=0, mean=0, var=1):
    #   scale = gamma/sqrt(var+eps), shift = beta - mean*scale.
    # TODO(synk): if pretrained running stats are ever loaded, fold those instead.
    scale = 1.0 / math.sqrt(1.0 + BN_EPS)
    w = w * scale
    shift = jnp.zeros((1, cout), F32)
    if cin_pad is not None and cin_pad > cin:
        # zero-pad the contraction (input-channel) dim -> MXU-friendly, identical math
        w = jnp.pad(w, ((0, 0), (0, 0), (0, 0), (0, cin_pad - cin), (0, 0)))
        cin = cin_pad
    return {"w": w.reshape(k ** 3, cin, cout).astype(BF16), "shift": shift}


def init_params(key, layers=(1, 1, 1, 1), num_class=5, in_channels=53):
    keys = iter(jax.random.split(key, 64))
    params = {"conv1": _fold_bn_conv(next(keys), 7, in_channels, 64, cin_pad=64)}
    inplanes = 64
    plane_list = [64, 128, 256, 512]     # 64, 64*2, 128*2, 256*2
    strides = [1, 2, 1, 1]
    for li in range(4):
        planes = plane_list[li]
        blocks = []
        for bi in range(layers[li]):
            s = strides[li] if bi == 0 else 1
            blk = {
                "conv1": _fold_bn_conv(next(keys), 3, inplanes, planes),
                "conv2": _fold_bn_conv(next(keys), 3, planes, planes),
            }
            if bi == 0 and (s != 1 or inplanes != planes):
                # shortcut_type='B': 1x1x1 conv (stride s) + BN
                blk["down"] = _fold_bn_conv(next(keys), 1, inplanes, planes)
            blocks.append(blk)
            inplanes = planes
        params[f"layer{li + 1}"] = blocks
    fea_dim = 512
    bound = 1.0 / math.sqrt(fea_dim)
    fc_w = jax.random.uniform(next(keys), (fea_dim, num_class), F32, -bound, bound)
    fc_b = jax.random.uniform(next(keys), (num_class,), F32, -bound, bound)
    params["fc_w"] = fc_w.reshape(1, fea_dim, num_class).astype(BF16)
    params["fc_b"] = fc_b.reshape(1, num_class)
    return params


# ----------------------------------------------------------------------------------
# Forward pass
# ----------------------------------------------------------------------------------

def basic_block(x, blk, *, stride, dilation):
    out = conv3d_bn_act(x, blk["conv1"], k=3, stride=stride, padding=dilation,
                        dilation=dilation, relu=True)
    if "down" in blk:
        residual = conv3d_bn_act(x, blk["down"], k=1, stride=stride, padding=0,
                                 dilation=1, relu=False)
    else:
        residual = x
    # conv2 + bn2 + residual add + relu, fused in one Pallas call
    out = conv3d_bn_act(out, blk["conv2"], k=3, stride=1, padding=dilation,
                        dilation=dilation, relu=True, residual=residual)
    return out


def resnet3d_forward(params, x_ncdhw):
    # NCDHW f32 -> NDHWC bf16, input channels zero-padded to conv1's folded Cin width.
    x = jnp.transpose(x_ncdhw.astype(F32), (0, 2, 3, 4, 1))
    cin_pad = params["conv1"]["w"].shape[1]
    if x.shape[-1] < cin_pad:
        x = jnp.pad(x, ((0, 0),) * 4 + ((0, cin_pad - x.shape[-1]),))
    x = x.astype(BF16)

    x = conv3d_bn_act(x, params["conv1"], k=7, stride=2, padding=3, dilation=1,
                      relu=True)
    x = maxpool3d(x, k=3, stride=2, padding=1)

    strides = (1, 2, 1, 1)
    dilations = (1, 1, 2, 4)
    for li in range(4):
        for bi, blk in enumerate(params[f"layer{li + 1}"]):
            s = strides[li] if bi == 0 else 1
            x = basic_block(x, blk, stride=s, dilation=dilations[li])

    emb = global_avg_pool(x)  # (N, 512) f32
    out = tap_matmul(emb.astype(BF16)[None], params["fc_w"], params["fc_b"], None,
                     group=1, relu=False, out_dtype=F32)
    return out  # (N, num_class)


# ----------------------------------------------------------------------------------

if __name__ == "__main__":
    key = jax.random.PRNGKey(0)
    kx, kp = jax.random.split(key)
    # input: (batch=2, channels=53 as required by conv1, D=H=W=8)
    x = jax.random.normal(kx, (2, 53, 8, 8, 8), F32)
    params = init_params(kp, layers=(1, 1, 1, 1), num_class=5)

    fwd = jax.jit(resnet3d_forward)
    out = jax.block_until_ready(fwd(params, x))
    assert out.shape == (2, 5), out.shape
    assert bool(jnp.all(jnp.isfinite(out)))
    print("KERNEL_OK")
</pallas_src>

<mosaic_0001>
module attributes {stable_mosaic.version = 11 : i64} {
  func.func @_tap_matmul_kernel(%arg0: i32, %arg1: i32, %arg2: i32, %arg3: memref<7x128x64xbf16, #tpu.memory_space<vmem>>, %arg4: memref<7x64x64xbf16, #tpu.memory_space<vmem>>, %arg5: memref<1x64xf32, #tpu.memory_space<vmem>>, %arg6: memref<128x64xbf16, #tpu.memory_space<vmem>>, %arg7: memref<128x64xf32, #tpu.memory_space<vmem>>) attributes {dimension_semantics = [#tpu.dimension_semantics<parallel>, #tpu.dimension_semantics<parallel>, #tpu.dimension_semantics<arbitrary>], iteration_bounds = array<i64: 1, 1, 49>, scalar_prefetch = 0 : i64, scratch_operands = 1 : i64, tpu.core_type = #tpu.core_type<tc>, window_params = [{transform_indices = @transform_0, window_bounds = array<i64: 7, 128, 64>}, {transform_indices = @transform_1, window_bounds = array<i64: 7, 64, 64>}, {transform_indices = @transform_2, window_bounds = array<i64: 1, 64>}, {transform_indices = @transform_3, window_bounds = array<i64: 128, 64>}]} {
    %c0_i32 = arith.constant 0 : i32
    %0 = arith.cmpi eq, %arg2, %c0_i32 : i32
    %1 = arith.extui %0 : i1 to i32
    %c0_i32_0 = arith.constant 0 : i32
    %2 = arith.cmpi ne, %1, %c0_i32_0 : i32
    scf.if %2 {
      %cst_47 = arith.constant 0.000000e+00 : f32
      %50 = vector.broadcast %cst_47 : f32 to vector<128x64xf32>
      %c0_48 = arith.constant 0 : index
      %c0_49 = arith.constant 0 : index
      %51 = vector.load %arg7[%c0_48, %c0_49] : memref<128x64xf32, #tpu.memory_space<vmem>>, vector<128x64xf32>
      tpu.vector_store %arg7[%c0_48, %c0_49], %50 {strides = array<i32>} : memref<128x64xf32, #tpu.memory_space<vmem>>, vector<128x64xf32>,
    } else {
    }
    %c0 = arith.constant 0 : index
    %c0_1 = arith.constant 0 : index
    %c0_2 = arith.constant 0 : index
    %3 = vector.load %arg3[%c0, %c0_1, %c0_2] : memref<7x128x64xbf16, #tpu.memory_space<vmem>>, vector<1x128x64xbf16>
    %4 = vector.shape_cast %3 : vector<1x128x64xbf16> to vector<128x64xbf16>
    %c0_3 = arith.constant 0 : index
    %c0_4 = arith.constant 0 : index
    %c0_5 = arith.constant 0 : index
    %5 = vector.load %arg4[%c0_3, %c0_4, %c0_5] : memref<7x64x64xbf16, #tpu.memory_space<vmem>>, vector<1x64x64xbf16>
    %6 = vector.shape_cast %5 : vector<1x64x64xbf16> to vector<64x64xbf16>
    %cst = arith.constant dense<0.000000e+00> : vector<128x64xf32>
    %7 = tpu.matmul %4, %6, %cst {dimension_numbers = #tpu.dot_dimension_numbers<[1], [0], [0], [1], [0, 0, 1, 1], [], []>} : vector<128x64xbf16>, vector<64x64xbf16>, vector<128x64xf32> -> vector<128x64xf32>
    %c1 = arith.constant 1 : index
    %c0_6 = arith.constant 0 : index
    %c0_7 = arith.constant 0 : index
    %8 = vector.load %arg3[%c1, %c0_6, %c0_7] : memref<7x128x64xbf16, #tpu.memory_space<vmem>>, vector<1x128x64xbf16>
    %9 = vector.shape_cast %8 : vector<1x128x64xbf16> to vector<128x64xbf16>
    %c1_8 = arith.constant 1 : index
    %c0_9 = arith.constant 0 : index
    %c0_10 = arith.constant 0 : index
    %10 = vector.load %arg4[%c1_8, %c0_9, %c0_10] : memref<7x64x64xbf16, #tpu.memory_space<vmem>>, vector<1x64x64xbf16>
    %11 = vector.shape_cast %10 : vector<1x64x64xbf16> to vector<64x64xbf16>
    %cst_11 = arith.constant dense<0.000000e+00> : vector<128x64xf32>
    %12 = tpu.matmul %9, %11, %cst_11 {dimension_numbers = #tpu.dot_dimension_numbers<[1], [0], [0], [1], [0, 0, 1, 1], [], []>} : vector<128x64xbf16>, vector<64x64xbf16>, vector<128x64xf32> -> vector<128x64xf32>
    %13 = arith.addf %7, %12 : vector<128x64xf32>
    %c2 = arith.constant 2 : index
    %c0_12 = arith.constant 0 : index
    %c0_13 = arith.constant 0 : index
    %14 = vector.load %arg3[%c2, %c0_12, %c0_13] : memref<7x128x64xbf16, #tpu.memory_space<vmem>>, vector<1x128x64xbf16>
    %15 = vector.shape_cast %14 : vector<1x128x64xbf16> to vector<128x64xbf16>
    %c2_14 = arith.constant 2 : index
    %c0_15 = arith.constant 0 : index
    %c0_16 = arith.constant 0 : index
    %16 = vector.load %arg4[%c2_14, %c0_15, %c0_16] : memref<7x64x64xbf16, #tpu.memory_space<vmem>>, vector<1x64x64xbf16>
    %17 = vector.shape_cast %16 : vector<1x64x64xbf16> to vector<64x64xbf16>
    %cst_17 = arith.constant dense<0.000000e+00> : vector<128x64xf32>
    %18 = tpu.matmul %15, %17, %cst_17 {dimension_numbers = #tpu.dot_dimension_numbers<[1], [0], [0], [1], [0, 0, 1, 1], [], []>} : vector<128x64xbf16>, vector<64x64xbf16>, vector<128x64xf32> -> vector<128x64xf32>
    %19 = arith.addf %13, %18 : vector<128x64xf32>
    %c3 = arith.constant 3 : index
    %c0_18 = arith.constant 0 : index
    %c0_19 = arith.constant 0 : index
    %20 = vector.load %arg3[%c3, %c0_18, %c0_19] : memref<7x128x64xbf16, #tpu.memory_space<vmem>>, vector<1x128x64xbf16>
    %21 = vector.shape_cast %20 : vector<1x128x64xbf16> to vector<128x64xbf16>
    %c3_20 = arith.constant 3 : index
    %c0_21 = arith.constant 0 : index
    %c0_22 = arith.constant 0 : index
    %22 = vector.load %arg4[%c3_20, %c0_21, %c0_22] : memref<7x64x64xbf16, #tpu.memory_space<vmem>>, vector<1x64x64xbf16>
    %23 = vector.shape_cast %22 : vector<1x64x64xbf16> to vector<64x64xbf16>
    %cst_23 = arith.constant dense<0.000000e+00> : vector<128x64xf32>
    %24 = tpu.matmul %21, %23, %cst_23 {dimension_numbers = #tpu.dot_dimension_numbers<[1], [0], [0], [1], [0, 0, 1, 1], [], []>} : vector<128x64xbf16>, vector<64x64xbf16>, vector<128x64xf32> -> vector<128x64xf32>
    %25 = arith.addf %19, %24 : vector<128x64xf32>
    %c4 = arith.constant 4 : index
    %c0_24 = arith.constant 0 : index
    %c0_25 = arith.constant 0 : index
    %26 = vector.load %arg3[%c4, %c0_24, %c0_25] : memref<7x128x64xbf16, #tpu.memory_space<vmem>>, vector<1x128x64xbf16>
    %27 = vector.shape_cast %26 : vector<1x128x64xbf16> to vector<128x64xbf16>
    %c4_26 = arith.constant 4 : index
    %c0_27 = arith.constant 0 : index
    %c0_28 = arith.constant 0 : index
    %28 = vector.load %arg4[%c4_26, %c0_27, %c0_28] : memref<7x64x64xbf16, #tpu.memory_space<vmem>>, vector<1x64x64xbf16>
    %29 = vector.shape_cast %28 : vector<1x64x64xbf16> to vector<64x64xbf16>
    %cst_29 = arith.constant dense<0.000000e+00> : vector<128x64xf32>
    %30 = tpu.matmul %27, %29, %cst_29 {dimension_numbers = #tpu.dot_dimension_numbers<[1], [0], [0], [1], [0, 0, 1, 1], [], []>} : vector<128x64xbf16>, vector<64x64xbf16>, vector<128x64xf32> -> vector<128x64xf32>
    %31 = arith.addf %25, %30 : vector<128x64xf32>
    %c5 = arith.constant 5 : index
    %c0_30 = arith.constant 0 : index
    %c0_31 = arith.constant 0 : index
    %32 = vector.load %arg3[%c5, %c0_30, %c0_31] : memref<7x128x64xbf16, #tpu.memory_space<vmem>>, vector<1x128x64xbf16>
    %33 = vector.shape_cast %32 : vector<1x128x64xbf16> to vector<128x64xbf16>
    %c5_32 = arith.constant 5 : index
    %c0_33 = arith.constant 0 : index
    %c0_34 = arith.constant 0 : index
    %34 = vector.load %arg4[%c5_32, %c0_33, %c0_34] : memref<7x64x64xbf16, #tpu.memory_space<vmem>>, vector<1x64x64xbf16>
    %35 = vector.shape_cast %34 : vector<1x64x64xbf16> to vector<64x64xbf16>
    %cst_35 = arith.constant dense<0.000000e+00> : vector<128x64xf32>
    %36 = tpu.matmul %33, %35, %cst_35 {dimension_numbers = #tpu.dot_dimension_numbers<[1], [0], [0], [1], [0, 0, 1, 1], [], []>} : vector<128x64xbf16>, vector<64x64xbf16>, vector<128x64xf32> -> vector<128x64xf32>
    %37 = arith.addf %31, %36 : vector<128x64xf32>
    %c6 = arith.constant 6 : index
    %c0_36 = arith.constant 0 : index
    %c0_37 = arith.constant 0 : index
    %38 = vector.load %arg3[%c6, %c0_36, %c0_37] : memref<7x128x64xbf16, #tpu.memory_space<vmem>>, vector<1x128x64xbf16>
    %39 = vector.shape_cast %38 : vector<1x128x64xbf16> to vector<128x64xbf16>
    %c6_38 = arith.constant 6 : index
    %c0_39 = arith.constant 0 : index
    %c0_40 = arith.constant 0 : index
    %40 = vector.load %arg4[%c6_38, %c0_39, %c0_40] : memref<7x64x64xbf16, #tpu.memory_space<vmem>>, vector<1x64x64xbf16>
    %41 = vector.shape_cast %40 : vector<1x64x64xbf16> to vector<64x64xbf16>
    %cst_41 = arith.constant dense<0.000000e+00> : vector<128x64xf32>
    %42 = tpu.matmul %39, %41, %cst_41 {dimension_numbers = #tpu.dot_dimension_numbers<[1], [0], [0], [1], [0, 0, 1, 1], [], []>} : vector<128x64xbf16>, vector<64x64xbf16>, vector<128x64xf32> -> vector<128x64xf32>
    %43 = arith.addf %37, %42 : vector<128x64xf32>
    %c0_42 = arith.constant 0 : index
    %c0_43 = arith.constant 0 : index
    %44 = vector.load %arg7[%c0_42, %c0_43] : memref<128x64xf32, #tpu.memory_space<vmem>>, vector<128x64xf32>
    %45 = arith.addf %44, %43 : vector<128x64xf32>
    %c0_44 = arith.constant 0 : index
    %c0_45 = arith.constant 0 : index
    %46 = vector.load %arg7[%c0_44, %c0_45] : memref<128x64xf32, #tpu.memory_space<vmem>>, vector<128x64xf32>
    tpu.vector_store %arg7[%c0_44, %c0_45], %45 {strides = array<i32>} : memref<128x64xf32, #tpu.memory_space<vmem>>, vector<128x64xf32>,
    %c48_i32 = arith.constant 48 : i32
    %47 = arith.cmpi eq, %arg2, %c48_i32 : i32
    %48 = arith.extui %47 : i1 to i32
    %c0_i32_46 = arith.constant 0 : i32
    %49 = arith.cmpi ne, %48, %c0_i32_46 : i32
    scf.if %49 {
      %c0_47 = arith.constant 0 : index
      %c0_48 = arith.constant 0 : index
      %50 = vector.load %arg7[%c0_47, %c0_48] : memref<128x64xf32, #tpu.memory_space<vmem>>, vector<128x64xf32>
      %c0_49 = arith.constant 0 : index
      %c0_50 = arith.constant 0 : index
      %51 = vector.load %arg5[%c0_49, %c0_50] : memref<1x64xf32, #tpu.memory_space<vmem>>, vector<1x64xf32>
      %52 = vector.broadcast %51 : vector<1x64xf32> to vector<128x64xf32>
      %53 = arith.addf %50, %52 : vector<128x64xf32>
      %cst_51 = arith.constant 0.000000e+00 : f32
      %54 = vector.broadcast %cst_51 : f32 to vector<128x64xf32>
      %55 = arith.maximumf %53, %54 : vector<128x64xf32>
      %56 = arith.truncf %55 : vector<128x64xf32> to vector<128x64xbf16>
      %c0_52 = arith.constant 0 : index
      %c0_53 = arith.constant 0 : index
      %57 = vector.load %arg6[%c0_52, %c0_53] : memref<128x64xbf16, #tpu.memory_space<vmem>>, vector<128x64xbf16>
      tpu.vector_store %arg6[%c0_52, %c0_53], %56 {strides = array<i32>} : memref<128x64xbf16, #tpu.memory_space<vmem>>, vector<128x64xbf16>,
    } else {
    }
    return
  }
  func.func @transform_0(%arg0: i32, %arg1: i32, %arg2: i32) -> (i32, i32, i32) {
    %c0_i32 = arith.constant 0 : i32
    %c0_i32_0 = arith.constant 0 : i32
    return %arg2, %arg0, %c0_i32 : i32, i32, i32
  }
  func.func @transform_1(%arg0: i32, %arg1: i32, %arg2: i32) -> (i32, i32, i32) {
    %c0_i32 = arith.constant 0 : i32
    %c0_i32_0 = arith.constant 0 : i32
    return %arg2, %c0_i32, %arg1 : i32, i32, i32
  }
  func.func @transform_2(%arg0: i32, %arg1: i32, %arg2: i32) -> (i32, i32) {
    %c0_i32 = arith.constant 0 : i32
    %c0_i32_0 = arith.constant 0 : i32
    return %c0_i32, %arg1 : i32, i32
  }
  func.func @transform_3(%arg0: i32, %arg1: i32, %arg2: i32) -> (i32, i32) {
    %c0_i32 = arith.constant 0 : i32
    return %arg0, %arg1 : i32, i32
  }
}

module attributes {stable_mosaic.version = 11 : i64} {
  func.func @_maxpool_kernel(%arg0: i32, %arg1: memref<27x16x64xbf16, #tpu.memory_space<vmem>>, %arg2: memref<16x64xbf16, #tpu.memory_space<vmem>>) attributes {dimension_semantics = [#tpu.dimension_semantics<parallel>], iteration_bounds = array<i64: 1>, scalar_prefetch = 0 : i64, scratch_operands = 0 : i64, tpu.core_type = #tpu.core_type<tc>, window_params = [{transform_indices = @transform_0, window_bounds = array<i64: 27, 16, 64>}, {transform_indices = @transform_1, window_bounds = array<i64: 16, 64>}]} {
    %c0 = arith.constant 0 : index
    %c0_0 = arith.constant 0 : index
    %c0_1 = arith.constant 0 : index
    %0 = vector.load %arg1[%c0, %c0_0, %c0_1] : memref<27x16x64xbf16, #tpu.memory_space<vmem>>, vector<27x16x64xbf16>
    %1 = arith.extf %0 : vector<27x16x64xbf16> to vector<27x16x64xf32>
    %cst = arith.constant dense<0xFF800000> : vector<16x64xf32>
    %2 = vector.multi_reduction <maximumf>, %1, %cst [0] : vector<27x16x64xf32> to vector<16x64xf32>
    %3 = arith.truncf %2 : vector<16x64xf32> to vector<16x64xbf16>
    %c0_2 = arith.constant 0 : index
    %c0_3 = arith.constant 0 : index
    %4 = vector.load %arg2[%c0_2, %c0_3] : memref<16x64xbf16, #tpu.memory_space<vmem>>, vector<16x64xbf16>
    tpu.vector_store %arg2[%c0_2, %c0_3], %3 {strides = array<i32>} : memref<16x64xbf16, #tpu.memory_space<vmem>>, vector<16x64xbf16>,
    return
  }
  func.func @transform_0(%arg0: i32) -> (i32, i32, i32) {
    %c0_i32 = arith.constant 0 : i32
    %c0_i32_0 = arith.constant 0 : i32
    %c0_i32_1 = arith.constant 0 : i32
    return %c0_i32, %arg0, %c0_i32_0 : i32, i32, i32
  }
  func.func @transform_1(%arg0: i32) -> (i32, i32) {
    %c0_i32 = arith.constant 0 : i32
    %c0_i32_0 = arith.constant 0 : i32
    return %arg0, %c0_i32 : i32, i32
  }
}

module attributes {stable_mosaic.version = 11 : i64} {
  func.func @_tap_matmul_kernel(%arg0: i32, %arg1: i32, %arg2: i32, %arg3: memref<3x16x64xbf16, #tpu.memory_space<vmem>>, %arg4: memref<3x64x64xbf16, #tpu.memory_space<vmem>>, %arg5: memref<1x64xf32, #tpu.memory_space<vmem>>, %arg6: memref<16x64xbf16, #tpu.memory_space<vmem>>, %arg7: memref<16x64xbf16, #tpu.memory_space<vmem>>, %arg8: memref<16x64xf32, #tpu.memory_space<vmem>>) attributes {dimension_semantics = [#tpu.dimension_semantics<parallel>, #tpu.dimension_semantics<parallel>, #tpu.dimension_semantics<arbitrary>], iteration_bounds = array<i64: 1, 1, 9>, scalar_prefetch = 0 : i64, scratch_operands = 1 : i64, tpu.core_type = #tpu.core_type<tc>, window_params = [{transform_indices = @transform_0, window_bounds = array<i64: 3, 16, 64>}, {transform_indices = @transform_1, window_bounds = array<i64: 3, 64, 64>}, {transform_indices = @transform_2, window_bounds = array<i64: 1, 64>}, {transform_indices = @transform_3, window_bounds = array<i64: 16, 64>}, {transform_indices = @transform_4, window_bounds = array<i64: 16, 64>}]} {
    %c0_i32 = arith.constant 0 : i32
    %0 = arith.cmpi eq, %arg2, %c0_i32 : i32
    %1 = arith.extui %0 : i1 to i32
    %c0_i32_0 = arith.constant 0 : i32
    %2 = arith.cmpi ne, %1, %c0_i32_0 : i32
    scf.if %2 {
      %cst_23 = arith.constant 0.000000e+00 : f32
      %26 = vector.broadcast %cst_23 : f32 to vector<16x64xf32>
      %c0_24 = arith.constant 0 : index
      %c0_25 = arith.constant 0 : index
      %27 = vector.load %arg8[%c0_24, %c0_25] : memref<16x64xf32, #tpu.memory_space<vmem>>, vector<16x64xf32>
      tpu.vector_store %arg8[%c0_24, %c0_25], %26 {strides = array<i32>} : memref<16x64xf32, #tpu.memory_space<vmem>>, vector<16x64xf32>,
    } else {
    }
    %c0 = arith.constant 0 : index
    %c0_1 = arith.constant 0 : index
    %c0_2 = arith.constant 0 : index
    %3 = vector.load %arg3[%c0, %c0_1, %c0_2] : memref<3x16x64xbf16, #tpu.memory_space<vmem>>, vector<1x16x64xbf16>
    %4 = vector.shape_cast %3 : vector<1x16x64xbf16> to vector<16x64xbf16>
    %c0_3 = arith.constant 0 : index
    %c0_4 = arith.constant 0 : index
    %c0_5 = arith.constant 0 : index
    %5 = vector.load %arg4[%c0_3, %c0_4, %c0_5] : memref<3x64x64xbf16, #tpu.memory_space<vmem>>, vector<1x64x64xbf16>
    %6 = vector.shape_cast %5 : vector<1x64x64xbf16> to vector<64x64xbf16>
    %cst = arith.constant dense<0.000000e+00> : vector<16x64xf32>
    %7 = tpu.matmul %4, %6, %cst {dimension_numbers = #tpu.dot_dimension_numbers<[1], [0], [0], [1], [0, 0, 1, 1], [], []>} : vector<16x64xbf16>, vector<64x64xbf16>, vector<16x64xf32> -> vector<16x64xf32>
    %c1 = arith.constant 1 : index
    %c0_6 = arith.constant 0 : index
    %c0_7 = arith.constant 0 : index
    %8 = vector.load %arg3[%c1, %c0_6, %c0_7] : memref<3x16x64xbf16, #tpu.memory_space<vmem>>, vector<1x16x64xbf16>
    %9 = vector.shape_cast %8 : vector<1x16x64xbf16> to vector<16x64xbf16>
    %c1_8 = arith.constant 1 : index
    %c0_9 = arith.constant 0 : index
    %c0_10 = arith.constant 0 : index
    %10 = vector.load %arg4[%c1_8, %c0_9, %c0_10] : memref<3x64x64xbf16, #tpu.memory_space<vmem>>, vector<1x64x64xbf16>
    %11 = vector.shape_cast %10 : vector<1x64x64xbf16> to vector<64x64xbf16>
    %cst_11 = arith.constant dense<0.000000e+00> : vector<16x64xf32>
    %12 = tpu.matmul %9, %11, %cst_11 {dimension_numbers = #tpu.dot_dimension_numbers<[1], [0], [0], [1], [0, 0, 1, 1], [], []>} : vector<16x64xbf16>, vector<64x64xbf16>, vector<16x64xf32> -> vector<16x64xf32>
    %13 = arith.addf %7, %12 : vector<16x64xf32>
    %c2 = arith.constant 2 : index
    %c0_12 = arith.constant 0 : index
    %c0_13 = arith.constant 0 : index
    %14 = vector.load %arg3[%c2, %c0_12, %c0_13] : memref<3x16x64xbf16, #tpu.memory_space<vmem>>, vector<1x16x64xbf16>
    %15 = vector.shape_cast %14 : vector<1x16x64xbf16> to vector<16x64xbf16>
    %c2_14 = arith.constant 2 : index
    %c0_15 = arith.constant 0 : index
    %c0_16 = arith.constant 0 : index
    %16 = vector.load %arg4[%c2_14, %c0_15, %c0_16] : memref<3x64x64xbf16, #tpu.memory_space<vmem>>, vector<1x64x64xbf16>
    %17 = vector.shape_cast %16 : vector<1x64x64xbf16> to vector<64x64xbf16>
    %cst_17 = arith.constant dense<0.000000e+00> : vector<16x64xf32>
    %18 = tpu.matmul %15, %17, %cst_17 {dimension_numbers = #tpu.dot_dimension_numbers<[1], [0], [0], [1], [0, 0, 1, 1], [], []>} : vector<16x64xbf16>, vector<64x64xbf16>, vector<16x64xf32> -> vector<16x64xf32>
    %19 = arith.addf %13, %18 : vector<16x64xf32>
    %c0_18 = arith.constant 0 : index
    %c0_19 = arith.constant 0 : index
    %20 = vector.load %arg8[%c0_18, %c0_19] : memref<16x64xf32, #tpu.memory_space<vmem>>, vector<16x64xf32>
    %21 = arith.addf %20, %19 : vector<16x64xf32>
    %c0_20 = arith.constant 0 : index
    %c0_21 = arith.constant 0 : index
    %22 = vector.load %arg8[%c0_20, %c0_21] : memref<16x64xf32, #tpu.memory_space<vmem>>, vector<16x64xf32>
    tpu.vector_store %arg8[%c0_20, %c0_21], %21 {strides = array<i32>} : memref<16x64xf32, #tpu.memory_space<vmem>>, vector<16x64xf32>,
    %c8_i32 = arith.constant 8 : i32
    %23 = arith.cmpi eq, %arg2, %c8_i32 : i32
    %24 = arith.extui %23 : i1 to i32
    %c0_i32_22 = arith.constant 0 : i32
    %25 = arith.cmpi ne, %24, %c0_i32_22 : i32
    scf.if %25 {
      %c0_23 = arith.constant 0 : index
      %c0_24 = arith.constant 0 : index
      %26 = vector.load %arg8[%c0_23, %c0_24] : memref<16x64xf32, #tpu.memory_space<vmem>>, vector<16x64xf32>
      %c0_25 = arith.constant 0 : index
      %c0_26 = arith.constant 0 : index
      %27 = vector.load %arg5[%c0_25, %c0_26] : memref<1x64xf32, #tpu.memory_space<vmem>>, vector<1x64xf32>
      %28 = vector.broadcast %27 : vector<1x64xf32> to vector<16x64xf32>
      %29 = arith.addf %26, %28 : vector<16x64xf32>
      %c0_27 = arith.constant 0 : index
      %c0_28 = arith.constant 0 : index
      %30 = vector.load %arg6[%c0_27, %c0_28] : memref<16x64xbf16, #tpu.memory_space<vmem>>, vector<16x64xbf16>
      %31 = arith.extf %30 : vector<16x64xbf16> to vector<16x64xf32>
      %32 = arith.addf %29, %31 : vector<16x64xf32>
      %cst_29 = arith.constant 0.000000e+00 : f32
      %33 = vector.broadcast %cst_29 : f32 to vector<16x64xf32>
      %34 = arith.maximumf %32, %33 : vector<16x64xf32>
      %35 = arith.truncf %34 : vector<16x64xf32> to vector<16x64xbf16>
      %c0_30 = arith.constant 0 : index
      %c0_31 = arith.constant 0 : index
      %36 = vector.load %arg7[%c0_30, %c0_31] : memref<16x64xbf16, #tpu.memory_space<vmem>>, vector<16x64xbf16>
      tpu.vector_store %arg7[%c0_30, %c0_31], %35 {strides = array<i32>} : memref<16x64xbf16, #tpu.memory_space<vmem>>, vector<16x64xbf16>,
    } else {
    }
    return
  }
  func.func @transform_0(%arg0: i32, %arg1: i32, %arg2: i32) -> (i32, i32, i32) {
    %c0_i32 = arith.constant 0 : i32
    %c0_i32_0 = arith.constant 0 : i32
    return %arg2, %arg0, %c0_i32 : i32, i32, i32
  }
  func.func @transform_1(%arg0: i32, %arg1: i32, %arg2: i32) -> (i32, i32, i32) {
    %c0_i32 = arith.constant 0 : i32
    %c0_i32_0 = arith.constant 0 : i32
    return %arg2, %c0_i32, %arg1 : i32, i32, i32
  }
  func.func @transform_2(%arg0: i32, %arg1: i32, %arg2: i32) -> (i32, i32) {
    %c0_i32 = arith.constant 0 : i32
    %c0_i32_0 = arith.constant 0 : i32
    return %c0_i32, %arg1 : i32, i32
  }
  func.func @transform_3(%arg0: i32, %arg1: i32, %arg2: i32) -> (i32, i32) {
    %c0_i32 = arith.constant 0 : i32
    return %arg0, %arg1 : i32, i32
  }
  func.func @transform_4(%arg0: i32, %arg1: i32, %arg2: i32) -> (i32, i32) {
    %c0_i32 = arith.constant 0 : i32
    return %arg0, %arg1 : i32, i32
  }
}

module attributes {stable_mosaic.version = 11 : i64} {
  func.func @_tap_matmul_kernel(%arg0: i32, %arg1: i32, %arg2: i32, %arg3: memref<3x16x64xbf16, #tpu.memory_space<vmem>>, %arg4: memref<3x64x64xbf16, #tpu.memory_space<vmem>>, %arg5: memref<1x64xf32, #tpu.memory_space<vmem>>, %arg6: memref<16x64xbf16, #tpu.memory_space<vmem>>, %arg7: memref<16x64xf32, #tpu.memory_space<vmem>>) attributes {dimension_semantics = [#tpu.dimension_semantics<parallel>, #tpu.dimension_semantics<parallel>, #tpu.dimension_semantics<arbitrary>], iteration_bounds = array<i64: 1, 1, 9>, scalar_prefetch = 0 : i64, scratch_operands = 1 : i64, tpu.core_type = #tpu.core_type<tc>, window_params = [{transform_indices = @transform_0, window_bounds = array<i64: 3, 16, 64>}, {transform_indices = @transform_1, window_bounds = array<i64: 3, 64, 64>}, {transform_indices = @transform_2, window_bounds = array<i64: 1, 64>}, {transform_indices = @transform_3, window_bounds = array<i64: 16, 64>}]} {
    %c0_i32 = arith.constant 0 : i32
    %0 = arith.cmpi eq, %arg2, %c0_i32 : i32
    %1 = arith.extui %0 : i1 to i32
    %c0_i32_0 = arith.constant 0 : i32
    %2 = arith.cmpi ne, %1, %c0_i32_0 : i32
    scf.if %2 {
      %cst_23 = arith.constant 0.000000e+00 : f32
      %26 = vector.broadcast %cst_23 : f32 to vector<16x64xf32>
      %c0_24 = arith.constant 0 : index
      %c0_25 = arith.constant 0 : index
      %27 = vector.load %arg7[%c0_24, %c0_25] : memref<16x64xf32, #tpu.memory_space<vmem>>, vector<16x64xf32>
      tpu.vector_store %arg7[%c0_24, %c0_25], %26 {strides = array<i32>} : memref<16x64xf32, #tpu.memory_space<vmem>>, vector<16x64xf32>,
    } else {
    }
    %c0 = arith.constant 0 : index
    %c0_1 = arith.constant 0 : index
    %c0_2 = arith.constant 0 : index
    %3 = vector.load %arg3[%c0, %c0_1, %c0_2] : memref<3x16x64xbf16, #tpu.memory_space<vmem>>, vector<1x16x64xbf16>
    %4 = vector.shape_cast %3 : vector<1x16x64xbf16> to vector<16x64xbf16>
    %c0_3 = arith.constant 0 : index
    %c0_4 = arith.constant 0 : index
    %c0_5 = arith.constant 0 : index
    %5 = vector.load %arg4[%c0_3, %c0_4, %c0_5] : memref<3x64x64xbf16, #tpu.memory_space<vmem>>, vector<1x64x64xbf16>
    %6 = vector.shape_cast %5 : vector<1x64x64xbf16> to vector<64x64xbf16>
    %cst = arith.constant dense<0.000000e+00> : vector<16x64xf32>
    %7 = tpu.matmul %4, %6, %cst {dimension_numbers = #tpu.dot_dimension_numbers<[1], [0], [0], [1], [0, 0, 1, 1], [], []>} : vector<16x64xbf16>, vector<64x64xbf16>, vector<16x64xf32> -> vector<16x64xf32>
    %c1 = arith.constant 1 : index
    %c0_6 = arith.constant 0 : index
    %c0_7 = arith.constant 0 : index
    %8 = vector.load %arg3[%c1, %c0_6, %c0_7] : memref<3x16x64xbf16, #tpu.memory_space<vmem>>, vector<1x16x64xbf16>
    %9 = vector.shape_cast %8 : vector<1x16x64xbf16> to vector<16x64xbf16>
    %c1_8 = arith.constant 1 : index
    %c0_9 = arith.constant 0 : index
    %c0_10 = arith.constant 0 : index
    %10 = vector.load %arg4[%c1_8, %c0_9, %c0_10] : memref<3x64x64xbf16, #tpu.memory_space<vmem>>, vector<1x64x64xbf16>
    %11 = vector.shape_cast %10 : vector<1x64x64xbf16> to vector<64x64xbf16>
    %cst_11 = arith.constant dense<0.000000e+00> : vector<16x64xf32>
    %12 = tpu.matmul %9, %11, %cst_11 {dimension_numbers = #tpu.dot_dimension_numbers<[1], [0], [0], [1], [0, 0, 1, 1], [], []>} : vector<16x64xbf16>, vector<64x64xbf16>, vector<16x64xf32> -> vector<16x64xf32>
    %13 = arith.addf %7, %12 : vector<16x64xf32>
    %c2 = arith.constant 2 : index
    %c0_12 = arith.constant 0 : index
    %c0_13 = arith.constant 0 : index
    %14 = vector.load %arg3[%c2, %c0_12, %c0_13] : memref<3x16x64xbf16, #tpu.memory_space<vmem>>, vector<1x16x64xbf16>
    %15 = vector.shape_cast %14 : vector<1x16x64xbf16> to vector<16x64xbf16>
    %c2_14 = arith.constant 2 : index
    %c0_15 = arith.constant 0 : index
    %c0_16 = arith.constant 0 : index
    %16 = vector.load %arg4[%c2_14, %c0_15, %c0_16] : memref<3x64x64xbf16, #tpu.memory_space<vmem>>, vector<1x64x64xbf16>
    %17 = vector.shape_cast %16 : vector<1x64x64xbf16> to vector<64x64xbf16>
    %cst_17 = arith.constant dense<0.000000e+00> : vector<16x64xf32>
    %18 = tpu.matmul %15, %17, %cst_17 {dimension_numbers = #tpu.dot_dimension_numbers<[1], [0], [0], [1], [0, 0, 1, 1], [], []>} : vector<16x64xbf16>, vector<64x64xbf16>, vector<16x64xf32> -> vector<16x64xf32>
    %19 = arith.addf %13, %18 : vector<16x64xf32>
    %c0_18 = arith.constant 0 : index
    %c0_19 = arith.constant 0 : index
    %20 = vector.load %arg7[%c0_18, %c0_19] : memref<16x64xf32, #tpu.memory_space<vmem>>, vector<16x64xf32>
    %21 = arith.addf %20, %19 : vector<16x64xf32>
    %c0_20 = arith.constant 0 : index
    %c0_21 = arith.constant 0 : index
    %22 = vector.load %arg7[%c0_20, %c0_21] : memref<16x64xf32, #tpu.memory_space<vmem>>, vector<16x64xf32>
    tpu.vector_store %arg7[%c0_20, %c0_21], %21 {strides = array<i32>} : memref<16x64xf32, #tpu.memory_space<vmem>>, vector<16x64xf32>,
    %c8_i32 = arith.constant 8 : i32
    %23 = arith.cmpi eq, %arg2, %c8_i32 : i32
    %24 = arith.extui %23 : i1 to i32
    %c0_i32_22 = arith.constant 0 : i32
    %25 = arith.cmpi ne, %24, %c0_i32_22 : i32
    scf.if %25 {
      %c0_23 = arith.constant 0 : index
      %c0_24 = arith.constant 0 : index
      %26 = vector.load %arg7[%c0_23, %c0_24] : memref<16x64xf32, #tpu.memory_space<vmem>>, vector<16x64xf32>
      %c0_25 = arith.constant 0 : index
      %c0_26 = arith.constant 0 : index
      %27 = vector.load %arg5[%c0_25, %c0_26] : memref<1x64xf32, #tpu.memory_space<vmem>>, vector<1x64xf32>
      %28 = vector.broadcast %27 : vector<1x64xf32> to vector<16x64xf32>
      %29 = arith.addf %26, %28 : vector<16x64xf32>
      %cst_27 = arith.constant 0.000000e+00 : f32
      %30 = vector.broadcast %cst_27 : f32 to vector<16x64xf32>
      %31 = arith.maximumf %29, %30 : vector<16x64xf32>
      %32 = arith.truncf %31 : vector<16x64xf32> to vector<16x64xbf16>
      %c0_28 = arith.constant 0 : index
      %c0_29 = arith.constant 0 : index
      %33 = vector.load %arg6[%c0_28, %c0_29] : memref<16x64xbf16, #tpu.memory_space<vmem>>, vector<16x64xbf16>
      tpu.vector_store %arg6[%c0_28, %c0_29], %32 {strides = array<i32>} : memref<16x64xbf16, #tpu.memory_space<vmem>>, vector<16x64xbf16>,
    } else {
    }
    return
  }
  func.func @transform_0(%arg0: i32, %arg1: i32, %arg2: i32) -> (i32, i32, i32) {
    %c0_i32 = arith.constant 0 : i32
    %c0_i32_0 = arith.constant 0 : i32
    return %arg2, %arg0, %c0_i32 : i32, i32, i32
  }
  func.func @transform_1(%arg0: i32, %arg1: i32, %arg2: i32) -> (i32, i32, i32) {
    %c0_i32 = arith.constant 0 : i32
    %c0_i32_0 = arith.constant 0 : i32
    return %arg2, %c0_i32, %arg1 : i32, i32, i32
  }
  func.func @transform_2(%arg0: i32, %arg1: i32, %arg2: i32) -> (i32, i32) {
    %c0_i32 = arith.constant 0 : i32
    %c0_i32_0 = arith.constant 0 : i32
    return %c0_i32, %arg1 : i32, i32
  }
  func.func @transform_3(%arg0: i32, %arg1: i32, %arg2: i32) -> (i32, i32) {
    %c0_i32 = arith.constant 0 : i32
    return %arg0, %arg1 : i32, i32
  }
}

module attributes {stable_mosaic.version = 11 : i64} {
  func.func @_tap_matmul_kernel(%arg0: i32, %arg1: i32, %arg2: i32, %arg3: memref<3x8x64xbf16, #tpu.memory_space<vmem>>, %arg4: memref<3x64x128xbf16, #tpu.memory_space<vmem>>, %arg5: memref<1x128xf32, #tpu.memory_space<vmem>>, %arg6: memref<8x128xbf16, #tpu.memory_space<vmem>>, %arg7: memref<8x128xf32, #tpu.memory_space<vmem>>) attributes {dimension_semantics = [#tpu.dimension_semantics<parallel>, #tpu.dimension_semantics<parallel>, #tpu.dimension_semantics<arbitrary>], iteration_bounds = array<i64: 1, 1, 9>, scalar_prefetch = 0 : i64, scratch_operands = 1 : i64, tpu.core_type = #tpu.core_type<tc>, window_params = [{transform_indices = @transform_0, window_bounds = array<i64: 3, 8, 64>}, {transform_indices = @transform_1, window_bounds = array<i64: 3, 64, 128>}, {transform_indices = @transform_2, window_bounds = array<i64: 1, 128>}, {transform_indices = @transform_3, window_bounds = array<i64: 8, 128>}]} {
    %c0_i32 = arith.constant 0 : i32
    %0 = arith.cmpi eq, %arg2, %c0_i32 : i32
    %1 = arith.extui %0 : i1 to i32
    %c0_i32_0 = arith.constant 0 : i32
    %2 = arith.cmpi ne, %1, %c0_i32_0 : i32
    scf.if %2 {
      %cst_23 = arith.constant 0.000000e+00 : f32
      %26 = vector.broadcast %cst_23 : f32 to vector<8x128xf32>
      %c0_24 = arith.constant 0 : index
      %c0_25 = arith.constant 0 : index
      %27 = vector.load %arg7[%c0_24, %c0_25] : memref<8x128xf32, #tpu.memory_space<vmem>>, vector<8x128xf32>
      tpu.vector_store %arg7[%c0_24, %c0_25], %26 {strides = array<i32>} : memref<8x128xf32, #tpu.memory_space<vmem>>, vector<8x128xf32>,
    } else {
    }
    %c0 = arith.constant 0 : index
    %c0_1 = arith.constant 0 : index
    %c0_2 = arith.constant 0 : index
    %3 = vector.load %arg3[%c0, %c0_1, %c0_2] : memref<3x8x64xbf16, #tpu.memory_space<vmem>>, vector<1x8x64xbf16>
    %4 = vector.shape_cast %3 : vector<1x8x64xbf16> to vector<8x64xbf16>
    %c0_3 = arith.constant 0 : index
    %c0_4 = arith.constant 0 : index
    %c0_5 = arith.constant 0 : index
    %5 = vector.load %arg4[%c0_3, %c0_4, %c0_5] : memref<3x64x128xbf16, #tpu.memory_space<vmem>>, vector<1x64x128xbf16>
    %6 = vector.shape_cast %5 : vector<1x64x128xbf16> to vector<64x128xbf16>
    %cst = arith.constant dense<0.000000e+00> : vector<8x128xf32>
    %7 = tpu.matmul %4, %6, %cst {dimension_numbers = #tpu.dot_dimension_numbers<[1], [0], [0], [1], [0, 0, 1, 1], [], []>} : vector<8x64xbf16>, vector<64x128xbf16>, vector<8x128xf32> -> vector<8x128xf32>
    %c1 = arith.constant 1 : index
    %c0_6 = arith.constant 0 : index
    %c0_7 = arith.constant 0 : index
    %8 = vector.load %arg3[%c1, %c0_6, %c0_7] : memref<3x8x64xbf16, #tpu.memory_space<vmem>>, vector<1x8x64xbf16>
    %9 = vector.shape_cast %8 : vector<1x8x64xbf16> to vector<8x64xbf16>
    %c1_8 = arith.constant 1 : index
    %c0_9 = arith.constant 0 : index
    %c0_10 = arith.constant 0 : index
    %10 = vector.load %arg4[%c1_8, %c0_9, %c0_10] : memref<3x64x128xbf16, #tpu.memory_space<vmem>>, vector<1x64x128xbf16>
    %11 = vector.shape_cast %10 : vector<1x64x128xbf16> to vector<64x128xbf16>
    %cst_11 = arith.constant dense<0.000000e+00> : vector<8x128xf32>
    %12 = tpu.matmul %9, %11, %cst_11 {dimension_numbers = #tpu.dot_dimension_numbers<[1], [0], [0], [1], [0, 0, 1, 1], [], []>} : vector<8x64xbf16>, vector<64x128xbf16>, vector<8x128xf32> -> vector<8x128xf32>
    %13 = arith.addf %7, %12 : vector<8x128xf32>
    %c2 = arith.constant 2 : index
    %c0_12 = arith.constant 0 : index
    %c0_13 = arith.constant 0 : index
    %14 = vector.load %arg3[%c2, %c0_12, %c0_13] : memref<3x8x64xbf16, #tpu.memory_space<vmem>>, vector<1x8x64xbf16>
    %15 = vector.shape_cast %14 : vector<1x8x64xbf16> to vector<8x64xbf16>
    %c2_14 = arith.constant 2 : index
    %c0_15 = arith.constant 0 : index
    %c0_16 = arith.constant 0 : index
    %16 = vector.load %arg4[%c2_14, %c0_15, %c0_16] : memref<3x64x128xbf16, #tpu.memory_space<vmem>>, vector<1x64x128xbf16>
    %17 = vector.shape_cast %16 : vector<1x64x128xbf16> to vector<64x128xbf16>
    %cst_17 = arith.constant dense<0.000000e+00> : vector<8x128xf32>
    %18 = tpu.matmul %15, %17, %cst_17 {dimension_numbers = #tpu.dot_dimension_numbers<[1], [0], [0], [1], [0, 0, 1, 1], [], []>} : vector<8x64xbf16>, vector<64x128xbf16>, vector<8x128xf32> -> vector<8x128xf32>
    %19 = arith.addf %13, %18 : vector<8x128xf32>
    %c0_18 = arith.constant 0 : index
    %c0_19 = arith.constant 0 : index
    %20 = vector.load %arg7[%c0_18, %c0_19] : memref<8x128xf32, #tpu.memory_space<vmem>>, vector<8x128xf32>
    %21 = arith.addf %20, %19 : vector<8x128xf32>
    %c0_20 = arith.constant 0 : index
    %c0_21 = arith.constant 0 : index
    %22 = vector.load %arg7[%c0_20, %c0_21] : memref<8x128xf32, #tpu.memory_space<vmem>>, vector<8x128xf32>
    tpu.vector_store %arg7[%c0_20, %c0_21], %21 {strides = array<i32>} : memref<8x128xf32, #tpu.memory_space<vmem>>, vector<8x128xf32>,
    %c8_i32 = arith.constant 8 : i32
    %23 = arith.cmpi eq, %arg2, %c8_i32 : i32
    %24 = arith.extui %23 : i1 to i32
    %c0_i32_22 = arith.constant 0 : i32
    %25 = arith.cmpi ne, %24, %c0_i32_22 : i32
    scf.if %25 {
      %c0_23 = arith.constant 0 : index
      %c0_24 = arith.constant 0 : index
      %26 = vector.load %arg7[%c0_23, %c0_24] : memref<8x128xf32, #tpu.memory_space<vmem>>, vector<8x128xf32>
      %c0_25 = arith.constant 0 : index
      %c0_26 = arith.constant 0 : index
      %27 = vector.load %arg5[%c0_25, %c0_26] : memref<1x128xf32, #tpu.memory_space<vmem>>, vector<1x128xf32>
      %28 = vector.broadcast %27 : vector<1x128xf32> to vector<8x128xf32>
      %29 = arith.addf %26, %28 : vector<8x128xf32>
      %cst_27 = arith.constant 0.000000e+00 : f32
      %30 = vector.broadcast %cst_27 : f32 to vector<8x128xf32>
      %31 = arith.maximumf %29, %30 : vector<8x128xf32>
      %32 = arith.truncf %31 : vector<8x128xf32> to vector<8x128xbf16>
      %c0_28 = arith.constant 0 : index
      %c0_29 = arith.constant 0 : index
      %33 = vector.load %arg6[%c0_28, %c0_29] : memref<8x128xbf16, #tpu.memory_space<vmem>>, vector<8x128xbf16>
      tpu.vector_store %arg6[%c0_28, %c0_29], %32 {strides = array<i32>} : memref<8x128xbf16, #tpu.memory_space<vmem>>, vector<8x128xbf16>,
    } else {
    }
    return
  }
  func.func @transform_0(%arg0: i32, %arg1: i32, %arg2: i32) -> (i32, i32, i32) {
    %c0_i32 = arith.constant 0 : i32
    %c0_i32_0 = arith.constant 0 : i32
    return %arg2, %arg0, %c0_i32 : i32, i32, i32
  }
  func.func @transform_1(%arg0: i32, %arg1: i32, %arg2: i32) -> (i32, i32, i32) {
    %c0_i32 = arith.constant 0 : i32
    %c0_i32_0 = arith.constant 0 : i32
    return %arg2, %c0_i32, %arg1 : i32, i32, i32
  }
  func.func @transform_2(%arg0: i32, %arg1: i32, %arg2: i32) -> (i32, i32) {
    %c0_i32 = arith.constant 0 : i32
    %c0_i32_0 = arith.constant 0 : i32
    return %c0_i32, %arg1 : i32, i32
  }
  func.func @transform_3(%arg0: i32, %arg1: i32, %arg2: i32) -> (i32, i32) {
    %c0_i32 = arith.constant 0 : i32
    return %arg0, %arg1 : i32, i32
  }
}

module attributes {stable_mosaic.version = 11 : i64} {
  func.func @_tap_matmul_kernel(%arg0: i32, %arg1: i32, %arg2: i32, %arg3: memref<1x8x64xbf16, #tpu.memory_space<vmem>>, %arg4: memref<1x64x128xbf16, #tpu.memory_space<vmem>>, %arg5: memref<1x128xf32, #tpu.memory_space<vmem>>, %arg6: memref<8x128xbf16, #tpu.memory_space<vmem>>, %arg7: memref<8x128xf32, #tpu.memory_space<vmem>>) attributes {dimension_semantics = [#tpu.dimension_semantics<parallel>, #tpu.dimension_semantics<parallel>, #tpu.dimension_semantics<arbitrary>], iteration_bounds = array<i64: 1, 1, 1>, scalar_prefetch = 0 : i64, scratch_operands = 1 : i64, tpu.core_type = #tpu.core_type<tc>, window_params = [{transform_indices = @transform_0, window_bounds = array<i64: 1, 8, 64>}, {transform_indices = @transform_1, window_bounds = array<i64: 1, 64, 128>}, {transform_indices = @transform_2, window_bounds = array<i64: 1, 128>}, {transform_indices = @transform_3, window_bounds = array<i64: 8, 128>}]} {
    %c0_i32 = arith.constant 0 : i32
    %0 = arith.cmpi eq, %arg2, %c0_i32 : i32
    %1 = arith.extui %0 : i1 to i32
    %c0_i32_0 = arith.constant 0 : i32
    %2 = arith.cmpi ne, %1, %c0_i32_0 : i32
    scf.if %2 {
      %cst_12 = arith.constant 0.000000e+00 : f32
      %14 = vector.broadcast %cst_12 : f32 to vector<8x128xf32>
      %c0_13 = arith.constant 0 : index
      %c0_14 = arith.constant 0 : index
      %15 = vector.load %arg7[%c0_13, %c0_14] : memref<8x128xf32, #tpu.memory_space<vmem>>, vector<8x128xf32>
      tpu.vector_store %arg7[%c0_13, %c0_14], %14 {strides = array<i32>} : memref<8x128xf32, #tpu.memory_space<vmem>>, vector<8x128xf32>,
    } else {
    }
    %c0 = arith.constant 0 : index
    %c0_1 = arith.constant 0 : index
    %c0_2 = arith.constant 0 : index
    %3 = vector.load %arg3[%c0, %c0_1, %c0_2] : memref<1x8x64xbf16, #tpu.memory_space<vmem>>, vector<1x8x64xbf16>
    %4 = vector.shape_cast %3 : vector<1x8x64xbf16> to vector<8x64xbf16>
    %c0_3 = arith.constant 0 : index
    %c0_4 = arith.constant 0 : index
    %c0_5 = arith.constant 0 : index
    %5 = vector.load %arg4[%c0_3, %c0_4, %c0_5] : memref<1x64x128xbf16, #tpu.memory_space<vmem>>, vector<1x64x128xbf16>
    %6 = vector.shape_cast %5 : vector<1x64x128xbf16> to vector<64x128xbf16>
    %cst = arith.constant dense<0.000000e+00> : vector<8x128xf32>
    %7 = tpu.matmul %4, %6, %cst {dimension_numbers = #tpu.dot_dimension_numbers<[1], [0], [0], [1], [0, 0, 1, 1], [], []>} : vector<8x64xbf16>, vector<64x128xbf16>, vector<8x128xf32> -> vector<8x128xf32>
    %c0_6 = arith.constant 0 : index
    %c0_7 = arith.constant 0 : index
    %8 = vector.load %arg7[%c0_6, %c0_7] : memref<8x128xf32, #tpu.memory_space<vmem>>, vector<8x128xf32>
    %9 = arith.addf %8, %7 : vector<8x128xf32>
    %c0_8 = arith.constant 0 : index
    %c0_9 = arith.constant 0 : index
    %10 = vector.load %arg7[%c0_8, %c0_9] : memref<8x128xf32, #tpu.memory_space<vmem>>, vector<8x128xf32>
    tpu.vector_store %arg7[%c0_8, %c0_9], %9 {strides = array<i32>} : memref<8x128xf32, #tpu.memory_space<vmem>>, vector<8x128xf32>,
    %c0_i32_10 = arith.constant 0 : i32
    %11 = arith.cmpi eq, %arg2, %c0_i32_10 : i32
    %12 = arith.extui %11 : i1 to i32
    %c0_i32_11 = arith.constant 0 : i32
    %13 = arith.cmpi ne, %12, %c0_i32_11 : i32
    scf.if %13 {
      %c0_12 = arith.constant 0 : index
      %c0_13 = arith.constant 0 : index
      %14 = vector.load %arg7[%c0_12, %c0_13] : memref<8x128xf32, #tpu.memory_space<vmem>>, vector<8x128xf32>
      %c0_14 = arith.constant 0 : index
      %c0_15 = arith.constant 0 : index
      %15 = vector.load %arg5[%c0_14, %c0_15] : memref<1x128xf32, #tpu.memory_space<vmem>>, vector<1x128xf32>
      %16 = vector.broadcast %15 : vector<1x128xf32> to vector<8x128xf32>
      %17 = arith.addf %14, %16 : vector<8x128xf32>
      %18 = arith.truncf %17 : vector<8x128xf32> to vector<8x128xbf16>
      %c0_16 = arith.constant 0 : index
      %c0_17 = arith.constant 0 : index
      %19 = vector.load %arg6[%c0_16, %c0_17] : memref<8x128xbf16, #tpu.memory_space<vmem>>, vector<8x128xbf16>
      tpu.vector_store %arg6[%c0_16, %c0_17], %18 {strides = array<i32>} : memref<8x128xbf16, #tpu.memory_space<vmem>>, vector<8x128xbf16>,
    } else {
    }
    return
  }
  func.func @transform_0(%arg0: i32, %arg1: i32, %arg2: i32) -> (i32, i32, i32) {
    %c0_i32 = arith.constant 0 : i32
    %c0_i32_0 = arith.constant 0 : i32
    return %arg2, %arg0, %c0_i32 : i32, i32, i32
  }
  func.func @transform_1(%arg0: i32, %arg1: i32, %arg2: i32) -> (i32, i32, i32) {
    %c0_i32 = arith.constant 0 : i32
    %c0_i32_0 = arith.constant 0 : i32
    return %arg2, %c0_i32, %arg1 : i32, i32, i32
  }
  func.func @transform_2(%arg0: i32, %arg1: i32, %arg2: i32) -> (i32, i32) {
    %c0_i32 = arith.constant 0 : i32
    %c0_i32_0 = arith.constant 0 : i32
    return %c0_i32, %arg1 : i32, i32
  }
  func.func @transform_3(%arg0: i32, %arg1: i32, %arg2: i32) -> (i32, i32) {
    %c0_i32 = arith.constant 0 : i32
    return %arg0, %arg1 : i32, i32
  }
}

module attributes {stable_mosaic.version = 11 : i64} {
  func.func @_tap_matmul_kernel(%arg0: i32, %arg1: i32, %arg2: i32, %arg3: memref<3x8x128xbf16, #tpu.memory_space<vmem>>, %arg4: memref<3x128x128xbf16, #tpu.memory_space<vmem>>, %arg5: memref<1x128xf32, #tpu.memory_space<vmem>>, %arg6: memref<8x128xbf16, #tpu.memory_space<vmem>>, %arg7: memref<8x128xbf16, #tpu.memory_space<vmem>>, %arg8: memref<8x128xf32, #tpu.memory_space<vmem>>) attributes {dimension_semantics = [#tpu.dimension_semantics<parallel>, #tpu.dimension_semantics<parallel>, #tpu.dimension_semantics<arbitrary>], iteration_bounds = array<i64: 1, 1, 9>, scalar_prefetch = 0 : i64, scratch_operands = 1 : i64, tpu.core_type = #tpu.core_type<tc>, window_params = [{transform_indices = @transform_0, window_bounds = array<i64: 3, 8, 128>}, {transform_indices = @transform_1, window_bounds = array<i64: 3, 128, 128>}, {transform_indices = @transform_2, window_bounds = array<i64: 1, 128>}, {transform_indices = @transform_3, window_bounds = array<i64: 8, 128>}, {transform_indices = @transform_4, window_bounds = array<i64: 8, 128>}]} {
    %c0_i32 = arith.constant 0 : i32
    %0 = arith.cmpi eq, %arg2, %c0_i32 : i32
    %1 = arith.extui %0 : i1 to i32
    %c0_i32_0 = arith.constant 0 : i32
    %2 = arith.cmpi ne, %1, %c0_i32_0 : i32
    scf.if %2 {
      %cst_23 = arith.constant 0.000000e+00 : f32
      %26 = vector.broadcast %cst_23 : f32 to vector<8x128xf32>
      %c0_24 = arith.constant 0 : index
      %c0_25 = arith.constant 0 : index
      %27 = vector.load %arg8[%c0_24, %c0_25] : memref<8x128xf32, #tpu.memory_space<vmem>>, vector<8x128xf32>
      tpu.vector_store %arg8[%c0_24, %c0_25], %26 {strides = array<i32>} : memref<8x128xf32, #tpu.memory_space<vmem>>, vector<8x128xf32>,
    } else {
    }
    %c0 = arith.constant 0 : index
    %c0_1 = arith.constant 0 : index
    %c0_2 = arith.constant 0 : index
    %3 = vector.load %arg3[%c0, %c0_1, %c0_2] : memref<3x8x128xbf16, #tpu.memory_space<vmem>>, vector<1x8x128xbf16>
    %4 = vector.shape_cast %3 : vector<1x8x128xbf16> to vector<8x128xbf16>
    %c0_3 = arith.constant 0 : index
    %c0_4 = arith.constant 0 : index
    %c0_5 = arith.constant 0 : index
    %5 = vector.load %arg4[%c0_3, %c0_4, %c0_5] : memref<3x128x128xbf16, #tpu.memory_space<vmem>>, vector<1x128x128xbf16>
    %6 = vector.shape_cast %5 : vector<1x128x128xbf16> to vector<128x128xbf16>
    %cst = arith.constant dense<0.000000e+00> : vector<8x128xf32>
    %7 = tpu.matmul %4, %6, %cst {dimension_numbers = #tpu.dot_dimension_numbers<[1], [0], [0], [1], [0, 0, 1, 1], [], []>} : vector<8x128xbf16>, vector<128x128xbf16>, vector<8x128xf32> -> vector<8x128xf32>
    %c1 = arith.constant 1 : index
    %c0_6 = arith.constant 0 : index
    %c0_7 = arith.constant 0 : index
    %8 = vector.load %arg3[%c1, %c0_6, %c0_7] : memref<3x8x128xbf16, #tpu.memory_space<vmem>>, vector<1x8x128xbf16>
    %9 = vector.shape_cast %8 : vector<1x8x128xbf16> to vector<8x128xbf16>
    %c1_8 = arith.constant 1 : index
    %c0_9 = arith.constant 0 : index
    %c0_10 = arith.constant 0 : index
    %10 = vector.load %arg4[%c1_8, %c0_9, %c0_10] : memref<3x128x128xbf16, #tpu.memory_space<vmem>>, vector<1x128x128xbf16>
    %11 = vector.shape_cast %10 : vector<1x128x128xbf16> to vector<128x128xbf16>
    %cst_11 = arith.constant dense<0.000000e+00> : vector<8x128xf32>
    %12 = tpu.matmul %9, %11, %cst_11 {dimension_numbers = #tpu.dot_dimension_numbers<[1], [0], [0], [1], [0, 0, 1, 1], [], []>} : vector<8x128xbf16>, vector<128x128xbf16>, vector<8x128xf32> -> vector<8x128xf32>
    %13 = arith.addf %7, %12 : vector<8x128xf32>
    %c2 = arith.constant 2 : index
    %c0_12 = arith.constant 0 : index
    %c0_13 = arith.constant 0 : index
    %14 = vector.load %arg3[%c2, %c0_12, %c0_13] : memref<3x8x128xbf16, #tpu.memory_space<vmem>>, vector<1x8x128xbf16>
    %15 = vector.shape_cast %14 : vector<1x8x128xbf16> to vector<8x128xbf16>
    %c2_14 = arith.constant 2 : index
    %c0_15 = arith.constant 0 : index
    %c0_16 = arith.constant 0 : index
    %16 = vector.load %arg4[%c2_14, %c0_15, %c0_16] : memref<3x128x128xbf16, #tpu.memory_space<vmem>>, vector<1x128x128xbf16>
    %17 = vector.shape_cast %16 : vector<1x128x128xbf16> to vector<128x128xbf16>
    %cst_17 = arith.constant dense<0.000000e+00> : vector<8x128xf32>
    %18 = tpu.matmul %15, %17, %cst_17 {dimension_numbers = #tpu.dot_dimension_numbers<[1], [0], [0], [1], [0, 0, 1, 1], [], []>} : vector<8x128xbf16>, vector<128x128xbf16>, vector<8x128xf32> -> vector<8x128xf32>
    %19 = arith.addf %13, %18 : vector<8x128xf32>
    %c0_18 = arith.constant 0 : index
    %c0_19 = arith.constant 0 : index
    %20 = vector.load %arg8[%c0_18, %c0_19] : memref<8x128xf32, #tpu.memory_space<vmem>>, vector<8x128xf32>
    %21 = arith.addf %20, %19 : vector<8x128xf32>
    %c0_20 = arith.constant 0 : index
    %c0_21 = arith.constant 0 : index
    %22 = vector.load %arg8[%c0_20, %c0_21] : memref<8x128xf32, #tpu.memory_space<vmem>>, vector<8x128xf32>
    tpu.vector_store %arg8[%c0_20, %c0_21], %21 {strides = array<i32>} : memref<8x128xf32, #tpu.memory_space<vmem>>, vector<8x128xf32>,
    %c8_i32 = arith.constant 8 : i32
    %23 = arith.cmpi eq, %arg2, %c8_i32 : i32
    %24 = arith.extui %23 : i1 to i32
    %c0_i32_22 = arith.constant 0 : i32
    %25 = arith.cmpi ne, %24, %c0_i32_22 : i32
    scf.if %25 {
      %c0_23 = arith.constant 0 : index
      %c0_24 = arith.constant 0 : index
      %26 = vector.load %arg8[%c0_23, %c0_24] : memref<8x128xf32, #tpu.memory_space<vmem>>, vector<8x128xf32>
      %c0_25 = arith.constant 0 : index
      %c0_26 = arith.constant 0 : index
      %27 = vector.load %arg5[%c0_25, %c0_26] : memref<1x128xf32, #tpu.memory_space<vmem>>, vector<1x128xf32>
      %28 = vector.broadcast %27 : vector<1x128xf32> to vector<8x128xf32>
      %29 = arith.addf %26, %28 : vector<8x128xf32>
      %c0_27 = arith.constant 0 : index
      %c0_28 = arith.constant 0 : index
      %30 = vector.load %arg6[%c0_27, %c0_28] : memref<8x128xbf16, #tpu.memory_space<vmem>>, vector<8x128xbf16>
      %31 = arith.extf %30 : vector<8x128xbf16> to vector<8x128xf32>
      %32 = arith.addf %29, %31 : vector<8x128xf32>
      %cst_29 = arith.constant 0.000000e+00 : f32
      %33 = vector.broadcast %cst_29 : f32 to vector<8x128xf32>
      %34 = arith.maximumf %32, %33 : vector<8x128xf32>
      %35 = arith.truncf %34 : vector<8x128xf32> to vector<8x128xbf16>
      %c0_30 = arith.constant 0 : index
      %c0_31 = arith.constant 0 : index
      %36 = vector.load %arg7[%c0_30, %c0_31] : memref<8x128xbf16, #tpu.memory_space<vmem>>, vector<8x128xbf16>
      tpu.vector_store %arg7[%c0_30, %c0_31], %35 {strides = array<i32>} : memref<8x128xbf16, #tpu.memory_space<vmem>>, vector<8x128xbf16>,
    } else {
    }
    return
  }
  func.func @transform_0(%arg0: i32, %arg1: i32, %arg2: i32) -> (i32, i32, i32) {
    %c0_i32 = arith.constant 0 : i32
    %c0_i32_0 = arith.constant 0 : i32
    return %arg2, %arg0, %c0_i32 : i32, i32, i32
  }
  func.func @transform_1(%arg0: i32, %arg1: i32, %arg2: i32) -> (i32, i32, i32) {
    %c0_i32 = arith.constant 0 : i32
    %c0_i32_0 = arith.constant 0 : i32
    return %arg2, %c0_i32, %arg1 : i32, i32, i32
  }
  func.func @transform_2(%arg0: i32, %arg1: i32, %arg2: i32) -> (i32, i32) {
    %c0_i32 = arith.constant 0 : i32
    %c0_i32_0 = arith.constant 0 : i32
    return %c0_i32, %arg1 : i32, i32
  }
  func.func @transform_3(%arg0: i32, %arg1: i32, %arg2: i32) -> (i32, i32) {
    %c0_i32 = arith.constant 0 : i32
    return %arg0, %arg1 : i32, i32
  }
  func.func @transform_4(%arg0: i32, %arg1: i32, %arg2: i32) -> (i32, i32) {
    %c0_i32 = arith.constant 0 : i32
    return %arg0, %arg1 : i32, i32
  }
}

module attributes {stable_mosaic.version = 11 : i64} {
  func.func @_tap_matmul_kernel(%arg0: i32, %arg1: i32, %arg2: i32, %arg3: memref<3x8x128xbf16, #tpu.memory_space<vmem>>, %arg4: memref<3x128x256xbf16, #tpu.memory_space<vmem>>, %arg5: memref<1x256xf32, #tpu.memory_space<vmem>>, %arg6: memref<8x256xbf16, #tpu.memory_space<vmem>>, %arg7: memref<8x256xf32, #tpu.memory_space<vmem>>) attributes {dimension_semantics = [#tpu.dimension_semantics<parallel>, #tpu.dimension_semantics<parallel>, #tpu.dimension_semantics<arbitrary>], iteration_bounds = array<i64: 1, 1, 9>, scalar_prefetch = 0 : i64, scratch_operands = 1 : i64, tpu.core_type = #tpu.core_type<tc>, window_params = [{transform_indices = @transform_0, window_bounds = array<i64: 3, 8, 128>}, {transform_indices = @transform_1, window_bounds = array<i64: 3, 128, 256>}, {transform_indices = @transform_2, window_bounds = array<i64: 1, 256>}, {transform_indices = @transform_3, window_bounds = array<i64: 8, 256>}]} {
    %c0_i32 = arith.constant 0 : i32
    %0 = arith.cmpi eq, %arg2, %c0_i32 : i32
    %1 = arith.extui %0 : i1 to i32
    %c0_i32_0 = arith.constant 0 : i32
    %2 = arith.cmpi ne, %1, %c0_i32_0 : i32
    scf.if %2 {
      %cst_23 = arith.constant 0.000000e+00 : f32
      %26 = vector.broadcast %cst_23 : f32 to vector<8x256xf32>
      %c0_24 = arith.constant 0 : index
      %c0_25 = arith.constant 0 : index
      %27 = vector.load %arg7[%c0_24, %c0_25] : memref<8x256xf32, #tpu.memory_space<vmem>>, vector<8x256xf32>
      tpu.vector_store %arg7[%c0_24, %c0_25], %26 {strides = array<i32>} : memref<8x256xf32, #tpu.memory_space<vmem>>, vector<8x256xf32>,
    } else {
    }
    %c0 = arith.constant 0 : index
    %c0_1 = arith.constant 0 : index
    %c0_2 = arith.constant 0 : index
    %3 = vector.load %arg3[%c0, %c0_1, %c0_2] : memref<3x8x128xbf16, #tpu.memory_space<vmem>>, vector<1x8x128xbf16>
    %4 = vector.shape_cast %3 : vector<1x8x128xbf16> to vector<8x128xbf16>
    %c0_3 = arith.constant 0 : index
    %c0_4 = arith.constant 0 : index
    %c0_5 = arith.constant 0 : index
    %5 = vector.load %arg4[%c0_3, %c0_4, %c0_5] : memref<3x128x256xbf16, #tpu.memory_space<vmem>>, vector<1x128x256xbf16>
    %6 = vector.shape_cast %5 : vector<1x128x256xbf16> to vector<128x256xbf16>
    %cst = arith.constant dense<0.000000e+00> : vector<8x256xf32>
    %7 = tpu.matmul %4, %6, %cst {dimension_numbers = #tpu.dot_dimension_numbers<[1], [0], [0], [1], [0, 0, 1, 1], [], []>} : vector<8x128xbf16>, vector<128x256xbf16>, vector<8x256xf32> -> vector<8x256xf32>
    %c1 = arith.constant 1 : index
    %c0_6 = arith.constant 0 : index
    %c0_7 = arith.constant 0 : index
    %8 = vector.load %arg3[%c1, %c0_6, %c0_7] : memref<3x8x128xbf16, #tpu.memory_space<vmem>>, vector<1x8x128xbf16>
    %9 = vector.shape_cast %8 : vector<1x8x128xbf16> to vector<8x128xbf16>
    %c1_8 = arith.constant 1 : index
    %c0_9 = arith.constant 0 : index
    %c0_10 = arith.constant 0 : index
    %10 = vector.load %arg4[%c1_8, %c0_9, %c0_10] : memref<3x128x256xbf16, #tpu.memory_space<vmem>>, vector<1x128x256xbf16>
    %11 = vector.shape_cast %10 : vector<1x128x256xbf16> to vector<128x256xbf16>
    %cst_11 = arith.constant dense<0.000000e+00> : vector<8x256xf32>
    %12 = tpu.matmul %9, %11, %cst_11 {dimension_numbers = #tpu.dot_dimension_numbers<[1], [0], [0], [1], [0, 0, 1, 1], [], []>} : vector<8x128xbf16>, vector<128x256xbf16>, vector<8x256xf32> -> vector<8x256xf32>
    %13 = arith.addf %7, %12 : vector<8x256xf32>
    %c2 = arith.constant 2 : index
    %c0_12 = arith.constant 0 : index
    %c0_13 = arith.constant 0 : index
    %14 = vector.load %arg3[%c2, %c0_12, %c0_13] : memref<3x8x128xbf16, #tpu.memory_space<vmem>>, vector<1x8x128xbf16>
    %15 = vector.shape_cast %14 : vector<1x8x128xbf16> to vector<8x128xbf16>
    %c2_14 = arith.constant 2 : index
    %c0_15 = arith.constant 0 : index
    %c0_16 = arith.constant 0 : index
    %16 = vector.load %arg4[%c2_14, %c0_15, %c0_16] : memref<3x128x256xbf16, #tpu.memory_space<vmem>>, vector<1x128x256xbf16>
    %17 = vector.shape_cast %16 : vector<1x128x256xbf16> to vector<128x256xbf16>
    %cst_17 = arith.constant dense<0.000000e+00> : vector<8x256xf32>
    %18 = tpu.matmul %15, %17, %cst_17 {dimension_numbers = #tpu.dot_dimension_numbers<[1], [0], [0], [1], [0, 0, 1, 1], [], []>} : vector<8x128xbf16>, vector<128x256xbf16>, vector<8x256xf32> -> vector<8x256xf32>
    %19 = arith.addf %13, %18 : vector<8x256xf32>
    %c0_18 = arith.constant 0 : index
    %c0_19 = arith.constant 0 : index
    %20 = vector.load %arg7[%c0_18, %c0_19] : memref<8x256xf32, #tpu.memory_space<vmem>>, vector<8x256xf32>
    %21 = arith.addf %20, %19 : vector<8x256xf32>
    %c0_20 = arith.constant 0 : index
    %c0_21 = arith.constant 0 : index
    %22 = vector.load %arg7[%c0_20, %c0_21] : memref<8x256xf32, #tpu.memory_space<vmem>>, vector<8x256xf32>
    tpu.vector_store %arg7[%c0_20, %c0_21], %21 {strides = array<i32>} : memref<8x256xf32, #tpu.memory_space<vmem>>, vector<8x256xf32>,
    %c8_i32 = arith.constant 8 : i32
    %23 = arith.cmpi eq, %arg2, %c8_i32 : i32
    %24 = arith.extui %23 : i1 to i32
    %c0_i32_22 = arith.constant 0 : i32
    %25 = arith.cmpi ne, %24, %c0_i32_22 : i32
    scf.if %25 {
      %c0_23 = arith.constant 0 : index
      %c0_24 = arith.constant 0 : index
      %26 = vector.load %arg7[%c0_23, %c0_24] : memref<8x256xf32, #tpu.memory_space<vmem>>, vector<8x256xf32>
      %c0_25 = arith.constant 0 : index
      %c0_26 = arith.constant 0 : index
      %27 = vector.load %arg5[%c0_25, %c0_26] : memref<1x256xf32, #tpu.memory_space<vmem>>, vector<1x256xf32>
      %28 = vector.broadcast %27 : vector<1x256xf32> to vector<8x256xf32>
      %29 = arith.addf %26, %28 : vector<8x256xf32>
      %cst_27 = arith.constant 0.000000e+00 : f32
      %30 = vector.broadcast %cst_27 : f32 to vector<8x256xf32>
      %31 = arith.maximumf %29, %30 : vector<8x256xf32>
      %32 = arith.truncf %31 : vector<8x256xf32> to vector<8x256xbf16>
      %c0_28 = arith.constant 0 : index
      %c0_29 = arith.constant 0 : index
      %33 = vector.load %arg6[%c0_28, %c0_29] : memref<8x256xbf16, #tpu.memory_space<vmem>>, vector<8x256xbf16>
      tpu.vector_store %arg6[%c0_28, %c0_29], %32 {strides = array<i32>} : memref<8x256xbf16, #tpu.memory_space<vmem>>, vector<8x256xbf16>,
    } else {
    }
    return
  }
  func.func @transform_0(%arg0: i32, %arg1: i32, %arg2: i32) -> (i32, i32, i32) {
    %c0_i32 = arith.constant 0 : i32
    %c0_i32_0 = arith.constant 0 : i32
    return %arg2, %arg0, %c0_i32 : i32, i32, i32
  }
  func.func @transform_1(%arg0: i32, %arg1: i32, %arg2: i32) -> (i32, i32, i32) {
    %c0_i32 = arith.constant 0 : i32
    %c0_i32_0 = arith.constant 0 : i32
    return %arg2, %c0_i32, %arg1 : i32, i32, i32
  }
  func.func @transform_2(%arg0: i32, %arg1: i32, %arg2: i32) -> (i32, i32) {
    %c0_i32 = arith.constant 0 : i32
    %c0_i32_0 = arith.constant 0 : i32
    return %c0_i32, %arg1 : i32, i32
  }
  func.func @transform_3(%arg0: i32, %arg1: i32, %arg2: i32) -> (i32, i32) {
    %c0_i32 = arith.constant 0 : i32
    return %arg0, %arg1 : i32, i32
  }
}

module attributes {stable_mosaic.version = 11 : i64} {
  func.func @_tap_matmul_kernel(%arg0: i32, %arg1: i32, %arg2: i32, %arg3: memref<1x8x128xbf16, #tpu.memory_space<vmem>>, %arg4: memref<1x128x256xbf16, #tpu.memory_space<vmem>>, %arg5: memref<1x256xf32, #tpu.memory_space<vmem>>, %arg6: memref<8x256xbf16, #tpu.memory_space<vmem>>, %arg7: memref<8x256xf32, #tpu.memory_space<vmem>>) attributes {dimension_semantics = [#tpu.dimension_semantics<parallel>, #tpu.dimension_semantics<parallel>, #tpu.dimension_semantics<arbitrary>], iteration_bounds = array<i64: 1, 1, 1>, scalar_prefetch = 0 : i64, scratch_operands = 1 : i64, tpu.core_type = #tpu.core_type<tc>, window_params = [{transform_indices = @transform_0, window_bounds = array<i64: 1, 8, 128>}, {transform_indices = @transform_1, window_bounds = array<i64: 1, 128, 256>}, {transform_indices = @transform_2, window_bounds = array<i64: 1, 256>}, {transform_indices = @transform_3, window_bounds = array<i64: 8, 256>}]} {
    %c0_i32 = arith.constant 0 : i32
    %0 = arith.cmpi eq, %arg2, %c0_i32 : i32
    %1 = arith.extui %0 : i1 to i32
    %c0_i32_0 = arith.constant 0 : i32
    %2 = arith.cmpi ne, %1, %c0_i32_0 : i32
    scf.if %2 {
      %cst_12 = arith.constant 0.000000e+00 : f32
      %14 = vector.broadcast %cst_12 : f32 to vector<8x256xf32>
      %c0_13 = arith.constant 0 : index
      %c0_14 = arith.constant 0 : index
      %15 = vector.load %arg7[%c0_13, %c0_14] : memref<8x256xf32, #tpu.memory_space<vmem>>, vector<8x256xf32>
      tpu.vector_store %arg7[%c0_13, %c0_14], %14 {strides = array<i32>} : memref<8x256xf32, #tpu.memory_space<vmem>>, vector<8x256xf32>,
    } else {
    }
    %c0 = arith.constant 0 : index
    %c0_1 = arith.constant 0 : index
    %c0_2 = arith.constant 0 : index
    %3 = vector.load %arg3[%c0, %c0_1, %c0_2] : memref<1x8x128xbf16, #tpu.memory_space<vmem>>, vector<1x8x128xbf16>
    %4 = vector.shape_cast %3 : vector<1x8x128xbf16> to vector<8x128xbf16>
    %c0_3 = arith.constant 0 : index
    %c0_4 = arith.constant 0 : index
    %c0_5 = arith.constant 0 : index
    %5 = vector.load %arg4[%c0_3, %c0_4, %c0_5] : memref<1x128x256xbf16, #tpu.memory_space<vmem>>, vector<1x128x256xbf16>
    %6 = vector.shape_cast %5 : vector<1x128x256xbf16> to vector<128x256xbf16>
    %cst = arith.constant dense<0.000000e+00> : vector<8x256xf32>
    %7 = tpu.matmul %4, %6, %cst {dimension_numbers = #tpu.dot_dimension_numbers<[1], [0], [0], [1], [0, 0, 1, 1], [], []>} : vector<8x128xbf16>, vector<128x256xbf16>, vector<8x256xf32> -> vector<8x256xf32>
    %c0_6 = arith.constant 0 : index
    %c0_7 = arith.constant 0 : index
    %8 = vector.load %arg7[%c0_6, %c0_7] : memref<8x256xf32, #tpu.memory_space<vmem>>, vector<8x256xf32>
    %9 = arith.addf %8, %7 : vector<8x256xf32>
    %c0_8 = arith.constant 0 : index
    %c0_9 = arith.constant 0 : index
    %10 = vector.load %arg7[%c0_8, %c0_9] : memref<8x256xf32, #tpu.memory_space<vmem>>, vector<8x256xf32>
    tpu.vector_store %arg7[%c0_8, %c0_9], %9 {strides = array<i32>} : memref<8x256xf32, #tpu.memory_space<vmem>>, vector<8x256xf32>,
    %c0_i32_10 = arith.constant 0 : i32
    %11 = arith.cmpi eq, %arg2, %c0_i32_10 : i32
    %12 = arith.extui %11 : i1 to i32
    %c0_i32_11 = arith.constant 0 : i32
    %13 = arith.cmpi ne, %12, %c0_i32_11 : i32
    scf.if %13 {
      %c0_12 = arith.constant 0 : index
      %c0_13 = arith.constant 0 : index
      %14 = vector.load %arg7[%c0_12, %c0_13] : memref<8x256xf32, #tpu.memory_space<vmem>>, vector<8x256xf32>
      %c0_14 = arith.constant 0 : index
      %c0_15 = arith.constant 0 : index
      %15 = vector.load %arg5[%c0_14, %c0_15] : memref<1x256xf32, #tpu.memory_space<vmem>>, vector<1x256xf32>
      %16 = vector.broadcast %15 : vector<1x256xf32> to vector<8x256xf32>
      %17 = arith.addf %14, %16 : vector<8x256xf32>
      %18 = arith.truncf %17 : vector<8x256xf32> to vector<8x256xbf16>
      %c0_16 = arith.constant 0 : index
      %c0_17 = arith.constant 0 : index
      %19 = vector.load %arg6[%c0_16, %c0_17] : memref<8x256xbf16, #tpu.memory_space<vmem>>, vector<8x256xbf16>
      tpu.vector_store %arg6[%c0_16, %c0_17], %18 {strides = array<i32>} : memref<8x256xbf16, #tpu.memory_space<vmem>>, vector<8x256xbf16>,
    } else {
    }
    return
  }
  func.func @transform_0(%arg0: i32, %arg1: i32, %arg2: i32) -> (i32, i32, i32) {
    %c0_i32 = arith.constant 0 : i32
    %c0_i32_0 = arith.constant 0 : i32
    return %arg2, %arg0, %c0_i32 : i32, i32, i32
  }
  func.func @transform_1(%arg0: i32, %arg1: i32, %arg2: i32) -> (i32, i32, i32) {
    %c0_i32 = arith.constant 0 : i32
    %c0_i32_0 = arith.constant 0 : i32
    return %arg2, %c0_i32, %arg1 : i32, i32, i32
  }
  func.func @transform_2(%arg0: i32, %arg1: i32, %arg2: i32) -> (i32, i32) {
    %c0_i32 = arith.constant 0 : i32
    %c0_i32_0 = arith.constant 0 : i32
    return %c0_i32, %arg1 : i32, i32
  }
  func.func @transform_3(%arg0: i32, %arg1: i32, %arg2: i32) -> (i32, i32) {
    %c0_i32 = arith.constant 0 : i32
    return %arg0, %arg1 : i32, i32
  }
}

module attributes {stable_mosaic.version = 11 : i64} {
  func.func @_tap_matmul_kernel(%arg0: i32, %arg1: i32, %arg2: i32, %arg3: memref<3x8x256xbf16, #tpu.memory_space<vmem>>, %arg4: memref<3x256x256xbf16, #tpu.memory_space<vmem>>, %arg5: memref<1x256xf32, #tpu.memory_space<vmem>>, %arg6: memref<8x256xbf16, #tpu.memory_space<vmem>>, %arg7: memref<8x256xbf16, #tpu.memory_space<vmem>>, %arg8: memref<8x256xf32, #tpu.memory_space<vmem>>) attributes {dimension_semantics = [#tpu.dimension_semantics<parallel>, #tpu.dimension_semantics<parallel>, #tpu.dimension_semantics<arbitrary>], iteration_bounds = array<i64: 1, 1, 9>, scalar_prefetch = 0 : i64, scratch_operands = 1 : i64, tpu.core_type = #tpu.core_type<tc>, window_params = [{transform_indices = @transform_0, window_bounds = array<i64: 3, 8, 256>}, {transform_indices = @transform_1, window_bounds = array<i64: 3, 256, 256>}, {transform_indices = @transform_2, window_bounds = array<i64: 1, 256>}, {transform_indices = @transform_3, window_bounds = array<i64: 8, 256>}, {transform_indices = @transform_4, window_bounds = array<i64: 8, 256>}]} {
    %c0_i32 = arith.constant 0 : i32
    %0 = arith.cmpi eq, %arg2, %c0_i32 : i32
    %1 = arith.extui %0 : i1 to i32
    %c0_i32_0 = arith.constant 0 : i32
    %2 = arith.cmpi ne, %1, %c0_i32_0 : i32
    scf.if %2 {
      %cst_23 = arith.constant 0.000000e+00 : f32
      %26 = vector.broadcast %cst_23 : f32 to vector<8x256xf32>
      %c0_24 = arith.constant 0 : index
      %c0_25 = arith.constant 0 : index
      %27 = vector.load %arg8[%c0_24, %c0_25] : memref<8x256xf32, #tpu.memory_space<vmem>>, vector<8x256xf32>
      tpu.vector_store %arg8[%c0_24, %c0_25], %26 {strides = array<i32>} : memref<8x256xf32, #tpu.memory_space<vmem>>, vector<8x256xf32>,
    } else {
    }
    %c0 = arith.constant 0 : index
    %c0_1 = arith.constant 0 : index
    %c0_2 = arith.constant 0 : index
    %3 = vector.load %arg3[%c0, %c0_1, %c0_2] : memref<3x8x256xbf16, #tpu.memory_space<vmem>>, vector<1x8x256xbf16>
    %4 = vector.shape_cast %3 : vector<1x8x256xbf16> to vector<8x256xbf16>
    %c0_3 = arith.constant 0 : index
    %c0_4 = arith.constant 0 : index
    %c0_5 = arith.constant 0 : index
    %5 = vector.load %arg4[%c0_3, %c0_4, %c0_5] : memref<3x256x256xbf16, #tpu.memory_space<vmem>>, vector<1x256x256xbf16>
    %6 = vector.shape_cast %5 : vector<1x256x256xbf16> to vector<256x256xbf16>
    %cst = arith.constant dense<0.000000e+00> : vector<8x256xf32>
    %7 = tpu.matmul %4, %6, %cst {dimension_numbers = #tpu.dot_dimension_numbers<[1], [0], [0], [1], [0, 0, 1, 1], [], []>} : vector<8x256xbf16>, vector<256x256xbf16>, vector<8x256xf32> -> vector<8x256xf32>
    %c1 = arith.constant 1 : index
    %c0_6 = arith.constant 0 : index
    %c0_7 = arith.constant 0 : index
    %8 = vector.load %arg3[%c1, %c0_6, %c0_7] : memref<3x8x256xbf16, #tpu.memory_space<vmem>>, vector<1x8x256xbf16>
    %9 = vector.shape_cast %8 : vector<1x8x256xbf16> to vector<8x256xbf16>
    %c1_8 = arith.constant 1 : index
    %c0_9 = arith.constant 0 : index
    %c0_10 = arith.constant 0 : index
    %10 = vector.load %arg4[%c1_8, %c0_9, %c0_10] : memref<3x256x256xbf16, #tpu.memory_space<vmem>>, vector<1x256x256xbf16>
    %11 = vector.shape_cast %10 : vector<1x256x256xbf16> to vector<256x256xbf16>
    %cst_11 = arith.constant dense<0.000000e+00> : vector<8x256xf32>
    %12 = tpu.matmul %9, %11, %cst_11 {dimension_numbers = #tpu.dot_dimension_numbers<[1], [0], [0], [1], [0, 0, 1, 1], [], []>} : vector<8x256xbf16>, vector<256x256xbf16>, vector<8x256xf32> -> vector<8x256xf32>
    %13 = arith.addf %7, %12 : vector<8x256xf32>
    %c2 = arith.constant 2 : index
    %c0_12 = arith.constant 0 : index
    %c0_13 = arith.constant 0 : index
    %14 = vector.load %arg3[%c2, %c0_12, %c0_13] : memref<3x8x256xbf16, #tpu.memory_space<vmem>>, vector<1x8x256xbf16>
    %15 = vector.shape_cast %14 : vector<1x8x256xbf16> to vector<8x256xbf16>
    %c2_14 = arith.constant 2 : index
    %c0_15 = arith.constant 0 : index
    %c0_16 = arith.constant 0 : index
    %16 = vector.load %arg4[%c2_14, %c0_15, %c0_16] : memref<3x256x256xbf16, #tpu.memory_space<vmem>>, vector<1x256x256xbf16>
    %17 = vector.shape_cast %16 : vector<1x256x256xbf16> to vector<256x256xbf16>
    %cst_17 = arith.constant dense<0.000000e+00> : vector<8x256xf32>
    %18 = tpu.matmul %15, %17, %cst_17 {dimension_numbers = #tpu.dot_dimension_numbers<[1], [0], [0], [1], [0, 0, 1, 1], [], []>} : vector<8x256xbf16>, vector<256x256xbf16>, vector<8x256xf32> -> vector<8x256xf32>
    %19 = arith.addf %13, %18 : vector<8x256xf32>
    %c0_18 = arith.constant 0 : index
    %c0_19 = arith.constant 0 : index
    %20 = vector.load %arg8[%c0_18, %c0_19] : memref<8x256xf32, #tpu.memory_space<vmem>>, vector<8x256xf32>
    %21 = arith.addf %20, %19 : vector<8x256xf32>
    %c0_20 = arith.constant 0 : index
    %c0_21 = arith.constant 0 : index
    %22 = vector.load %arg8[%c0_20, %c0_21] : memref<8x256xf32, #tpu.memory_space<vmem>>, vector<8x256xf32>
    tpu.vector_store %arg8[%c0_20, %c0_21], %21 {strides = array<i32>} : memref<8x256xf32, #tpu.memory_space<vmem>>, vector<8x256xf32>,
    %c8_i32 = arith.constant 8 : i32
    %23 = arith.cmpi eq, %arg2, %c8_i32 : i32
    %24 = arith.extui %23 : i1 to i32
    %c0_i32_22 = arith.constant 0 : i32
    %25 = arith.cmpi ne, %24, %c0_i32_22 : i32
    scf.if %25 {
      %c0_23 = arith.constant 0 : index
      %c0_24 = arith.constant 0 : index
      %26 = vector.load %arg8[%c0_23, %c0_24] : memref<8x256xf32, #tpu.memory_space<vmem>>, vector<8x256xf32>
      %c0_25 = arith.constant 0 : index
      %c0_26 = arith.constant 0 : index
      %27 = vector.load %arg5[%c0_25, %c0_26] : memref<1x256xf32, #tpu.memory_space<vmem>>, vector<1x256xf32>
      %28 = vector.broadcast %27 : vector<1x256xf32> to vector<8x256xf32>
      %29 = arith.addf %26, %28 : vector<8x256xf32>
      %c0_27 = arith.constant 0 : index
      %c0_28 = arith.constant 0 : index
      %30 = vector.load %arg6[%c0_27, %c0_28] : memref<8x256xbf16, #tpu.memory_space<vmem>>, vector<8x256xbf16>
      %31 = arith.extf %30 : vector<8x256xbf16> to vector<8x256xf32>
      %32 = arith.addf %29, %31 : vector<8x256xf32>
      %cst_29 = arith.constant 0.000000e+00 : f32
      %33 = vector.broadcast %cst_29 : f32 to vector<8x256xf32>
      %34 = arith.maximumf %32, %33 : vector<8x256xf32>
      %35 = arith.truncf %34 : vector<8x256xf32> to vector<8x256xbf16>
      %c0_30 = arith.constant 0 : index
      %c0_31 = arith.constant 0 : index
      %36 = vector.load %arg7[%c0_30, %c0_31] : memref<8x256xbf16, #tpu.memory_space<vmem>>, vector<8x256xbf16>
      tpu.vector_store %arg7[%c0_30, %c0_31], %35 {strides = array<i32>} : memref<8x256xbf16, #tpu.memory_space<vmem>>, vector<8x256xbf16>,
    } else {
    }
    return
  }
  func.func @transform_0(%arg0: i32, %arg1: i32, %arg2: i32) -> (i32, i32, i32) {
    %c0_i32 = arith.constant 0 : i32
    %c0_i32_0 = arith.constant 0 : i32
    return %arg2, %arg0, %c0_i32 : i32, i32, i32
  }
  func.func @transform_1(%arg0: i32, %arg1: i32, %arg2: i32) -> (i32, i32, i32) {
    %c0_i32 = arith.constant 0 : i32
    %c0_i32_0 = arith.constant 0 : i32
    return %arg2, %c0_i32, %arg1 : i32, i32, i32
  }
  func.func @transform_2(%arg0: i32, %arg1: i32, %arg2: i32) -> (i32, i32) {
    %c0_i32 = arith.constant 0 : i32
    %c0_i32_0 = arith.constant 0 : i32
    return %c0_i32, %arg1 : i32, i32
  }
  func.func @transform_3(%arg0: i32, %arg1: i32, %arg2: i32) -> (i32, i32) {
    %c0_i32 = arith.constant 0 : i32
    return %arg0, %arg1 : i32, i32
  }
  func.func @transform_4(%arg0: i32, %arg1: i32, %arg2: i32) -> (i32, i32) {
    %c0_i32 = arith.constant 0 : i32
    return %arg0, %arg1 : i32, i32
  }
}

module attributes {stable_mosaic.version = 11 : i64} {
  func.func @_tap_matmul_kernel(%arg0: i32, %arg1: i32, %arg2: i32, %arg3: memref<3x8x256xbf16, #tpu.memory_space<vmem>>, %arg4: memref<3x256x256xbf16, #tpu.memory_space<vmem>>, %arg5: memref<1x256xf32, #tpu.memory_space<vmem>>, %arg6: memref<8x256xbf16, #tpu.memory_space<vmem>>, %arg7: memref<8x256xf32, #tpu.memory_space<vmem>>) attributes {dimension_semantics = [#tpu.dimension_semantics<parallel>, #tpu.dimension_semantics<parallel>, #tpu.dimension_semantics<arbitrary>], iteration_bounds = array<i64: 1, 2, 9>, scalar_prefetch = 0 : i64, scratch_operands = 1 : i64, tpu.core_type = #tpu.core_type<tc>, window_params = [{transform_indices = @transform_0, window_bounds = array<i64: 3, 8, 256>}, {transform_indices = @transform_1, window_bounds = array<i64: 3, 256, 256>}, {transform_indices = @transform_2, window_bounds = array<i64: 1, 256>}, {transform_indices = @transform_3, window_bounds = array<i64: 8, 256>}]} {
    %c0_i32 = arith.constant 0 : i32
    %0 = arith.cmpi eq, %arg2, %c0_i32 : i32
    %1 = arith.extui %0 : i1 to i32
    %c0_i32_0 = arith.constant 0 : i32
    %2 = arith.cmpi ne, %1, %c0_i32_0 : i32
    scf.if %2 {
      %cst_23 = arith.constant 0.000000e+00 : f32
      %26 = vector.broadcast %cst_23 : f32 to vector<8x256xf32>
      %c0_24 = arith.constant 0 : index
      %c0_25 = arith.constant 0 : index
      %27 = vector.load %arg7[%c0_24, %c0_25] : memref<8x256xf32, #tpu.memory_space<vmem>>, vector<8x256xf32>
      tpu.vector_store %arg7[%c0_24, %c0_25], %26 {strides = array<i32>} : memref<8x256xf32, #tpu.memory_space<vmem>>, vector<8x256xf32>,
    } else {
    }
    %c0 = arith.constant 0 : index
    %c0_1 = arith.constant 0 : index
    %c0_2 = arith.constant 0 : index
    %3 = vector.load %arg3[%c0, %c0_1, %c0_2] : memref<3x8x256xbf16, #tpu.memory_space<vmem>>, vector<1x8x256xbf16>
    %4 = vector.shape_cast %3 : vector<1x8x256xbf16> to vector<8x256xbf16>
    %c0_3 = arith.constant 0 : index
    %c0_4 = arith.constant 0 : index
    %c0_5 = arith.constant 0 : index
    %5 = vector.load %arg4[%c0_3, %c0_4, %c0_5] : memref<3x256x256xbf16, #tpu.memory_space<vmem>>, vector<1x256x256xbf16>
    %6 = vector.shape_cast %5 : vector<1x256x256xbf16> to vector<256x256xbf16>
    %cst = arith.constant dense<0.000000e+00> : vector<8x256xf32>
    %7 = tpu.matmul %4, %6, %cst {dimension_numbers = #tpu.dot_dimension_numbers<[1], [0], [0], [1], [0, 0, 1, 1], [], []>} : vector<8x256xbf16>, vector<256x256xbf16>, vector<8x256xf32> -> vector<8x256xf32>
    %c1 = arith.constant 1 : index
    %c0_6 = arith.constant 0 : index
    %c0_7 = arith.constant 0 : index
    %8 = vector.load %arg3[%c1, %c0_6, %c0_7] : memref<3x8x256xbf16, #tpu.memory_space<vmem>>, vector<1x8x256xbf16>
    %9 = vector.shape_cast %8 : vector<1x8x256xbf16> to vector<8x256xbf16>
    %c1_8 = arith.constant 1 : index
    %c0_9 = arith.constant 0 : index
    %c0_10 = arith.constant 0 : index
    %10 = vector.load %arg4[%c1_8, %c0_9, %c0_10] : memref<3x256x256xbf16, #tpu.memory_space<vmem>>, vector<1x256x256xbf16>
    %11 = vector.shape_cast %10 : vector<1x256x256xbf16> to vector<256x256xbf16>
    %cst_11 = arith.constant dense<0.000000e+00> : vector<8x256xf32>
    %12 = tpu.matmul %9, %11, %cst_11 {dimension_numbers = #tpu.dot_dimension_numbers<[1], [0], [0], [1], [0, 0, 1, 1], [], []>} : vector<8x256xbf16>, vector<256x256xbf16>, vector<8x256xf32> -> vector<8x256xf32>
    %13 = arith.addf %7, %12 : vector<8x256xf32>
    %c2 = arith.constant 2 : index
    %c0_12 = arith.constant 0 : index
    %c0_13 = arith.constant 0 : index
    %14 = vector.load %arg3[%c2, %c0_12, %c0_13] : memref<3x8x256xbf16, #tpu.memory_space<vmem>>, vector<1x8x256xbf16>
    %15 = vector.shape_cast %14 : vector<1x8x256xbf16> to vector<8x256xbf16>
    %c2_14 = arith.constant 2 : index
    %c0_15 = arith.constant 0 : index
    %c0_16 = arith.constant 0 : index
    %16 = vector.load %arg4[%c2_14, %c0_15, %c0_16] : memref<3x256x256xbf16, #tpu.memory_space<vmem>>, vector<1x256x256xbf16>
    %17 = vector.shape_cast %16 : vector<1x256x256xbf16> to vector<256x256xbf16>
    %cst_17 = arith.constant dense<0.000000e+00> : vector<8x256xf32>
    %18 = tpu.matmul %15, %17, %cst_17 {dimension_numbers = #tpu.dot_dimension_numbers<[1], [0], [0], [1], [0, 0, 1, 1], [], []>} : vector<8x256xbf16>, vector<256x256xbf16>, vector<8x256xf32> -> vector<8x256xf32>
    %19 = arith.addf %13, %18 : vector<8x256xf32>
    %c0_18 = arith.constant 0 : index
    %c0_19 = arith.constant 0 : index
    %20 = vector.load %arg7[%c0_18, %c0_19] : memref<8x256xf32, #tpu.memory_space<vmem>>, vector<8x256xf32>
    %21 = arith.addf %20, %19 : vector<8x256xf32>
    %c0_20 = arith.constant 0 : index
    %c0_21 = arith.constant 0 : index
    %22 = vector.load %arg7[%c0_20, %c0_21] : memref<8x256xf32, #tpu.memory_space<vmem>>, vector<8x256xf32>
    tpu.vector_store %arg7[%c0_20, %c0_21], %21 {strides = array<i32>} : memref<8x256xf32, #tpu.memory_space<vmem>>, vector<8x256xf32>,
    %c8_i32 = arith.constant 8 : i32
    %23 = arith.cmpi eq, %arg2, %c8_i32 : i32
    %24 = arith.extui %23 : i1 to i32
    %c0_i32_22 = arith.constant 0 : i32
    %25 = arith.cmpi ne, %24, %c0_i32_22 : i32
    scf.if %25 {
      %c0_23 = arith.constant 0 : index
      %c0_24 = arith.constant 0 : index
      %26 = vector.load %arg7[%c0_23, %c0_24] : memref<8x256xf32, #tpu.memory_space<vmem>>, vector<8x256xf32>
      %c0_25 = arith.constant 0 : index
      %c0_26 = arith.constant 0 : index
      %27 = vector.load %arg5[%c0_25, %c0_26] : memref<1x256xf32, #tpu.memory_space<vmem>>, vector<1x256xf32>
      %28 = vector.broadcast %27 : vector<1x256xf32> to vector<8x256xf32>
      %29 = arith.addf %26, %28 : vector<8x256xf32>
      %cst_27 = arith.constant 0.000000e+00 : f32
      %30 = vector.broadcast %cst_27 : f32 to vector<8x256xf32>
      %31 = arith.maximumf %29, %30 : vector<8x256xf32>
      %32 = arith.truncf %31 : vector<8x256xf32> to vector<8x256xbf16>
      %c0_28 = arith.constant 0 : index
      %c0_29 = arith.constant 0 : index
      %33 = vector.load %arg6[%c0_28, %c0_29] : memref<8x256xbf16, #tpu.memory_space<vmem>>, vector<8x256xbf16>
      tpu.vector_store %arg6[%c0_28, %c0_29], %32 {strides = array<i32>} : memref<8x256xbf16, #tpu.memory_space<vmem>>, vector<8x256xbf16>,
    } else {
    }
    return
  }
  func.func @transform_0(%arg0: i32, %arg1: i32, %arg2: i32) -> (i32, i32, i32) {
    %c0_i32 = arith.constant 0 : i32
    %c0_i32_0 = arith.constant 0 : i32
    return %arg2, %arg0, %c0_i32 : i32, i32, i32
  }
  func.func @transform_1(%arg0: i32, %arg1: i32, %arg2: i32) -> (i32, i32, i32) {
    %c0_i32 = arith.constant 0 : i32
    %c0_i32_0 = arith.constant 0 : i32
    return %arg2, %c0_i32, %arg1 : i32, i32, i32
  }
  func.func @transform_2(%arg0: i32, %arg1: i32, %arg2: i32) -> (i32, i32) {
    %c0_i32 = arith.constant 0 : i32
    %c0_i32_0 = arith.constant 0 : i32
    return %c0_i32, %arg1 : i32, i32
  }
  func.func @transform_3(%arg0: i32, %arg1: i32, %arg2: i32) -> (i32, i32) {
    %c0_i32 = arith.constant 0 : i32
    return %arg0, %arg1 : i32, i32
  }
}

module attributes {stable_mosaic.version = 11 : i64} {
  func.func @_tap_matmul_kernel(%arg0: i32, %arg1: i32, %arg2: i32, %arg3: memref<1x8x256xbf16, #tpu.memory_space<vmem>>, %arg4: memref<1x256x256xbf16, #tpu.memory_space<vmem>>, %arg5: memref<1x256xf32, #tpu.memory_space<vmem>>, %arg6: memref<8x256xbf16, #tpu.memory_space<vmem>>, %arg7: memref<8x256xf32, #tpu.memory_space<vmem>>) attributes {dimension_semantics = [#tpu.dimension_semantics<parallel>, #tpu.dimension_semantics<parallel>, #tpu.dimension_semantics<arbitrary>], iteration_bounds = array<i64: 1, 2, 1>, scalar_prefetch = 0 : i64, scratch_operands = 1 : i64, tpu.core_type = #tpu.core_type<tc>, window_params = [{transform_indices = @transform_0, window_bounds = array<i64: 1, 8, 256>}, {transform_indices = @transform_1, window_bounds = array<i64: 1, 256, 256>}, {transform_indices = @transform_2, window_bounds = array<i64: 1, 256>}, {transform_indices = @transform_3, window_bounds = array<i64: 8, 256>}]} {
    %c0_i32 = arith.constant 0 : i32
    %0 = arith.cmpi eq, %arg2, %c0_i32 : i32
    %1 = arith.extui %0 : i1 to i32
    %c0_i32_0 = arith.constant 0 : i32
    %2 = arith.cmpi ne, %1, %c0_i32_0 : i32
    scf.if %2 {
      %cst_12 = arith.constant 0.000000e+00 : f32
      %14 = vector.broadcast %cst_12 : f32 to vector<8x256xf32>
      %c0_13 = arith.constant 0 : index
      %c0_14 = arith.constant 0 : index
      %15 = vector.load %arg7[%c0_13, %c0_14] : memref<8x256xf32, #tpu.memory_space<vmem>>, vector<8x256xf32>
      tpu.vector_store %arg7[%c0_13, %c0_14], %14 {strides = array<i32>} : memref<8x256xf32, #tpu.memory_space<vmem>>, vector<8x256xf32>,
    } else {
    }
    %c0 = arith.constant 0 : index
    %c0_1 = arith.constant 0 : index
    %c0_2 = arith.constant 0 : index
    %3 = vector.load %arg3[%c0, %c0_1, %c0_2] : memref<1x8x256xbf16, #tpu.memory_space<vmem>>, vector<1x8x256xbf16>
    %4 = vector.shape_cast %3 : vector<1x8x256xbf16> to vector<8x256xbf16>
    %c0_3 = arith.constant 0 : index
    %c0_4 = arith.constant 0 : index
    %c0_5 = arith.constant 0 : index
    %5 = vector.load %arg4[%c0_3, %c0_4, %c0_5] : memref<1x256x256xbf16, #tpu.memory_space<vmem>>, vector<1x256x256xbf16>
    %6 = vector.shape_cast %5 : vector<1x256x256xbf16> to vector<256x256xbf16>
    %cst = arith.constant dense<0.000000e+00> : vector<8x256xf32>
    %7 = tpu.matmul %4, %6, %cst {dimension_numbers = #tpu.dot_dimension_numbers<[1], [0], [0], [1], [0, 0, 1, 1], [], []>} : vector<8x256xbf16>, vector<256x256xbf16>, vector<8x256xf32> -> vector<8x256xf32>
    %c0_6 = arith.constant 0 : index
    %c0_7 = arith.constant 0 : index
    %8 = vector.load %arg7[%c0_6, %c0_7] : memref<8x256xf32, #tpu.memory_space<vmem>>, vector<8x256xf32>
    %9 = arith.addf %8, %7 : vector<8x256xf32>
    %c0_8 = arith.constant 0 : index
    %c0_9 = arith.constant 0 : index
    %10 = vector.load %arg7[%c0_8, %c0_9] : memref<8x256xf32, #tpu.memory_space<vmem>>, vector<8x256xf32>
    tpu.vector_store %arg7[%c0_8, %c0_9], %9 {strides = array<i32>} : memref<8x256xf32, #tpu.memory_space<vmem>>, vector<8x256xf32>,
    %c0_i32_10 = arith.constant 0 : i32
    %11 = arith.cmpi eq, %arg2, %c0_i32_10 : i32
    %12 = arith.extui %11 : i1 to i32
    %c0_i32_11 = arith.constant 0 : i32
    %13 = arith.cmpi ne, %12, %c0_i32_11 : i32
    scf.if %13 {
      %c0_12 = arith.constant 0 : index
      %c0_13 = arith.constant 0 : index
      %14 = vector.load %arg7[%c0_12, %c0_13] : memref<8x256xf32, #tpu.memory_space<vmem>>, vector<8x256xf32>
      %c0_14 = arith.constant 0 : index
      %c0_15 = arith.constant 0 : index
      %15 = vector.load %arg5[%c0_14, %c0_15] : memref<1x256xf32, #tpu.memory_space<vmem>>, vector<1x256xf32>
      %16 = vector.broadcast %15 : vector<1x256xf32> to vector<8x256xf32>
      %17 = arith.addf %14, %16 : vector<8x256xf32>
      %18 = arith.truncf %17 : vector<8x256xf32> to vector<8x256xbf16>
      %c0_16 = arith.constant 0 : index
      %c0_17 = arith.constant 0 : index
      %19 = vector.load %arg6[%c0_16, %c0_17] : memref<8x256xbf16, #tpu.memory_space<vmem>>, vector<8x256xbf16>
      tpu.vector_store %arg6[%c0_16, %c0_17], %18 {strides = array<i32>} : memref<8x256xbf16, #tpu.memory_space<vmem>>, vector<8x256xbf16>,
    } else {
    }
    return
  }
  func.func @transform_0(%arg0: i32, %arg1: i32, %arg2: i32) -> (i32, i32, i32) {
    %c0_i32 = arith.constant 0 : i32
    %c0_i32_0 = arith.constant 0 : i32
    return %arg2, %arg0, %c0_i32 : i32, i32, i32
  }
  func.func @transform_1(%arg0: i32, %arg1: i32, %arg2: i32) -> (i32, i32, i32) {
    %c0_i32 = arith.constant 0 : i32
    %c0_i32_0 = arith.constant 0 : i32
    return %arg2, %c0_i32, %arg1 : i32, i32, i32
  }
  func.func @transform_2(%arg0: i32, %arg1: i32, %arg2: i32) -> (i32, i32) {
    %c0_i32 = arith.constant 0 : i32
    %c0_i32_0 = arith.constant 0 : i32
    return %c0_i32, %arg1 : i32, i32
  }
  func.func @transform_3(%arg0: i32, %arg1: i32, %arg2: i32) -> (i32, i32) {
    %c0_i32 = arith.constant 0 : i32
    return %arg0, %arg1 : i32, i32
  }
}

module attributes {stable_mosaic.version = 11 : i64} {
  func.func @_avgpool_kernel(%arg0: i32, %arg1: memref<2x1x512xbf16, #tpu.memory_space<vmem>>, %arg2: memref<2x512xf32, #tpu.memory_space<vmem>>, %arg3: memref<2x512xf32, #tpu.memory_space<vmem>>) attributes {dimension_semantics = [#tpu.dimension_semantics<arbitrary>], iteration_bounds = array<i64: 1>, scalar_prefetch = 0 : i64, scratch_operands = 1 : i64, tpu.core_type = #tpu.core_type<tc>, window_params = [{transform_indices = @transform_0, window_bounds = array<i64: 2, 1, 512>}, {pipeline_mode = #tpu.pipeline_mode<synchronous>, transform_indices = @transform_1, window_bounds = array<i64: 2, 512>}]} {
    %c0_i32 = arith.constant 0 : i32
    %0 = arith.cmpi eq, %arg0, %c0_i32 : i32
    %1 = arith.extui %0 : i1 to i32
    %c0_i32_0 = arith.constant 0 : i32
    %2 = arith.cmpi ne, %1, %c0_i32_0 : i32
    scf.if %2 {
      %cst_9 = arith.constant 0.000000e+00 : f32
      %12 = vector.broadcast %cst_9 : f32 to vector<2x512xf32>
      %c0_10 = arith.constant 0 : index
      %c0_11 = arith.constant 0 : index
      %13 = vector.load %arg3[%c0_10, %c0_11] : memref<2x512xf32, #tpu.memory_space<vmem>>, vector<2x512xf32>
      tpu.vector_store %arg3[%c0_10, %c0_11], %12 {strides = array<i32>} : memref<2x512xf32, #tpu.memory_space<vmem>>, vector<2x512xf32>,
    } else {
    }
    %c0 = arith.constant 0 : index
    %c0_1 = arith.constant 0 : index
    %3 = vector.load %arg3[%c0, %c0_1] : memref<2x512xf32, #tpu.memory_space<vmem>>, vector<2x512xf32>
    %c0_2 = arith.constant 0 : index
    %c0_3 = arith.constant 0 : index
    %c0_4 = arith.constant 0 : index
    %4 = vector.load %arg1[%c0_2, %c0_3, %c0_4] : memref<2x1x512xbf16, #tpu.memory_space<vmem>>, vector<2x1x512xbf16>
    %5 = arith.extf %4 : vector<2x1x512xbf16> to vector<2x1x512xf32>
    %cst = arith.constant dense<0.000000e+00> : vector<2x512xf32>
    %6 = vector.multi_reduction <add>, %5, %cst [1] : vector<2x1x512xf32> to vector<2x512xf32>
    %7 = arith.addf %3, %6 : vector<2x512xf32>
    %c0_5 = arith.constant 0 : index
    %c0_6 = arith.constant 0 : index
    %8 = vector.load %arg3[%c0_5, %c0_6] : memref<2x512xf32, #tpu.memory_space<vmem>>, vector<2x512xf32>
    tpu.vector_store %arg3[%c0_5, %c0_6], %7 {strides = array<i32>} : memref<2x512xf32, #tpu.memory_space<vmem>>, vector<2x512xf32>,
    %c0_i32_7 = arith.constant 0 : i32
    %9 = arith.cmpi eq, %arg0, %c0_i32_7 : i32
    %10 = arith.extui %9 : i1 to i32
    %c0_i32_8 = arith.constant 0 : i32
    %11 = arith.cmpi ne, %10, %c0_i32_8 : i32
    scf.if %11 {
      %c0_9 = arith.constant 0 : index
      %c0_10 = arith.constant 0 : index
      %12 = vector.load %arg3[%c0_9, %c0_10] : memref<2x512xf32, #tpu.memory_space<vmem>>, vector<2x512xf32>
      %cst_11 = arith.constant 1.000000e+00 : f32
      %13 = vector.broadcast %cst_11 : f32 to vector<2x512xf32>
      %14 = arith.mulf %12, %13 : vector<2x512xf32>
      %c0_12 = arith.constant 0 : index
      %c0_13 = arith.constant 0 : index
      %15 = vector.load %arg2[%c0_12, %c0_13] : memref<2x512xf32, #tpu.memory_space<vmem>>, vector<2x512xf32>
      tpu.vector_store %arg2[%c0_12, %c0_13], %14 {strides = array<i32>} : memref<2x512xf32, #tpu.memory_space<vmem>>, vector<2x512xf32>,
    } else {
    }
    return
  }
  func.func @transform_0(%arg0: i32) -> (i32, i32, i32) {
    %c0_i32 = arith.constant 0 : i32
    %c0_i32_0 = arith.constant 0 : i32
    %c0_i32_1 = arith.constant 0 : i32
    return %c0_i32, %arg0, %c0_i32_0 : i32, i32, i32
  }
  func.func @transform_1(%arg0: i32) -> (i32, i32) {
    %c0_i32 = arith.constant 0 : i32
    %c0_i32_0 = arith.constant 0 : i32
    %c0_i32_1 = arith.constant 0 : i32
    return %c0_i32, %c0_i32_0 : i32, i32
  }
}

module attributes {stable_mosaic.version = 11 : i64} {
  func.func @_tap_matmul_kernel(%arg0: i32, %arg1: i32, %arg2: i32, %arg3: memref<3x8x512xbf16, #tpu.memory_space<vmem>>, %arg4: memref<3x512x256xbf16, #tpu.memory_space<vmem>>, %arg5: memref<1x256xf32, #tpu.memory_space<vmem>>, %arg6: memref<8x256xbf16, #tpu.memory_space<vmem>>, %arg7: memref<8x256xbf16, #tpu.memory_space<vmem>>, %arg8: memref<8x256xf32, #tpu.memory_space<vmem>>) attributes {dimension_semantics = [#tpu.dimension_semantics<parallel>, #tpu.dimension_semantics<parallel>, #tpu.dimension_semantics<arbitrary>], iteration_bounds = array<i64: 1, 2, 9>, scalar_prefetch = 0 : i64, scratch_operands = 1 : i64, tpu.core_type = #tpu.core_type<tc>, window_params = [{transform_indices = @transform_0, window_bounds = array<i64: 3, 8, 512>}, {transform_indices = @transform_1, window_bounds = array<i64: 3, 512, 256>}, {transform_indices = @transform_2, window_bounds = array<i64: 1, 256>}, {transform_indices = @transform_3, window_bounds = array<i64: 8, 256>}, {transform_indices = @transform_4, window_bounds = array<i64: 8, 256>}]} {
    %c0_i32 = arith.constant 0 : i32
    %0 = arith.cmpi eq, %arg2, %c0_i32 : i32
    %1 = arith.extui %0 : i1 to i32
    %c0_i32_0 = arith.constant 0 : i32
    %2 = arith.cmpi ne, %1, %c0_i32_0 : i32
    scf.if %2 {
      %cst_23 = arith.constant 0.000000e+00 : f32
      %26 = vector.broadcast %cst_23 : f32 to vector<8x256xf32>
      %c0_24 = arith.constant 0 : index
      %c0_25 = arith.constant 0 : index
      %27 = vector.load %arg8[%c0_24, %c0_25] : memref<8x256xf32, #tpu.memory_space<vmem>>, vector<8x256xf32>
      tpu.vector_store %arg8[%c0_24, %c0_25], %26 {strides = array<i32>} : memref<8x256xf32, #tpu.memory_space<vmem>>, vector<8x256xf32>,
    } else {
    }
    %c0 = arith.constant 0 : index
    %c0_1 = arith.constant 0 : index
    %c0_2 = arith.constant 0 : index
    %3 = vector.load %arg3[%c0, %c0_1, %c0_2] : memref<3x8x512xbf16, #tpu.memory_space<vmem>>, vector<1x8x512xbf16>
    %4 = vector.shape_cast %3 : vector<1x8x512xbf16> to vector<8x512xbf16>
    %c0_3 = arith.constant 0 : index
    %c0_4 = arith.constant 0 : index
    %c0_5 = arith.constant 0 : index
    %5 = vector.load %arg4[%c0_3, %c0_4, %c0_5] : memref<3x512x256xbf16, #tpu.memory_space<vmem>>, vector<1x512x256xbf16>
    %6 = vector.shape_cast %5 : vector<1x512x256xbf16> to vector<512x256xbf16>
    %cst = arith.constant dense<0.000000e+00> : vector<8x256xf32>
    %7 = tpu.matmul %4, %6, %cst {dimension_numbers = #tpu.dot_dimension_numbers<[1], [0], [0], [1], [0, 0, 1, 1], [], []>} : vector<8x512xbf16>, vector<512x256xbf16>, vector<8x256xf32> -> vector<8x256xf32>
    %c1 = arith.constant 1 : index
    %c0_6 = arith.constant 0 : index
    %c0_7 = arith.constant 0 : index
    %8 = vector.load %arg3[%c1, %c0_6, %c0_7] : memref<3x8x512xbf16, #tpu.memory_space<vmem>>, vector<1x8x512xbf16>
    %9 = vector.shape_cast %8 : vector<1x8x512xbf16> to vector<8x512xbf16>
    %c1_8 = arith.constant 1 : index
    %c0_9 = arith.constant 0 : index
    %c0_10 = arith.constant 0 : index
    %10 = vector.load %arg4[%c1_8, %c0_9, %c0_10] : memref<3x512x256xbf16, #tpu.memory_space<vmem>>, vector<1x512x256xbf16>
    %11 = vector.shape_cast %10 : vector<1x512x256xbf16> to vector<512x256xbf16>
    %cst_11 = arith.constant dense<0.000000e+00> : vector<8x256xf32>
    %12 = tpu.matmul %9, %11, %cst_11 {dimension_numbers = #tpu.dot_dimension_numbers<[1], [0], [0], [1], [0, 0, 1, 1], [], []>} : vector<8x512xbf16>, vector<512x256xbf16>, vector<8x256xf32> -> vector<8x256xf32>
    %13 = arith.addf %7, %12 : vector<8x256xf32>
    %c2 = arith.constant 2 : index
    %c0_12 = arith.constant 0 : index
    %c0_13 = arith.constant 0 : index
    %14 = vector.load %arg3[%c2, %c0_12, %c0_13] : memref<3x8x512xbf16, #tpu.memory_space<vmem>>, vector<1x8x512xbf16>
    %15 = vector.shape_cast %14 : vector<1x8x512xbf16> to vector<8x512xbf16>
    %c2_14 = arith.constant 2 : index
    %c0_15 = arith.constant 0 : index
    %c0_16 = arith.constant 0 : index
    %16 = vector.load %arg4[%c2_14, %c0_15, %c0_16] : memref<3x512x256xbf16, #tpu.memory_space<vmem>>, vector<1x512x256xbf16>
    %17 = vector.shape_cast %16 : vector<1x512x256xbf16> to vector<512x256xbf16>
    %cst_17 = arith.constant dense<0.000000e+00> : vector<8x256xf32>
    %18 = tpu.matmul %15, %17, %cst_17 {dimension_numbers = #tpu.dot_dimension_numbers<[1], [0], [0], [1], [0, 0, 1, 1], [], []>} : vector<8x512xbf16>, vector<512x256xbf16>, vector<8x256xf32> -> vector<8x256xf32>
    %19 = arith.addf %13, %18 : vector<8x256xf32>
    %c0_18 = arith.constant 0 : index
    %c0_19 = arith.constant 0 : index
    %20 = vector.load %arg8[%c0_18, %c0_19] : memref<8x256xf32, #tpu.memory_space<vmem>>, vector<8x256xf32>
    %21 = arith.addf %20, %19 : vector<8x256xf32>
    %c0_20 = arith.constant 0 : index
    %c0_21 = arith.constant 0 : index
    %22 = vector.load %arg8[%c0_20, %c0_21] : memref<8x256xf32, #tpu.memory_space<vmem>>, vector<8x256xf32>
    tpu.vector_store %arg8[%c0_20, %c0_21], %21 {strides = array<i32>} : memref<8x256xf32, #tpu.memory_space<vmem>>, vector<8x256xf32>,
    %c8_i32 = arith.constant 8 : i32
    %23 = arith.cmpi eq, %arg2, %c8_i32 : i32
    %24 = arith.extui %23 : i1 to i32
    %c0_i32_22 = arith.constant 0 : i32
    %25 = arith.cmpi ne, %24, %c0_i32_22 : i32
    scf.if %25 {
      %c0_23 = arith.constant 0 : index
      %c0_24 = arith.constant 0 : index
      %26 = vector.load %arg8[%c0_23, %c0_24] : memref<8x256xf32, #tpu.memory_space<vmem>>, vector<8x256xf32>
      %c0_25 = arith.constant 0 : index
      %c0_26 = arith.constant 0 : index
      %27 = vector.load %arg5[%c0_25, %c0_26] : memref<1x256xf32, #tpu.memory_space<vmem>>, vector<1x256xf32>
      %28 = vector.broadcast %27 : vector<1x256xf32> to vector<8x256xf32>
      %29 = arith.addf %26, %28 : vector<8x256xf32>
      %c0_27 = arith.constant 0 : index
      %c0_28 = arith.constant 0 : index
      %30 = vector.load %arg6[%c0_27, %c0_28] : memref<8x256xbf16, #tpu.memory_space<vmem>>, vector<8x256xbf16>
      %31 = arith.extf %30 : vector<8x256xbf16> to vector<8x256xf32>
      %32 = arith.addf %29, %31 : vector<8x256xf32>
      %cst_29 = arith.constant 0.000000e+00 : f32
      %33 = vector.broadcast %cst_29 : f32 to vector<8x256xf32>
      %34 = arith.maximumf %32, %33 : vector<8x256xf32>
      %35 = arith.truncf %34 : vector<8x256xf32> to vector<8x256xbf16>
      %c0_30 = arith.constant 0 : index
      %c0_31 = arith.constant 0 : index
      %36 = vector.load %arg7[%c0_30, %c0_31] : memref<8x256xbf16, #tpu.memory_space<vmem>>, vector<8x256xbf16>
      tpu.vector_store %arg7[%c0_30, %c0_31], %35 {strides = array<i32>} : memref<8x256xbf16, #tpu.memory_space<vmem>>, vector<8x256xbf16>,
    } else {
    }
    return
  }
  func.func @transform_0(%arg0: i32, %arg1: i32, %arg2: i32) -> (i32, i32, i32) {
    %c0_i32 = arith.constant 0 : i32
    %c0_i32_0 = arith.constant 0 : i32
    return %arg2, %arg0, %c0_i32 : i32, i32, i32
  }
  func.func @transform_1(%arg0: i32, %arg1: i32, %arg2: i32) -> (i32, i32, i32) {
    %c0_i32 = arith.constant 0 : i32
    %c0_i32_0 = arith.constant 0 : i32
    return %arg2, %c0_i32, %arg1 : i32, i32, i32
  }
  func.func @transform_2(%arg0: i32, %arg1: i32, %arg2: i32) -> (i32, i32) {
    %c0_i32 = arith.constant 0 : i32
    %c0_i32_0 = arith.constant 0 : i32
    return %c0_i32, %arg1 : i32, i32
  }
  func.func @transform_3(%arg0: i32, %arg1: i32, %arg2: i32) -> (i32, i32) {
    %c0_i32 = arith.constant 0 : i32
    return %arg0, %arg1 : i32, i32
  }
  func.func @transform_4(%arg0: i32, %arg1: i32, %arg2: i32) -> (i32, i32) {
    %c0_i32 = arith.constant 0 : i32
    return %arg0, %arg1 : i32, i32
  }
}

module attributes {stable_mosaic.version = 11 : i64} {
  func.func @_tap_matmul_kernel(%arg0: i32, %arg1: i32, %arg2: i32, %arg3: memref<1x8x512xbf16, #tpu.memory_space<vmem>>, %arg4: memref<1x512x5xbf16, #tpu.memory_space<vmem>>, %arg5: memref<1x5xf32, #tpu.memory_space<vmem>>, %arg6: memref<8x5xf32, #tpu.memory_space<vmem>>, %arg7: memref<8x5xf32, #tpu.memory_space<vmem>>) attributes {dimension_semantics = [#tpu.dimension_semantics<parallel>, #tpu.dimension_semantics<parallel>, #tpu.dimension_semantics<arbitrary>], iteration_bounds = array<i64: 1, 1, 1>, scalar_prefetch = 0 : i64, scratch_operands = 1 : i64, tpu.core_type = #tpu.core_type<tc>, window_params = [{transform_indices = @transform_0, window_bounds = array<i64: 1, 8, 512>}, {transform_indices = @transform_1, window_bounds = array<i64: 1, 512, 5>}, {transform_indices = @transform_2, window_bounds = array<i64: 1, 5>}, {transform_indices = @transform_3, window_bounds = array<i64: 8, 5>}]} {
    %c0_i32 = arith.constant 0 : i32
    %0 = arith.cmpi eq, %arg2, %c0_i32 : i32
    %1 = arith.extui %0 : i1 to i32
    %c0_i32_0 = arith.constant 0 : i32
    %2 = arith.cmpi ne, %1, %c0_i32_0 : i32
    scf.if %2 {
      %cst_12 = arith.constant 0.000000e+00 : f32
      %14 = vector.broadcast %cst_12 : f32 to vector<8x5xf32>
      %c0_13 = arith.constant 0 : index
      %c0_14 = arith.constant 0 : index
      %15 = vector.load %arg7[%c0_13, %c0_14] : memref<8x5xf32, #tpu.memory_space<vmem>>, vector<8x5xf32>
      tpu.vector_store %arg7[%c0_13, %c0_14], %14 {strides = array<i32>} : memref<8x5xf32, #tpu.memory_space<vmem>>, vector<8x5xf32>,
    } else {
    }
    %c0 = arith.constant 0 : index
    %c0_1 = arith.constant 0 : index
    %c0_2 = arith.constant 0 : index
    %3 = vector.load %arg3[%c0, %c0_1, %c0_2] : memref<1x8x512xbf16, #tpu.memory_space<vmem>>, vector<1x8x512xbf16>
    %4 = vector.shape_cast %3 : vector<1x8x512xbf16> to vector<8x512xbf16>
    %c0_3 = arith.constant 0 : index
    %c0_4 = arith.constant 0 : index
    %c0_5 = arith.constant 0 : index
    %5 = vector.load %arg4[%c0_3, %c0_4, %c0_5] : memref<1x512x5xbf16, #tpu.memory_space<vmem>>, vector<1x512x5xbf16>
    %6 = vector.shape_cast %5 : vector<1x512x5xbf16> to vector<512x5xbf16>
    %cst = arith.constant dense<0.000000e+00> : vector<8x5xf32>
    %7 = tpu.matmul %4, %6, %cst {dimension_numbers = #tpu.dot_dimension_numbers<[1], [0], [0], [1], [0, 0, 1, 1], [], []>} : vector<8x512xbf16>, vector<512x5xbf16>, vector<8x5xf32> -> vector<8x5xf32>
    %c0_6 = arith.constant 0 : index
    %c0_7 = arith.constant 0 : index
    %8 = vector.load %arg7[%c0_6, %c0_7] : memref<8x5xf32, #tpu.memory_space<vmem>>, vector<8x5xf32>
    %9 = arith.addf %8, %7 : vector<8x5xf32>
    %c0_8 = arith.constant 0 : index
    %c0_9 = arith.constant 0 : index
    %10 = vector.load %arg7[%c0_8, %c0_9] : memref<8x5xf32, #tpu.memory_space<vmem>>, vector<8x5xf32>
    tpu.vector_store %arg7[%c0_8, %c0_9], %9 {strides = array<i32>} : memref<8x5xf32, #tpu.memory_space<vmem>>, vector<8x5xf32>,
    %c0_i32_10 = arith.constant 0 : i32
    %11 = arith.cmpi eq, %arg2, %c0_i32_10 : i32
    %12 = arith.extui %11 : i1 to i32
    %c0_i32_11 = arith.constant 0 : i32
    %13 = arith.cmpi ne, %12, %c0_i32_11 : i32
    scf.if %13 {
      %c0_12 = arith.constant 0 : index
      %c0_13 = arith.constant 0 : index
      %14 = vector.load %arg7[%c0_12, %c0_13] : memref<8x5xf32, #tpu.memory_space<vmem>>, vector<8x5xf32>
      %c0_14 = arith.constant 0 : index
      %c0_15 = arith.constant 0 : index
      %15 = vector.load %arg5[%c0_14, %c0_15] : memref<1x5xf32, #tpu.memory_space<vmem>>, vector<1x5xf32>
      %16 = vector.broadcast %15 : vector<1x5xf32> to vector<8x5xf32>
      %17 = arith.addf %14, %16 : vector<8x5xf32>
      %c0_16 = arith.constant 0 : index
      %c0_17 = arith.constant 0 : index
      %18 = vector.load %arg6[%c0_16, %c0_17] : memref<8x5xf32, #tpu.memory_space<vmem>>, vector<8x5xf32>
      tpu.vector_store %arg6[%c0_16, %c0_17], %17 {strides = array<i32>} : memref<8x5xf32, #tpu.memory_space<vmem>>, vector<8x5xf32>,
    } else {
    }
    return
  }
  func.func @transform_0(%arg0: i32, %arg1: i32, %arg2: i32) -> (i32, i32, i32) {
    %c0_i32 = arith.constant 0 : i32
    %c0_i32_0 = arith.constant 0 : i32
    return %arg2, %arg0, %c0_i32 : i32, i32, i32
  }
  func.func @transform_1(%arg0: i32, %arg1: i32, %arg2: i32) -> (i32, i32, i32) {
    %c0_i32 = arith.constant 0 : i32
    %c0_i32_0 = arith.constant 0 : i32
    return %arg2, %c0_i32, %arg1 : i32, i32, i32
  }
  func.func @transform_2(%arg0: i32, %arg1: i32, %arg2: i32) -> (i32, i32) {
    %c0_i32 = arith.constant 0 : i32
    %c0_i32_0 = arith.constant 0 : i32
    return %c0_i32, %arg1 : i32, i32
  }
  func.func @transform_3(%arg0: i32, %arg1: i32, %arg2: i32) -> (i32, i32) {
    %c0_i32 = arith.constant 0 : i32
    return %arg0, %arg1 : i32, i32
  }
}

</mosaic_0001>

<bundles_post_ra>
// kernel: resnet3d_forward.15
= control target key start
LH: loop header
LB: loop body
LE: loop exit
PB: predicated region body
PF: predicated region fallthrough
CT: control target
= control target key end

     0   :  { %s2991_s12 = smov 0   ;;  %s2993_s13 = smov 0   ;;  %s3296_s0 = inlined_call_operand.vmem [shape: bf16[343,128,64], index: 0, kind: input, shape index: {}]   ;;  %s3297_s1 = inlined_call_operand.vmem [shape: bf16[343,64,64], index: 1, kind: input, shape index: {}]   ;;  %s3298_s2 = inlined_call_operand.vmem [shape: f32[1,64], index: 2, kind: input, shape index: {}]   ;;  %s3299_s3 = inlined_call_operand.vmem [shape: bf16[128,64], index: 3, kind: output, shape index: {}]  }
   0x1   :  { %s2995_s14 = smov 0  }
   0x2 LB: > { %s25_s15 = sadd.s32 1, %s2964_s13  ;;  %p2151_p0 = scmp.ge.s32.totalorder %s2968_s14, 1  ;;  %s2968_s14 = sphi %s2995_s14, %s13_s14   ;;  %s2964_s13 = sphi %s2993_s13, %s3301_s13   ;;  %s2960_s12 = sphi %s2991_s12, %s3300_s12  }
   0x3   : > { %p26_p1 = scmp.ge.s32.totalorder %s25_s15, 49  ;;  %p192_p2 = scmp.lt.s32.totalorder %s2968_s14, 50 }
   0x5   : > { %s3303_s15 = smov (%p26_p1, %s25_s15), 0  ;;  %p193_p3 = pnand %p2151_p0, %p192_p2 }
   0x6   : > { %s236_s16 = smul.u32 (!%p193_p3), 7, %s2960_s12  ;;  %p2156_p5 = scmp.ne.s32.totalorder (!%p193_p3), %s2960_s12, 0 }
   0x7   : > { %196 = sbr.rel (%p193_p3) target bundleno = 380 (0x17c), region = 32 }
   0x8   : > { %p238_p4 = scmp.lt.s32.totalorder (!%p193_p3), %s236_s16, 342 }
   0xe   : > { %s3305_s16 = smov (!%p238_p4, %s236_s16), 342  ;;  %274 = sbr.rel (%p2156_p5) target bundleno = 24 (0x18), region = 36 }
   0xf   : > { %s2463_s17 = sshll.u32 %s3305_s16, 6  ;;  %s2464_s18 = sshll.u32 %s3305_s16, 5  ;;  %vm275_vm0 = vcmask (!%p2156_p5), 523264   ;;  %v2970_v0 = vmov (!%p2156_p5), 0.0  }
  0x10   : > { %s3015_s21 = scalar_lea.vmem %s3296_s0, %s2463_s17  ;;  %s3020_s24 = scalar_lea.vmem %s3297_s1, %s2464_s18  ;;  %276 = vst.msk [vmem:[#allocation2] sm:$0xff] (!%p2156_p5), %vm275_vm0, %v2970_v0  ;;  %277 = vst.msk [vmem:[#allocation2 + $0x8] sm:$0xff] (!%p2156_p5), %vm275_vm0, %v2970_v0 }
  0x11   : > { %278 = vst.msk [vmem:[#allocation2 + $0x10] sm:$0xff] (!%p2156_p5), %vm275_vm0, %v2970_v0  ;;  %279 = vst.msk [vmem:[#allocation2 + $0x18] sm:$0xff] (!%p2156_p5), %vm275_vm0, %v2970_v0 }
  0x12   : > { %280 = vst.msk [vmem:[#allocation2 + $0x20] sm:$0xff] (!%p2156_p5), %vm275_vm0, %v2970_v0  ;;  %281 = vst.msk [vmem:[#allocation2 + $0x28] sm:$0xff] (!%p2156_p5), %vm275_vm0, %v2970_v0 }
  0x13   : > { %282 = vst.msk [vmem:[#allocation2 + $0x30] sm:$0xff] (!%p2156_p5), %vm275_vm0, %v2970_v0  ;;  %283 = vst.msk [vmem:[#allocation2 + $0x38] sm:$0xff] (!%p2156_p5), %vm275_vm0, %v2970_v0 }
  0x14   : > { %284 = vst.msk [vmem:[#allocation2 + $0x40] sm:$0xff] (!%p2156_p5), %vm275_vm0, %v2970_v0  ;;  %285 = vst.msk [vmem:[#allocation2 + $0x48] sm:$0xff] (!%p2156_p5), %vm275_vm0, %v2970_v0 }
  0x15   : > { %286 = vst.msk [vmem:[#allocation2 + $0x50] sm:$0xff] %vm275_vm0, %v2970_v0  ;;  %287 = vst.msk [vmem:[#allocation2 + $0x58] sm:$0xff] %vm275_vm0, %v2970_v0 }
  0x16   : > { %288 = vst.msk [vmem:[#allocation2 + $0x60] sm:$0xff] %vm275_vm0, %v2970_v0  ;;  %289 = vst.msk [vmem:[#allocation2 + $0x68] sm:$0xff] %vm275_vm0, %v2970_v0 }
  0x17   : > { %290 = vst.msk [vmem:[#allocation2 + $0x70] sm:$0xff] %vm275_vm0, %v2970_v0  ;;  %291 = vst.msk [vmem:[#allocation2 + $0x78] sm:$0xff] %vm275_vm0, %v2970_v0 }
  0x18 PF: > { %v2862_v1 = vld [vmem:[%s3020_s24 + $0x20] sm:$0xff]   ;;  %v2864_v3 = vld [vmem:[%s3020_s24 + $0x28] sm:$0xff]   ;;  %v2866_v5 = vld [vmem:[%s3020_s24 + $0x30] sm:$0xff]   ;;  %vm406_vm1 = vcmask 523264   ;;  %p2441_p6 = scmp.ne.s32.totalorder %s2960_s12, 48 }
  0x19   : > { %v3041_v2 = vld [vmem:[%s3020_s24 + $0x60] sm:$0xff]   ;;  %2565 = vmatprep.subr.bf16.mxu1 %v2862_v1  ;;  %v3046_v4 = vld [vmem:[%s3020_s24 + $0x68] sm:$0xff]   ;;  %v3052_v6 = vld [vmem:[%s3020_s24 + $0x70] sm:$0xff]   ;;  %vm2019_vm2 = vcmask (!%p2441_p6), 519168  }
  0x1a   : > { %2637 = vmatprep.subr.bf16.mxu0 %v3041_v2  ;;  %2566 = vmatpush3.bf16.msra.mxu1 %v2862_v1  ;;  %v2868_v7 = vld [vmem:[%s3020_s24 + $0x38] sm:$0xff]   ;;  %v2870_v9 = vld [vmem:[%s3015_s21 + $0x40] sm:$0xff]   ;;  %v2872_v11 = vld [vmem:[%s3015_s21 + $0x48] sm:$0xff]  }
  0x1b   : > { %2638 = vmatpush3.bf16.msra.mxu0 %v3041_v2  ;;  %2567 = vmatprep.subr.bf16.mxu1 %v2864_v3  ;;  %v3056_v8 = vld [vmem:[%s3020_s24 + $0x78] sm:$0xff]   ;;  %v2871_v10 = vld [vmem:[%s3015_s21 + $0xc0] sm:$0xff]   ;;  %v2874_v14 = vld [vmem:[%s3015_s21 + $0xc8] sm:$0xff]  }
  0x1c   : > { %2639 = vmatprep.subr.bf16.mxu0 %v3046_v4  ;;  %2573 = vmatprep.mubr.msk.bf16.mxu1 %vm406_vm1, %v2870_v9  ;;  %v2873_v12 = vld [vmem:[%s3020_s24] sm:$0xff]   ;;  %v2876_v15 = vld [vmem:[%s3020_s24 + $0x88] sm:$0xff]   ;;  %v2877_v16 = vld [vmem:[%s3015_s21 + $0x50] sm:$0xff]  }
  0x1d   : > { %2645 = vmatprep.mubr.msk.bf16.mxu0 %vm406_vm1, %v2871_v10  ;;  %v2875_v13 = vld [vmem:[%s3020_s24 + $0x80] sm:$0xff]   ;;  %v2878_v17 = vld [vmem:[%s3015_s21 + $0xd0] sm:$0xff]   ;;  %v2880_v18 = vld [vmem:[%s3020_s24 + $0x8] sm:$0xff]  }
  0x1e   : > { %2568 = vmatpush3.bf16.msra.mxu1 %v2864_v3  ;;  %v2879_v19 = vld [vmem:[%s3015_s21 + $0x58] sm:$0xff]   ;;  %v2882_v20 = vld [vmem:[%s3020_s24 + $0x90] sm:$0xff]   ;;  %v2884_v23 = vld [vmem:[%s3015_s21 + $0x60] sm:$0xff]  }
  0x1f   : > { %2640 = vmatpush3.bf16.msra.mxu0 %v3046_v4  ;;  %2569 = vmatprep.subr.bf16.mxu1 %v2866_v5  ;;  %v2881_v21 = vld [vmem:[%s3015_s21 + $0xd8] sm:$0xff]   ;;  %v2885_v24 = vld [vmem:[%s3015_s21 + $0x100] sm:$0xff]   ;;  %v2887_v25 = vld [vmem:[%s3020_s24 + $0x10] sm:$0xff]  }
  0x20   : > { %2641 = vmatprep.subr.bf16.mxu0 %v3052_v6  ;;  %v2883_v22 = vld [vmem:[%s3020_s24 + $0x98] sm:$0xff]   ;;  %v2886_v26 = vld [vmem:[%s3015_s21 + $0x68] sm:$0xff]   ;;  %v2889_v28 = vld [vmem:[%s3020_s24 + $0xa0] sm:$0xff]  }
  0x21   : > { %v2888_v27 = vld [vmem:[%s3015_s21 + $0x108] sm:$0xff]   ;;  %v2890_v29 = vld [vmem:[%s3015_s21 + $0x70] sm:$0xff]   ;;  %v2893_v30 = vld [vmem:[%s3020_s24 + $0x18] sm:$0xff]  }
  0x22   : > { %2570 = vmatpush3.bf16.msra.mxu1 %v2866_v5  ;;  %v2891_v31 = vld [vmem:[%s3015_s21 + $0x110] sm:$0xff]   ;;  %v2895_v32 = vld [vmem:[%s3020_s24 + $0xa8] sm:$0xff]   ;;  %v2892_v33 = vld [vmem:[%s3015_s21 + $0x78] sm:$0xff]  }
  0x23   : > { %2642 = vmatpush3.bf16.msra.mxu0 %v3052_v6  ;;  %2571 = vmatprep.subr.bf16.mxu1 %v2868_v7  ;;  %v2894_v34 = vld [vmem:[%s3015_s21 + $0x118] sm:$0xff]   ;;  %v2899_v35 = vld [vmem:[%s3020_s24 + $0x40] sm:$0xff]   ;;  %v2901_v37 = vld [vmem:[%s3020_s24 + $0xb0] sm:$0xff]  }
  0x24   : > { %2643 = vmatprep.subr.bf16.mxu0 %v3056_v8  ;;  %v2896_v36 = vld [vmem:[%s3015_s21] sm:$0xff]   ;;  %v2898_v39 = vld [vmem:[%s3015_s21 + $0x8] sm:$0xff]   ;;  %v2907_v40 = vld [vmem:[%s3020_s24 + $0xb8] sm:$0xff]  }
  0x25   : > { %v2897_v38 = vld [vmem:[%s3015_s21 + $0x120] sm:$0xff]   ;;  %v2900_v41 = vld [vmem:[%s3015_s21 + $0x128] sm:$0xff]   ;;  %v2902_v42 = vld [vmem:[%s3015_s21 + $0x10] sm:$0xff]  }
  0x26   : > { %2572 = vmatpush3.bf16.msra.mxu1 %v2868_v7  ;;  %v2903_v43 = vld [vmem:[%s3015_s21 + $0x130] sm:$0xff]   ;;  %v2905_v44 = vld [vmem:[%s3020_s24 + $0x48] sm:$0xff]   ;;  %v2913_v45 = vld [vmem:[%s3020_s24 + $0xc0] sm:$0xff]  }
  0x27   : > { %2644 = vmatpush3.bf16.msra.mxu0 %v3056_v8  ;;  %2589 = vmatprep.subr.bf16.mxu1 %v2873_v12  ;;  %v2911_v46 = vld [vmem:[%s3020_s24 + $0x50] sm:$0xff]   ;;  %v2904_v47 = vld [vmem:[%s3015_s21 + $0x18] sm:$0xff]   ;;  %v2908_v49 = vld [vmem:[%s3015_s21 + $0x20] sm:$0xff]  }
  0x28   : > { %2661 = vmatprep.subr.bf16.mxu0 %v2875_v13  ;;  %v2906_v48 = vld [vmem:[%s3015_s21 + $0x138] sm:$0xff]   ;;  %v2909_v50 = vld [vmem:[%s3015_s21 + $0x140] sm:$0xff]   ;;  %v2910_v52 = vld [vmem:[%s3015_s21 + $0x28] sm:$0xff]  }
  0x29   : > { %2574 = vmatmul.mubr.msk.bf16.vlgmr.msra.gmra.mrb[0].mxu1 %vm406_vm1, %v2872_v11  ;;  %v2917_v51 = vld [vmem:[%s3020_s24 + $0x58] sm:$0xff]   ;;  %v2912_v53 = vld [vmem:[%s3015_s21 + $0x148] sm:$0xff]   ;;  %v2914_v54 = vld [vmem:[%s3015_s21 + $0x30] sm:$0xff]  }
  0x2a   : > { %2646 = vmatmul.mubr.msk.bf16.vlgmr.msra.gmra.mrb[0].mxu0 %vm406_vm1, %v2874_v14  ;;  %2590 = vmatpush3.bf16.msra.mxu1 %v2873_v12  ;;  %v2915_v55 = vld [vmem:[%s3015_s21 + $0x150] sm:$0xff]   ;;  %v2919_v56 = vld [vmem:[%s3020_s24 + $0xc8] sm:$0xff]   ;;  %v2916_v57 = vld [vmem:[%s3015_s21 + $0x38] sm:$0xff]  }
  0x2b   : > { %2662 = vmatpush3.bf16.msra.mxu0 %v2875_v13  ;;  %2577 = vmatprep.mubr.msk.bf16.mxu1 %vm406_vm1, %v2877_v16  ;;  %v2924_v58 = vld [vmem:[%s3020_s24 + $0xd0] sm:$0xff]   ;;  %v2918_v59 = vld [vmem:[%s3015_s21 + $0x158] sm:$0xff]   ;;  %v2920_v60 = vld [vmem:[%s3015_s21 + $0x80] sm:$0xff]  }
  0x2c   : > { %2663 = vmatprep.subr.bf16.mxu0 %v2876_v15  ;;  %2649 = vmatprep.mubr.msk.bf16.mxu0 %vm406_vm1, %v2878_v17  ;;  %v2921_v61 = vld [vmem:[%s3015_s21 + $0x160] sm:$0xff]   ;;  %v2929_v62 = vld [vmem:[%s3020_s24 + $0xd8] sm:$0xff]   ;;  %v2922_v63 = vld [vmem:[%s3015_s21 + $0x88] sm:$0xff]  }
  0x2d   : > { %2591 = vmatprep.subr.bf16.mxu1 %v2880_v18  ;;  %v2923_v0 = vld [vmem:[%s3015_s21 + $0x168] sm:$0xff]   ;;  %v2925_v1 = vld [vmem:[%s3015_s21 + $0x90] sm:$0xff]   ;;  %v2927_v5 = vld [vmem:[%s3015_s21 + $0x98] sm:$0xff]  }
  0x2e   : > { %2592 = vmatpush3.bf16.msra.mxu1 %v2880_v18  ;;  %v2926_v3 = vld [vmem:[%s3015_s21 + $0x170] sm:$0xff]   ;;  %v2928_v7 = vld [vmem:[%s3015_s21 + $0x178] sm:$0xff]   ;;  %v2930_v9 = vld [vmem:[%s3015_s21 + $0xa0] sm:$0xff]  }
  0x2f   : > { %2664 = vmatpush3.bf16.msra.mxu0 %v2876_v15  ;;  %2593 = vmatprep.subr.bf16.mxu1 %v2887_v25  ;;  %v2931_v10 = vld [vmem:[%s3015_s21 + $0x180] sm:$0xff]   ;;  %v2934_v11 = vld [vmem:[%s3015_s21 + $0xb0] sm:$0xff]   ;;  %v2937_v13 = vld [vmem:[%s3015_s21 + $0x198] sm:$0xff]  }
  0x30   : > { %2665 = vmatprep.subr.bf16.mxu0 %v2882_v20  ;;  %v2935_v12 = vld [vmem:[%s3015_s21 + $0x190] sm:$0xff]   ;;  %v2938_v14 = vld [vmem:[%s3015_s21 + $0xe0] sm:$0xff]   ;;  %v2941_v16 = vld [vmem:[%s3015_s21 + $0x1a8] sm:$0xff]  }
  0x31   : > { %2578 = vmatmul.mubr.msk.bf16.gmra.mrb[4].mxu1 %vm406_vm1, %v2879_v19  ;;  %v2939_v15 = vld [vmem:[%s3015_s21 + $0x1a0] sm:$0xff]   ;;  %v2942_v17 = vld [vmem:[%s3015_s21 + $0xf0] sm:$0xff]   ;;  %v2944_v19 = vld [vmem:[%s3015_s21 + $0xf8] sm:$0xff]  }
  0x32   : > { %2650 = vmatmul.mubr.msk.bf16.gmra.mrb[4].mxu0 %vm406_vm1, %v2881_v21  ;;  %2581 = vmatprep.mubr.msk.bf16.mxu1 %vm406_vm1, %v2884_v23  ;;  %v2943_v18 = vld [vmem:[%s3015_s21 + $0x1b0] sm:$0xff]  }
  0x33   : > { %2666 = vmatpush3.bf16.msra.mxu0 %v2882_v20  ;;  %2669 = vmatprep.mubr.msk.bf16.mxu0 %vm406_vm1, %v2885_v24  ;;  %v2945_v20 = vld [vmem:[%s3015_s21 + $0x1b8] sm:$0xff]  }
  0x34   : > { %2667 = vmatprep.subr.bf16.mxu0 %v2883_v22  ;;  %2594 = vmatpush3.bf16.msra.mxu1 %v2887_v25 }
  0x35   : > { %2595 = vmatprep.subr.bf16.mxu1 %v2893_v30 }
  0x37   : > { %2668 = vmatpush3.bf16.msra.mxu0 %v2883_v22 }
  0x38   : > { %2685 = vmatprep.subr.bf16.mxu0 %v2889_v28  ;;  %2596 = vmatpush3.bf16.msra.mxu1 %v2893_v30  ;;  %v1850_v30 = vld [vmem:[#allocation2 + $0x10] sm:$0xff] }
  0x39   : > { %2582 = vmatmul.mubr.msk.bf16.gmra.mrb[8].mxu1 %vm406_vm1, %v2886_v26  ;;  %2613 = vmatprep.subr.bf16.mxu1 %v2899_v35 }
  0x3a   : > { %2670 = vmatmul.mubr.msk.bf16.vlgmr.msra.gmra.mrb[0].mxu0 %vm406_vm1, %v2888_v27  ;;  %2585 = vmatprep.mubr.msk.bf16.mxu1 %vm406_vm1, %v2890_v29 }
  0x3b   : > { %2686 = vmatpush3.bf16.msra.mxu0 %v2889_v28  ;;  %2673 = vmatprep.mubr.msk.bf16.mxu0 %vm406_vm1, %v2891_v31 }
  0x3c   : > { %2687 = vmatprep.subr.bf16.mxu0 %v2895_v32 }
  0x3f   : > { %2688 = vmatpush3.bf16.msra.mxu0 %v2895_v32 }
  0x40   : > { %2689 = vmatprep.subr.bf16.mxu0 %v2901_v37 }
  0x41   : > { %2586 = vmatmul.mubr.msk.bf16.gmra.mrb[12].mxu1 %vm406_vm1, %v2892_v33  ;;  %v1848_v33 = vld [vmem:[#allocation2] sm:$0xff] }
  0x42   : > { %2674 = vmatmul.mubr.msk.bf16.gmra.mrb[4].mxu0 %vm406_vm1, %v2894_v34  ;;  %2597 = vmatprep.mubr.msk.bf16.mxu1 %vm406_vm1, %v2896_v36  ;;  %v1851_v36 = vld [vmem:[#allocation2 + $0x18] sm:$0xff] }
  0x43   : > { %2677 = vmatprep.mubr.msk.bf16.mxu0 %vm406_vm1, %v2897_v38  ;;  %2690 = vmatpush3.bf16.msra.mxu0 %v2901_v37 }
  0x44   : > { %2691 = vmatprep.subr.bf16.mxu0 %v2907_v40 }
  0x47   : > { %2692 = vmatpush3.bf16.msra.mxu0 %v2907_v40  ;;  %v1849_v40 = vld [vmem:[#allocation2 + $0x8] sm:$0xff] }
  0x48   : > { %2709 = vmatprep.subr.bf16.mxu0 %v2913_v45 }
  0x49   : > { %2598 = vmatmul.mubr.msk.bf16.vlgmr.msra.gmra.mrb[0].mxu1 %vm406_vm1, %v2898_v39 }
  0x4a   : > { %2678 = vmatmul.mubr.msk.bf16.gmra.mrb[8].mxu0 %vm406_vm1, %v2900_v41  ;;  %2614 = vmatpush3.bf16.msra.mxu1 %v2899_v35 }
  0x4b   : > { %2601 = vmatprep.mubr.msk.bf16.mxu1 %vm406_vm1, %v2902_v42  ;;  %2681 = vmatprep.mubr.msk.bf16.mxu0 %vm406_vm1, %v2903_v43 }
  0x4c   : > { %2615 = vmatprep.subr.bf16.mxu1 %v2905_v44 }
  0x4e   : > { %2616 = vmatpush3.bf16.msra.mxu1 %v2905_v44 }
  0x4f   : > { %2617 = vmatprep.subr.bf16.mxu1 %v2911_v46 }
  0x51   : > { %2602 = vmatmul.mubr.msk.bf16.gmra.mrb[4].mxu1 %vm406_vm1, %v2904_v47 }
  0x52   : > { %2682 = vmatmul.mubr.msk.bf16.gmra.mrb[12].mxu0 %vm406_vm1, %v2906_v48  ;;  %2605 = vmatprep.mubr.msk.bf16.mxu1 %vm406_vm1, %v2908_v49  ;;  %v1852_v49 = vld [vmem:[#allocation2 + $0x20] sm:$0xff] }
  0x53   : > { %2693 = vmatprep.mubr.msk.bf16.mxu0 %vm406_vm1, %v2909_v50  ;;  %2618 = vmatpush3.bf16.msra.mxu1 %v2911_v46  ;;  %v1854_v46 = vld [vmem:[#allocation2 + $0x30] sm:$0xff] }
  0x54   : > { %2619 = vmatprep.subr.bf16.mxu1 %v2917_v51 }
  0x57   : > { %2620 = vmatpush3.bf16.msra.mxu1 %v2917_v51 }
  0x58   : > { %2733 = vmatprep.subr.bf16.mxu1 %v3041_v2 }
  0x59   : > { %2606 = vmatmul.mubr.msk.bf16.gmra.mrb[8].mxu1 %vm406_vm1, %v2910_v52  ;;  %v1855_v52 = vld [vmem:[#allocation2 + $0x38] sm:$0xff] }
  0x5a   : > { %2694 = vmatmul.mubr.msk.bf16.vlgmr.msra.gmra.mrb[0].mxu0 %vm406_vm1, %v2912_v53  ;;  %2609 = vmatprep.mubr.msk.bf16.mxu1 %vm406_vm1, %v2914_v54 }
  0x5b   : > { %2710 = vmatpush3.bf16.msra.mxu0 %v2913_v45  ;;  %2697 = vmatprep.mubr.msk.bf16.mxu0 %vm406_vm1, %v2915_v55 }
  0x5c   : > { %2711 = vmatprep.subr.bf16.mxu0 %v2919_v56 }
  0x5f   : > { %2712 = vmatpush3.bf16.msra.mxu0 %v2919_v56  ;;  %v1853_v56 = vld [vmem:[#allocation2 + $0x28] sm:$0xff] }
  0x60   : > { %2713 = vmatprep.subr.bf16.mxu0 %v2924_v58 }
  0x61   : > { %2610 = vmatmul.mubr.msk.bf16.gmra.mrb[12].mxu1 %vm406_vm1, %v2916_v57 }
  0x62   : > { %2698 = vmatmul.mubr.msk.bf16.gmra.mrb[4].mxu0 %vm406_vm1, %v2918_v59  ;;  %2621 = vmatprep.mubr.msk.bf16.mxu1 %vm406_vm1, %v2920_v60 }
  0x63   : > { %2701 = vmatprep.mubr.msk.bf16.mxu0 %vm406_vm1, %v2921_v61  ;;  %2714 = vmatpush3.bf16.msra.mxu0 %v2924_v58 }
  0x64   : > { %2715 = vmatprep.subr.bf16.mxu0 %v2929_v62 }
  0x67   : > { %2716 = vmatpush3.bf16.msra.mxu0 %v2929_v62 }
  0x69   : > { %2622 = vmatmul.mubr.msk.bf16.vlgmr.msra.gmra.mrb[0].mxu1 %vm406_vm1, %v2922_v63  ;;  %v1858_v63 = vld [vmem:[#allocation2 + $0x50] sm:$0xff] }
  0x6a   : > { %2702 = vmatmul.mubr.msk.bf16.gmra.mrb[8].mxu0 %vm406_vm1, %v2923_v0  ;;  %2737 = vmatpush3.bf16.msra.mxu1 %v3041_v2  ;;  %v2932_v2 = vld [vmem:[%s3015_s21 + $0xa8] sm:$0xff]  }
  0x6b   : > { %2625 = vmatprep.mubr.msk.bf16.mxu1 %vm406_vm1, %v2925_v1  ;;  %2705 = vmatprep.mubr.msk.bf16.mxu0 %vm406_vm1, %v2926_v3 }
  0x6c   : > { %2734 = vmatprep.subr.bf16.mxu1 %v3046_v4 }
  0x6e   : > { %2738 = vmatpush3.bf16.msra.mxu1 %v3046_v4  ;;  %v2933_v4 = vld [vmem:[%s3015_s21 + $0x188] sm:$0xff]  }
  0x6f   : > { %2735 = vmatprep.subr.bf16.mxu1 %v3052_v6 }
  0x71   : > { %2626 = vmatmul.mubr.msk.bf16.gmra.mrb[4].mxu1 %vm406_vm1, %v2927_v5  ;;  %v1856_v5 = vld [vmem:[#allocation2 + $0x40] sm:$0xff] }
  0x72   : > { %2706 = vmatmul.mubr.msk.bf16.gmra.mrb[12].mxu0 %vm406_vm1, %v2928_v7  ;;  %2629 = vmatprep.mubr.msk.bf16.mxu1 %vm406_vm1, %v2930_v9 }
  0x73   : > { %2717 = vmatprep.mubr.msk.bf16.mxu0 %vm406_vm1, %v2931_v10  ;;  %2739 = vmatpush3.bf16.msra.mxu1 %v3052_v6  ;;  %v2936_v6 = vld [vmem:[%s3015_s21 + $0xb8] sm:$0xff]  }
  0x74   : > { %2736 = vmatprep.subr.bf16.mxu1 %v3056_v8 }
  0x77   : > { %2740 = vmatpush3.bf16.msra.mxu1 %v3056_v8  ;;  %v2940_v8 = vld [vmem:[%s3015_s21 + $0xe8] sm:$0xff]  }
  0x79   : > { %2630 = vmatmul.mubr.msk.bf16.gmra.mrb[8].mxu1 %vm406_vm1, %v2932_v2  ;;  %v1859_v2 = vld [vmem:[#allocation2 + $0x58] sm:$0xff] }
  0x7a   : > { %2718 = vmatmul.mubr.msk.bf16.vlgmr.msra.gmra.mrb[0].mxu0 %vm406_vm1, %v2933_v4  ;;  %2633 = vmatprep.mubr.msk.bf16.mxu1 %vm406_vm1, %v2934_v11 }
  0x7b   : > { %2721 = vmatprep.mubr.msk.bf16.mxu0 %vm406_vm1, %v2935_v12 }
  0x81   : > { %2634 = vmatmul.mubr.msk.bf16.gmra.mrb[12].mxu1 %vm406_vm1, %v2936_v6 }
  0x82   : > { %2722 = vmatmul.mubr.msk.bf16.gmra.mrb[4].mxu0 %vm406_vm1, %v2937_v13  ;;  %2653 = vmatprep.mubr.msk.bf16.mxu1 %vm406_vm1, %v2938_v14  ;;  %v1857_v13 = vld [vmem:[#allocation2 + $0x48] sm:$0xff] }
  0x83   : > { %2725 = vmatprep.mubr.msk.bf16.mxu0 %vm406_vm1, %v2939_v15 }
  0x89   : > { %2654 = vmatmul.mubr.msk.bf16.vlgmr.msra.gmra.mrb[8].mxu1 %vm406_vm1, %v2940_v8 }
  0x8a   : > { %2726 = vmatmul.mubr.msk.bf16.gmra.mrb[8].mxu0 %vm406_vm1, %v2941_v16  ;;  %2657 = vmatprep.mubr.msk.bf16.mxu1 %vm406_vm1, %v2942_v17 }
  0x8b   : > { %2729 = vmatprep.mubr.msk.bf16.mxu0 %vm406_vm1, %v2943_v18 }
  0x91   : > { %2658 = vmatmul.mubr.msk.bf16.gmra.mrb[12].mxu1 %vm406_vm1, %v2944_v19  ;;  %v1862_v19 = vld [vmem:[#allocation2 + $0x70] sm:$0xff] }
  0x92   : > { %2730 = vmatmul.mubr.msk.bf16.gmra.mrb[12].mxu0 %vm406_vm1, %v2945_v20 }
 0x13c   : > { %v2623_v21 = vpop.f32.mrb[0].mxu1 }
 0x13d   : > { %v861_v22 = vpop.f32.mrb[1].mxu1 }
 0x13e   : > { %v2624_v23 = vpop.f32.mrb[2].mxu1 }
 0x13f   : > { %v864_v24 = vpop.f32.mrb[3].mxu1 }
 0x144   : > { %v2627_v25 = vpop.f32.mrb[4].mxu1 }
 0x145   : > { %v877_v26 = vpop.f32.mrb[5].mxu1 }
 0x146   : > { %v2628_v27 = vpop.f32.mrb[6].mxu1 }
 0x147   : > { %v880_v28 = vpop.f32.mrb[7].mxu1 }
 0x14d   : > { %v2719_v29 = vpop.f32.mrb[0].mxu0 }
 0x14e   : > { %v2741_v31 = vadd.f32 %v2719_v29, %v2623_v21  ;;  %v1769_v32 = vpop.f32.mrb[1].mxu0 }
 0x14f   : > { %v2742_v34 = vadd.f32 %v1769_v32, %v861_v22  ;;  %v2720_v35 = vpop.f32.mrb[2].mxu0  ;;  %v1861_v32 = vld [vmem:[#allocation2 + $0x68] sm:$0xff] }
 0x150   : > { %v1866_v37 = vadd.f32 %v2741_v31, %v1850_v30  ;;  %v2743_v38 = vadd.f32 %v2720_v35, %v2624_v23  ;;  %v1772_v39 = vpop.f32.mrb[3].mxu0  ;;  %v1860_v23 = vld [vmem:[#allocation2 + $0x60] sm:$0xff] }
 0x151   : > { %v1864_v41 = vadd.f32 %v2742_v34, %v1848_v33  ;;  %v2744_v42 = vadd.f32 %v1772_v39, %v864_v24 }
 0x152   : > { %1882 = vst.msk [vmem:[#allocation2 + $0x10] sm:$0xff] %vm406_vm1, %v1866_v37  ;;  %v1867_v43 = vadd.f32 %v2743_v38, %v1851_v36  ;;  %v2442_v38 = vld [vmem:[%s3298_s2] ss:$0 sm:$0xff] (!%p2441_p6) }
 0x153   : > { %1880 = vst.msk [vmem:[#allocation2] sm:$0xff] %vm406_vm1, %v1864_v41  ;;  %v1865_v44 = vadd.f32 %v2744_v42, %v1849_v40 }
 0x154   : > { %1883 = vst.msk [vmem:[#allocation2 + $0x18] sm:$0xff] %vm406_vm1, %v1867_v43 }
 0x155   : > { %1881 = vst.msk [vmem:[#allocation2 + $0x8] sm:$0xff] %vm406_vm1, %v1865_v44  ;;  %v2723_v45 = vpop.f32.mrb[4].mxu0 }
 0x156   : > { %v2745_v47 = vadd.f32 %v2723_v45, %v2627_v25  ;;  %v1785_v48 = vpop.f32.mrb[5].mxu0 }
 0x157   : > { %v2746_v50 = vadd.f32 %v1785_v48, %v877_v26  ;;  %v2724_v51 = vpop.f32.mrb[6].mxu0 }
 0x158   : > { %v1870_v53 = vadd.f32 %v2745_v47, %v1854_v46  ;;  %v2747_v54 = vadd.f32 %v2724_v51, %v2628_v27  ;;  %v1788_v55 = vpop.f32.mrb[7].mxu0  ;;  %v1863_v27 = vld [vmem:[#allocation2 + $0x78] sm:$0xff] }
 0x159   : > { %v1868_v57 = vadd.f32 %v2746_v50, %v1852_v49  ;;  %v2748_v58 = vadd.f32 %v1788_v55, %v880_v28  ;;  %v1902_v42 = vld [vmem:[#allocation2 + $0x10] sm:$0xff] (!%p2441_p6) }
 0x15a   : > { %1886 = vst.msk [vmem:[#allocation2 + $0x30] sm:$0xff] %vm406_vm1, %v1870_v53  ;;  %v1871_v59 = vadd.f32 %v2747_v54, %v1855_v52  ;;  %v1900_v37 = vld [vmem:[#allocation2] sm:$0xff] (!%p2441_p6)  ;;  %v1925_v45 = vadd.f32 (!%p2441_p6), %v2442_v38, %v1902_v42 }
 0x15b   : > { %1884 = vst.msk [vmem:[#allocation2 + $0x20] sm:$0xff] %vm406_vm1, %v1868_v57  ;;  %v1869_v60 = vadd.f32 %v2748_v58, %v1853_v56  ;;  %v1923_v40 = vadd.f32 (!%p2441_p6), %v2442_v38, %v1900_v37  ;;  %v1903_v43 = vld [vmem:[#allocation2 + $0x18] sm:$0xff] (!%p2441_p6) }
 0x15c   : > { %1887 = vst.msk [vmem:[#allocation2 + $0x38] sm:$0xff] %vm406_vm1, %v1871_v59  ;;  %v2655_v61 = vpop.f32.mrb[8].mxu1  ;;  %v1901_v39 = vld [vmem:[#allocation2 + $0x8] sm:$0xff] (!%p2441_p6)  ;;  %v1926_v46 = vadd.f32 (!%p2441_p6), %v2442_v38, %v1903_v43  ;;  %v1941_v55 = vmax.f32 (!%p2441_p6), %v1925_v45, 0.0 }
 0x15d   : > { %1885 = vst.msk [vmem:[#allocation2 + $0x28] sm:$0xff] %vm406_vm1, %v1869_v60  ;;  %v2727_v62 = vpop.f32.mrb[8].mxu0  ;;  %v1120_v0 = vpop.f32.mrb[9].mxu1  ;;  %v1924_v41 = vadd.f32 (!%p2441_p6), %v2442_v38, %v1901_v39  ;;  %v1939_v51 = vmax.f32 (!%p2441_p6), %v1923_v40, 0.0 }
 0x15e   : > { %v2749_v1 = vadd.f32 %v2727_v62, %v2655_v61  ;;  %v1801_v3 = vpop.f32.mrb[9].mxu0  ;;  %v2656_v7 = vpop.f32.mrb[10].mxu1  ;;  %v1942_v56 = vmax.f32 (!%p2441_p6), %v1926_v46, 0.0 }
 0x15f   : > { %v2750_v9 = vadd.f32 %v1801_v3, %v1120_v0  ;;  %v2728_v10 = vpop.f32.mrb[10].mxu0  ;;  %v1123_v4 = vpop.f32.mrb[11].mxu1  ;;  %v1940_v52 = vmax.f32 (!%p2441_p6), %v1924_v41, 0.0  ;;  %v2465_v61 = vpack.c.bf16 (!%p2441_p6), %v1939_v51, %v1939_v51 }
 0x160   : > { %v1874_v11 = vadd.f32 %v2749_v1, %v1858_v63  ;;  %v2751_v12 = vadd.f32 %v2728_v10, %v2656_v7  ;;  %v1804_v6 = vpop.f32.mrb[11].mxu0  ;;  %v2467_v7 = vpack.c.bf16 (!%p2441_p6), %v1941_v55, %v1941_v55 }
 0x161   : > { %v1872_v14 = vadd.f32 %v2750_v9, %v1856_v5  ;;  %v2752_v15 = vadd.f32 %v1804_v6, %v1123_v4  ;;  %v1906_v49 = vld [vmem:[#allocation2 + $0x30] sm:$0xff] (!%p2441_p6)  ;;  %v2466_v62 = vpack.c.bf16 (!%p2441_p6), %v1940_v52, %v1940_v52  ;;  %v2468_v9 = vpack.c.bf16 (!%p2441_p6), %v1942_v56, %v1942_v56  ;;  %2020 = vst.msk [vmem:[%s3299_s3] sm:$0xf] (!%p2441_p6), %vm2019_vm2, %v2465_v61 }
 0x162   : > { %1890 = vst.msk [vmem:[#allocation2 + $0x50] sm:$0xff] %vm406_vm1, %v1874_v11  ;;  %v1875_v8 = vadd.f32 %v2751_v12, %v1859_v2  ;;  %v1904_v44 = vld [vmem:[#allocation2 + $0x20] sm:$0xff] (!%p2441_p6)  ;;  %v1929_v54 = vadd.f32 (!%p2441_p6), %v2442_v38, %v1906_v49 }
 0x163   : > { %1888 = vst.msk [vmem:[#allocation2 + $0x40] sm:$0xff] %vm406_vm1, %v1872_v14  ;;  %v1873_v16 = vadd.f32 %v2752_v15, %v1857_v13  ;;  %v1927_v47 = vadd.f32 (!%p2441_p6), %v2442_v38, %v1904_v44  ;;  %v1907_v50 = vld [vmem:[#allocation2 + $0x38] sm:$0xff] (!%p2441_p6) }
 0x164   : > { %1891 = vst.msk [vmem:[#allocation2 + $0x58] sm:$0xff] %vm406_vm1, %v1875_v8  ;;  %v2659_v17 = vpop.f32.mrb[12].mxu1  ;;  %v1905_v48 = vld [vmem:[#allocation2 + $0x28] sm:$0xff] (!%p2441_p6)  ;;  %v1930_v58 = vadd.f32 (!%p2441_p6), %v2442_v38, %v1907_v50  ;;  %v1945_v0 = vmax.f32 (!%p2441_p6), %v1929_v54, 0.0 }
 0x165   : > { %1889 = vst.msk [vmem:[#allocation2 + $0x48] sm:$0xff] %vm406_vm1, %v1873_v16  ;;  %v2731_v18 = vpop.f32.mrb[12].mxu0  ;;  %v1136_v20 = vpop.f32.mrb[13].mxu1  ;;  %v1928_v53 = vadd.f32 (!%p2441_p6), %v2442_v38, %v1905_v48  ;;  %v1943_v57 = vmax.f32 (!%p2441_p6), %v1927_v47, 0.0 }
 0x166   : > { %v2753_v21 = vadd.f32 %v2731_v18, %v2659_v17  ;;  %v1817_v22 = vpop.f32.mrb[13].mxu0  ;;  %v2660_v24 = vpop.f32.mrb[14].mxu1  ;;  %v1946_v2 = vmax.f32 (!%p2441_p6), %v1930_v58, 0.0  ;;  %2021 = vst.msk [vmem:[%s3299_s3 + $0x4] sm:$0xf] (!%p2441_p6), %vm2019_vm2, %v2466_v62  ;;  %v2471_v6 = vpack.c.bf16 (!%p2441_p6), %v1945_v0, %v1945_v0 }
 0x167   : > { %v2754_v25 = vadd.f32 %v1817_v22, %v1136_v20  ;;  %v2732_v26 = vpop.f32.mrb[14].mxu0  ;;  %v1139_v28 = vpop.f32.mrb[15].mxu1  ;;  %1899 = sbr.rel (%p2441_p6) target bundleno = 380 (0x17c), region = 40  ;;  %v1944_v63 = vmax.f32 (!%p2441_p6), %v1928_v53, 0.0  ;;  %v2469_v10 = vpack.c.bf16 (!%p2441_p6), %v1943_v57, %v1943_v57  ;;  %2022 = vst.msk [vmem:[%s3299_s3 + $0x8] sm:$0xf] (!%p2441_p6), %vm2019_vm2, %v2467_v7 }
 0x168   : > { %v1878_v29 = vadd.f32 %v2753_v21, %v1862_v19  ;;  %v2755_v30 = vadd.f32 %v2732_v26, %v2660_v24  ;;  %v1820_v31 = vpop.f32.mrb[15].mxu0  ;;  %2023 = vst.msk [vmem:[%s3299_s3 + $0xc] sm:$0xf] (!%p2441_p6), %vm2019_vm2, %v2468_v9  ;;  %v2472_v8 = vpack.c.bf16 (!%p2441_p6), %v1946_v2, %v1946_v2  ;;  %2026 = vst.msk [vmem:[%s3299_s3 + $0x18] sm:$0xf] (!%p2441_p6), %vm2019_vm2, %v2471_v6 }
 0x169   : > { %v1876_v33 = vadd.f32 %v2754_v25, %v1860_v23  ;;  %v2756_v34 = vadd.f32 %v1820_v31, %v1139_v28  ;;  %v1910_v1 = vld [vmem:[#allocation2 + $0x50] sm:$0xff] (!%p2441_p6)  ;;  %v2470_v12 = vpack.c.bf16 (!%p2441_p6), %v1944_v63, %v1944_v63  ;;  %2024 = vst.msk [vmem:[%s3299_s3 + $0x10] sm:$0xf] (!%p2441_p6), %vm2019_vm2, %v2469_v10 }
 0x16a   : > { %1894 = vst.msk [vmem:[#allocation2 + $0x70] sm:$0xff] %vm406_vm1, %v1878_v29  ;;  %v1879_v35 = vadd.f32 %v2755_v30, %v1863_v27  ;;  %v1908_v59 = vld [vmem:[#allocation2 + $0x40] sm:$0xff] (!%p2441_p6)  ;;  %v1933_v16 = vadd.f32 (!%p2441_p6), %v2442_v38, %v1910_v1 }
 0x16b   : > { %1892 = vst.msk [vmem:[#allocation2 + $0x60] sm:$0xff] %vm406_vm1, %v1876_v33  ;;  %v1877_v36 = vadd.f32 %v2756_v34, %v1861_v32  ;;  %v1911_v3 = vld [vmem:[#allocation2 + $0x58] sm:$0xff] (!%p2441_p6)  ;;  %v1931_v13 = vadd.f32 (!%p2441_p6), %v2442_v38, %v1908_v59 }
 0x16c   : > { %1895 = vst.msk [vmem:[#allocation2 + $0x78] sm:$0xff] %vm406_vm1, %v1879_v35  ;;  %v1909_v60 = vld [vmem:[#allocation2 + $0x48] sm:$0xff] (!%p2441_p6)  ;;  %v1934_v17 = vadd.f32 (!%p2441_p6), %v2442_v38, %v1911_v3  ;;  %v1949_v23 = vmax.f32 (!%p2441_p6), %v1933_v16, 0.0 }
 0x16d   : > { %1893 = vst.msk [vmem:[#allocation2 + $0x68] sm:$0xff] %vm406_vm1, %v1877_v36  ;;  %v1932_v14 = vadd.f32 (!%p2441_p6), %v2442_v38, %v1909_v60  ;;  %v1947_v19 = vmax.f32 (!%p2441_p6), %v1931_v13, 0.0 }
 0x16e   : > { %2025 = vst.msk [vmem:[%s3299_s3 + $0x14] sm:$0xf] %vm2019_vm2, %v2470_v12  ;;  %2027 = vst.msk [vmem:[%s3299_s3 + $0x1c] sm:$0xf] %vm2019_vm2, %v2472_v8  ;;  %v1950_v24 = vmax.f32 %v1934_v17, 0.0  ;;  %v2475_v31 = vpack.c.bf16 %v1949_v23, %v1949_v23 }
 0x16f   : > { %v1948_v20 = vmax.f32 %v1932_v14, 0.0  ;;  %v2473_v27 = vpack.c.bf16 %v1947_v19, %v1947_v19 }
 0x170   : > { %v2476_v32 = vpack.c.bf16 %v1950_v24, %v1950_v24  ;;  %2030 = vst.msk [vmem:[%s3299_s3 + $0x28] sm:$0xf] %vm2019_vm2, %v2475_v31 }
 0x171   : > { %v1914_v11 = vld [vmem:[#allocation2 + $0x70] sm:$0xff]  ;;  %v2474_v28 = vpack.c.bf16 %v1948_v20, %v1948_v20  ;;  %2028 = vst.msk [vmem:[%s3299_s3 + $0x20] sm:$0xf] %vm2019_vm2, %v2473_v27 }
 0x172   : > { %v1912_v5 = vld [vmem:[#allocation2 + $0x60] sm:$0xff]  ;;  %v1937_v22 = vadd.f32 %v2442_v38, %v1914_v11  ;;  %2031 = vst.msk [vmem:[%s3299_s3 + $0x2c] sm:$0xf] %vm2019_vm2, %v2476_v32 }
 0x173   : > { %v1915_v15 = vld [vmem:[#allocation2 + $0x78] sm:$0xff]  ;;  %v1935_v18 = vadd.f32 %v2442_v38, %v1912_v5  ;;  %2029 = vst.msk [vmem:[%s3299_s3 + $0x24] sm:$0xf] %vm2019_vm2, %v2474_v28 }
 0x174   : > { %v1913_v4 = vld [vmem:[#allocation2 + $0x68] sm:$0xff]  ;;  %v1938_v26 = vadd.f32 %v2442_v38, %v1915_v15  ;;  %v1953_v30 = vmax.f32 %v1937_v22, 0.0 }
 0x175   : > { %v1936_v21 = vadd.f32 %v2442_v38, %v1913_v4  ;;  %v1951_v25 = vmax.f32 %v1935_v18, 0.0 }
 0x176   : > { %v1954_v34 = vmax.f32 %v1938_v26, 0.0  ;;  %v2479_v36 = vpack.c.bf16 %v1953_v30, %v1953_v30 }
 0x177   : > { %v1952_v29 = vmax.f32 %v1936_v21, 0.0  ;;  %v2477_v33 = vpack.c.bf16 %v1951_v25, %v1951_v25 }
 0x178   : > { %v2480_v37 = vpack.c.bf16 %v1954_v34, %v1954_v34  ;;  %2034 = vst.msk [vmem:[%s3299_s3 + $0x38] sm:$0xf] %vm2019_vm2, %v2479_v36 }
 0x179   : > { %v2478_v35 = vpack.c.bf16 %v1952_v29, %v1952_v29  ;;  %2032 = vst.msk [vmem:[%s3299_s3 + $0x30] sm:$0xf] %vm2019_vm2, %v2477_v33 }
 0x17a   : > { %2035 = vst.msk [vmem:[%s3299_s3 + $0x3c] sm:$0xf] %vm2019_vm2, %v2480_v37 }
 0x17b   : > { %2033 = vst.msk [vmem:[%s3299_s3 + $0x34] sm:$0xf] %vm2019_vm2, %v2478_v35 }
 0x17c PF: > { %s13_s14 = sadd.s32 1, %s2968_s14   ;;  %s3300_s12 = smov %s2964_s13 }
 0x17d   : > { %p10_p7 = scmp.ge.s32.totalorder %s13_s14, 51   ;;  %s3301_s13 = smov %s3303_s15 }
 0x17f   :  { %12 = sbr.rel (!%p10_p7) target bundleno = 2 (0x2), region = 88 }

// kernel: resnet3d_forward.16
= control target key start
LH: loop header
LB: loop body
LE: loop exit
PB: predicated region body
PF: predicated region fallthrough
CT: control target
= control target key end

     0   :  { %vm116_vm0 = vcmask 523264   ;;  %vm231_vm1 = vcmask 519168   ;;  %s693_s0 = inlined_call_operand.vmem [shape: bf16[27,16,64], index: 0, kind: input, shape index: {}]   ;;  %s694_s1 = inlined_call_operand.vmem [shape: bf16[16,64], index: 1, kind: output, shape index: {}]  }
   0x1   :  { %v389_v0 = vld [vmem:[%s693_s0] sm:$0xff]   ;;  %v394_v1 = vld [vmem:[%s693_s0 + $0x8] sm:$0xff]   ;;  %v399_v2 = vld [vmem:[%s693_s0 + $0x10] sm:$0xff]  }
   0x2   :  { %v404_v3 = vld [vmem:[%s693_s0 + $0x18] sm:$0xff]   ;;  %v409_v4 = vld [vmem:[%s693_s0 + $0x20] sm:$0xff]   ;;  %v244_v5 = vunpack.c.l.bf16 %v389_v0  ;;  %v415_v6 = vld [vmem:[%s693_s0 + $0x28] sm:$0xff]   ;;  %v245_v8 = vunpack.c.h.bf16 %v389_v0  ;;  %v248_v9 = vunpack.c.l.bf16 %v394_v1  ;;  %v249_v10 = vunpack.c.h.bf16 %v394_v1 }
   0x3   :  { %v420_v7 = vld [vmem:[%s693_s0 + $0x30] sm:$0xff]   ;;  %v252_v11 = vunpack.c.l.bf16 %v399_v2  ;;  %v429_v12 = vld [vmem:[%s693_s0 + $0x38] sm:$0xff]   ;;  %v434_v13 = vld [vmem:[%s693_s0 + $0x40] sm:$0xff]   ;;  %v253_v14 = vunpack.c.h.bf16 %v399_v2  ;;  %v256_v15 = vunpack.c.l.bf16 %v404_v3  ;;  %v257_v16 = vunpack.c.h.bf16 %v404_v3 }
   0x4   :  { %v260_v17 = vunpack.c.l.bf16 %v409_v4  ;;  %v443_v18 = vld [vmem:[%s693_s0 + $0x48] sm:$0xff]   ;;  %v448_v19 = vld [vmem:[%s693_s0 + $0x50] sm:$0xff]   ;;  %v261_v20 = vunpack.c.h.bf16 %v409_v4  ;;  %v264_v21 = vunpack.c.l.bf16 %v415_v6  ;;  %v265_v22 = vunpack.c.h.bf16 %v415_v6  ;;  %v457_v24 = vld [vmem:[%s693_s0 + $0x58] sm:$0xff]  }
   0x5   :  { %v268_v23 = vunpack.c.l.bf16 %v420_v7  ;;  %v462_v25 = vld [vmem:[%s693_s0 + $0x60] sm:$0xff]   ;;  %v269_v26 = vunpack.c.h.bf16 %v420_v7  ;;  %v272_v27 = vunpack.c.l.bf16 %v429_v12  ;;  %v273_v28 = vunpack.c.h.bf16 %v429_v12  ;;  %v471_v30 = vld [vmem:[%s693_s0 + $0x68] sm:$0xff]   ;;  %v476_v31 = vld [vmem:[%s693_s0 + $0x70] sm:$0xff]  }
   0x6   :  { %v276_v29 = vunpack.c.l.bf16 %v434_v13  ;;  %v280_v33 = vunpack.c.l.bf16 %v443_v18  ;;  %v284_v35 = vunpack.c.l.bf16 %v448_v19  ;;  %v485_v36 = vld [vmem:[%s693_s0 + $0x78] sm:$0xff]   ;;  %v490_v37 = vld [vmem:[%s693_s0 + $0x80] sm:$0xff]   ;;  %v288_v39 = vunpack.c.l.bf16 %v457_v24  ;;  %v499_v42 = vld [vmem:[%s693_s0 + $0x88] sm:$0xff]  }
   0x7   :  { %v292_v41 = vunpack.c.l.bf16 %v462_v25  ;;  %v504_v43 = vld [vmem:[%s693_s0 + $0x90] sm:$0xff]   ;;  %v296_v45 = vunpack.c.l.bf16 %v471_v30  ;;  %v300_v47 = vunpack.c.l.bf16 %v476_v31  ;;  %v513_v48 = vld [vmem:[%s693_s0 + $0x98] sm:$0xff]   ;;  %v304_v50 = vunpack.c.l.bf16 %v485_v36  ;;  %v526_v57 = vld [vmem:[%s693_s0 + $0xa0] sm:$0xff]  }
   0x8   :  { %v308_v52 = vunpack.c.l.bf16 %v490_v37  ;;  %v533_v60 = vld [vmem:[%s693_s0 + $0xa8] sm:$0xff]   ;;  %v117_v61 = vsel %vm116_vm0, %v244_v5, -inf  ;;  %v118_v62 = vsel %vm116_vm0, %v248_v9, -inf  ;;  %v540_v63 = vld [vmem:[%s693_s0 + $0xb0] sm:$0xff]   ;;  %v119_v55 = vsel %vm116_vm0, %v252_v11, -inf  ;;  %v551_v5 = vld [vmem:[%s693_s0 + $0xb8] sm:$0xff]  }
   0x9   :  { %v121_v58 = vsel %vm116_vm0, %v256_v15, -inf  ;;  %v123_v53 = vsel %vm116_vm0, %v260_v17, -inf  ;;  %v125_v51 = vsel %vm116_vm0, %v264_v21, -inf  ;;  %v120_v9 = vmax.f32 %v117_v61, %v119_v55  ;;  %v558_v15 = vld [vmem:[%s693_s0 + $0xc0] sm:$0xff]   ;;  %v563_v17 = vld [vmem:[%s693_s0 + $0xc8] sm:$0xff]   ;;  %v572_v61 = vld [vmem:[%s693_s0 + $0xd0] sm:$0xff]  }
   0xa   :  { %v122_v44 = vmax.f32 %v118_v62, %v121_v58  ;;  %v328_v11 = vunpack.c.l.bf16 %v533_v60  ;;  %v127_v21 = vsel %vm116_vm0, %v268_v23, -inf  ;;  %v129_v49 = vsel %vm116_vm0, %v272_v27, -inf }
   0xb   :  { %v332_v58 = vunpack.c.l.bf16 %v540_v63  ;;  %v124_v62 = vmax.f32 %v120_v9, %v123_v53  ;;  %v336_v38 = vunpack.c.l.bf16 %v551_v5  ;;  %v131_v59 = vsel %vm116_vm0, %v276_v29, -inf }
   0xc   :  { %v126_v40 = vmax.f32 %v122_v44, %v125_v51  ;;  %v133_v23 = vsel %vm116_vm0, %v280_v33, -inf  ;;  %v340_v27 = vunpack.c.l.bf16 %v558_v15  ;;  %v344_v55 = vunpack.c.l.bf16 %v563_v17 }
   0xd   :  { %v128_v56 = vmax.f32 %v124_v62, %v127_v21  ;;  %v348_v32 = vunpack.c.l.bf16 %v572_v61  ;;  %v135_v54 = vsel %vm116_vm0, %v284_v35, -inf  ;;  %v137_v44 = vsel %vm116_vm0, %v288_v39, -inf }
   0xe   :  { %v130_v34 = vmax.f32 %v126_v40, %v129_v49  ;;  %v139_v51 = vsel %vm116_vm0, %v292_v41, -inf  ;;  %v141_v29 = vsel %vm116_vm0, %v296_v45, -inf  ;;  %v143_v33 = vsel %vm116_vm0, %v300_v47, -inf }
   0xf   :  { %v132_v53 = vmax.f32 %v128_v56, %v131_v59  ;;  %v145_v46 = vsel %vm116_vm0, %v304_v50, -inf  ;;  %v170_v40 = vsel %vm116_vm0, %v245_v8, -inf  ;;  %v171_v35 = vsel %vm116_vm0, %v249_v10, -inf }
  0x10   :  { %v134_v9 = vmax.f32 %v130_v34, %v133_v23  ;;  %v172_v39 = vsel %vm116_vm0, %v253_v14, -inf  ;;  %v174_v45 = vsel %vm116_vm0, %v257_v16, -inf  ;;  %v176_v0 = vsel %vm116_vm0, %v261_v20, -inf }
  0x11   :  { %v136_v41 = vmax.f32 %v132_v53, %v135_v54  ;;  %v173_v49 = vmax.f32 %v170_v40, %v172_v39  ;;  %v175_v47 = vmax.f32 %v171_v35, %v174_v45  ;;  %v178_v1 = vsel %vm116_vm0, %v265_v22, -inf }
  0x12   :  { %v138_v34 = vmax.f32 %v134_v9, %v137_v44  ;;  %v180_v2 = vsel %vm116_vm0, %v269_v26, -inf  ;;  %v182_v3 = vsel %vm116_vm0, %v273_v28, -inf  ;;  %v147_v4 = vsel %vm116_vm0, %v308_v52, -inf }
  0x13   :  { %v140_v8 = vmax.f32 %v136_v41, %v139_v51  ;;  %v177_v14 = vmax.f32 %v173_v49, %v176_v0  ;;  %v695_v16 = vunpack.c.l.bf16 %v499_v42  ;;  %v179_v20 = vmax.f32 %v175_v47, %v178_v1 }
  0x14   :  { %v142_v10 = vmax.f32 %v138_v34, %v141_v29  ;;  %v696_v7 = vunpack.c.h.bf16 %v434_v13  ;;  %v697_v12 = vunpack.c.h.bf16 %v443_v18  ;;  %v698_v56 = vunpack.c.l.bf16 %v504_v43 }
  0x15   :  { %v149_v6 = vsel %vm116_vm0, %v695_v16, -inf  ;;  %v144_v26 = vmax.f32 %v140_v8, %v143_v33  ;;  %v181_v54 = vmax.f32 %v177_v14, %v180_v2  ;;  %v699_v59 = vunpack.c.l.bf16 %v513_v48 }
  0x16   :  { %v184_v22 = vsel %vm116_vm0, %v696_v7, -inf  ;;  %v146_v50 = vmax.f32 %v142_v10, %v145_v46  ;;  %v186_v28 = vsel %vm116_vm0, %v697_v12, -inf  ;;  %v151_v52 = vsel %vm116_vm0, %v698_v56, -inf }
  0x17   :  { %v153_v21 = vsel %vm116_vm0, %v699_v59, -inf  ;;  %v183_v62 = vmax.f32 %v179_v20, %v182_v3  ;;  %v700_v13 = vunpack.c.h.bf16 %v448_v19  ;;  %v148_v44 = vmax.f32 %v144_v26, %v147_v4 }
  0x18   :  { %v150_v46 = vmax.f32 %v146_v50, %v149_v6  ;;  %v185_v51 = vmax.f32 %v181_v54, %v184_v22  ;;  %v701_v18 = vunpack.c.h.bf16 %v457_v24  ;;  %v702_v9 = vunpack.c.l.bf16 %v526_v57 }
  0x19   :  { %v188_v23 = vsel %vm116_vm0, %v700_v13, -inf  ;;  %v157_v33 = vsel %vm116_vm0, %v328_v11, -inf  ;;  %v187_v40 = vmax.f32 %v183_v62, %v186_v28  ;;  %v703_v35 = vunpack.c.h.bf16 %v462_v25 }
  0x1a   :  { %v190_v53 = vsel %vm116_vm0, %v701_v18, -inf  ;;  %v155_v29 = vsel %vm116_vm0, %v702_v9, -inf  ;;  %v152_v39 = vmax.f32 %v148_v44, %v151_v52  ;;  %v154_v41 = vmax.f32 %v150_v46, %v153_v21 }
  0x1b   :  { %v192_v19 = vsel %vm116_vm0, %v703_v35, -inf  ;;  %v189_v34 = vmax.f32 %v185_v51, %v188_v23  ;;  %v704_v49 = vunpack.c.h.bf16 %v471_v30  ;;  %v159_v45 = vsel %vm116_vm0, %v332_v58, -inf }
  0x1c   :  { %v161_v47 = vsel %vm116_vm0, %v336_v38, -inf  ;;  %v191_v0 = vmax.f32 %v187_v40, %v190_v53  ;;  %v705_v1 = vunpack.c.h.bf16 %v476_v31  ;;  %v156_v2 = vmax.f32 %v152_v39, %v155_v29 }
  0x1d   :  { %v194_v24 = vsel %vm116_vm0, %v704_v49, -inf  ;;  %v158_v25 = vmax.f32 %v154_v41, %v157_v33  ;;  %v193_v8 = vmax.f32 %v189_v34, %v192_v19  ;;  %v706_v10 = vunpack.c.h.bf16 %v485_v36 }
  0x1e   :  { %v196_v11 = vsel %vm116_vm0, %v705_v1, -inf  ;;  %v163_v30 = vsel %vm116_vm0, %v340_v27, -inf  ;;  %v165_v3 = vsel %vm116_vm0, %v344_v55, -inf  ;;  %v195_v4 = vmax.f32 %v191_v0, %v194_v24 }
  0x1f   :  { %v198_v14 = vsel %vm116_vm0, %v706_v10, -inf  ;;  %v707_v58 = vunpack.c.h.bf16 %v490_v37  ;;  %v160_v16 = vmax.f32 %v156_v2, %v159_v45  ;;  %v162_v31 = vmax.f32 %v158_v25, %v161_v47 }
  0x20   :  { %v197_v6 = vmax.f32 %v193_v8, %v196_v11  ;;  %v708_v20 = vunpack.c.h.bf16 %v499_v42  ;;  %v337_v36 = vunpack.c.h.bf16 %v551_v5  ;;  %v167_v27 = vsel %vm116_vm0, %v348_v32, -inf }
  0x21   :  { %v200_v38 = vsel %vm116_vm0, %v707_v58, -inf  ;;  %v199_v22 = vmax.f32 %v195_v4, %v198_v14  ;;  %v709_v55 = vunpack.c.h.bf16 %v504_v43  ;;  %v164_v26 = vmax.f32 %v160_v16, %v163_v30 }
  0x22   :  { %v202_v7 = vsel %vm116_vm0, %v708_v20, -inf  ;;  %v166_v50 = vmax.f32 %v162_v31, %v165_v3  ;;  %v201_v54 = vmax.f32 %v197_v6, %v200_v38  ;;  %v710_v12 = vunpack.c.h.bf16 %v513_v48 }
  0x23   :  { %v204_v37 = vsel %vm116_vm0, %v709_v55, -inf  ;;  %v341_v28 = vunpack.c.h.bf16 %v558_v15  ;;  %v203_v56 = vmax.f32 %v199_v22, %v202_v7  ;;  %v711_v5 = vunpack.c.h.bf16 %v526_v57 }
  0x24   :  { %v206_v42 = vsel %vm116_vm0, %v710_v12, -inf  ;;  %v345_v32 = vunpack.c.h.bf16 %v563_v17  ;;  %v168_v59 = vmax.f32 %v164_v26, %v167_v27  ;;  %v205_v43 = vmax.f32 %v201_v54, %v204_v37 }
  0x25   :  { %v208_v52 = vsel %vm116_vm0, %v711_v5, -inf  ;;  %v712_v21 = vunpack.c.h.bf16 %v533_v60  ;;  %v349_v13 = vunpack.c.h.bf16 %v572_v61  ;;  %v207_v48 = vmax.f32 %v203_v56, %v206_v42 }
  0x26   :  { %v713_v23 = vunpack.c.h.bf16 %v540_v63  ;;  %v169_v44 = vmax.f32 %v168_v59, %v166_v50  ;;  %v209_v46 = vmax.f32 %v205_v43, %v208_v52  ;;  %v214_v57 = vsel %vm116_vm0, %v337_v36, -inf }
  0x27   :  { %v210_v62 = vsel %vm116_vm0, %v712_v21, -inf  ;;  %v216_v17 = vsel %vm116_vm0, %v341_v28, -inf  ;;  %v218_v60 = vsel %vm116_vm0, %v345_v32, -inf  ;;  %v220_v61 = vsel %vm116_vm0, %v349_v13, -inf }
  0x28   :  { %v212_v15 = vsel %vm116_vm0, %v713_v23, -inf  ;;  %v211_v51 = vmax.f32 %v207_v48, %v210_v62  ;;  %v240_v53 = vpack.c.bf16 %v169_v44, %v169_v44 }
  0x29   :  { %v213_v18 = vmax.f32 %v209_v46, %v212_v15 }
  0x2a   :  { %v215_v9 = vmax.f32 %v211_v51, %v214_v57  ;;  %232 = vst.msk [vmem:[%s694_s1] sm:$0xf] %vm231_vm1, %v240_v53 }
  0x2b   :  { %v217_v29 = vmax.f32 %v213_v18, %v216_v17 }
  0x2c   :  { %v219_v63 = vmax.f32 %v215_v9, %v218_v60 }
  0x2d   :  { %v221_v33 = vmax.f32 %v217_v29, %v220_v61 }
  0x2f   :  { %v222_v40 = vmax.f32 %v221_v33, %v219_v63 }
  0x31   :  { %v241_v35 = vpack.c.bf16 %v222_v40, %v222_v40 }
  0x33   :  { %233 = vst.msk [vmem:[%s694_s1 + $0x4] sm:$0xf] %vm231_vm1, %v241_v35 }

// kernel: resnet3d_forward.17
= control target key start
LH: loop header
LB: loop body
LE: loop exit
PB: predicated region body
PF: predicated region fallthrough
CT: control target
= control target key end

     0   :  { %8 = vsyncpa [#allocation4], 0  ;;  %s1148_s0 = inlined_call_operand.vmem [shape: bf16[27,16,64], index: 0, kind: input, shape index: {}]   ;;  %s1149_s1 = inlined_call_operand.hbm [shape: bf16[27,64,64], index: 1, kind: input, shape index: {}]   ;;  %s1150_s2 = inlined_call_operand.vmem [shape: f32[1,64], index: 2, kind: input, shape index: {}]   ;;  %s1151_s3 = inlined_call_operand.vmem [shape: bf16[16,64], index: 3, kind: output, shape index: {}]  }
   0x1   :  { %10 = vsyncpa [#allocation4 + $0x1], 0  ;;  %s993_s12 = smov 0   ;;  %s995_s13 = smov 0  }
   0x2   :  { %s997_s14 = smov 0   ;;  %s999_s15 = smov 0  }
   0x3   :  { %s1001_s16 = smov 0   ;;  %s1003_s17 = smov 0  }
   0x4 LB: > { %s695_s18 = sadd.s32 4294967295, %s965_s17   ;;  %s28_s19 = sadd.s32 1, %s961_s16  ;;  %s965_s17 = sphi %s1003_s17, %s16_s17   ;;  %s961_s16 = sphi %s1001_s16, %s1158_s16   ;;  %s957_s15 = sphi %s999_s15, %s1157_s15   ;;  %s953_s14 = sphi %s997_s14, %s1156_s14   ;;  %s949_s13 = sphi %s995_s13, %s1155_s13   ;;  %s945_s12 = sphi %s993_s12, %s1154_s12  }
   0x5   : > { %p29_p0 = scmp.ge.s32.totalorder %s28_s19, 9  ;;  %s72_s20 = sadd.s32 1, %s953_s14 }
   0x6   : > { %p79_p1 = scmp.ne.s32.totalorder %s953_s14, %s949_s13  ;;  %p80_p2 = scmp.eq.s32.totalorder %s965_s17, 0 }
   0x7   : > { %s1160_s19 = smov (%p29_p0, %s28_s19), 0  ;;  %p85_p4 = scmp.ne.s32.totalorder %s949_s13, %s945_s12 }
   0x8   : > { %p81_p3 = por %p80_p2, %p79_p1  ;;  %s67_s21 = ssub.s32 %s961_s16, %s1160_s19 }
   0x9   : > { %p86_p5 = scmp.eq.s32.totalorder %s695_s18, 0  ;;  %p70_p6 = scmp.eq.s32.totalorder %s67_s21, 0 }
   0xa   : > { %p816_p8 = scmp.lt.s32.totalorder %s965_s17, 9  ;;  %s184_s24 = sand.u32 1, %s953_s14  }
   0xb   : > { %p1032_p7 = por %p86_p5, %p85_p4  ;;  %s756_s25 = smul.u32 1536, %s961_s16 }
   0xc   : > { %s1038_s23 = scalar_select %p70_p6, %s953_s14, %s72_s20  }
   0xd   : > { %s808_s26 = smul.u32 96, %s184_s24  ;;  %s1045_s29 = scalar_lea.hbm %s1149_s1, %s756_s25 }
   0xe   : > { %p1047_p9 = pnand %p816_p8, %p81_p3  ;;  %s1053_s6 = scalar_lea.sflag [#allocation4], %s184_s24 }
   0xf   : > { %s188_s4 = scalar_lea.vmem [#allocation3], %s808_s26  ;;  %s885_s7 = scalar_lea.hbm %s1045_s29, 1536 }
  0x10   : > { %s197_s5 = sshll.u32 %s188_s4, 4  ;;  %p886_p10 = scmp.ne.s32.totalorder %s1045_s29, %s885_s7  ;;  %s1051_s5 = int_to_ptr.vmem [resolvable:$true] %s197_s5 }
  0x11   : > { %p887_p11 = pneg %p1047_p9  ;;  %s890_s10 = scalar_lea.hbm %s1149_s1, 13824 }
  0x12   : > { %p891_p0 = scmp.lt.u32.totalorder %s1045_s29, %s1149_s1  ;;  %p892_p1 = scmp.lt.u32.totalorder %s890_s10, %s885_s7 }
  0x13   : > { %p888_p12 = pnand %p887_p11, %p886_p10  ;;  %p894_p3 = scmp.lt.u32.totalorder %s885_s7, %s1045_s29 }
  0x14   : > { %p893_p2 = por %p892_p1, %p891_p0 }
  0x15   : > { %p889_p13 = pneg %p888_p12 }
  0x16   : > { %p895_p4 = por %p894_p3, %p893_p2 }
  0x18   : > { %p896_p5 = pnand %p895_p4, %p889_p13 }
  0x1a   : > { %899 = shalt.err (!%p896_p5)
}
  0x1b   : > { %s900_s18 = scalar_lea.vmem %s1051_s5, 1536  ;;  %s967_s20 = smov [#allocation3]  }
  0x1c   : > { %p901_p6 = scmp.ne.s32.totalorder %s1051_s5, %s900_s18  ;;  %s905_s21 = sshll.u32 %s967_s20, 4  ;;  %s906_s21 = int_to_ptr.vmem [resolvable:$false] %s905_s21 }
  0x1d   : > { %s907_s24 = scalar_lea.vmem %s906_s21, 3072  ;;  %p908_p12 = scmp.lt.s32.totalorder %s1051_s5, %s906_s21 }
  0x1e   : > { %p903_p8 = pnand %p901_p6, %p887_p11  ;;  %p909_p0 = scmp.lt.s32.totalorder %s907_s24, %s900_s18 }
  0x20   : > { %p904_p10 = pneg %p903_p8  ;;  %p910_p1 = por %p909_p0, %p908_p12 }
  0x22   : > { %p911_p2 = pnand %p910_p1, %p904_p10 }
  0x24   : > { %914 = shalt.err (!%p911_p2)
}
  0x25   : > { %s968_s25 = smov 64   ;;  %s969_s26 = smov 4  }
  0x26   : > { %815 = dma.hbm_to_vmem [thread:$0]  (!%p1047_p9), %s1045_s29, 1536, %s1051_s5, %s1053_s6, %s968_s25, %s968_s25, %s969_s26  }
  0x27   : > { %p701_p11 = scmp.ge.s32.totalorder %s965_s17, 1  ;;  %p205_p13 = scmp.lt.s32.totalorder %s965_s17, 10 }
  0x29   : > { %p206_p3 = pnand %p701_p11, %p205_p13 }
  0x2a   : > { %s211_s27 = sand.u32 (!%p206_p3), 1, %s949_s13  }
  0x2b   : > { %209 = sbr.rel (%p206_p3) target bundleno = 326 (0x146), region = 32  ;;  %s212_s4 = scalar_lea.sflag (!%p206_p3), [#allocation4], %s211_s27 }
  0x2c   : > { %s809_s28 = smul.u32 (!%p206_p3), 96, %s211_s27 }
  0x2e   : > { %s1084_s7 = scalar_lea.vmem (!%p206_p3), [#allocation3], %s809_s28 }
  0x32   : > { %940 = dma.done.wait (%p1032_p7), %s212_s4, 1536  }
  0x33   : > { %942 = vsyncadd (%p1032_p7), %s212_s4, 4294965760  ;;  %s254_s8 = smul.u32 3, %s957_s15  ;;  %p704_p9 = scmp.ne.s32.totalorder %s957_s15, 0 }
  0x34   : > { %vm284_vm0 = vcmask (!%p704_p9), 523264   ;;  %v970_v0 = vmov (!%p704_p9), 0.0  }
  0x35   : > { %p256_p4 = scmp.lt.s32.totalorder %s254_s8, 26  ;;  %283 = sbr.rel (%p704_p9) target bundleno = 60 (0x3c), region = 40  ;;  %285 = vst.msk [vmem:[#allocation2] sm:$0xff] (!%p704_p9), %vm284_vm0, %v970_v0  ;;  %286 = vst.msk [vmem:[#allocation2 + $0x8] sm:$0xff] (!%p704_p9), %vm284_vm0, %v970_v0 }
  0x37   : > { %s1162_s8 = smov (!%p256_p4, %s254_s8), 26 }
  0x38   : > { %s753_s29 = sshll.u32 %s1162_s8, 3 }
  0x39   : > { %s1094_s6 = scalar_lea.vmem %s1148_s0, %s753_s29 }
  0x3c PF: > { %v870_v1 = vld [vmem:[%s1084_s7 + $0x20] sm:$0xff]   ;;  %v971_v2 = vmov 0.0   ;;  %v872_v4 = vld [vmem:[%s1084_s7 + $0x28] sm:$0xff]   ;;  %vm972_vm1 = vmmov 0   ;;  %v874_v6 = vld [vmem:[%s1084_s7 + $0x30] sm:$0xff]   ;;  %vm338_vm2 = vcmask 523264  }
  0x3d   : > { %772 = vmatprep.subr.bf16.mxu0 %v971_v2  ;;  %784 = vmatprep.subr.bf16.mxu1 %v971_v2  ;;  %v871_v3 = vld [vmem:[%s1084_s7] sm:$0xff]   ;;  %v873_v5 = vld [vmem:[%s1084_s7 + $0x8] sm:$0xff]   ;;  %v875_v7 = vld [vmem:[%s1084_s7 + $0x10] sm:$0xff]   ;;  %p743_p7 = scmp.ne.s32.totalorder %s957_s15, 8 }
  0x3e   : > { %773 = vmatpush3.bf16.msra.mxu0 %v870_v1  ;;  %780 = vmatprep.mubr.msk.bf16.mxu0 %vm972_vm1, %v971_v2  ;;  %v876_v8 = vld [vmem:[%s1084_s7 + $0x38] sm:$0xff]   ;;  %v879_v11 = vld [vmem:[%s1094_s6] sm:$0xff]   ;;  %v880_v12 = vld [vmem:[%s1084_s7 + $0x40] sm:$0xff]   ;;  %vm574_vm3 = vcmask (!%p743_p7), 519168  }
  0x3f   : > { %785 = vmatpush3.bf16.msra.mxu1 %v871_v3  ;;  %774 = vmatprep.subr.bf16.mxu0 %v971_v2  ;;  %v877_v9 = vld [vmem:[%s1084_s7 + $0x18] sm:$0xff]   ;;  %v881_v13 = vld [vmem:[%s1084_s7 + $0x48] sm:$0xff]   ;;  %v882_v14 = vld [vmem:[%s1084_s7 + $0x50] sm:$0xff]  }
  0x40   : > { %786 = vmatprep.subr.bf16.mxu1 %v971_v2  ;;  %792 = vmatprep.mubr.msk.bf16.mxu1 %vm972_vm1, %v971_v2  ;;  %v878_v10 = vld [vmem:[%s1094_s6 + $0x8] sm:$0xff]   ;;  %v884_v16 = vld [vmem:[%s1094_s6 + $0x10] sm:$0xff]   ;;  %v543_v28 = vld [vmem:[#allocation2] sm:$0xff] }
  0x41   : > { %v883_v15 = vld [vmem:[%s1084_s7 + $0x58] sm:$0xff]   ;;  %v744_v38 = vld [vmem:[%s1150_s2] ss:$0 sm:$0xff] (!%p743_p7) }
  0x42   : > { %775 = vmatpush3.bf16.msra.mxu0 %v872_v4  ;;  %v544_v32 = vld [vmem:[#allocation2 + $0x8] sm:$0xff] }
  0x43   : > { %787 = vmatpush3.bf16.msra.mxu1 %v873_v5  ;;  %776 = vmatprep.subr.bf16.mxu0 %v971_v2 }
  0x44   : > { %788 = vmatprep.subr.bf16.mxu1 %v971_v2 }
  0x46   : > { %777 = vmatpush3.bf16.msra.mxu0 %v874_v6 }
  0x47   : > { %789 = vmatpush3.bf16.msra.mxu1 %v875_v7  ;;  %778 = vmatprep.subr.bf16.mxu0 %v971_v2 }
  0x48   : > { %790 = vmatprep.subr.bf16.mxu1 %v971_v2 }
  0x4a   : > { %779 = vmatpush3.bf16.msra.mxu0 %v876_v8 }
  0x4b   : > { %791 = vmatpush3.bf16.msra.mxu1 %v877_v9  ;;  %796 = vmatprep.subr.bf16.mxu0 %v971_v2 }
  0x4d   : > { %781 = vmatmul.mubr.msk.bf16.vlgmr.msra.gmra.mrb[0].mxu0 %vm338_vm2, %v878_v10 }
  0x4e   : > { %793 = vmatmul.mubr.msk.bf16.vlgmr.msra.gmra.mrb[0].mxu1 %vm338_vm2, %v879_v11  ;;  %797 = vmatpush3.bf16.msra.mxu0 %v880_v12 }
  0x4f   : > { %798 = vmatprep.subr.bf16.mxu0 %v971_v2  ;;  %804 = vmatprep.mubr.msk.bf16.mxu0 %vm972_vm1, %v971_v2 }
  0x52   : > { %799 = vmatpush3.bf16.msra.mxu0 %v881_v13 }
  0x53   : > { %800 = vmatprep.subr.bf16.mxu0 %v971_v2 }
  0x56   : > { %801 = vmatpush3.bf16.msra.mxu0 %v882_v14 }
  0x57   : > { %802 = vmatprep.subr.bf16.mxu0 %v971_v2 }
  0x5a   : > { %803 = vmatpush3.bf16.msra.mxu0 %v883_v15 }
  0x5d   : > { %805 = vmatmul.mubr.msk.bf16.vlgmr.msra.gmra.mrb[4].mxu0 %vm338_vm2, %v884_v16 }
 0x120   : > { %v376_v17 = vpop.f32.mrb[0].mxu0 }
 0x121   : > { %v449_v18 = vpop.f32.mrb[0].mxu1  ;;  %v782_v19 = vpop.f32.mrb[1].mxu0 }
 0x122   : > { %v450_v20 = vadd.f32 %v449_v18, %v376_v17  ;;  %v794_v21 = vpop.f32.mrb[1].mxu1  ;;  %v379_v22 = vpop.f32.mrb[2].mxu0 }
 0x123   : > { %v452_v23 = vpop.f32.mrb[2].mxu1  ;;  %v783_v24 = vpop.f32.mrb[3].mxu0 }
 0x124   : > { %v453_v25 = vadd.f32 %v452_v23, %v379_v22  ;;  %v795_v26 = vpop.f32.mrb[3].mxu1 }
 0x130   : > { %v534_v27 = vpop.f32.mrb[4].mxu0 }
 0x131   : > { %v541_v29 = vadd.f32 %v534_v27, %v450_v20  ;;  %v806_v30 = vpop.f32.mrb[5].mxu0  ;;  %552 = sbr.rel (%p743_p7) target bundleno = 326 (0x146), region = 44 }
 0x132   : > { %v537_v31 = vpop.f32.mrb[6].mxu0 }
 0x133   : > { %v545_v33 = vadd.f32 %v543_v28, %v541_v29  ;;  %v542_v34 = vadd.f32 %v537_v31, %v453_v25  ;;  %v807_v35 = vpop.f32.mrb[7].mxu0 }
 0x135   : > { %547 = vst.msk [vmem:[#allocation2] sm:$0xff] %vm338_vm2, %v545_v33  ;;  %v546_v36 = vadd.f32 %v544_v32, %v542_v34 }
 0x137   : > { %548 = vst.msk [vmem:[#allocation2 + $0x8] sm:$0xff] %vm338_vm2, %v546_v36 }
 0x13c   : > { %v553_v37 = vld [vmem:[#allocation2] sm:$0xff] }
 0x13d   : > { %v562_v40 = vadd.f32 %v744_v38, %v553_v37 }
 0x13e   : > { %v554_v39 = vld [vmem:[#allocation2 + $0x8] sm:$0xff] }
 0x13f   : > { %v563_v41 = vadd.f32 %v744_v38, %v554_v39  ;;  %v564_v42 = vmax.f32 %v562_v40, 0.0 }
 0x141   : > { %v565_v43 = vmax.f32 %v563_v41, 0.0  ;;  %v754_v44 = vpack.c.bf16 %v564_v42, %v564_v42 }
 0x143   : > { %v755_v45 = vpack.c.bf16 %v565_v43, %v565_v43  ;;  %575 = vst.msk [vmem:[%s1151_s3] sm:$0xf] %vm574_vm3, %v754_v44 }
 0x145   : > { %576 = vst.msk [vmem:[%s1151_s3 + $0x4] sm:$0xf] %vm574_vm3, %v755_v45 }
 0x146 PF: > { %s16_s17 = sadd.s32 1, %s965_s17   ;;  %s1154_s12 = smov %s949_s13 }
 0x147   : > { %p13_p5 = scmp.ge.s32.totalorder %s16_s17, 11   ;;  %s1155_s13 = smov %s953_s14 }
 0x148   : > { %s1156_s14 = smov %s1038_s23  ;;  %s1157_s15 = smov %s961_s16 }
 0x149   : > { %s1158_s16 = smov %s1160_s19  ;;  %15 = sbr.rel (!%p13_p5) target bundleno = 4 (0x4), region = 90 }
 0x150   :  { %605 = vsyncpa [#allocation4], 1 }
 0x151   :  { %607 = vsyncpa [#allocation4 + $0x1], 1 }

// kernel: resnet3d_forward.18
= control target key start
LH: loop header
LB: loop body
LE: loop exit
PB: predicated region body
PF: predicated region fallthrough
CT: control target
= control target key end

     0   :  { %9 = vsyncpa [#allocation4], 0  ;;  %s1245_s0 = inlined_call_operand.vmem [shape: bf16[27,16,64], index: 0, kind: input, shape index: {}]   ;;  %s1246_s1 = inlined_call_operand.hbm [shape: bf16[27,64,64], index: 1, kind: input, shape index: {}]   ;;  %s1247_s2 = inlined_call_operand.vmem [shape: f32[1,64], index: 2, kind: input, shape index: {}]   ;;  %s1248_s3 = inlined_call_operand.vmem [shape: bf16[16,64], index: 3, kind: input, shape index: {}]   ;;  %s1249_s4 = inlined_call_operand.vmem [shape: bf16[16,64], index: 4, kind: output, shape index: {}]  }
   0x1   :  { %11 = vsyncpa [#allocation4 + $0x1], 0  ;;  %s1087_s15 = smov 0   ;;  %s1089_s16 = smov 0  }
   0x2   :  { %s1091_s17 = smov 0   ;;  %s1093_s18 = smov 0  }
   0x3   :  { %s1095_s19 = smov 0   ;;  %s1097_s20 = smov 0  }
   0x4 LB: > { %s779_s21 = sadd.s32 4294967295, %s1054_s20   ;;  %s29_s22 = sadd.s32 1, %s1050_s19  ;;  %s1054_s20 = sphi %s1097_s20, %s17_s20   ;;  %s1050_s19 = sphi %s1095_s19, %s1256_s19   ;;  %s1046_s18 = sphi %s1093_s18, %s1255_s18   ;;  %s1042_s17 = sphi %s1091_s17, %s1254_s17   ;;  %s1038_s16 = sphi %s1089_s16, %s1253_s16   ;;  %s1034_s15 = sphi %s1087_s15, %s1252_s15  }
   0x5   : > { %p30_p0 = scmp.ge.s32.totalorder %s29_s22, 9  ;;  %s73_s23 = sadd.s32 1, %s1042_s17 }
   0x6   : > { %p80_p1 = scmp.ne.s32.totalorder %s1042_s17, %s1038_s16  ;;  %p81_p2 = scmp.eq.s32.totalorder %s1054_s20, 0 }
   0x7   : > { %s1258_s22 = smov (%p30_p0, %s29_s22), 0  ;;  %p86_p4 = scmp.ne.s32.totalorder %s1038_s16, %s1034_s15 }
   0x8   : > { %p82_p3 = por %p81_p2, %p80_p1  ;;  %s68_s24 = ssub.s32 %s1050_s19, %s1258_s22 }
   0x9   : > { %p87_p5 = scmp.eq.s32.totalorder %s779_s21, 0  ;;  %p71_p6 = scmp.eq.s32.totalorder %s68_s24, 0 }
   0xa   : > { %p905_p8 = scmp.lt.s32.totalorder %s1054_s20, 9  ;;  %s225_s27 = sand.u32 1, %s1042_s17  }
   0xb   : > { %p1126_p7 = por %p87_p5, %p86_p4  ;;  %s845_s28 = smul.u32 1536, %s1050_s19 }
   0xc   : > { %s1132_s26 = scalar_select %p71_p6, %s1042_s17, %s73_s23  }
   0xd   : > { %s897_s29 = smul.u32 96, %s225_s27  ;;  %s1139_s6 = scalar_lea.hbm %s1246_s1, %s845_s28 }
   0xe   : > { %p1141_p9 = pnand %p905_p8, %p82_p3  ;;  %s1147_s10 = scalar_lea.sflag [#allocation4], %s225_s27 }
   0xf   : > { %s229_s8 = scalar_lea.vmem [#allocation3], %s897_s29  ;;  %s974_s11 = scalar_lea.hbm %s1139_s6, 1536 }
  0x10   : > { %s238_s9 = sshll.u32 %s229_s8, 4  ;;  %p975_p10 = scmp.ne.s32.totalorder %s1139_s6, %s974_s11  ;;  %s1145_s9 = int_to_ptr.vmem [resolvable:$true] %s238_s9 }
  0x11   : > { %p976_p11 = pneg %p1141_p9  ;;  %s979_s14 = scalar_lea.hbm %s1246_s1, 13824 }
  0x12   : > { %p980_p0 = scmp.lt.u32.totalorder %s1139_s6, %s1246_s1  ;;  %p981_p1 = scmp.lt.u32.totalorder %s979_s14, %s974_s11 }
  0x13   : > { %p977_p12 = pnand %p976_p11, %p975_p10  ;;  %p983_p3 = scmp.lt.u32.totalorder %s974_s11, %s1139_s6 }
  0x14   : > { %p982_p2 = por %p981_p1, %p980_p0 }
  0x15   : > { %p978_p13 = pneg %p977_p12 }
  0x16   : > { %p984_p4 = por %p983_p3, %p982_p2 }
  0x18   : > { %p985_p5 = pnand %p984_p4, %p978_p13 }
  0x1a   : > { %988 = shalt.err (!%p985_p5)
}
  0x1b   : > { %s989_s23 = scalar_lea.vmem %s1145_s9, 1536  ;;  %s1056_s24 = smov [#allocation3]  }
  0x1c   : > { %p990_p6 = scmp.ne.s32.totalorder %s1145_s9, %s989_s23  ;;  %s994_s27 = sshll.u32 %s1056_s24, 4  ;;  %s995_s27 = int_to_ptr.vmem [resolvable:$false] %s994_s27 }
  0x1d   : > { %s996_s28 = scalar_lea.vmem %s995_s27, 3072  ;;  %p997_p12 = scmp.lt.s32.totalorder %s1145_s9, %s995_s27 }
  0x1e   : > { %p992_p8 = pnand %p990_p6, %p976_p11  ;;  %p998_p0 = scmp.lt.s32.totalorder %s996_s28, %s989_s23 }
  0x20   : > { %p993_p10 = pneg %p992_p8  ;;  %p999_p1 = por %p998_p0, %p997_p12 }
  0x22   : > { %p1000_p2 = pnand %p999_p1, %p993_p10 }
  0x24   : > { %1003 = shalt.err (!%p1000_p2)
}
  0x25   : > { %s1057_s29 = smov 64   ;;  %s1058_s30 = smov 4  }
  0x26   : > { %904 = dma.hbm_to_vmem [thread:$0]  (!%p1141_p9), %s1139_s6, 1536, %s1145_s9, %s1147_s10, %s1057_s29, %s1057_s29, %s1058_s30  }
  0x27   : > { %p786_p11 = scmp.ge.s32.totalorder %s1054_s20, 1  ;;  %p246_p13 = scmp.lt.s32.totalorder %s1054_s20, 10 }
  0x29   : > { %p247_p3 = pnand %p786_p11, %p246_p13 }
  0x2a   : > { %s252_s5 = sand.u32 (!%p247_p3), 1, %s1038_s16  }
  0x2b   : > { %250 = sbr.rel (%p247_p3) target bundleno = 328 (0x148), region = 36  ;;  %s253_s11 = scalar_lea.sflag (!%p247_p3), [#allocation4], %s252_s5 }
  0x2c   : > { %s898_s8 = smul.u32 (!%p247_p3), 96, %s252_s5 }
  0x2e   : > { %s1178_s12 = scalar_lea.vmem (!%p247_p3), [#allocation3], %s898_s8 }
  0x32   : > { %1029 = dma.done.wait (%p1126_p7), %s253_s11, 1536  }
  0x33   : > { %1031 = vsyncadd (%p1126_p7), %s253_s11, 4294965760  ;;  %s305_s13 = smul.u32 3, %s1046_s18  ;;  %p789_p9 = scmp.ne.s32.totalorder %s1046_s18, 0 }
  0x34   : > { %vm344_vm0 = vcmask (!%p789_p9), 523264   ;;  %v1059_v0 = vmov (!%p789_p9), 0.0  }
  0x35   : > { %p307_p4 = scmp.lt.s32.totalorder %s305_s13, 26  ;;  %343 = sbr.rel (%p789_p9) target bundleno = 60 (0x3c), region = 44  ;;  %345 = vst.msk [vmem:[#allocation2] sm:$0xff] (!%p789_p9), %vm344_vm0, %v1059_v0  ;;  %346 = vst.msk [vmem:[#allocation2 + $0x8] sm:$0xff] (!%p789_p9), %vm344_vm0, %v1059_v0 }
  0x37   : > { %s1260_s13 = smov (!%p307_p4, %s305_s13), 26 }
  0x38   : > { %s838_s6 = sshll.u32 %s1260_s13, 3 }
  0x39   : > { %s1188_s10 = scalar_lea.vmem %s1245_s0, %s838_s6 }
  0x3c PF: > { %v959_v1 = vld [vmem:[%s1178_s12 + $0x20] sm:$0xff]   ;;  %v1060_v2 = vmov 0.0   ;;  %v961_v4 = vld [vmem:[%s1178_s12 + $0x28] sm:$0xff]   ;;  %vm1061_vm1 = vmmov 0   ;;  %v963_v6 = vld [vmem:[%s1178_s12 + $0x30] sm:$0xff]   ;;  %vm398_vm2 = vcmask 523264  }
  0x3d   : > { %861 = vmatprep.subr.bf16.mxu0 %v1060_v2  ;;  %873 = vmatprep.subr.bf16.mxu1 %v1060_v2  ;;  %v960_v3 = vld [vmem:[%s1178_s12] sm:$0xff]   ;;  %v962_v5 = vld [vmem:[%s1178_s12 + $0x8] sm:$0xff]   ;;  %v964_v7 = vld [vmem:[%s1178_s12 + $0x10] sm:$0xff]   ;;  %p828_p7 = scmp.ne.s32.totalorder %s1046_s18, 8 }
  0x3e   : > { %862 = vmatpush3.bf16.msra.mxu0 %v959_v1  ;;  %869 = vmatprep.mubr.msk.bf16.mxu0 %vm1061_vm1, %v1060_v2  ;;  %v965_v8 = vld [vmem:[%s1178_s12 + $0x38] sm:$0xff]   ;;  %v968_v11 = vld [vmem:[%s1188_s10] sm:$0xff]   ;;  %v969_v12 = vld [vmem:[%s1178_s12 + $0x40] sm:$0xff]   ;;  %vm640_vm3 = vcmask (!%p828_p7), 519168  }
  0x3f   : > { %874 = vmatpush3.bf16.msra.mxu1 %v960_v3  ;;  %863 = vmatprep.subr.bf16.mxu0 %v1060_v2  ;;  %v966_v9 = vld [vmem:[%s1178_s12 + $0x18] sm:$0xff]   ;;  %v970_v13 = vld [vmem:[%s1178_s12 + $0x48] sm:$0xff]   ;;  %v971_v14 = vld [vmem:[%s1178_s12 + $0x50] sm:$0xff]  }
  0x40   : > { %875 = vmatprep.subr.bf16.mxu1 %v1060_v2  ;;  %881 = vmatprep.mubr.msk.bf16.mxu1 %vm1061_vm1, %v1060_v2  ;;  %v967_v10 = vld [vmem:[%s1188_s10 + $0x8] sm:$0xff]   ;;  %v973_v16 = vld [vmem:[%s1188_s10 + $0x10] sm:$0xff]   ;;  %v603_v28 = vld [vmem:[#allocation2] sm:$0xff] }
  0x41   : > { %v972_v15 = vld [vmem:[%s1178_s12 + $0x58] sm:$0xff]   ;;  %v829_v38 = vld [vmem:[%s1247_s2] ss:$0 sm:$0xff] (!%p828_p7) }
  0x42   : > { %864 = vmatpush3.bf16.msra.mxu0 %v961_v4  ;;  %v604_v32 = vld [vmem:[#allocation2 + $0x8] sm:$0xff]  ;;  %v842_v39 = vld [vmem:[%s1248_s3] sm:$0xff] (!%p828_p7)  }
  0x43   : > { %876 = vmatpush3.bf16.msra.mxu1 %v962_v5  ;;  %865 = vmatprep.subr.bf16.mxu0 %v1060_v2  ;;  %v843_v41 = vunpack.c.l.bf16 (!%p828_p7), %v842_v39  ;;  %v844_v43 = vunpack.c.h.bf16 (!%p828_p7), %v842_v39 }
  0x44   : > { %877 = vmatprep.subr.bf16.mxu1 %v1060_v2 }
  0x46   : > { %866 = vmatpush3.bf16.msra.mxu0 %v963_v6 }
  0x47   : > { %878 = vmatpush3.bf16.msra.mxu1 %v964_v7  ;;  %867 = vmatprep.subr.bf16.mxu0 %v1060_v2 }
  0x48   : > { %879 = vmatprep.subr.bf16.mxu1 %v1060_v2 }
  0x4a   : > { %868 = vmatpush3.bf16.msra.mxu0 %v965_v8 }
  0x4b   : > { %880 = vmatpush3.bf16.msra.mxu1 %v966_v9  ;;  %885 = vmatprep.subr.bf16.mxu0 %v1060_v2 }
  0x4d   : > { %870 = vmatmul.mubr.msk.bf16.vlgmr.msra.gmra.mrb[0].mxu0 %vm398_vm2, %v967_v10 }
  0x4e   : > { %882 = vmatmul.mubr.msk.bf16.vlgmr.msra.gmra.mrb[0].mxu1 %vm398_vm2, %v968_v11  ;;  %886 = vmatpush3.bf16.msra.mxu0 %v969_v12 }
  0x4f   : > { %887 = vmatprep.subr.bf16.mxu0 %v1060_v2  ;;  %893 = vmatprep.mubr.msk.bf16.mxu0 %vm1061_vm1, %v1060_v2 }
  0x52   : > { %888 = vmatpush3.bf16.msra.mxu0 %v970_v13 }
  0x53   : > { %889 = vmatprep.subr.bf16.mxu0 %v1060_v2 }
  0x56   : > { %890 = vmatpush3.bf16.msra.mxu0 %v971_v14 }
  0x57   : > { %891 = vmatprep.subr.bf16.mxu0 %v1060_v2 }
  0x5a   : > { %892 = vmatpush3.bf16.msra.mxu0 %v972_v15 }
  0x5d   : > { %894 = vmatmul.mubr.msk.bf16.vlgmr.msra.gmra.mrb[4].mxu0 %vm398_vm2, %v973_v16 }
 0x120   : > { %v436_v17 = vpop.f32.mrb[0].mxu0 }
 0x121   : > { %v509_v18 = vpop.f32.mrb[0].mxu1  ;;  %v871_v19 = vpop.f32.mrb[1].mxu0 }
 0x122   : > { %v510_v20 = vadd.f32 %v509_v18, %v436_v17  ;;  %v883_v21 = vpop.f32.mrb[1].mxu1  ;;  %v439_v22 = vpop.f32.mrb[2].mxu0 }
 0x123   : > { %v512_v23 = vpop.f32.mrb[2].mxu1  ;;  %v872_v24 = vpop.f32.mrb[3].mxu0 }
 0x124   : > { %v513_v25 = vadd.f32 %v512_v23, %v439_v22  ;;  %v884_v26 = vpop.f32.mrb[3].mxu1 }
 0x130   : > { %v594_v27 = vpop.f32.mrb[4].mxu0 }
 0x131   : > { %v601_v29 = vadd.f32 %v594_v27, %v510_v20  ;;  %v895_v30 = vpop.f32.mrb[5].mxu0  ;;  %612 = sbr.rel (%p828_p7) target bundleno = 328 (0x148), region = 48 }
 0x132   : > { %v597_v31 = vpop.f32.mrb[6].mxu0 }
 0x133   : > { %v605_v33 = vadd.f32 %v603_v28, %v601_v29  ;;  %v602_v34 = vadd.f32 %v597_v31, %v513_v25  ;;  %v896_v35 = vpop.f32.mrb[7].mxu0 }
 0x135   : > { %607 = vst.msk [vmem:[#allocation2] sm:$0xff] %vm398_vm2, %v605_v33  ;;  %v606_v36 = vadd.f32 %v604_v32, %v602_v34 }
 0x137   : > { %608 = vst.msk [vmem:[#allocation2 + $0x8] sm:$0xff] %vm398_vm2, %v606_v36 }
 0x13c   : > { %v613_v37 = vld [vmem:[#allocation2] sm:$0xff] }
 0x13d   : > { %v622_v40 = vadd.f32 %v829_v38, %v613_v37 }
 0x13e   : > { %v614_v42 = vld [vmem:[#allocation2 + $0x8] sm:$0xff] }
 0x13f   : > { %v623_v44 = vadd.f32 %v829_v38, %v614_v42  ;;  %v628_v45 = vadd.f32 %v843_v41, %v622_v40 }
 0x141   : > { %v629_v46 = vadd.f32 %v844_v43, %v623_v44  ;;  %v630_v47 = vmax.f32 %v628_v45, 0.0 }
 0x143   : > { %v631_v48 = vmax.f32 %v629_v46, 0.0  ;;  %v839_v49 = vpack.c.bf16 %v630_v47, %v630_v47 }
 0x145   : > { %v840_v50 = vpack.c.bf16 %v631_v48, %v631_v48  ;;  %641 = vst.msk [vmem:[%s1249_s4] sm:$0xf] %vm640_vm3, %v839_v49 }
 0x147   : > { %642 = vst.msk [vmem:[%s1249_s4 + $0x4] sm:$0xf] %vm640_vm3, %v840_v50 }
 0x148 PF: > { %s17_s20 = sadd.s32 1, %s1054_s20   ;;  %s1252_s15 = smov %s1038_s16 }
 0x149   : > { %p14_p5 = scmp.ge.s32.totalorder %s17_s20, 11   ;;  %s1253_s16 = smov %s1042_s17 }
 0x14a   : > { %s1254_s17 = smov %s1132_s26  ;;  %s1255_s18 = smov %s1050_s19 }
 0x14b   : > { %s1256_s19 = smov %s1258_s22  ;;  %16 = sbr.rel (!%p14_p5) target bundleno = 4 (0x4), region = 97 }
 0x152   :  { %671 = vsyncpa [#allocation4], 1 }
 0x153   :  { %673 = vsyncpa [#allocation4 + $0x1], 1 }

// kernel: resnet3d_forward.19
= control target key start
LH: loop header
LB: loop body
LE: loop exit
PB: predicated region body
PF: predicated region fallthrough
CT: control target
= control target key end

     0   :  { %8 = vsyncpa [#allocation4], 0  ;;  %s1072_s0 = inlined_call_operand.vmem [shape: bf16[27,8,64], index: 0, kind: input, shape index: {}]   ;;  %s1073_s1 = inlined_call_operand.hbm [shape: bf16[27,64,128], index: 1, kind: input, shape index: {}]   ;;  %s1074_s2 = inlined_call_operand.vmem [shape: f32[1,128], index: 2, kind: input, shape index: {}]   ;;  %s1075_s3 = inlined_call_operand.vmem [shape: bf16[8,128], index: 3, kind: output, shape index: {}]  }
   0x1   :  { %10 = vsyncpa [#allocation4 + $0x1], 0  ;;  %s922_s12 = smov 0   ;;  %s924_s13 = smov 0  }
   0x2   :  { %s926_s14 = smov 0   ;;  %s928_s15 = smov 0  }
   0x3   :  { %s930_s16 = smov 0   ;;  %s932_s17 = smov 0  }
   0x4 LB: > { %s639_s18 = sadd.s32 4294967295, %s894_s17   ;;  %s28_s19 = sadd.s32 1, %s890_s16  ;;  %s894_s17 = sphi %s932_s17, %s16_s17   ;;  %s890_s16 = sphi %s930_s16, %s1082_s16   ;;  %s886_s15 = sphi %s928_s15, %s1081_s15   ;;  %s882_s14 = sphi %s926_s14, %s1080_s14   ;;  %s878_s13 = sphi %s924_s13, %s1079_s13   ;;  %s874_s12 = sphi %s922_s12, %s1078_s12  }
   0x5   : > { %p29_p0 = scmp.ge.s32.totalorder %s28_s19, 9  ;;  %s72_s20 = sadd.s32 1, %s882_s14 }
   0x6   : > { %p79_p1 = scmp.ne.s32.totalorder %s882_s14, %s878_s13  ;;  %p80_p2 = scmp.eq.s32.totalorder %s894_s17, 0 }
   0x7   : > { %s1084_s19 = smov (%p29_p0, %s28_s19), 0  ;;  %p85_p4 = scmp.ne.s32.totalorder %s878_s13, %s874_s12 }
   0x8   : > { %p81_p3 = por %p80_p2, %p79_p1  ;;  %s67_s21 = ssub.s32 %s890_s16, %s1084_s19 }
   0x9   : > { %p86_p5 = scmp.eq.s32.totalorder %s639_s18, 0  ;;  %p70_p6 = scmp.eq.s32.totalorder %s67_s21, 0 }
   0xa   : > { %p748_p8 = scmp.lt.s32.totalorder %s894_s17, 9  ;;  %s181_s24 = sand.u32 1, %s882_s14  }
   0xb   : > { %p961_p7 = por %p86_p5, %p85_p4  ;;  %s688_s25 = smul.u32 1536, %s890_s16 }
   0xc   : > { %s967_s23 = scalar_select %p70_p6, %s882_s14, %s72_s20  }
   0xd   : > { %s740_s26 = smul.u32 96, %s181_s24  ;;  %s974_s29 = scalar_lea.hbm %s1073_s1, %s688_s25 }
   0xe   : > { %p976_p9 = pnand %p748_p8, %p81_p3  ;;  %s982_s6 = scalar_lea.sflag [#allocation4], %s181_s24 }
   0xf   : > { %s185_s4 = scalar_lea.vmem [#allocation3], %s740_s26  ;;  %s814_s7 = scalar_lea.hbm %s974_s29, 1536 }
  0x10   : > { %s194_s5 = sshll.u32 %s185_s4, 4  ;;  %p815_p10 = scmp.ne.s32.totalorder %s974_s29, %s814_s7  ;;  %s980_s5 = int_to_ptr.vmem [resolvable:$true] %s194_s5 }
  0x11   : > { %p816_p11 = pneg %p976_p9  ;;  %s819_s10 = scalar_lea.hbm %s1073_s1, 13824 }
  0x12   : > { %p820_p0 = scmp.lt.u32.totalorder %s974_s29, %s1073_s1  ;;  %p821_p1 = scmp.lt.u32.totalorder %s819_s10, %s814_s7 }
  0x13   : > { %p817_p12 = pnand %p816_p11, %p815_p10  ;;  %p823_p3 = scmp.lt.u32.totalorder %s814_s7, %s974_s29 }
  0x14   : > { %p822_p2 = por %p821_p1, %p820_p0 }
  0x15   : > { %p818_p13 = pneg %p817_p12 }
  0x16   : > { %p824_p4 = por %p823_p3, %p822_p2 }
  0x18   : > { %p825_p5 = pnand %p824_p4, %p818_p13 }
  0x1a   : > { %828 = shalt.err (!%p825_p5)
}
  0x1b   : > { %s829_s18 = scalar_lea.vmem %s980_s5, 1536  ;;  %s896_s20 = smov [#allocation3]  }
  0x1c   : > { %p830_p6 = scmp.ne.s32.totalorder %s980_s5, %s829_s18  ;;  %s834_s21 = sshll.u32 %s896_s20, 4  ;;  %s835_s21 = int_to_ptr.vmem [resolvable:$false] %s834_s21 }
  0x1d   : > { %s836_s24 = scalar_lea.vmem %s835_s21, 3072  ;;  %p837_p12 = scmp.lt.s32.totalorder %s980_s5, %s835_s21 }
  0x1e   : > { %p832_p8 = pnand %p830_p6, %p816_p11  ;;  %p838_p0 = scmp.lt.s32.totalorder %s836_s24, %s829_s18 }
  0x20   : > { %p833_p10 = pneg %p832_p8  ;;  %p839_p1 = por %p838_p0, %p837_p12 }
  0x22   : > { %p840_p2 = pnand %p839_p1, %p833_p10 }
  0x24   : > { %843 = shalt.err (!%p840_p2)
}
  0x25   : > { %s897_s25 = smov 64   ;;  %s898_s26 = smov 4  }
  0x26   : > { %747 = dma.hbm_to_vmem [thread:$0]  (!%p976_p9), %s974_s29, 1536, %s980_s5, %s982_s6, %s897_s25, %s897_s25, %s898_s26  }
  0x27   : > { %p645_p11 = scmp.ge.s32.totalorder %s894_s17, 1  ;;  %p202_p13 = scmp.lt.s32.totalorder %s894_s17, 10 }
  0x29   : > { %p203_p3 = pnand %p645_p11, %p202_p13 }
  0x2a   : > { %s208_s27 = sand.u32 (!%p203_p3), 1, %s878_s13  }
  0x2b   : > { %206 = sbr.rel (%p203_p3) target bundleno = 324 (0x144), region = 32  ;;  %s209_s4 = scalar_lea.sflag (!%p203_p3), [#allocation4], %s208_s27 }
  0x2c   : > { %s741_s28 = smul.u32 (!%p203_p3), 96, %s208_s27 }
  0x2e   : > { %s1013_s7 = scalar_lea.vmem (!%p203_p3), [#allocation3], %s741_s28 }
  0x32   : > { %869 = dma.done.wait (%p961_p7), %s209_s4, 1536  }
  0x33   : > { %871 = vsyncadd (%p961_p7), %s209_s4, 4294965760  ;;  %s248_s8 = smul.u32 3, %s886_s15  ;;  %p647_p9 = scmp.ne.s32.totalorder %s886_s15, 0 }
  0x34   : > { %v899_v0 = vmov (!%p647_p9), 0.0  }
  0x35   : > { %p249_p4 = scmp.lt.s32.totalorder %s248_s8, 26  ;;  %272 = sbr.rel (%p647_p9) target bundleno = 60 (0x3c), region = 40  ;;  %273 = vst [vmem:[#allocation2] sm:$0xff] (!%p647_p9), %v899_v0 }
  0x37   : > { %s1086_s8 = smov (!%p249_p4, %s248_s8), 26 }
  0x38   : > { %s646_s29 = sshll.u32 %s1086_s8, 2 }
  0x39   : > { %s1023_s6 = scalar_lea.vmem %s1072_s0, %s646_s29 }
  0x3c PF: > { %v802_v1 = vld [vmem:[%s1013_s7 + $0x20] sm:$0xff]   ;;  %v900_v2 = vmov 0.0   ;;  %v804_v4 = vld [vmem:[%s1013_s7 + $0x28] sm:$0xff]   ;;  %vm901_vm0 = vmmov 0   ;;  %v806_v6 = vld [vmem:[%s1013_s7 + $0x30] sm:$0xff]   ;;  %vm318_vm1 = vcmask 523264  }
  0x3d   : > { %704 = vmatprep.subr.bf16.mxu0 %v900_v2  ;;  %716 = vmatprep.subr.bf16.mxu1 %v900_v2  ;;  %v803_v3 = vld [vmem:[%s1013_s7] sm:$0xff]   ;;  %v805_v5 = vld [vmem:[%s1013_s7 + $0x8] sm:$0xff]   ;;  %v807_v7 = vld [vmem:[%s1013_s7 + $0x10] sm:$0xff]   ;;  %p681_p7 = scmp.ne.s32.totalorder %s886_s15, 8 }
  0x3e   : > { %705 = vmatpush3.bf16.msra.mxu0 %v802_v1  ;;  %712 = vmatprep.mubr.msk.bf16.mxu0 %vm901_vm0, %v900_v2  ;;  %v808_v8 = vld [vmem:[%s1013_s7 + $0x38] sm:$0xff]   ;;  %v810_v11 = vld [vmem:[%s1013_s7 + $0x40] sm:$0xff]   ;;  %v811_v13 = vld [vmem:[%s1013_s7 + $0x48] sm:$0xff]  }
  0x3f   : > { %717 = vmatpush3.bf16.msra.mxu1 %v803_v3  ;;  %706 = vmatprep.subr.bf16.mxu0 %v900_v2  ;;  %v809_v9 = vld [vmem:[%s1013_s7 + $0x18] sm:$0xff]   ;;  %v812_v14 = vld [vmem:[%s1013_s7 + $0x50] sm:$0xff]   ;;  %v667_v16 = vld [vmem:[%s1023_s6 + $0x8] sm:$0xf] }
  0x40   : > { %718 = vmatprep.subr.bf16.mxu1 %v900_v2  ;;  %724 = vmatprep.mubr.msk.bf16.mxu1 %vm901_vm0, %v900_v2  ;;  %v648_v10 = vld [vmem:[%s1023_s6 + $0x4] sm:$0xf]  ;;  %v274_v12 = vld [vmem:[%s1023_s6] sm:$0xf] }
  0x41   : > { %v813_v15 = vld [vmem:[%s1013_s7 + $0x58] sm:$0xff]  }
  0x42   : > { %707 = vmatpush3.bf16.msra.mxu0 %v804_v4  ;;  %v508_v27 = vld [vmem:[#allocation2] sm:$0xff] }
  0x43   : > { %719 = vmatpush3.bf16.msra.mxu1 %v805_v5  ;;  %708 = vmatprep.subr.bf16.mxu0 %v900_v2  ;;  %v682_v34 = vld [vmem:[%s1074_s2] ss:$0 sm:$0xff] (!%p681_p7) }
  0x44   : > { %720 = vmatprep.subr.bf16.mxu1 %v900_v2 }
  0x46   : > { %709 = vmatpush3.bf16.msra.mxu0 %v806_v6 }
  0x47   : > { %721 = vmatpush3.bf16.msra.mxu1 %v807_v7  ;;  %710 = vmatprep.subr.bf16.mxu0 %v900_v2 }
  0x48   : > { %722 = vmatprep.subr.bf16.mxu1 %v900_v2 }
  0x4a   : > { %711 = vmatpush3.bf16.msra.mxu0 %v808_v8 }
  0x4b   : > { %723 = vmatpush3.bf16.msra.mxu1 %v809_v9  ;;  %728 = vmatprep.subr.bf16.mxu0 %v900_v2 }
  0x4d   : > { %713 = vmatmul.mubr.msk.bf16.vlgmr.msra.gmra.mrb[0].mxu0 %vm318_vm1, %v648_v10 }
  0x4e   : > { %725 = vmatmul.mubr.msk.bf16.vlgmr.msra.gmra.mrb[0].mxu1 %vm318_vm1, %v274_v12  ;;  %729 = vmatpush3.bf16.msra.mxu0 %v810_v11 }
  0x4f   : > { %730 = vmatprep.subr.bf16.mxu0 %v900_v2  ;;  %736 = vmatprep.mubr.msk.bf16.mxu0 %vm901_vm0, %v900_v2 }
  0x52   : > { %731 = vmatpush3.bf16.msra.mxu0 %v811_v13 }
  0x53   : > { %732 = vmatprep.subr.bf16.mxu0 %v900_v2 }
  0x56   : > { %733 = vmatpush3.bf16.msra.mxu0 %v812_v14 }
  0x57   : > { %734 = vmatprep.subr.bf16.mxu0 %v900_v2 }
  0x5a   : > { %735 = vmatpush3.bf16.msra.mxu0 %v813_v15 }
  0x5d   : > { %737 = vmatmul.mubr.msk.bf16.vlgmr.msra.gmra.mrb[4].mxu0 %vm318_vm1, %v667_v16 }
 0x120   : > { %v356_v17 = vpop.f32.mrb[0].mxu0 }
 0x121   : > { %v714_v18 = vpop.f32.mrb[1].mxu0  ;;  %v423_v19 = vpop.f32.mrb[0].mxu1 }
 0x122   : > { %v424_v20 = vadd.f32 %v423_v19, %v356_v17  ;;  %v359_v21 = vpop.f32.mrb[2].mxu0  ;;  %v726_v22 = vpop.f32.mrb[1].mxu1 }
 0x123   : > { %v715_v23 = vpop.f32.mrb[3].mxu0  ;;  %v426_v24 = vpop.f32.mrb[2].mxu1 }
 0x124   : > { %v727_v25 = vpop.f32.mrb[3].mxu1 }
 0x12f   : > { %514 = sbr.rel (%p681_p7) target bundleno = 324 (0x144), region = 44 }
 0x130   : > { %v501_v26 = vpop.f32.mrb[4].mxu0 }
 0x131   : > { %v507_v28 = vadd.f32 %v501_v26, %v424_v20  ;;  %v738_v29 = vpop.f32.mrb[5].mxu0 }
 0x132   : > { %v504_v30 = vpop.f32.mrb[6].mxu0 }
 0x133   : > { %v509_v31 = vadd.f32 %v508_v27, %v507_v28  ;;  %v739_v32 = vpop.f32.mrb[7].mxu0 }
 0x135   : > { %510 = vst [vmem:[#allocation2] sm:$0xff] %v509_v31 }
 0x13c   : > { %v515_v33 = vld [vmem:[#allocation2] sm:$0xff] }
 0x13d   : > { %v523_v35 = vadd.f32 %v682_v34, %v515_v33 }
 0x13f   : > { %v524_v36 = vmax.f32 %v523_v35, 0.0 }
 0x141   : > { %v525_v37 = vpack.c.bf16 %v524_v36, %v524_v36 }
 0x143   : > { %526 = vst [vmem:[%s1075_s3] sm:$0xf] %v525_v37 }
 0x144 PF: > { %s16_s17 = sadd.s32 1, %s894_s17   ;;  %s1078_s12 = smov %s878_s13 }
 0x145   : > { %p13_p5 = scmp.ge.s32.totalorder %s16_s17, 11   ;;  %s1079_s13 = smov %s882_s14 }
 0x146   : > { %s1080_s14 = smov %s967_s23  ;;  %s1081_s15 = smov %s890_s16 }
 0x147   : > { %s1082_s16 = smov %s1084_s19  ;;  %15 = sbr.rel (!%p13_p5) target bundleno = 4 (0x4), region = 90 }
 0x14e   :  { %552 = vsyncpa [#allocation4], 1 }
 0x14f   :  { %554 = vsyncpa [#allocation4 + $0x1], 1 }

// kernel: resnet3d_forward.20
= control target key start
LH: loop header
LB: loop body
LE: loop exit
PB: predicated region body
PF: predicated region fallthrough
CT: control target
= control target key end

     0   :  { %v147_v0 = vmov 0.0   ;;  %vm148_vm0 = vmmov 0   ;;  %vm53_vm1 = vcmask 523264   ;;  %s190_s1 = inlined_call_operand.vmem [shape: bf16[1,64,128], index: 1, kind: input, shape index: {}]   ;;  %s191_s0 = inlined_call_operand.vmem [shape: bf16[1,8,64], index: 0, kind: input, shape index: {}]   ;;  %s192_s2 = inlined_call_operand.vmem [shape: f32[1,128], index: 2, kind: input, shape index: {}]   ;;  %s193_s3 = inlined_call_operand.vmem [shape: bf16[8,128], index: 3, kind: output, shape index: {}]  }
   0x1   :  { %129 = vmatprep.subr.bf16.mxu0 %v147_v0  ;;  %v143_v1 = vld [vmem:[%s190_s1] sm:$0xff]   ;;  %137 = vmatprep.mubr.msk.bf16.mxu0 %vm148_vm0, %v147_v0  ;;  %v144_v2 = vld [vmem:[%s190_s1 + $0x8] sm:$0xff]   ;;  %v145_v3 = vld [vmem:[%s190_s1 + $0x10] sm:$0xff]  }
   0x2   :  { %130 = vmatpush3.bf16.msra.mxu0 %v143_v1  ;;  %v146_v4 = vld [vmem:[%s190_s1 + $0x18] sm:$0xff]   ;;  %v20_v5 = vld [vmem:[%s191_s0] sm:$0xf] }
   0x3   :  { %131 = vmatprep.subr.bf16.mxu0 %v147_v0  ;;  %v123_v6 = vld [vmem:[%s192_s2] ss:$0 sm:$0xff] }
   0x6   :  { %132 = vmatpush3.bf16.msra.mxu0 %v144_v2 }
   0x7   :  { %133 = vmatprep.subr.bf16.mxu0 %v147_v0 }
   0xa   :  { %134 = vmatpush3.bf16.msra.mxu0 %v145_v3 }
   0xb   :  { %135 = vmatprep.subr.bf16.mxu0 %v147_v0 }
   0xe   :  { %136 = vmatpush3.bf16.msra.mxu0 %v146_v4 }
  0x11   :  { %138 = vmatmul.mubr.msk.bf16.vlgmr.msra.gmra.mrb[0].mxu0 %vm53_vm1, %v20_v5 }
  0xe4   :  { %v91_v7 = vpop.f32.mrb[0].mxu0 }
  0xe5   :  { %v111_v8 = vadd.f32 %v123_v6, %v91_v7  ;;  %v139_v9 = vpop.f32.mrb[1].mxu0 }
  0xe6   :  { %v94_v10 = vpop.f32.mrb[2].mxu0 }
  0xe7   :  { %v112_v11 = vpack.c.bf16 %v111_v8, %v111_v8  ;;  %v140_v12 = vpop.f32.mrb[3].mxu0 }
  0xe9   :  { %113 = vst [vmem:[%s193_s3] sm:$0xf] %v112_v11 }

// kernel: resnet3d_forward.21
= control target key start
LH: loop header
LB: loop body
LE: loop exit
PB: predicated region body
PF: predicated region fallthrough
CT: control target
= control target key end

     0   :  { %9 = vsyncpa [#allocation4], 0  ;;  %s1352_s0 = inlined_call_operand.vmem [shape: bf16[27,8,128], index: 0, kind: input, shape index: {}]   ;;  %s1353_s1 = inlined_call_operand.hbm [shape: bf16[27,128,128], index: 1, kind: input, shape index: {}]   ;;  %s1354_s2 = inlined_call_operand.vmem [shape: f32[1,128], index: 2, kind: input, shape index: {}]   ;;  %s1355_s3 = inlined_call_operand.vmem [shape: bf16[8,128], index: 3, kind: input, shape index: {}]   ;;  %s1356_s4 = inlined_call_operand.vmem [shape: bf16[8,128], index: 4, kind: output, shape index: {}]  }
   0x1   :  { %11 = vsyncpa [#allocation4 + $0x1], 0  ;;  %s1163_s15 = smov 0   ;;  %s1165_s16 = smov 0  }
   0x2   :  { %s1167_s17 = smov 0   ;;  %s1169_s18 = smov 0  }
   0x3   :  { %s1171_s19 = smov 0   ;;  %s1173_s20 = smov 0  }
   0x4 LB: > { %s801_s21 = sadd.s32 4294967295, %s1130_s20   ;;  %s29_s22 = sadd.s32 1, %s1126_s19  ;;  %s1130_s20 = sphi %s1173_s20, %s17_s20   ;;  %s1126_s19 = sphi %s1171_s19, %s1363_s19   ;;  %s1122_s18 = sphi %s1169_s18, %s1362_s18   ;;  %s1118_s17 = sphi %s1167_s17, %s1361_s17   ;;  %s1114_s16 = sphi %s1165_s16, %s1360_s16   ;;  %s1110_s15 = sphi %s1163_s15, %s1359_s15  }
   0x5   : > { %p30_p0 = scmp.ge.s32.totalorder %s29_s22, 9  ;;  %s73_s23 = sadd.s32 1, %s1118_s17 }
   0x6   : > { %p80_p1 = scmp.ne.s32.totalorder %s1118_s17, %s1114_s16  ;;  %p81_p2 = scmp.eq.s32.totalorder %s1130_s20, 0 }
   0x7   : > { %s1365_s22 = smov (%p30_p0, %s29_s22), 0  ;;  %p86_p4 = scmp.ne.s32.totalorder %s1114_s16, %s1110_s15 }
   0x8   : > { %p82_p3 = por %p81_p2, %p80_p1  ;;  %s68_s24 = ssub.s32 %s1126_s19, %s1365_s22 }
   0x9   : > { %p87_p5 = scmp.eq.s32.totalorder %s801_s21, 0  ;;  %p71_p6 = scmp.eq.s32.totalorder %s68_s24, 0 }
   0xa   : > { %p972_p8 = scmp.lt.s32.totalorder %s1130_s20, 9  ;;  %s220_s27 = sand.u32 1, %s1118_s17  }
   0xb   : > { %p1202_p7 = por %p87_p5, %p86_p4  ;;  %s876_s28 = smul.u32 3072, %s1126_s19 }
   0xc   : > { %s1208_s26 = scalar_select %p71_p6, %s1118_s17, %s73_s23  }
   0xd   : > { %s964_s29 = smul.u32 192, %s220_s27  ;;  %s1215_s6 = scalar_lea.hbm %s1353_s1, %s876_s28 }
   0xe   : > { %p1217_p9 = pnand %p972_p8, %p82_p3  ;;  %s1223_s10 = scalar_lea.sflag [#allocation4], %s220_s27 }
   0xf   : > { %s224_s8 = scalar_lea.vmem [#allocation3], %s964_s29  ;;  %s1050_s11 = scalar_lea.hbm %s1215_s6, 3072 }
  0x10   : > { %s233_s9 = sshll.u32 %s224_s8, 4  ;;  %p1051_p10 = scmp.ne.s32.totalorder %s1215_s6, %s1050_s11  ;;  %s1221_s9 = int_to_ptr.vmem [resolvable:$true] %s233_s9 }
  0x11   : > { %p1052_p11 = pneg %p1217_p9  ;;  %s1055_s14 = scalar_lea.hbm %s1353_s1, 27648 }
  0x12   : > { %p1056_p0 = scmp.lt.u32.totalorder %s1215_s6, %s1353_s1  ;;  %p1057_p1 = scmp.lt.u32.totalorder %s1055_s14, %s1050_s11 }
  0x13   : > { %p1053_p12 = pnand %p1052_p11, %p1051_p10  ;;  %p1059_p3 = scmp.lt.u32.totalorder %s1050_s11, %s1215_s6 }
  0x14   : > { %p1058_p2 = por %p1057_p1, %p1056_p0 }
  0x15   : > { %p1054_p13 = pneg %p1053_p12 }
  0x16   : > { %p1060_p4 = por %p1059_p3, %p1058_p2 }
  0x18   : > { %p1061_p5 = pnand %p1060_p4, %p1054_p13 }
  0x1a   : > { %1064 = shalt.err (!%p1061_p5)
}
  0x1b   : > { %s1065_s23 = scalar_lea.vmem %s1221_s9, 3072  ;;  %s1132_s24 = smov [#allocation3]  }
  0x1c   : > { %p1066_p6 = scmp.ne.s32.totalorder %s1221_s9, %s1065_s23  ;;  %s1070_s27 = sshll.u32 %s1132_s24, 4  ;;  %s1071_s27 = int_to_ptr.vmem [resolvable:$false] %s1070_s27 }
  0x1d   : > { %s1072_s28 = scalar_lea.vmem %s1071_s27, 6144  ;;  %p1073_p12 = scmp.lt.s32.totalorder %s1221_s9, %s1071_s27 }
  0x1e   : > { %p1068_p8 = pnand %p1066_p6, %p1052_p11  ;;  %p1074_p0 = scmp.lt.s32.totalorder %s1072_s28, %s1065_s23 }
  0x20   : > { %p1069_p10 = pneg %p1068_p8  ;;  %p1075_p1 = por %p1074_p0, %p1073_p12 }
  0x22   : > { %p1076_p2 = pnand %p1075_p1, %p1069_p10 }
  0x24   : > { %1079 = shalt.err (!%p1076_p2)
}
  0x25   : > { %s1133_s29 = smov 64   ;;  %s1134_s30 = smov 4  }
  0x26   : > { %971 = dma.hbm_to_vmem [thread:$0]  (!%p1217_p9), %s1215_s6, 3072, %s1221_s9, %s1223_s10, %s1133_s29, %s1133_s29, %s1134_s30  }
  0x27   : > { %p808_p11 = scmp.ge.s32.totalorder %s1130_s20, 1  ;;  %p241_p13 = scmp.lt.s32.totalorder %s1130_s20, 10 }
  0x29   : > { %p242_p3 = pnand %p808_p11, %p241_p13 }
  0x2a   : > { %s247_s5 = sand.u32 (!%p242_p3), 1, %s1114_s16  }
  0x2b   : > { %245 = sbr.rel (%p242_p3) target bundleno = 358 (0x166), region = 36  ;;  %s248_s11 = scalar_lea.sflag (!%p242_p3), [#allocation4], %s247_s5 }
  0x2c   : > { %s965_s8 = smul.u32 (!%p242_p3), 192, %s247_s5 }
  0x2e   : > { %s1254_s12 = scalar_lea.vmem (!%p242_p3), [#allocation3], %s965_s8 }
  0x32   : > { %1105 = dma.done.wait (%p1202_p7), %s248_s11, 3072  }
  0x33   : > { %1107 = vsyncadd (%p1202_p7), %s248_s11, 4294964224  ;;  %s296_s13 = smul.u32 3, %s1122_s18  ;;  %p810_p9 = scmp.ne.s32.totalorder %s1122_s18, 0 }
  0x34   : > { %v1135_v0 = vmov (!%p810_p9), 0.0  }
  0x35   : > { %p297_p4 = scmp.lt.s32.totalorder %s296_s13, 26  ;;  %327 = sbr.rel (%p810_p9) target bundleno = 60 (0x3c), region = 44  ;;  %328 = vst [vmem:[#allocation2] sm:$0xff] (!%p810_p9), %v1135_v0 }
  0x37   : > { %s1367_s13 = smov (!%p297_p4, %s296_s13), 26 }
  0x38   : > { %s809_s6 = sshll.u32 %s1367_s13, 2 }
  0x39   : > { %s1264_s10 = scalar_lea.vmem %s1352_s0, %s809_s6 }
  0x3c PF: > { %v1026_v1 = vld [vmem:[%s1254_s12 + $0x40] sm:$0xff]   ;;  %v1136_v2 = vmov 0.0   ;;  %v1028_v4 = vld [vmem:[%s1254_s12 + $0x48] sm:$0xff]   ;;  %vm1137_vm0 = vmmov 0   ;;  %v1030_v6 = vld [vmem:[%s1254_s12 + $0x50] sm:$0xff]   ;;  %p869_p7 = scmp.ne.s32.totalorder %s1122_s18, 8 }
  0x3d   : > { %904 = vmatprep.subr.bf16.mxu0 %v1136_v2  ;;  %924 = vmatprep.subr.bf16.mxu1 %v1136_v2  ;;  %v1027_v3 = vld [vmem:[%s1254_s12] sm:$0xff]   ;;  %v1029_v5 = vld [vmem:[%s1254_s12 + $0x8] sm:$0xff]   ;;  %v1031_v7 = vld [vmem:[%s1254_s12 + $0x10] sm:$0xff]  }
  0x3e   : > { %905 = vmatpush3.bf16.msra.mxu0 %v1026_v1  ;;  %920 = vmatprep.mubr.msk.bf16.mxu0 %vm1137_vm0, %v1136_v2  ;;  %v1032_v8 = vld [vmem:[%s1254_s12 + $0x58] sm:$0xff]   ;;  %v1034_v10 = vld [vmem:[%s1254_s12 + $0x60] sm:$0xff]   ;;  %v1036_v12 = vld [vmem:[%s1254_s12 + $0x68] sm:$0xff]  }
  0x3f   : > { %925 = vmatpush3.bf16.msra.mxu1 %v1027_v3  ;;  %906 = vmatprep.subr.bf16.mxu0 %v1136_v2  ;;  %v1033_v9 = vld [vmem:[%s1254_s12 + $0x18] sm:$0xff]   ;;  %v1035_v11 = vld [vmem:[%s1254_s12 + $0x20] sm:$0xff]   ;;  %v1037_v13 = vld [vmem:[%s1254_s12 + $0x28] sm:$0xff]  }
  0x40   : > { %926 = vmatprep.subr.bf16.mxu1 %v1136_v2  ;;  %940 = vmatprep.mubr.msk.bf16.mxu1 %vm1137_vm0, %v1136_v2  ;;  %v1038_v14 = vld [vmem:[%s1254_s12 + $0x70] sm:$0xff]   ;;  %v1040_v16 = vld [vmem:[%s1254_s12 + $0x78] sm:$0xff]   ;;  %v1042_v19 = vld [vmem:[%s1254_s12 + $0x80] sm:$0xff]  }
  0x41   : > { %v1039_v15 = vld [vmem:[%s1254_s12 + $0x30] sm:$0xff]   ;;  %v1041_v17 = vld [vmem:[%s1254_s12 + $0x38] sm:$0xff]   ;;  %v1043_v21 = vld [vmem:[%s1254_s12 + $0x88] sm:$0xff]  }
  0x42   : > { %907 = vmatpush3.bf16.msra.mxu0 %v1028_v4  ;;  %v811_v18 = vld [vmem:[%s1264_s10 + $0x4] sm:$0xf]  ;;  %v329_v20 = vld [vmem:[%s1264_s10] sm:$0xf]  ;;  %v1044_v22 = vld [vmem:[%s1254_s12 + $0x90] sm:$0xff]  }
  0x43   : > { %927 = vmatpush3.bf16.msra.mxu1 %v1029_v5  ;;  %908 = vmatprep.subr.bf16.mxu0 %v1136_v2  ;;  %v1045_v23 = vld [vmem:[%s1254_s12 + $0x98] sm:$0xff]   ;;  %v1046_v24 = vld [vmem:[%s1254_s12 + $0xa0] sm:$0xff]   ;;  %v1047_v25 = vld [vmem:[%s1254_s12 + $0xa8] sm:$0xff]  }
  0x44   : > { %928 = vmatprep.subr.bf16.mxu1 %v1136_v2  ;;  %v1048_v26 = vld [vmem:[%s1254_s12 + $0xb0] sm:$0xff]   ;;  %v1049_v27 = vld [vmem:[%s1254_s12 + $0xb8] sm:$0xff]   ;;  %v844_v28 = vld [vmem:[%s1264_s10 + $0x8] sm:$0xf] }
  0x45   : > { %v649_v39 = vld [vmem:[#allocation2] sm:$0xff] }
  0x46   : > { %909 = vmatpush3.bf16.msra.mxu0 %v1030_v6  ;;  %v870_v46 = vld [vmem:[%s1354_s2] ss:$0 sm:$0xff] (!%p869_p7) }
  0x47   : > { %929 = vmatpush3.bf16.msra.mxu1 %v1031_v7  ;;  %910 = vmatprep.subr.bf16.mxu0 %v1136_v2  ;;  %v665_v47 = vld [vmem:[%s1355_s3] sm:$0xf] (!%p869_p7) }
  0x48   : > { %930 = vmatprep.subr.bf16.mxu1 %v1136_v2  ;;  %v666_v49 = vunpack.c.l.bf16 (!%p869_p7), %v665_v47 }
  0x4a   : > { %911 = vmatpush3.bf16.msra.mxu0 %v1032_v8 }
  0x4b   : > { %931 = vmatpush3.bf16.msra.mxu1 %v1033_v9  ;;  %912 = vmatprep.subr.bf16.mxu0 %v1136_v2 }
  0x4c   : > { %932 = vmatprep.subr.bf16.mxu1 %v1136_v2 }
  0x4e   : > { %913 = vmatpush3.bf16.msra.mxu0 %v1034_v10 }
  0x4f   : > { %933 = vmatpush3.bf16.msra.mxu1 %v1035_v11  ;;  %914 = vmatprep.subr.bf16.mxu0 %v1136_v2 }
  0x50   : > { %934 = vmatprep.subr.bf16.mxu1 %v1136_v2 }
  0x52   : > { %915 = vmatpush3.bf16.msra.mxu0 %v1036_v12 }
  0x53   : > { %935 = vmatpush3.bf16.msra.mxu1 %v1037_v13  ;;  %916 = vmatprep.subr.bf16.mxu0 %v1136_v2 }
  0x54   : > { %936 = vmatprep.subr.bf16.mxu1 %v1136_v2 }
  0x56   : > { %917 = vmatpush3.bf16.msra.mxu0 %v1038_v14 }
  0x57   : > { %937 = vmatpush3.bf16.msra.mxu1 %v1039_v15  ;;  %918 = vmatprep.subr.bf16.mxu0 %v1136_v2 }
  0x58   : > { %938 = vmatprep.subr.bf16.mxu1 %v1136_v2 }
  0x5a   : > { %919 = vmatpush3.bf16.msra.mxu0 %v1040_v16 }
  0x5b   : > { %939 = vmatpush3.bf16.msra.mxu1 %v1041_v17  ;;  %944 = vmatprep.subr.bf16.mxu0 %v1136_v2 }
  0x5d   : > { %921 = vmatmul.mubr.bf16.vlgmr.msra.gmra.mrb[0].mxu0 %v811_v18 }
  0x5e   : > { %941 = vmatmul.mubr.bf16.vlgmr.msra.gmra.mrb[0].mxu1 %v329_v20  ;;  %945 = vmatpush3.bf16.msra.mxu0 %v1042_v19 }
  0x5f   : > { %946 = vmatprep.subr.bf16.mxu0 %v1136_v2  ;;  %960 = vmatprep.mubr.msk.bf16.mxu0 %vm1137_vm0, %v1136_v2 }
  0x62   : > { %947 = vmatpush3.bf16.msra.mxu0 %v1043_v21 }
  0x63   : > { %948 = vmatprep.subr.bf16.mxu0 %v1136_v2 }
  0x66   : > { %949 = vmatpush3.bf16.msra.mxu0 %v1044_v22 }
  0x67   : > { %950 = vmatprep.subr.bf16.mxu0 %v1136_v2 }
  0x6a   : > { %951 = vmatpush3.bf16.msra.mxu0 %v1045_v23 }
  0x6b   : > { %952 = vmatprep.subr.bf16.mxu0 %v1136_v2 }
  0x6e   : > { %953 = vmatpush3.bf16.msra.mxu0 %v1046_v24 }
  0x6f   : > { %954 = vmatprep.subr.bf16.mxu0 %v1136_v2 }
  0x72   : > { %955 = vmatpush3.bf16.msra.mxu0 %v1047_v25 }
  0x73   : > { %956 = vmatprep.subr.bf16.mxu0 %v1136_v2 }
  0x76   : > { %957 = vmatpush3.bf16.msra.mxu0 %v1048_v26 }
  0x77   : > { %958 = vmatprep.subr.bf16.mxu0 %v1136_v2 }
  0x7a   : > { %959 = vmatpush3.bf16.msra.mxu0 %v1049_v27 }
  0x7d   : > { %961 = vmatmul.mubr.bf16.vlgmr.msra.gmra.mrb[4].mxu0 %v844_v28 }
 0x130   : > { %v447_v29 = vpop.f32.mrb[0].mxu0 }
 0x131   : > { %v922_v30 = vpop.f32.mrb[1].mxu0  ;;  %v535_v31 = vpop.f32.mrb[0].mxu1 }
 0x132   : > { %v536_v32 = vadd.f32 %v535_v31, %v447_v29  ;;  %v450_v33 = vpop.f32.mrb[2].mxu0  ;;  %v942_v34 = vpop.f32.mrb[1].mxu1 }
 0x133   : > { %v923_v35 = vpop.f32.mrb[3].mxu0  ;;  %v538_v36 = vpop.f32.mrb[2].mxu1 }
 0x134   : > { %v943_v37 = vpop.f32.mrb[3].mxu1 }
 0x14f   : > { %655 = sbr.rel (%p869_p7) target bundleno = 358 (0x166), region = 48 }
 0x150   : > { %v642_v38 = vpop.f32.mrb[4].mxu0 }
 0x151   : > { %v648_v40 = vadd.f32 %v642_v38, %v536_v32  ;;  %v962_v41 = vpop.f32.mrb[5].mxu0 }
 0x152   : > { %v645_v42 = vpop.f32.mrb[6].mxu0 }
 0x153   : > { %v650_v43 = vadd.f32 %v649_v39, %v648_v40  ;;  %v963_v44 = vpop.f32.mrb[7].mxu0 }
 0x155   : > { %651 = vst [vmem:[#allocation2] sm:$0xff] %v650_v43 }
 0x15c   : > { %v656_v45 = vld [vmem:[#allocation2] sm:$0xff] }
 0x15d   : > { %v664_v48 = vadd.f32 %v870_v46, %v656_v45 }
 0x15f   : > { %v667_v50 = vadd.f32 %v666_v49, %v664_v48 }
 0x161   : > { %v668_v51 = vmax.f32 %v667_v50, 0.0 }
 0x163   : > { %v669_v52 = vpack.c.bf16 %v668_v51, %v668_v51 }
 0x165   : > { %670 = vst [vmem:[%s1356_s4] sm:$0xf] %v669_v52 }
 0x166 PF: > { %s17_s20 = sadd.s32 1, %s1130_s20   ;;  %s1359_s15 = smov %s1114_s16 }
 0x167   : > { %p14_p5 = scmp.ge.s32.totalorder %s17_s20, 11   ;;  %s1360_s16 = smov %s1118_s17 }
 0x168   : > { %s1361_s17 = smov %s1208_s26  ;;  %s1362_s18 = smov %s1126_s19 }
 0x169   : > { %s1363_s19 = smov %s1365_s22  ;;  %16 = sbr.rel (!%p14_p5) target bundleno = 4 (0x4), region = 97 }
 0x170   :  { %696 = vsyncpa [#allocation4], 1 }
 0x171   :  { %698 = vsyncpa [#allocation4 + $0x1], 1 }

// kernel: resnet3d_forward.22
= control target key start
LH: loop header
LB: loop body
LE: loop exit
PB: predicated region body
PF: predicated region fallthrough
CT: control target
= control target key end

     0   :  { %8 = vsyncpa [#allocation4], 0  ;;  %s1390_s0 = inlined_call_operand.vmem [shape: bf16[27,8,128], index: 0, kind: input, shape index: {}]   ;;  %s1391_s1 = inlined_call_operand.hbm [shape: bf16[27,128,256], index: 1, kind: input, shape index: {}]   ;;  %s1392_s2 = inlined_call_operand.vmem [shape: f32[1,256], index: 2, kind: input, shape index: {}]   ;;  %s1393_s3 = inlined_call_operand.vmem [shape: bf16[8,256], index: 3, kind: output, shape index: {}]  }
   0x1   :  { %10 = vsyncpa [#allocation4 + $0x1], 0  ;;  %s1207_s12 = smov 0   ;;  %s1209_s13 = smov 0  }
   0x2   :  { %s1211_s14 = smov 0   ;;  %s1213_s15 = smov 0  }
   0x3   :  { %s1215_s16 = smov 0   ;;  %s1217_s17 = smov 0  }
   0x4 LB: > { %s866_s18 = sadd.s32 4294967295, %s1180_s17   ;;  %s28_s19 = sadd.s32 1, %s1176_s16  ;;  %s1180_s17 = sphi %s1217_s17, %s16_s17   ;;  %s1176_s16 = sphi %s1215_s16, %s1400_s16   ;;  %s1172_s15 = sphi %s1213_s15, %s1399_s15   ;;  %s1168_s14 = sphi %s1211_s14, %s1398_s14   ;;  %s1164_s13 = sphi %s1209_s13, %s1397_s13   ;;  %s1160_s12 = sphi %s1207_s12, %s1396_s12  }
   0x5   : > { %p29_p0 = scmp.ge.s32.totalorder %s28_s19, 9  ;;  %s72_s20 = sadd.s32 1, %s1168_s14 }
   0x6   : > { %p79_p1 = scmp.ne.s32.totalorder %s1168_s14, %s1164_s13  ;;  %p80_p2 = scmp.eq.s32.totalorder %s1180_s17, 0 }
   0x7   : > { %s1402_s19 = smov (%p29_p0, %s28_s19), 0  ;;  %p85_p4 = scmp.ne.s32.totalorder %s1164_s13, %s1160_s12 }
   0x8   : > { %p81_p3 = por %p80_p2, %p79_p1  ;;  %s67_s21 = ssub.s32 %s1176_s16, %s1402_s19 }
   0x9   : > { %p86_p5 = scmp.eq.s32.totalorder %s866_s18, 0  ;;  %p70_p6 = scmp.eq.s32.totalorder %s67_s21, 0 }
   0xa   : > { %p975_p8 = scmp.lt.s32.totalorder %s1180_s17, 9  ;;  %s183_s24 = sand.u32 1, %s1168_s14  }
   0xb   : > { %p1246_p7 = por %p86_p5, %p85_p4  ;;  %s966_s25 = smul.u32 6144, %s1176_s16 }
   0xc   : > { %s1252_s23 = scalar_select %p70_p6, %s1168_s14, %s72_s20  }
   0xd   : > { %s967_s26 = smul.u32 384, %s183_s24  ;;  %s1259_s29 = scalar_lea.hbm %s1391_s1, %s966_s25 }
   0xe   : > { %p1261_p9 = pnand %p975_p8, %p81_p3  ;;  %s1267_s6 = scalar_lea.sflag [#allocation4], %s183_s24 }
   0xf   : > { %s187_s4 = scalar_lea.vmem [#allocation3], %s967_s26  ;;  %s1100_s7 = scalar_lea.hbm %s1259_s29, 6144 }
  0x10   : > { %s197_s5 = sshll.u32 %s187_s4, 4  ;;  %p1101_p10 = scmp.ne.s32.totalorder %s1259_s29, %s1100_s7  ;;  %s1265_s5 = int_to_ptr.vmem [resolvable:$true] %s197_s5 }
  0x11   : > { %p1102_p11 = pneg %p1261_p9  ;;  %s1105_s10 = scalar_lea.hbm %s1391_s1, 55296 }
  0x12   : > { %p1106_p0 = scmp.lt.u32.totalorder %s1259_s29, %s1391_s1  ;;  %p1107_p1 = scmp.lt.u32.totalorder %s1105_s10, %s1100_s7 }
  0x13   : > { %p1103_p12 = pnand %p1102_p11, %p1101_p10  ;;  %p1109_p3 = scmp.lt.u32.totalorder %s1100_s7, %s1259_s29 }
  0x14   : > { %p1108_p2 = por %p1107_p1, %p1106_p0 }
  0x15   : > { %p1104_p13 = pneg %p1103_p12 }
  0x16   : > { %p1110_p4 = por %p1109_p3, %p1108_p2 }
  0x18   : > { %p1111_p5 = pnand %p1110_p4, %p1104_p13 }
  0x1a   : > { %1114 = shalt.err (!%p1111_p5)
}
  0x1b   : > { %s1115_s18 = scalar_lea.vmem %s1265_s5, 6144  ;;  %s1182_s20 = smov [#allocation3]  }
  0x1c   : > { %p1116_p6 = scmp.ne.s32.totalorder %s1265_s5, %s1115_s18  ;;  %s1120_s21 = sshll.u32 %s1182_s20, 4  ;;  %s1121_s21 = int_to_ptr.vmem [resolvable:$false] %s1120_s21 }
  0x1d   : > { %s1122_s24 = scalar_lea.vmem %s1121_s21, 12288  ;;  %p1123_p12 = scmp.lt.s32.totalorder %s1265_s5, %s1121_s21 }
  0x1e   : > { %p1118_p8 = pnand %p1116_p6, %p1102_p11  ;;  %p1124_p0 = scmp.lt.s32.totalorder %s1122_s24, %s1115_s18 }
  0x20   : > { %p1119_p10 = pneg %p1118_p8  ;;  %p1125_p1 = por %p1124_p0, %p1123_p12 }
  0x22   : > { %p1126_p2 = pnand %p1125_p1, %p1119_p10 }
  0x24   : > { %1129 = shalt.err (!%p1126_p2)
}
  0x25   : > { %s1183_s25 = smov 128   ;;  %s1184_s26 = smov 8  }
  0x26   : > { %974 = dma.hbm_to_vmem [thread:$0]  (!%p1261_p9), %s1259_s29, 6144, %s1265_s5, %s1267_s6, %s1183_s25, %s1183_s25, %s1184_s26  }
  0x27   : > { %p872_p11 = scmp.ge.s32.totalorder %s1180_s17, 1  ;;  %p205_p13 = scmp.lt.s32.totalorder %s1180_s17, 10 }
  0x29   : > { %p206_p3 = pnand %p872_p11, %p205_p13 }
  0x2a   : > { %s211_s27 = sand.u32 (!%p206_p3), 1, %s1164_s13  }
  0x2b   : > { %209 = sbr.rel (%p206_p3) target bundleno = 358 (0x166), region = 32  ;;  %s212_s4 = scalar_lea.sflag (!%p206_p3), [#allocation4], %s211_s27 }
  0x2c   : > { %s968_s28 = smul.u32 (!%p206_p3), 384, %s211_s27 }
  0x2e   : > { %s1298_s7 = scalar_lea.vmem (!%p206_p3), [#allocation3], %s968_s28 }
  0x32   : > { %1155 = dma.done.wait (%p1246_p7), %s212_s4, 6144  }
  0x33   : > { %1157 = vsyncadd (%p1246_p7), %s212_s4, 4294961152  ;;  %s254_s8 = smul.u32 3, %s1172_s15  ;;  %p874_p9 = scmp.ne.s32.totalorder %s1172_s15, 0 }
  0x34   : > { %v1185_v0 = vmov (!%p874_p9), 0.0  }
  0x35   : > { %p255_p4 = scmp.lt.s32.totalorder %s254_s8, 26  ;;  %284 = sbr.rel (%p874_p9) target bundleno = 60 (0x3c), region = 40  ;;  %285 = vst [vmem:[#allocation2] sm:$0xff] (!%p874_p9), %v1185_v0  ;;  %286 = vst [vmem:[#allocation2 + $0x8] sm:$0xff] (!%p874_p9), %v1185_v0 }
  0x37   : > { %s1404_s8 = smov (!%p255_p4, %s254_s8), 26 }
  0x38   : > { %s873_s29 = sshll.u32 %s1404_s8, 2 }
  0x39   : > { %s1308_s6 = scalar_lea.vmem %s1390_s0, %s873_s29 }
  0x3c PF: > { %v1028_v1 = vld [vmem:[%s1298_s7 + $0x84] ss:$8 sps:$4 sm:$0xff]   ;;  %v1186_v3 = vmov 0   ;;  %v1032_v4 = vld [vmem:[%s1298_s7 + $0x80] ss:$8 sps:$4 sm:$0xff]   ;;  %v707_v0 = vld [vmem:[#allocation2] sm:$0xff] }
  0x3d   : > { %v1030_v2 = vld [vmem:[%s1298_s7 + $0x4] ss:$8 sps:$4 sm:$0xff]   ;;  %435 = vmatprep.mubr.bf16.mxu0 %v1186_v3  ;;  %556 = vmatprep.mubr.bf16.mxu1 %v1186_v3  ;;  %v1033_v5 = vld [vmem:[%s1298_s7] ss:$8 sps:$4 sm:$0xff]   ;;  %v1034_v6 = vld [vmem:[%s1298_s7 + $0x94] ss:$8 sps:$4 sm:$0xff]  }
  0x3e   : > { %403 = vmatprep.subr.bf16.mxu0 %v1028_v1  ;;  %524 = vmatprep.subr.bf16.mxu1 %v1030_v2  ;;  %v1036_v7 = vld [vmem:[%s1298_s7 + $0x14] ss:$8 sps:$4 sm:$0xff]   ;;  %v1038_v8 = vld [vmem:[%s1298_s7 + $0x90] ss:$8 sps:$4 sm:$0xff]   ;;  %v1040_v10 = vld [vmem:[%s1298_s7 + $0xa4] ss:$8 sps:$4 sm:$0xff]  }
  0x3f   : > { %404 = vmatpush1.bf16.msra.mxu0 %v1032_v4  ;;  %525 = vmatpush1.bf16.msra.mxu1 %v1033_v5  ;;  %v1039_v9 = vld [vmem:[%s1298_s7 + $0x10] ss:$8 sps:$4 sm:$0xff]   ;;  %v1042_v11 = vld [vmem:[%s1298_s7 + $0x24] ss:$8 sps:$4 sm:$0xff]   ;;  %v1044_v12 = vld [vmem:[%s1298_s7 + $0xa0] ss:$8 sps:$4 sm:$0xff]  }
  0x40   : > { %405 = vmatprep.subr.bf16.mxu0 %v1034_v6  ;;  %526 = vmatprep.subr.bf16.mxu1 %v1036_v7  ;;  %v1045_v13 = vld [vmem:[%s1298_s7 + $0x20] ss:$8 sps:$4 sm:$0xff]   ;;  %v1046_v14 = vld [vmem:[%s1298_s7 + $0xb4] ss:$8 sps:$4 sm:$0xff]   ;;  %v1050_v16 = vld [vmem:[%s1298_s7 + $0xb0] ss:$8 sps:$4 sm:$0xff]  }
  0x41   : > { %v1048_v15 = vld [vmem:[%s1298_s7 + $0x34] ss:$8 sps:$4 sm:$0xff]   ;;  %v1051_v17 = vld [vmem:[%s1298_s7 + $0x30] ss:$8 sps:$4 sm:$0xff]   ;;  %v1052_v18 = vld [vmem:[%s1298_s7 + $0xc4] ss:$8 sps:$4 sm:$0xff]  }
  0x42   : > { %v1054_v19 = vld [vmem:[%s1298_s7 + $0x44] ss:$8 sps:$4 sm:$0xff]   ;;  %v1056_v20 = vld [vmem:[%s1298_s7 + $0xc0] ss:$8 sps:$4 sm:$0xff]   ;;  %v1058_v22 = vld [vmem:[%s1298_s7 + $0xd4] ss:$8 sps:$4 sm:$0xff]  }
  0x43   : > { %406 = vmatpush1.bf16.msra.mxu0 %v1038_v8  ;;  %527 = vmatpush1.bf16.msra.mxu1 %v1039_v9  ;;  %v1057_v21 = vld [vmem:[%s1298_s7 + $0x40] ss:$8 sps:$4 sm:$0xff]   ;;  %v1060_v23 = vld [vmem:[%s1298_s7 + $0x54] ss:$8 sps:$4 sm:$0xff]   ;;  %v1062_v24 = vld [vmem:[%s1298_s7 + $0xd0] ss:$8 sps:$4 sm:$0xff]  }
  0x44   : > { %407 = vmatprep.subr.bf16.mxu0 %v1040_v10  ;;  %528 = vmatprep.subr.bf16.mxu1 %v1042_v11  ;;  %v1063_v25 = vld [vmem:[%s1298_s7 + $0x50] ss:$8 sps:$4 sm:$0xff]   ;;  %v1064_v26 = vld [vmem:[%s1298_s7 + $0xe4] ss:$8 sps:$4 sm:$0xff]   ;;  %v1068_v28 = vld [vmem:[%s1298_s7 + $0xe0] ss:$8 sps:$4 sm:$0xff]  }
  0x45   : > { %v1066_v27 = vld [vmem:[%s1298_s7 + $0x64] ss:$8 sps:$4 sm:$0xff]   ;;  %v1069_v29 = vld [vmem:[%s1298_s7 + $0x60] ss:$8 sps:$4 sm:$0xff]   ;;  %v1070_v30 = vld [vmem:[%s1298_s7 + $0xf4] ss:$8 sps:$4 sm:$0xff]  }
  0x46   : > { %v1072_v31 = vld [vmem:[%s1298_s7 + $0x74] ss:$8 sps:$4 sm:$0xff]   ;;  %v1074_v32 = vld [vmem:[%s1298_s7 + $0xf0] ss:$8 sps:$4 sm:$0xff]   ;;  %v1078_v34 = vld [vmem:[%s1298_s7 + $0x104] ss:$8 sps:$4 sm:$0xff]  }
  0x47   : > { %408 = vmatpush1.bf16.msra.mxu0 %v1044_v12  ;;  %529 = vmatpush1.bf16.msra.mxu1 %v1045_v13  ;;  %v1075_v33 = vld [vmem:[%s1298_s7 + $0x70] ss:$8 sps:$4 sm:$0xff]   ;;  %v875_v35 = vld [vmem:[%s1308_s6 + $0x4] sm:$0xf]  ;;  %v1076_v37 = vld [vmem:[%s1298_s7 + $0x100] ss:$8 sps:$4 sm:$0xff]  }
  0x48   : > { %409 = vmatprep.subr.bf16.mxu0 %v1046_v14  ;;  %530 = vmatprep.subr.bf16.mxu1 %v1048_v15  ;;  %v287_v36 = vld [vmem:[%s1308_s6] sm:$0xf]  ;;  %v1081_v38 = vld [vmem:[%s1298_s7 + $0x114] ss:$8 sps:$4 sm:$0xff]   ;;  %v1084_v40 = vld [vmem:[%s1298_s7 + $0x124] ss:$8 sps:$4 sm:$0xff]  }
  0x49   : > { %v1079_v39 = vld [vmem:[%s1298_s7 + $0x110] ss:$8 sps:$4 sm:$0xff]   ;;  %v1082_v41 = vld [vmem:[%s1298_s7 + $0x120] ss:$8 sps:$4 sm:$0xff]   ;;  %v1087_v42 = vld [vmem:[%s1298_s7 + $0x134] ss:$8 sps:$4 sm:$0xff]  }
  0x4a   : > { %v1085_v43 = vld [vmem:[%s1298_s7 + $0x130] ss:$8 sps:$4 sm:$0xff]   ;;  %v1090_v44 = vld [vmem:[%s1298_s7 + $0x144] ss:$8 sps:$4 sm:$0xff]   ;;  %v1088_v45 = vld [vmem:[%s1298_s7 + $0x140] ss:$8 sps:$4 sm:$0xff]  }
  0x4b   : > { %410 = vmatpush1.bf16.msra.mxu0 %v1050_v16  ;;  %531 = vmatpush1.bf16.msra.mxu1 %v1051_v17  ;;  %v1093_v46 = vld [vmem:[%s1298_s7 + $0x154] ss:$8 sps:$4 sm:$0xff]   ;;  %v1091_v47 = vld [vmem:[%s1298_s7 + $0x150] ss:$8 sps:$4 sm:$0xff]   ;;  %v1096_v48 = vld [vmem:[%s1298_s7 + $0x164] ss:$8 sps:$4 sm:$0xff]  }
  0x4c   : > { %411 = vmatprep.subr.bf16.mxu0 %v1052_v18  ;;  %532 = vmatprep.subr.bf16.mxu1 %v1054_v19  ;;  %v1094_v49 = vld [vmem:[%s1298_s7 + $0x160] ss:$8 sps:$4 sm:$0xff]   ;;  %v1099_v50 = vld [vmem:[%s1298_s7 + $0x174] ss:$8 sps:$4 sm:$0xff]   ;;  %v1097_v51 = vld [vmem:[%s1298_s7 + $0x170] ss:$8 sps:$4 sm:$0xff]  }
  0x4d   : > { %v924_v52 = vld [vmem:[%s1308_s6 + $0x8] sm:$0xf]  ;;  %p957_p7 = scmp.ne.s32.totalorder %s1172_s15, 8 }
  0x4e   : > { %v721_v9 = vlaneseq (!%p957_p7)  ;;  %v719_v11 = vld [vmem:[%s1392_s2] sm:$0x3] (!%p957_p7) }
  0x4f   : > { %412 = vmatpush1.bf16.msra.mxu0 %v1056_v20  ;;  %533 = vmatpush1.bf16.msra.mxu1 %v1057_v21 }
  0x50   : > { %413 = vmatprep.subr.bf16.mxu0 %v1058_v22  ;;  %534 = vmatprep.subr.bf16.mxu1 %v1060_v23  ;;  %v722_v10 = vshrl.u32 (!%p957_p7), %v721_v9, 7 }
  0x52   : > { %v723_v12 = vsub.s32 (!%p957_p7), 0, %v722_v10  ;;  %v727_v13 = vsub.s32 (!%p957_p7), 1, %v722_v10 }
  0x53   : > { %414 = vmatpush1.bf16.msra.mxu0 %v1062_v24  ;;  %535 = vmatpush1.bf16.msra.mxu1 %v1063_v25 }
  0x54   : > { %415 = vmatprep.subr.bf16.mxu0 %v1064_v26  ;;  %536 = vmatprep.subr.bf16.mxu1 %v1066_v27  ;;  %v724_v16 = vrot.slane (!%p957_p7), %v719_v11, %v723_v12  ;;  %v728_v17 = vrot.slane (!%p957_p7), %v719_v11, %v727_v13 }
  0x57   : > { %416 = vmatpush1.bf16.msra.mxu0 %v1068_v28  ;;  %537 = vmatpush1.bf16.msra.mxu1 %v1069_v29 }
  0x58   : > { %417 = vmatprep.subr.bf16.mxu0 %v1070_v30  ;;  %538 = vmatprep.subr.bf16.mxu1 %v1072_v31 }
  0x5b   : > { %418 = vmatpush1.bf16.msra.mxu0 %v1074_v32  ;;  %539 = vmatpush1.bf16.msra.mxu1 %v1075_v33 }
  0x5c   : > { %664 = vmatprep.subr.bf16.mxu0 %v1078_v34 }
  0x5e   : > { %436 = vmatmul.mubr.bf16.vlgmr.msra.gmra.mrb[0].mxu0 %v875_v35  ;;  %557 = vmatmul.mubr.bf16.vlgmr.msra.gmra.mrb[0].mxu1 %v287_v36 }
  0x5f   : > { %665 = vmatpush1.bf16.msra.mxu0 %v1076_v37  ;;  %696 = vmatprep.mubr.bf16.mxu0 %v1186_v3  ;;  %v708_v3 = vld [vmem:[#allocation2 + $0x8] sm:$0xff] }
  0x60   : > { %666 = vmatprep.subr.bf16.mxu0 %v1081_v38 }
  0x63   : > { %667 = vmatpush1.bf16.msra.mxu0 %v1079_v39 }
  0x64   : > { %668 = vmatprep.subr.bf16.mxu0 %v1084_v40 }
  0x67   : > { %669 = vmatpush1.bf16.msra.mxu0 %v1082_v41 }
  0x68   : > { %670 = vmatprep.subr.bf16.mxu0 %v1087_v42 }
  0x6b   : > { %671 = vmatpush1.bf16.msra.mxu0 %v1085_v43 }
  0x6c   : > { %672 = vmatprep.subr.bf16.mxu0 %v1090_v44 }
  0x6f   : > { %673 = vmatpush1.bf16.msra.mxu0 %v1088_v45 }
  0x70   : > { %674 = vmatprep.subr.bf16.mxu0 %v1093_v46 }
  0x73   : > { %675 = vmatpush1.bf16.msra.mxu0 %v1091_v47 }
  0x74   : > { %676 = vmatprep.subr.bf16.mxu0 %v1096_v48 }
  0x77   : > { %677 = vmatpush1.bf16.msra.mxu0 %v1094_v49 }
  0x78   : > { %678 = vmatprep.subr.bf16.mxu0 %v1099_v50 }
  0x7b   : > { %679 = vmatpush1.bf16.msra.mxu0 %v1097_v51 }
  0x7e   : > { %697 = vmatmul.mubr.bf16.vlgmr.msra.gmra.mrb[4].mxu0 %v924_v52 }
 0x131   : > { %v437_v53 = vpop.f32.mrb[0].mxu0  ;;  %v558_v54 = vpop.f32.mrb[0].mxu1 }
 0x132   : > { %v559_v55 = vadd.f32 %v558_v54, %v437_v53  ;;  %v439_v56 = vpop.f32.mrb[1].mxu0  ;;  %v560_v57 = vpop.f32.mrb[1].mxu1 }
 0x133   : > { %v561_v58 = vadd.f32 %v560_v57, %v439_v56  ;;  %v441_v59 = vpop.f32.mrb[2].mxu0  ;;  %v562_v60 = vpop.f32.mrb[2].mxu1 }
 0x134   : > { %v442_v61 = vpop.f32.mrb[3].mxu0  ;;  %v563_v62 = vpop.f32.mrb[3].mxu1 }
 0x151   : > { %v698_v63 = vpop.f32.mrb[4].mxu0  ;;  %716 = sbr.rel (%p957_p7) target bundleno = 358 (0x166), region = 44 }
 0x152   : > { %v705_v1 = vadd.f32 %v698_v63, %v559_v55  ;;  %v700_v2 = vpop.f32.mrb[5].mxu0 }
 0x153   : > { %v706_v4 = vadd.f32 %v700_v2, %v561_v58  ;;  %v702_v5 = vpop.f32.mrb[6].mxu0 }
 0x154   : > { %v709_v6 = vadd.f32 %v707_v0, %v705_v1  ;;  %v703_v7 = vpop.f32.mrb[7].mxu0 }
 0x155   : > { %v710_v8 = vadd.f32 %v708_v3, %v706_v4 }
 0x156   : > { %711 = vst [vmem:[#allocation2] sm:$0xff] %v709_v6 }
 0x157   : > { %712 = vst [vmem:[#allocation2 + $0x8] sm:$0xff] %v710_v8 }
 0x15d   : > { %v717_v14 = vld [vmem:[#allocation2] sm:$0xff] }
 0x15e   : > { %v718_v15 = vld [vmem:[#allocation2 + $0x8] sm:$0xff]  ;;  %v731_v18 = vadd.f32 %v724_v16, %v717_v14 }
 0x15f   : > { %v732_v19 = vadd.f32 %v728_v17, %v718_v15 }
 0x160   : > { %v733_v20 = vmax.f32 %v731_v18, 0.0 }
 0x161   : > { %v734_v21 = vmax.f32 %v732_v19, 0.0 }
 0x163   : > { %v965_v22 = vpack.c.bf16 %v734_v21, %v733_v20 }
 0x165   : > { %743 = vst [vmem:[%s1393_s3] sm:$0xff] %v965_v22 }
 0x166 PF: > { %s16_s17 = sadd.s32 1, %s1180_s17   ;;  %s1396_s12 = smov %s1164_s13 }
 0x167   : > { %p13_p5 = scmp.ge.s32.totalorder %s16_s17, 11   ;;  %s1397_s13 = smov %s1168_s14 }
 0x168   : > { %s1398_s14 = smov %s1252_s23  ;;  %s1399_s15 = smov %s1176_s16 }
 0x169   : > { %s1400_s16 = smov %s1402_s19  ;;  %15 = sbr.rel (!%p13_p5) target bundleno = 4 (0x4), region = 90 }
 0x170   :  { %774 = vsyncpa [#allocation4], 1 }
 0x171   :  { %776 = vsyncpa [#allocation4 + $0x1], 1 }

// kernel: resnet3d_forward.23
= control target key start
LH: loop header
LB: loop body
LE: loop exit
PB: predicated region body
PF: predicated region fallthrough
CT: control target
= control target key end

     0   :  { %v240_v1 = vmov 0   ;;  %v172_v18 = vlaneseq  ;;  %s318_s1 = inlined_call_operand.vmem [shape: bf16[1,128,256], index: 1, kind: input, shape index: {}]   ;;  %s319_s0 = inlined_call_operand.vmem [shape: bf16[1,8,128], index: 0, kind: input, shape index: {}]   ;;  %s320_s2 = inlined_call_operand.vmem [shape: f32[1,256], index: 2, kind: input, shape index: {}]   ;;  %s321_s3 = inlined_call_operand.vmem [shape: bf16[8,256], index: 3, kind: output, shape index: {}]  }
   0x1   :  { %v216_v0 = vld [vmem:[%s318_s1 + $0x4] ss:$8 sps:$4 sm:$0xff]   ;;  %150 = vmatprep.mubr.bf16.mxu0 %v240_v1  ;;  %v218_v2 = vld [vmem:[%s318_s1] ss:$8 sps:$4 sm:$0xff]   ;;  %v219_v3 = vld [vmem:[%s318_s1 + $0x14] ss:$8 sps:$4 sm:$0xff]  }
   0x2   :  { %118 = vmatprep.subr.bf16.mxu0 %v216_v0  ;;  %v221_v4 = vld [vmem:[%s318_s1 + $0x10] ss:$8 sps:$4 sm:$0xff]   ;;  %v222_v5 = vld [vmem:[%s318_s1 + $0x24] ss:$8 sps:$4 sm:$0xff]   ;;  %v224_v6 = vld [vmem:[%s318_s1 + $0x20] ss:$8 sps:$4 sm:$0xff]  }
   0x3   :  { %119 = vmatpush1.bf16.msra.mxu0 %v218_v2  ;;  %v225_v7 = vld [vmem:[%s318_s1 + $0x34] ss:$8 sps:$4 sm:$0xff]   ;;  %v227_v8 = vld [vmem:[%s318_s1 + $0x30] ss:$8 sps:$4 sm:$0xff]   ;;  %v228_v9 = vld [vmem:[%s318_s1 + $0x44] ss:$8 sps:$4 sm:$0xff]  }
   0x4   :  { %120 = vmatprep.subr.bf16.mxu0 %v219_v3  ;;  %v230_v10 = vld [vmem:[%s318_s1 + $0x40] ss:$8 sps:$4 sm:$0xff]   ;;  %v231_v11 = vld [vmem:[%s318_s1 + $0x54] ss:$8 sps:$4 sm:$0xff]   ;;  %v233_v12 = vld [vmem:[%s318_s1 + $0x50] ss:$8 sps:$4 sm:$0xff]  }
   0x5   :  { %v234_v13 = vld [vmem:[%s318_s1 + $0x64] ss:$8 sps:$4 sm:$0xff]   ;;  %v236_v14 = vld [vmem:[%s318_s1 + $0x60] ss:$8 sps:$4 sm:$0xff]   ;;  %v237_v15 = vld [vmem:[%s318_s1 + $0x74] ss:$8 sps:$4 sm:$0xff]  }
   0x6   :  { %v239_v16 = vld [vmem:[%s318_s1 + $0x70] ss:$8 sps:$4 sm:$0xff]   ;;  %v21_v17 = vld [vmem:[%s319_s0] sm:$0xf]  ;;  %v173_v19 = vshrl.u32 %v172_v18, 7 }
   0x7   :  { %121 = vmatpush1.bf16.msra.mxu0 %v221_v4  ;;  %v170_v21 = vld [vmem:[%s320_s2] sm:$0x3] }
   0x8   :  { %122 = vmatprep.subr.bf16.mxu0 %v222_v5  ;;  %v174_v20 = vsub.s32 0, %v173_v19  ;;  %v178_v22 = vsub.s32 1, %v173_v19 }
   0xa   :  { %v175_v23 = vrot.slane %v170_v21, %v174_v20  ;;  %v179_v24 = vrot.slane %v170_v21, %v178_v22 }
   0xb   :  { %123 = vmatpush1.bf16.msra.mxu0 %v224_v6 }
   0xc   :  { %124 = vmatprep.subr.bf16.mxu0 %v225_v7 }
   0xf   :  { %125 = vmatpush1.bf16.msra.mxu0 %v227_v8 }
  0x10   :  { %126 = vmatprep.subr.bf16.mxu0 %v228_v9 }
  0x13   :  { %127 = vmatpush1.bf16.msra.mxu0 %v230_v10 }
  0x14   :  { %128 = vmatprep.subr.bf16.mxu0 %v231_v11 }
  0x17   :  { %129 = vmatpush1.bf16.msra.mxu0 %v233_v12 }
  0x18   :  { %130 = vmatprep.subr.bf16.mxu0 %v234_v13 }
  0x1b   :  { %131 = vmatpush1.bf16.msra.mxu0 %v236_v14 }
  0x1c   :  { %132 = vmatprep.subr.bf16.mxu0 %v237_v15 }
  0x1f   :  { %133 = vmatpush1.bf16.msra.mxu0 %v239_v16 }
  0x22   :  { %151 = vmatmul.mubr.bf16.vlgmr.msra.gmra.mrb[0].mxu0 %v21_v17 }
  0xf5   :  { %v152_v25 = vpop.f32.mrb[0].mxu0 }
  0xf6   :  { %v182_v26 = vadd.f32 %v175_v23, %v152_v25  ;;  %v154_v27 = vpop.f32.mrb[1].mxu0 }
  0xf7   :  { %v183_v28 = vadd.f32 %v179_v24, %v154_v27  ;;  %v156_v29 = vpop.f32.mrb[2].mxu0 }
  0xf8   :  { %v157_v30 = vpop.f32.mrb[3].mxu0 }
  0xf9   :  { %v214_v31 = vpack.c.bf16 %v183_v28, %v182_v26 }
  0xfb   :  { %192 = vst [vmem:[%s321_s3] sm:$0xff] %v214_v31 }

// kernel: resnet3d_forward.24
= control target key start
LH: loop header
LB: loop body
LE: loop exit
PB: predicated region body
PF: predicated region fallthrough
CT: control target
= control target key end

     0   :  { %s1674_s15 = smov 0   ;;  %s1676_s16 = smov 0   ;;  %s1830_s0 = inlined_call_operand.vmem [shape: bf16[27,8,256], index: 0, kind: input, shape index: {}]   ;;  %s1831_s1 = inlined_call_operand.vmem [shape: bf16[27,256,256], index: 1, kind: input, shape index: {}]   ;;  %s1832_s2 = inlined_call_operand.vmem [shape: f32[1,256], index: 2, kind: input, shape index: {}]   ;;  %s1833_s3 = inlined_call_operand.vmem [shape: bf16[8,256], index: 3, kind: input, shape index: {}]   ;;  %s1834_s4 = inlined_call_operand.vmem [shape: bf16[8,256], index: 4, kind: output, shape index: {}]  }
   0x1   :  { %s1678_s17 = smov 0  }
   0x2 LB: > { %s26_s18 = sadd.s32 1, %s1642_s16  ;;  %p1266_p0 = scmp.ge.s32.totalorder %s1646_s17, 1  ;;  %s1646_s17 = sphi %s1678_s17, %s14_s17   ;;  %s1642_s16 = sphi %s1676_s16, %s1836_s16   ;;  %s1638_s15 = sphi %s1674_s15, %s1835_s15  }
   0x3   : > { %p27_p1 = scmp.ge.s32.totalorder %s26_s18, 9  ;;  %p237_p2 = scmp.lt.s32.totalorder %s1646_s17, 10 }
   0x5   : > { %s1838_s18 = smov (%p27_p1, %s26_s18), 0  ;;  %p238_p3 = pnand %p1266_p0, %p237_p2 }
   0x6   : > { %s295_s19 = smul.u32 (!%p238_p3), 3, %s1638_s15  ;;  %p1271_p5 = scmp.ne.s32.totalorder (!%p238_p3), %s1638_s15, 0 }
   0x7   : > { %241 = sbr.rel (%p238_p3) target bundleno = 384 (0x180), region = 36 }
   0x8   : > { %p296_p4 = scmp.lt.s32.totalorder (!%p238_p3), %s295_s19, 26 }
   0xe   : > { %s1840_s19 = smov (!%p296_p4, %s295_s19), 26  ;;  %346 = sbr.rel (%p1271_p5) target bundleno = 21 (0x15), region = 40 }
   0xf   : > { %s1446_s20 = sshll.u32 %s1840_s19, 3  ;;  %s1447_s21 = sshll.u32 %s1840_s19, 8  ;;  %v1648_v0 = vmov (!%p1271_p5), 0.0  }
  0x10   : > { %s1698_s24 = scalar_lea.vmem %s1830_s0, %s1446_s20  ;;  %s1703_s27 = scalar_lea.vmem %s1831_s1, %s1447_s21  ;;  %347 = vst [vmem:[#allocation2] sm:$0xff] (!%p1271_p5), %v1648_v0  ;;  %348 = vst [vmem:[#allocation2 + $0x8] sm:$0xff] (!%p1271_p5), %v1648_v0 }
  0x15 PF: > { %v1474_v1 = vld [vmem:[%s1703_s27 + $0x104] ss:$8 sps:$4 sm:$0xff]   ;;  %v1478_v3 = vld [vmem:[%s1703_s27 + $0x100] ss:$8 sps:$4 sm:$0xff]   ;;  %v1480_v5 = vld [vmem:[%s1703_s27 + $0x114] ss:$8 sps:$4 sm:$0xff]  }
  0x16   : > { %v1476_v2 = vld [vmem:[%s1703_s27 + $0x4] ss:$8 sps:$4 sm:$0xff]   ;;  %584 = vmatprep.subr.bf16.mxu0 %v1474_v1  ;;  %v1479_v4 = vld [vmem:[%s1703_s27] ss:$8 sps:$4 sm:$0xff]   ;;  %v1482_v6 = vld [vmem:[%s1703_s27 + $0x14] ss:$8 sps:$4 sm:$0xff]  }
  0x17   : > { %792 = vmatprep.subr.bf16.mxu1 %v1476_v2  ;;  %585 = vmatpush1.bf16.msra.mxu0 %v1478_v3  ;;  %v1484_v7 = vld [vmem:[%s1703_s27 + $0x110] ss:$8 sps:$4 sm:$0xff]   ;;  %v1486_v9 = vld [vmem:[%s1703_s27 + $0x124] ss:$8 sps:$4 sm:$0xff]   ;;  %v1490_v11 = vld [vmem:[%s1703_s27 + $0x120] ss:$8 sps:$4 sm:$0xff]  }
  0x18   : > { %793 = vmatpush1.bf16.msra.mxu1 %v1479_v4  ;;  %586 = vmatprep.subr.bf16.mxu0 %v1480_v5  ;;  %v1485_v8 = vld [vmem:[%s1703_s27 + $0x10] ss:$8 sps:$4 sm:$0xff]   ;;  %v1488_v10 = vld [vmem:[%s1703_s27 + $0x24] ss:$8 sps:$4 sm:$0xff]   ;;  %v1491_v12 = vld [vmem:[%s1703_s27 + $0x20] ss:$8 sps:$4 sm:$0xff]  }
  0x19   : > { %794 = vmatprep.subr.bf16.mxu1 %v1482_v6  ;;  %v1492_v13 = vld [vmem:[%s1703_s27 + $0x134] ss:$8 sps:$4 sm:$0xff]   ;;  %v1496_v15 = vld [vmem:[%s1703_s27 + $0x130] ss:$8 sps:$4 sm:$0xff]   ;;  %v1498_v17 = vld [vmem:[%s1703_s27 + $0x144] ss:$8 sps:$4 sm:$0xff]  }
  0x1a   : > { %v1494_v14 = vld [vmem:[%s1703_s27 + $0x34] ss:$8 sps:$4 sm:$0xff]   ;;  %v1497_v16 = vld [vmem:[%s1703_s27 + $0x30] ss:$8 sps:$4 sm:$0xff]   ;;  %v1500_v18 = vld [vmem:[%s1703_s27 + $0x44] ss:$8 sps:$4 sm:$0xff]  }
  0x1b   : > { %587 = vmatpush1.bf16.msra.mxu0 %v1484_v7  ;;  %v1502_v19 = vld [vmem:[%s1703_s27 + $0x140] ss:$8 sps:$4 sm:$0xff]   ;;  %v1504_v21 = vld [vmem:[%s1703_s27 + $0x154] ss:$8 sps:$4 sm:$0xff]   ;;  %v1508_v23 = vld [vmem:[%s1703_s27 + $0x150] ss:$8 sps:$4 sm:$0xff]  }
  0x1c   : > { %795 = vmatpush1.bf16.msra.mxu1 %v1485_v8  ;;  %588 = vmatprep.subr.bf16.mxu0 %v1486_v9  ;;  %v1503_v20 = vld [vmem:[%s1703_s27 + $0x40] ss:$8 sps:$4 sm:$0xff]   ;;  %v1506_v22 = vld [vmem:[%s1703_s27 + $0x54] ss:$8 sps:$4 sm:$0xff]   ;;  %v1509_v24 = vld [vmem:[%s1703_s27 + $0x50] ss:$8 sps:$4 sm:$0xff]  }
  0x1d   : > { %796 = vmatprep.subr.bf16.mxu1 %v1488_v10  ;;  %v1510_v25 = vld [vmem:[%s1703_s27 + $0x164] ss:$8 sps:$4 sm:$0xff]   ;;  %v1514_v27 = vld [vmem:[%s1703_s27 + $0x160] ss:$8 sps:$4 sm:$0xff]   ;;  %v1516_v29 = vld [vmem:[%s1703_s27 + $0x174] ss:$8 sps:$4 sm:$0xff]  }
  0x1e   : > { %v1512_v26 = vld [vmem:[%s1703_s27 + $0x64] ss:$8 sps:$4 sm:$0xff]   ;;  %v1515_v28 = vld [vmem:[%s1703_s27 + $0x60] ss:$8 sps:$4 sm:$0xff]   ;;  %v1518_v30 = vld [vmem:[%s1703_s27 + $0x74] ss:$8 sps:$4 sm:$0xff]  }
  0x1f   : > { %589 = vmatpush1.bf16.msra.mxu0 %v1490_v11  ;;  %v1520_v31 = vld [vmem:[%s1703_s27 + $0x170] ss:$8 sps:$4 sm:$0xff]   ;;  %v1522_v33 = vld [vmem:[%s1703_s27 + $0x184] ss:$8 sps:$4 sm:$0xff]   ;;  %v1526_v35 = vld [vmem:[%s1703_s27 + $0x180] ss:$8 sps:$4 sm:$0xff]  }
  0x20   : > { %797 = vmatpush1.bf16.msra.mxu1 %v1491_v12  ;;  %590 = vmatprep.subr.bf16.mxu0 %v1492_v13  ;;  %v1521_v32 = vld [vmem:[%s1703_s27 + $0x70] ss:$8 sps:$4 sm:$0xff]   ;;  %v1524_v34 = vld [vmem:[%s1703_s27 + $0x84] ss:$8 sps:$4 sm:$0xff]   ;;  %v1527_v36 = vld [vmem:[%s1703_s27 + $0x80] ss:$8 sps:$4 sm:$0xff]  }
  0x21   : > { %798 = vmatprep.subr.bf16.mxu1 %v1494_v14  ;;  %v1528_v37 = vld [vmem:[%s1703_s27 + $0x194] ss:$8 sps:$4 sm:$0xff]   ;;  %v1532_v39 = vld [vmem:[%s1703_s27 + $0x190] ss:$8 sps:$4 sm:$0xff]   ;;  %v1534_v41 = vld [vmem:[%s1703_s27 + $0x1a4] ss:$8 sps:$4 sm:$0xff]  }
  0x22   : > { %v1530_v38 = vld [vmem:[%s1703_s27 + $0x94] ss:$8 sps:$4 sm:$0xff]   ;;  %v1533_v40 = vld [vmem:[%s1703_s27 + $0x90] ss:$8 sps:$4 sm:$0xff]   ;;  %v1536_v42 = vld [vmem:[%s1703_s27 + $0xa4] ss:$8 sps:$4 sm:$0xff]  }
  0x23   : > { %591 = vmatpush1.bf16.msra.mxu0 %v1496_v15  ;;  %v1538_v43 = vld [vmem:[%s1703_s27 + $0x1a0] ss:$8 sps:$4 sm:$0xff]   ;;  %v1540_v45 = vld [vmem:[%s1703_s27 + $0x1b4] ss:$8 sps:$4 sm:$0xff]   ;;  %v1544_v50 = vld [vmem:[%s1703_s27 + $0x1b0] ss:$8 sps:$4 sm:$0xff]  }
  0x24   : > { %799 = vmatpush1.bf16.msra.mxu1 %v1497_v16  ;;  %592 = vmatprep.subr.bf16.mxu0 %v1498_v17  ;;  %v1539_v44 = vld [vmem:[%s1703_s27 + $0xa0] ss:$8 sps:$4 sm:$0xff]   ;;  %v1542_v46 = vld [vmem:[%s1703_s27 + $0xb4] ss:$8 sps:$4 sm:$0xff]   ;;  %v1545_v51 = vld [vmem:[%s1703_s27 + $0xb0] ss:$8 sps:$4 sm:$0xff]  }
  0x25   : > { %800 = vmatprep.subr.bf16.mxu1 %v1500_v18  ;;  %v1272_v47 = vld [vmem:[%s1698_s24 + $0x8] sm:$0xff]  ;;  %v349_v49 = vld [vmem:[%s1698_s24] sm:$0xff]  ;;  %v1552_v57 = vld [vmem:[%s1703_s27 + $0x1d4] ss:$8 sps:$4 sm:$0xff]   ;;  %p1440_p6 = scmp.ne.s32.totalorder %s1638_s15, 8 }
  0x26   : > { %v1306_v48 = vcombine.high %v1272_v47, %v1272_v47  ;;  %v1340_v52 = vcombine.high %v349_v49, %v349_v49  ;;  %v1546_v53 = vld [vmem:[%s1703_s27 + $0x1c4] ss:$8 sps:$4 sm:$0xff]   ;;  %v1550_v55 = vld [vmem:[%s1703_s27 + $0x1c0] ss:$8 sps:$4 sm:$0xff]   ;;  %v1554_v58 = vld [vmem:[%s1703_s27 + $0xd4] ss:$8 sps:$4 sm:$0xff]   ;;  %v1305_v6 = vcombine.low %v1272_v47, %v1272_v47  ;;  %v1339_v7 = vcombine.low %v349_v49, %v349_v49 }
  0x27   : > { %593 = vmatpush1.bf16.msra.mxu0 %v1502_v19  ;;  %v1548_v54 = vld [vmem:[%s1703_s27 + $0xc4] ss:$8 sps:$4 sm:$0xff]   ;;  %v1551_v56 = vld [vmem:[%s1703_s27 + $0xc0] ss:$8 sps:$4 sm:$0xff]   ;;  %v1556_v59 = vld [vmem:[%s1703_s27 + $0x1d0] ss:$8 sps:$4 sm:$0xff]  }
  0x28   : > { %801 = vmatpush1.bf16.msra.mxu1 %v1503_v20  ;;  %594 = vmatprep.subr.bf16.mxu0 %v1504_v21  ;;  %v1557_v60 = vld [vmem:[%s1703_s27 + $0xd0] ss:$8 sps:$4 sm:$0xff]   ;;  %v1558_v61 = vld [vmem:[%s1703_s27 + $0x1e4] ss:$8 sps:$4 sm:$0xff]   ;;  %v1562_v63 = vld [vmem:[%s1703_s27 + $0x1e0] ss:$8 sps:$4 sm:$0xff]  }
  0x29   : > { %802 = vmatprep.subr.bf16.mxu1 %v1506_v22  ;;  %616 = vmatprep.mubr.bf16.mxu0 %v1306_v48  ;;  %v1560_v62 = vld [vmem:[%s1703_s27 + $0xe4] ss:$8 sps:$4 sm:$0xff]   ;;  %v1563_v0 = vld [vmem:[%s1703_s27 + $0xe0] ss:$8 sps:$4 sm:$0xff]   ;;  %v1564_v1 = vld [vmem:[%s1703_s27 + $0x1f4] ss:$8 sps:$4 sm:$0xff]  }
  0x2a   : > { %824 = vmatprep.mubr.bf16.mxu1 %v1340_v52  ;;  %v1566_v2 = vld [vmem:[%s1703_s27 + $0xf4] ss:$8 sps:$4 sm:$0xff]   ;;  %v1568_v3 = vld [vmem:[%s1703_s27 + $0x1f0] ss:$8 sps:$4 sm:$0xff]   ;;  %v1576_v5 = vld [vmem:[%s1703_s27 + $0x204] ss:$8 sps:$4 sm:$0xff]  }
  0x2b   : > { %595 = vmatpush1.bf16.msra.mxu0 %v1508_v23  ;;  %v1569_v4 = vld [vmem:[%s1703_s27 + $0xf0] ss:$8 sps:$4 sm:$0xff]   ;;  %v1574_v8 = vld [vmem:[%s1703_s27 + $0x200] ss:$8 sps:$4 sm:$0xff]   ;;  %v1579_v10 = vld [vmem:[%s1703_s27 + $0x214] ss:$8 sps:$4 sm:$0xff]  }
  0x2c   : > { %803 = vmatpush1.bf16.msra.mxu1 %v1509_v24  ;;  %596 = vmatprep.subr.bf16.mxu0 %v1510_v25  ;;  %v1775_v9 = vld [vmem:[%s1698_s24 + $0x10] sm:$0xff]  ;;  %v1582_v13 = vld [vmem:[%s1703_s27 + $0x224] ss:$8 sps:$4 sm:$0xff]   ;;  %v1580_v14 = vld [vmem:[%s1703_s27 + $0x220] ss:$8 sps:$4 sm:$0xff]  }
  0x2d   : > { %804 = vmatprep.subr.bf16.mxu1 %v1512_v26  ;;  %v1407_v11 = vcombine.high %v1775_v9, %v1775_v9  ;;  %v1577_v12 = vld [vmem:[%s1703_s27 + $0x210] ss:$8 sps:$4 sm:$0xff]   ;;  %v1585_v15 = vld [vmem:[%s1703_s27 + $0x234] ss:$8 sps:$4 sm:$0xff]   ;;  %v1588_v17 = vld [vmem:[%s1703_s27 + $0x244] ss:$8 sps:$4 sm:$0xff]  }
  0x2e   : > { %v1583_v16 = vld [vmem:[%s1703_s27 + $0x230] ss:$8 sps:$4 sm:$0xff]   ;;  %v1586_v18 = vld [vmem:[%s1703_s27 + $0x240] ss:$8 sps:$4 sm:$0xff]   ;;  %v1591_v19 = vld [vmem:[%s1703_s27 + $0x254] ss:$8 sps:$4 sm:$0xff]  }
  0x2f   : > { %597 = vmatpush1.bf16.msra.mxu0 %v1514_v27  ;;  %v1589_v20 = vld [vmem:[%s1703_s27 + $0x250] ss:$8 sps:$4 sm:$0xff]   ;;  %v1594_v21 = vld [vmem:[%s1703_s27 + $0x264] ss:$8 sps:$4 sm:$0xff]   ;;  %v1592_v22 = vld [vmem:[%s1703_s27 + $0x260] ss:$8 sps:$4 sm:$0xff]  }
  0x30   : > { %805 = vmatpush1.bf16.msra.mxu1 %v1515_v28  ;;  %598 = vmatprep.subr.bf16.mxu0 %v1516_v29  ;;  %v1597_v23 = vld [vmem:[%s1703_s27 + $0x274] ss:$8 sps:$4 sm:$0xff]   ;;  %v1595_v24 = vld [vmem:[%s1703_s27 + $0x270] ss:$8 sps:$4 sm:$0xff]   ;;  %v1600_v25 = vld [vmem:[%s1703_s27 + $0x284] ss:$8 sps:$4 sm:$0xff]  }
  0x31   : > { %806 = vmatprep.subr.bf16.mxu1 %v1518_v30  ;;  %v1598_v26 = vld [vmem:[%s1703_s27 + $0x280] ss:$8 sps:$4 sm:$0xff]   ;;  %v1603_v27 = vld [vmem:[%s1703_s27 + $0x294] ss:$8 sps:$4 sm:$0xff]   ;;  %v1601_v28 = vld [vmem:[%s1703_s27 + $0x290] ss:$8 sps:$4 sm:$0xff]  }
  0x32   : > { %v1606_v29 = vld [vmem:[%s1703_s27 + $0x2a4] ss:$8 sps:$4 sm:$0xff]   ;;  %v1604_v30 = vld [vmem:[%s1703_s27 + $0x2a0] ss:$8 sps:$4 sm:$0xff]  }
  0x33   : > { %599 = vmatpush1.bf16.msra.mxu0 %v1520_v31  ;;  %v1609_v31 = vld [vmem:[%s1703_s27 + $0x2b4] ss:$8 sps:$4 sm:$0xff]  }
  0x34   : > { %807 = vmatpush1.bf16.msra.mxu1 %v1521_v32  ;;  %600 = vmatprep.subr.bf16.mxu0 %v1522_v33  ;;  %v1607_v32 = vld [vmem:[%s1703_s27 + $0x2b0] ss:$8 sps:$4 sm:$0xff]   ;;  %v1612_v33 = vld [vmem:[%s1703_s27 + $0x2c4] ss:$8 sps:$4 sm:$0xff]  }
  0x35   : > { %808 = vmatprep.subr.bf16.mxu1 %v1524_v34  ;;  %v1610_v34 = vld [vmem:[%s1703_s27 + $0x2c0] ss:$8 sps:$4 sm:$0xff]  }
  0x37   : > { %601 = vmatpush1.bf16.msra.mxu0 %v1526_v35  ;;  %v1615_v35 = vld [vmem:[%s1703_s27 + $0x2d4] ss:$8 sps:$4 sm:$0xff]  }
  0x38   : > { %809 = vmatpush1.bf16.msra.mxu1 %v1527_v36  ;;  %602 = vmatprep.subr.bf16.mxu0 %v1528_v37  ;;  %v1613_v36 = vld [vmem:[%s1703_s27 + $0x2d0] ss:$8 sps:$4 sm:$0xff]   ;;  %v1618_v37 = vld [vmem:[%s1703_s27 + $0x2e4] ss:$8 sps:$4 sm:$0xff]  }
  0x39   : > { %810 = vmatprep.subr.bf16.mxu1 %v1530_v38  ;;  %v1616_v38 = vld [vmem:[%s1703_s27 + $0x2e0] ss:$8 sps:$4 sm:$0xff]  }
  0x3b   : > { %603 = vmatpush1.bf16.msra.mxu0 %v1532_v39  ;;  %v1621_v39 = vld [vmem:[%s1703_s27 + $0x2f4] ss:$8 sps:$4 sm:$0xff]  }
  0x3c   : > { %811 = vmatpush1.bf16.msra.mxu1 %v1533_v40  ;;  %604 = vmatprep.subr.bf16.mxu0 %v1534_v41  ;;  %v1619_v40 = vld [vmem:[%s1703_s27 + $0x2f0] ss:$8 sps:$4 sm:$0xff]   ;;  %v1406_v41 = vcombine.low %v1775_v9, %v1775_v9 }
  0x3d   : > { %812 = vmatprep.subr.bf16.mxu1 %v1536_v42 }
  0x3f   : > { %605 = vmatpush1.bf16.msra.mxu0 %v1538_v43 }
  0x40   : > { %813 = vmatpush1.bf16.msra.mxu1 %v1539_v44  ;;  %606 = vmatprep.subr.bf16.mxu0 %v1540_v45 }
  0x41   : > { %814 = vmatprep.subr.bf16.mxu1 %v1542_v46 }
  0x43   : > { %607 = vmatpush1.bf16.msra.mxu0 %v1544_v50 }
  0x44   : > { %815 = vmatpush1.bf16.msra.mxu1 %v1545_v51  ;;  %608 = vmatprep.subr.bf16.mxu0 %v1546_v53  ;;  %v1078_v53 = vld [vmem:[#allocation2] sm:$0xff] }
  0x45   : > { %816 = vmatprep.subr.bf16.mxu1 %v1548_v54 }
  0x47   : > { %609 = vmatpush1.bf16.msra.mxu0 %v1550_v55 }
  0x48   : > { %817 = vmatpush1.bf16.msra.mxu1 %v1551_v56  ;;  %610 = vmatprep.subr.bf16.mxu0 %v1552_v57  ;;  %v1079_v56 = vld [vmem:[#allocation2 + $0x8] sm:$0xff] }
  0x49   : > { %818 = vmatprep.subr.bf16.mxu1 %v1554_v58 }
  0x4b   : > { %611 = vmatpush1.bf16.msra.mxu0 %v1556_v59 }
  0x4c   : > { %819 = vmatpush1.bf16.msra.mxu1 %v1557_v60  ;;  %612 = vmatprep.subr.bf16.mxu0 %v1558_v61 }
  0x4d   : > { %820 = vmatprep.subr.bf16.mxu1 %v1560_v62  ;;  %v1092_v62 = vlaneseq (!%p1440_p6) }
  0x4f   : > { %613 = vmatpush1.bf16.msra.mxu0 %v1562_v63  ;;  %v1093_v63 = vshrl.u32 (!%p1440_p6), %v1092_v62, 7 }
  0x50   : > { %821 = vmatpush1.bf16.msra.mxu1 %v1563_v0  ;;  %614 = vmatprep.subr.bf16.mxu0 %v1564_v1  ;;  %v1090_v0 = vld [vmem:[%s1832_s2] sm:$0x3] (!%p1440_p6) }
  0x51   : > { %822 = vmatprep.subr.bf16.mxu1 %v1566_v2  ;;  %v1104_v1 = vld [vmem:[%s1833_s3] sm:$0xff] (!%p1440_p6)  ;;  %v1094_v2 = vsub.s32 (!%p1440_p6), 0, %v1093_v63 }
  0x52   : > { %v1106_v9 = vunpack.c.h.bf16 (!%p1440_p6), %v1104_v1 }
  0x53   : > { %615 = vmatpush1.bf16.msra.mxu0 %v1568_v3  ;;  %v1098_v3 = vsub.s32 (!%p1440_p6), 1, %v1093_v63 }
  0x54   : > { %823 = vmatpush1.bf16.msra.mxu1 %v1569_v4  ;;  %1035 = vmatprep.subr.bf16.mxu0 %v1576_v5 }
  0x56   : > { %617 = vmatmul.mubr.bf16.vlgmr.msra.gmra.mrb[0].mxu0 %v1305_v6  ;;  %v1095_v6 = vrot.slane (!%p1440_p6), %v1090_v0, %v1094_v2 }
  0x57   : > { %825 = vmatmul.mubr.bf16.vlgmr.msra.gmra.mrb[0].mxu1 %v1339_v7  ;;  %1036 = vmatpush1.bf16.msra.mxu0 %v1574_v8  ;;  %v1099_v7 = vrot.slane (!%p1440_p6), %v1090_v0, %v1098_v3  ;;  %v1105_v8 = vunpack.c.l.bf16 (!%p1440_p6), %v1104_v1 }
  0x58   : > { %1067 = vmatprep.mubr.bf16.mxu0 %v1407_v11  ;;  %1037 = vmatprep.subr.bf16.mxu0 %v1579_v10 }
  0x5b   : > { %1038 = vmatpush1.bf16.msra.mxu0 %v1577_v12 }
  0x5c   : > { %1039 = vmatprep.subr.bf16.mxu0 %v1582_v13 }
  0x5f   : > { %1040 = vmatpush1.bf16.msra.mxu0 %v1580_v14 }
  0x60   : > { %1041 = vmatprep.subr.bf16.mxu0 %v1585_v15 }
  0x63   : > { %1042 = vmatpush1.bf16.msra.mxu0 %v1583_v16 }
  0x64   : > { %1043 = vmatprep.subr.bf16.mxu0 %v1588_v17 }
  0x67   : > { %1044 = vmatpush1.bf16.msra.mxu0 %v1586_v18 }
  0x68   : > { %1045 = vmatprep.subr.bf16.mxu0 %v1591_v19 }
  0x6b   : > { %1046 = vmatpush1.bf16.msra.mxu0 %v1589_v20 }
  0x6c   : > { %1047 = vmatprep.subr.bf16.mxu0 %v1594_v21 }
  0x6f   : > { %1048 = vmatpush1.bf16.msra.mxu0 %v1592_v22 }
  0x70   : > { %1049 = vmatprep.subr.bf16.mxu0 %v1597_v23 }
  0x73   : > { %1050 = vmatpush1.bf16.msra.mxu0 %v1595_v24 }
  0x74   : > { %1051 = vmatprep.subr.bf16.mxu0 %v1600_v25 }
  0x77   : > { %1052 = vmatpush1.bf16.msra.mxu0 %v1598_v26 }
  0x78   : > { %1053 = vmatprep.subr.bf16.mxu0 %v1603_v27 }
  0x7b   : > { %1054 = vmatpush1.bf16.msra.mxu0 %v1601_v28 }
  0x7c   : > { %1055 = vmatprep.subr.bf16.mxu0 %v1606_v29 }
  0x7f   : > { %1056 = vmatpush1.bf16.msra.mxu0 %v1604_v30 }
  0x80   : > { %1057 = vmatprep.subr.bf16.mxu0 %v1609_v31 }
  0x83   : > { %1058 = vmatpush1.bf16.msra.mxu0 %v1607_v32 }
  0x84   : > { %1059 = vmatprep.subr.bf16.mxu0 %v1612_v33 }
  0x87   : > { %1060 = vmatpush1.bf16.msra.mxu0 %v1610_v34 }
  0x88   : > { %1061 = vmatprep.subr.bf16.mxu0 %v1615_v35 }
  0x8b   : > { %1062 = vmatpush1.bf16.msra.mxu0 %v1613_v36 }
  0x8c   : > { %1063 = vmatprep.subr.bf16.mxu0 %v1618_v37 }
  0x8f   : > { %1064 = vmatpush1.bf16.msra.mxu0 %v1616_v38 }
  0x90   : > { %1065 = vmatprep.subr.bf16.mxu0 %v1621_v39 }
  0x93   : > { %1066 = vmatpush1.bf16.msra.mxu0 %v1619_v40 }
  0x96   : > { %1068 = vmatmul.mubr.bf16.vlgmr.msra.gmra.mrb[4].mxu0 %v1406_v41 }
 0x129   : > { %v618_v42 = vpop.f32.mrb[0].mxu0 }
 0x12a   : > { %v826_v43 = vpop.f32.mrb[0].mxu1  ;;  %v620_v45 = vpop.f32.mrb[1].mxu0 }
 0x12b   : > { %v827_v44 = vadd.f32 %v826_v43, %v618_v42  ;;  %v828_v46 = vpop.f32.mrb[1].mxu1  ;;  %v622_v48 = vpop.f32.mrb[2].mxu0 }
 0x12c   : > { %v829_v47 = vadd.f32 %v828_v46, %v620_v45  ;;  %v830_v49 = vpop.f32.mrb[2].mxu1  ;;  %v623_v50 = vpop.f32.mrb[3].mxu0 }
 0x12d   : > { %v831_v51 = vpop.f32.mrb[3].mxu1 }
 0x169   : > { %v1069_v52 = vpop.f32.mrb[4].mxu0  ;;  %1087 = sbr.rel (%p1440_p6) target bundleno = 384 (0x180), region = 44 }
 0x16a   : > { %v1076_v54 = vadd.f32 %v1069_v52, %v827_v44  ;;  %v1071_v55 = vpop.f32.mrb[5].mxu0 }
 0x16b   : > { %v1077_v57 = vadd.f32 %v1071_v55, %v829_v47  ;;  %v1073_v58 = vpop.f32.mrb[6].mxu0 }
 0x16c   : > { %v1080_v59 = vadd.f32 %v1078_v53, %v1076_v54  ;;  %v1074_v60 = vpop.f32.mrb[7].mxu0 }
 0x16d   : > { %v1081_v61 = vadd.f32 %v1079_v56, %v1077_v57 }
 0x16e   : > { %1082 = vst [vmem:[#allocation2] sm:$0xff] %v1080_v59 }
 0x16f   : > { %1083 = vst [vmem:[#allocation2 + $0x8] sm:$0xff] %v1081_v61 }
 0x175   : > { %v1088_v4 = vld [vmem:[#allocation2] sm:$0xff] }
 0x176   : > { %v1089_v5 = vld [vmem:[#allocation2 + $0x8] sm:$0xff]  ;;  %v1102_v10 = vadd.f32 %v1095_v6, %v1088_v4 }
 0x177   : > { %v1103_v11 = vadd.f32 %v1099_v7, %v1089_v5 }
 0x178   : > { %v1107_v12 = vadd.f32 %v1105_v8, %v1102_v10 }
 0x179   : > { %v1108_v13 = vadd.f32 %v1106_v9, %v1103_v11 }
 0x17a   : > { %v1109_v14 = vmax.f32 %v1107_v12, 0.0 }
 0x17b   : > { %v1110_v15 = vmax.f32 %v1108_v13, 0.0 }
 0x17d   : > { %v1448_v16 = vpack.c.bf16 %v1110_v15, %v1109_v14 }
 0x17f   : > { %1119 = vst [vmem:[%s1834_s4] sm:$0xff] %v1448_v16 }
 0x180 PF: > { %s14_s17 = sadd.s32 1, %s1646_s17   ;;  %s1835_s15 = smov %s1642_s16 }
 0x181   : > { %p11_p7 = scmp.ge.s32.totalorder %s14_s17, 11   ;;  %s1836_s16 = smov %s1838_s18 }
 0x183   :  { %13 = sbr.rel (!%p11_p7) target bundleno = 2 (0x2), region = 87 }

// kernel: resnet3d_forward.25
= control target key start
LH: loop header
LB: loop body
LE: loop exit
PB: predicated region body
PF: predicated region fallthrough
CT: control target
= control target key end

     0   :  { %s2054_s12 = smov 0   ;;  %s2056_s13 = smov 0   ;;  %s2468_s0 = inlined_call_operand.vmem [shape: bf16[27,8,256], index: 0, kind: input, shape index: {}]   ;;  %s2469_s1 = inlined_call_operand.vmem [shape: bf16[27,256,512], index: 1, kind: input, shape index: {}]   ;;  %s2470_s2 = inlined_call_operand.vmem [shape: f32[1,512], index: 2, kind: input, shape index: {}]   ;;  %s2471_s3 = inlined_call_operand.vmem [shape: bf16[8,512], index: 3, kind: output, shape index: {}]  }
   0x1   :  { %s2058_s14 = smov 0   ;;  %s2060_s15 = smov 0  }
   0x2   :  { %s2062_s16 = smov 0   ;;  %s2064_s17 = smov 0  }
   0x3   :  { %s2066_s18 = smov 0  }
   0x4 LB: > { %s25_s19 = sadd.s32 1, %s2023_s16  ;;  %s28_s20 = sadd.s32 1, %s2027_s17  ;;  %s2031_s18 = sphi %s2066_s18, %s13_s18   ;;  %s2027_s17 = sphi %s2064_s17, %s2477_s17   ;;  %s2023_s16 = sphi %s2062_s16, %s2476_s16   ;;  %s2019_s15 = sphi %s2060_s15, %s2475_s15   ;;  %s2015_s14 = sphi %s2058_s14, %s2474_s14   ;;  %s2011_s13 = sphi %s2056_s13, %s2473_s13   ;;  %s2007_s12 = sphi %s2054_s12, %s2472_s12  }
   0x5   : > { %p26_p0 = scmp.ge.s32.totalorder %s25_s19, 9  ;;  %p76_p1 = scmp.ne.s32.totalorder %s2011_s13, %s2007_s12 }
   0x6   : > { %p77_p2 = scmp.eq.s32.totalorder %s2031_s18, 0  ;;  %s69_s24 = sadd.s32 1, %s2011_s13 }
   0x7   : > { %s2479_s19 = smov (%p26_p0, %s25_s19), 0  ;;  %s2481_s20 = smov (!%p26_p0, %s28_s20), %s2027_s17 }
   0x8   : > { %p78_p3 = por %p77_p2, %p76_p1  ;;  %p30_p4 = scmp.ge.s32.totalorder %s2481_s20, 2 }
   0x9   : > { %s64_s21 = ssub.s32 %s2023_s16, %s2479_s19  ;;  %p1582_p6 = scmp.ge.s32.totalorder %s2031_s18, 18 }
   0xa   : > { %s2483_s20 = smov (%p30_p4, %s2481_s20), 0 }
   0xb   : > { %s65_s22 = ssub.s32 %s2027_s17, %s2483_s20  ;;  %156 = sbr.rel (%p1582_p6) target bundleno = 74 (0x4a), region = 16 }
   0xc   : > { %s66_s23 = sor.u32 %s65_s22, %s64_s21 }
   0xd   : > { %p67_p5 = scmp.eq.s32.totalorder %s66_s23, 0 }
   0xf   : > { %s2105_s25 = scalar_select %p67_p5, %s2011_s13, %s69_s24  }
  0x12   : > { %173 = sbr.rel (!%p78_p3) target bundleno = 74 (0x4a), region = 24  ;;  %s175_s26 = sand.u32 (%p78_p3), 1, %s2011_s13  }
  0x13   : > { %s1768_s27 = smul.u32 (%p78_p3), 768, %s175_s26  ;;  %s1583_s28 = sshll.u32 (%p78_p3), %s2027_s17, 1 }
  0x14   : > { %s1765_s29 = smul.u32 (%p78_p3), 384, %s2023_s16 }
  0x15   : > { %s2119_s8 = scalar_lea.vmem (%p78_p3), [#allocation3], %s1768_s27 }
  0x16   : > { %s181_s30 = sadd.s32 (%p78_p3), %s1765_s29, %s1583_s28 }
  0x17   : > { %s1585_s4 = sshll.u32 (%p78_p3), %s181_s30, 2 }
  0x18   : > { %s2114_s7 = scalar_lea.vmem (%p78_p3), %s2469_s1, %s1585_s4 }
  0x19   : > { %v401_v0 = vld [vmem:[%s2114_s7] sm:$0xff]  ;;  %v403_v1 = vld [vmem:[%s2114_s7 + $0x10] sm:$0xff] }
  0x1a   : > { %v405_v2 = vld [vmem:[%s2114_s7 + $0x20] sm:$0xff]  ;;  %402 = vst [vmem:[%s2119_s8] sm:$0xff] %v401_v0  ;;  %404 = vst [vmem:[%s2119_s8 + $0x8] sm:$0xff] %v403_v1  ;;  %v407_v3 = vld [vmem:[%s2114_s7 + $0x30] sm:$0xff] }
  0x1b   : > { %406 = vst [vmem:[%s2119_s8 + $0x10] sm:$0xff] %v405_v2  ;;  %v409_v4 = vld [vmem:[%s2114_s7 + $0x40] sm:$0xff]  ;;  %v411_v5 = vld [vmem:[%s2114_s7 + $0x50] sm:$0xff]  ;;  %408 = vst [vmem:[%s2119_s8 + $0x18] sm:$0xff] %v407_v3 }
  0x1c   : > { %410 = vst [vmem:[%s2119_s8 + $0x20] sm:$0xff] %v409_v4  ;;  %412 = vst [vmem:[%s2119_s8 + $0x28] sm:$0xff] %v411_v5  ;;  %v413_v6 = vld [vmem:[%s2114_s7 + $0x60] sm:$0xff]  ;;  %v415_v7 = vld [vmem:[%s2114_s7 + $0x70] sm:$0xff] }
  0x1d   : > { %v417_v8 = vld [vmem:[%s2114_s7 + $0x80] sm:$0xff]  ;;  %414 = vst [vmem:[%s2119_s8 + $0x30] sm:$0xff] %v413_v6  ;;  %416 = vst [vmem:[%s2119_s8 + $0x38] sm:$0xff] %v415_v7  ;;  %v419_v9 = vld [vmem:[%s2114_s7 + $0x90] sm:$0xff] }
  0x1e   : > { %418 = vst [vmem:[%s2119_s8 + $0x40] sm:$0xff] %v417_v8  ;;  %v421_v10 = vld [vmem:[%s2114_s7 + $0xa0] sm:$0xff]  ;;  %v423_v11 = vld [vmem:[%s2114_s7 + $0xb0] sm:$0xff]  ;;  %420 = vst [vmem:[%s2119_s8 + $0x48] sm:$0xff] %v419_v9 }
  0x1f   : > { %422 = vst [vmem:[%s2119_s8 + $0x50] sm:$0xff] %v421_v10  ;;  %424 = vst [vmem:[%s2119_s8 + $0x58] sm:$0xff] %v423_v11  ;;  %v425_v12 = vld [vmem:[%s2114_s7 + $0xc0] sm:$0xff]  ;;  %v427_v13 = vld [vmem:[%s2114_s7 + $0xd0] sm:$0xff] }
  0x20   : > { %v429_v14 = vld [vmem:[%s2114_s7 + $0xe0] sm:$0xff]  ;;  %426 = vst [vmem:[%s2119_s8 + $0x60] sm:$0xff] %v425_v12  ;;  %428 = vst [vmem:[%s2119_s8 + $0x68] sm:$0xff] %v427_v13  ;;  %v431_v15 = vld [vmem:[%s2114_s7 + $0xf0] sm:$0xff] }
  0x21   : > { %430 = vst [vmem:[%s2119_s8 + $0x70] sm:$0xff] %v429_v14  ;;  %v433_v16 = vld [vmem:[%s2114_s7 + $0x100] sm:$0xff]  ;;  %v435_v17 = vld [vmem:[%s2114_s7 + $0x110] sm:$0xff]  ;;  %432 = vst [vmem:[%s2119_s8 + $0x78] sm:$0xff] %v431_v15 }
  0x22   : > { %434 = vst [vmem:[%s2119_s8 + $0x80] sm:$0xff] %v433_v16  ;;  %436 = vst [vmem:[%s2119_s8 + $0x88] sm:$0xff] %v435_v17  ;;  %v437_v18 = vld [vmem:[%s2114_s7 + $0x120] sm:$0xff]  ;;  %v439_v19 = vld [vmem:[%s2114_s7 + $0x130] sm:$0xff] }
  0x23   : > { %v441_v20 = vld [vmem:[%s2114_s7 + $0x140] sm:$0xff]  ;;  %438 = vst [vmem:[%s2119_s8 + $0x90] sm:$0xff] %v437_v18  ;;  %440 = vst [vmem:[%s2119_s8 + $0x98] sm:$0xff] %v439_v19  ;;  %v443_v21 = vld [vmem:[%s2114_s7 + $0x150] sm:$0xff] }
  0x24   : > { %442 = vst [vmem:[%s2119_s8 + $0xa0] sm:$0xff] %v441_v20  ;;  %v445_v22 = vld [vmem:[%s2114_s7 + $0x160] sm:$0xff]  ;;  %v447_v23 = vld [vmem:[%s2114_s7 + $0x170] sm:$0xff]  ;;  %444 = vst [vmem:[%s2119_s8 + $0xa8] sm:$0xff] %v443_v21 }
  0x25   : > { %446 = vst [vmem:[%s2119_s8 + $0xb0] sm:$0xff] %v445_v22  ;;  %448 = vst [vmem:[%s2119_s8 + $0xb8] sm:$0xff] %v447_v23  ;;  %v449_v24 = vld [vmem:[%s2114_s7 + $0x180] sm:$0xff]  ;;  %v451_v25 = vld [vmem:[%s2114_s7 + $0x190] sm:$0xff] }
  0x26   : > { %v453_v26 = vld [vmem:[%s2114_s7 + $0x1a0] sm:$0xff]  ;;  %450 = vst [vmem:[%s2119_s8 + $0xc0] sm:$0xff] %v449_v24  ;;  %452 = vst [vmem:[%s2119_s8 + $0xc8] sm:$0xff] %v451_v25  ;;  %v455_v27 = vld [vmem:[%s2114_s7 + $0x1b0] sm:$0xff] }
  0x27   : > { %454 = vst [vmem:[%s2119_s8 + $0xd0] sm:$0xff] %v453_v26  ;;  %v457_v28 = vld [vmem:[%s2114_s7 + $0x1c0] sm:$0xff]  ;;  %v459_v29 = vld [vmem:[%s2114_s7 + $0x1d0] sm:$0xff]  ;;  %456 = vst [vmem:[%s2119_s8 + $0xd8] sm:$0xff] %v455_v27 }
  0x28   : > { %458 = vst [vmem:[%s2119_s8 + $0xe0] sm:$0xff] %v457_v28  ;;  %460 = vst [vmem:[%s2119_s8 + $0xe8] sm:$0xff] %v459_v29  ;;  %v461_v30 = vld [vmem:[%s2114_s7 + $0x1e0] sm:$0xff]  ;;  %v463_v31 = vld [vmem:[%s2114_s7 + $0x1f0] sm:$0xff] }
  0x29   : > { %v465_v32 = vld [vmem:[%s2114_s7 + $0x200] sm:$0xff]  ;;  %462 = vst [vmem:[%s2119_s8 + $0xf0] sm:$0xff] %v461_v30  ;;  %464 = vst [vmem:[%s2119_s8 + $0xf8] sm:$0xff] %v463_v31  ;;  %v467_v33 = vld [vmem:[%s2114_s7 + $0x210] sm:$0xff] }
  0x2a   : > { %466 = vst [vmem:[%s2119_s8 + $0x100] sm:$0xff] %v465_v32  ;;  %v469_v34 = vld [vmem:[%s2114_s7 + $0x220] sm:$0xff]  ;;  %v471_v35 = vld [vmem:[%s2114_s7 + $0x230] sm:$0xff]  ;;  %468 = vst [vmem:[%s2119_s8 + $0x108] sm:$0xff] %v467_v33 }
  0x2b   : > { %470 = vst [vmem:[%s2119_s8 + $0x110] sm:$0xff] %v469_v34  ;;  %472 = vst [vmem:[%s2119_s8 + $0x118] sm:$0xff] %v471_v35  ;;  %v473_v36 = vld [vmem:[%s2114_s7 + $0x240] sm:$0xff]  ;;  %v475_v37 = vld [vmem:[%s2114_s7 + $0x250] sm:$0xff] }
  0x2c   : > { %v477_v38 = vld [vmem:[%s2114_s7 + $0x260] sm:$0xff]  ;;  %474 = vst [vmem:[%s2119_s8 + $0x120] sm:$0xff] %v473_v36  ;;  %476 = vst [vmem:[%s2119_s8 + $0x128] sm:$0xff] %v475_v37  ;;  %v479_v39 = vld [vmem:[%s2114_s7 + $0x270] sm:$0xff] }
  0x2d   : > { %478 = vst [vmem:[%s2119_s8 + $0x130] sm:$0xff] %v477_v38  ;;  %v481_v40 = vld [vmem:[%s2114_s7 + $0x280] sm:$0xff]  ;;  %v483_v41 = vld [vmem:[%s2114_s7 + $0x290] sm:$0xff]  ;;  %480 = vst [vmem:[%s2119_s8 + $0x138] sm:$0xff] %v479_v39 }
  0x2e   : > { %482 = vst [vmem:[%s2119_s8 + $0x140] sm:$0xff] %v481_v40  ;;  %484 = vst [vmem:[%s2119_s8 + $0x148] sm:$0xff] %v483_v41  ;;  %v485_v42 = vld [vmem:[%s2114_s7 + $0x2a0] sm:$0xff]  ;;  %v487_v43 = vld [vmem:[%s2114_s7 + $0x2b0] sm:$0xff] }
  0x2f   : > { %v489_v44 = vld [vmem:[%s2114_s7 + $0x2c0] sm:$0xff]  ;;  %486 = vst [vmem:[%s2119_s8 + $0x150] sm:$0xff] %v485_v42  ;;  %488 = vst [vmem:[%s2119_s8 + $0x158] sm:$0xff] %v487_v43  ;;  %v491_v45 = vld [vmem:[%s2114_s7 + $0x2d0] sm:$0xff] }
  0x30   : > { %490 = vst [vmem:[%s2119_s8 + $0x160] sm:$0xff] %v489_v44  ;;  %v493_v46 = vld [vmem:[%s2114_s7 + $0x2e0] sm:$0xff]  ;;  %v495_v47 = vld [vmem:[%s2114_s7 + $0x2f0] sm:$0xff]  ;;  %492 = vst [vmem:[%s2119_s8 + $0x168] sm:$0xff] %v491_v45 }
  0x31   : > { %494 = vst [vmem:[%s2119_s8 + $0x170] sm:$0xff] %v493_v46  ;;  %496 = vst [vmem:[%s2119_s8 + $0x178] sm:$0xff] %v495_v47  ;;  %v497_v48 = vld [vmem:[%s2114_s7 + $0x300] sm:$0xff]  ;;  %v499_v49 = vld [vmem:[%s2114_s7 + $0x310] sm:$0xff] }
  0x32   : > { %v501_v50 = vld [vmem:[%s2114_s7 + $0x320] sm:$0xff]  ;;  %498 = vst [vmem:[%s2119_s8 + $0x180] sm:$0xff] %v497_v48  ;;  %500 = vst [vmem:[%s2119_s8 + $0x188] sm:$0xff] %v499_v49  ;;  %v503_v51 = vld [vmem:[%s2114_s7 + $0x330] sm:$0xff] }
  0x33   : > { %502 = vst [vmem:[%s2119_s8 + $0x190] sm:$0xff] %v501_v50  ;;  %v505_v52 = vld [vmem:[%s2114_s7 + $0x340] sm:$0xff]  ;;  %v507_v53 = vld [vmem:[%s2114_s7 + $0x350] sm:$0xff]  ;;  %504 = vst [vmem:[%s2119_s8 + $0x198] sm:$0xff] %v503_v51 }
  0x34   : > { %506 = vst [vmem:[%s2119_s8 + $0x1a0] sm:$0xff] %v505_v52  ;;  %508 = vst [vmem:[%s2119_s8 + $0x1a8] sm:$0xff] %v507_v53  ;;  %v509_v54 = vld [vmem:[%s2114_s7 + $0x360] sm:$0xff]  ;;  %v511_v55 = vld [vmem:[%s2114_s7 + $0x370] sm:$0xff] }
  0x35   : > { %v513_v56 = vld [vmem:[%s2114_s7 + $0x380] sm:$0xff]  ;;  %510 = vst [vmem:[%s2119_s8 + $0x1b0] sm:$0xff] %v509_v54  ;;  %512 = vst [vmem:[%s2119_s8 + $0x1b8] sm:$0xff] %v511_v55  ;;  %v515_v57 = vld [vmem:[%s2114_s7 + $0x390] sm:$0xff] }
  0x36   : > { %514 = vst [vmem:[%s2119_s8 + $0x1c0] sm:$0xff] %v513_v56  ;;  %v517_v58 = vld [vmem:[%s2114_s7 + $0x3a0] sm:$0xff]  ;;  %v519_v59 = vld [vmem:[%s2114_s7 + $0x3b0] sm:$0xff]  ;;  %516 = vst [vmem:[%s2119_s8 + $0x1c8] sm:$0xff] %v515_v57 }
  0x37   : > { %518 = vst [vmem:[%s2119_s8 + $0x1d0] sm:$0xff] %v517_v58  ;;  %520 = vst [vmem:[%s2119_s8 + $0x1d8] sm:$0xff] %v519_v59  ;;  %v521_v60 = vld [vmem:[%s2114_s7 + $0x3c0] sm:$0xff]  ;;  %v523_v61 = vld [vmem:[%s2114_s7 + $0x3d0] sm:$0xff] }
  0x38   : > { %v525_v62 = vld [vmem:[%s2114_s7 + $0x3e0] sm:$0xff]  ;;  %522 = vst [vmem:[%s2119_s8 + $0x1e0] sm:$0xff] %v521_v60  ;;  %524 = vst [vmem:[%s2119_s8 + $0x1e8] sm:$0xff] %v523_v61  ;;  %v527_v63 = vld [vmem:[%s2114_s7 + $0x3f0] sm:$0xff] }
  0x39   : > { %526 = vst [vmem:[%s2119_s8 + $0x1f0] sm:$0xff] %v525_v62  ;;  %v529_v0 = vld [vmem:[%s2114_s7 + $0x400] sm:$0xff]  ;;  %v531_v1 = vld [vmem:[%s2114_s7 + $0x410] sm:$0xff]  ;;  %528 = vst [vmem:[%s2119_s8 + $0x1f8] sm:$0xff] %v527_v63 }
  0x3a   : > { %530 = vst [vmem:[%s2119_s8 + $0x200] sm:$0xff] %v529_v0  ;;  %532 = vst [vmem:[%s2119_s8 + $0x208] sm:$0xff] %v531_v1  ;;  %v533_v2 = vld [vmem:[%s2114_s7 + $0x420] sm:$0xff]  ;;  %v535_v3 = vld [vmem:[%s2114_s7 + $0x430] sm:$0xff] }
  0x3b   : > { %v537_v4 = vld [vmem:[%s2114_s7 + $0x440] sm:$0xff]  ;;  %534 = vst [vmem:[%s2119_s8 + $0x210] sm:$0xff] %v533_v2  ;;  %536 = vst [vmem:[%s2119_s8 + $0x218] sm:$0xff] %v535_v3  ;;  %v539_v5 = vld [vmem:[%s2114_s7 + $0x450] sm:$0xff] }
  0x3c   : > { %538 = vst [vmem:[%s2119_s8 + $0x220] sm:$0xff] %v537_v4  ;;  %v541_v6 = vld [vmem:[%s2114_s7 + $0x460] sm:$0xff]  ;;  %v543_v7 = vld [vmem:[%s2114_s7 + $0x470] sm:$0xff]  ;;  %540 = vst [vmem:[%s2119_s8 + $0x228] sm:$0xff] %v539_v5 }
  0x3d   : > { %542 = vst [vmem:[%s2119_s8 + $0x230] sm:$0xff] %v541_v6  ;;  %544 = vst [vmem:[%s2119_s8 + $0x238] sm:$0xff] %v543_v7  ;;  %v545_v8 = vld [vmem:[%s2114_s7 + $0x480] sm:$0xff]  ;;  %v547_v9 = vld [vmem:[%s2114_s7 + $0x490] sm:$0xff] }
  0x3e   : > { %v549_v10 = vld [vmem:[%s2114_s7 + $0x4a0] sm:$0xff]  ;;  %546 = vst [vmem:[%s2119_s8 + $0x240] sm:$0xff] %v545_v8  ;;  %548 = vst [vmem:[%s2119_s8 + $0x248] sm:$0xff] %v547_v9  ;;  %v551_v11 = vld [vmem:[%s2114_s7 + $0x4b0] sm:$0xff] }
  0x3f   : > { %550 = vst [vmem:[%s2119_s8 + $0x250] sm:$0xff] %v549_v10  ;;  %v553_v12 = vld [vmem:[%s2114_s7 + $0x4c0] sm:$0xff]  ;;  %v555_v13 = vld [vmem:[%s2114_s7 + $0x4d0] sm:$0xff]  ;;  %552 = vst [vmem:[%s2119_s8 + $0x258] sm:$0xff] %v551_v11 }
  0x40   : > { %554 = vst [vmem:[%s2119_s8 + $0x260] sm:$0xff] %v553_v12  ;;  %556 = vst [vmem:[%s2119_s8 + $0x268] sm:$0xff] %v555_v13  ;;  %v557_v14 = vld [vmem:[%s2114_s7 + $0x4e0] sm:$0xff]  ;;  %v559_v15 = vld [vmem:[%s2114_s7 + $0x4f0] sm:$0xff] }
  0x41   : > { %v561_v16 = vld [vmem:[%s2114_s7 + $0x500] sm:$0xff]  ;;  %558 = vst [vmem:[%s2119_s8 + $0x270] sm:$0xff] %v557_v14  ;;  %560 = vst [vmem:[%s2119_s8 + $0x278] sm:$0xff] %v559_v15  ;;  %v563_v17 = vld [vmem:[%s2114_s7 + $0x510] sm:$0xff] }
  0x42   : > { %562 = vst [vmem:[%s2119_s8 + $0x280] sm:$0xff] %v561_v16  ;;  %v565_v18 = vld [vmem:[%s2114_s7 + $0x520] sm:$0xff]  ;;  %v567_v19 = vld [vmem:[%s2114_s7 + $0x530] sm:$0xff]  ;;  %564 = vst [vmem:[%s2119_s8 + $0x288] sm:$0xff] %v563_v17 }
  0x43   : > { %566 = vst [vmem:[%s2119_s8 + $0x290] sm:$0xff] %v565_v18  ;;  %568 = vst [vmem:[%s2119_s8 + $0x298] sm:$0xff] %v567_v19  ;;  %v569_v20 = vld [vmem:[%s2114_s7 + $0x540] sm:$0xff]  ;;  %v571_v21 = vld [vmem:[%s2114_s7 + $0x550] sm:$0xff] }
  0x44   : > { %v573_v22 = vld [vmem:[%s2114_s7 + $0x560] sm:$0xff]  ;;  %570 = vst [vmem:[%s2119_s8 + $0x2a0] sm:$0xff] %v569_v20  ;;  %572 = vst [vmem:[%s2119_s8 + $0x2a8] sm:$0xff] %v571_v21  ;;  %v575_v23 = vld [vmem:[%s2114_s7 + $0x570] sm:$0xff] }
  0x45   : > { %574 = vst [vmem:[%s2119_s8 + $0x2b0] sm:$0xff] %v573_v22  ;;  %v577_v24 = vld [vmem:[%s2114_s7 + $0x580] sm:$0xff]  ;;  %v579_v25 = vld [vmem:[%s2114_s7 + $0x590] sm:$0xff]  ;;  %576 = vst [vmem:[%s2119_s8 + $0x2b8] sm:$0xff] %v575_v23 }
  0x46   : > { %578 = vst [vmem:[%s2119_s8 + $0x2c0] sm:$0xff] %v577_v24  ;;  %580 = vst [vmem:[%s2119_s8 + $0x2c8] sm:$0xff] %v579_v25  ;;  %v581_v26 = vld [vmem:[%s2114_s7 + $0x5a0] sm:$0xff]  ;;  %v583_v27 = vld [vmem:[%s2114_s7 + $0x5b0] sm:$0xff] }
  0x47   : > { %v585_v28 = vld [vmem:[%s2114_s7 + $0x5c0] sm:$0xff]  ;;  %582 = vst [vmem:[%s2119_s8 + $0x2d0] sm:$0xff] %v581_v26  ;;  %584 = vst [vmem:[%s2119_s8 + $0x2d8] sm:$0xff] %v583_v27  ;;  %v587_v29 = vld [vmem:[%s2114_s7 + $0x5d0] sm:$0xff] }
  0x48   : > { %586 = vst [vmem:[%s2119_s8 + $0x2e0] sm:$0xff] %v585_v28  ;;  %v589_v30 = vld [vmem:[%s2114_s7 + $0x5e0] sm:$0xff]  ;;  %v591_v31 = vld [vmem:[%s2114_s7 + $0x5f0] sm:$0xff]  ;;  %588 = vst [vmem:[%s2119_s8 + $0x2e8] sm:$0xff] %v587_v29 }
  0x49   : > { %590 = vst [vmem:[%s2119_s8 + $0x2f0] sm:$0xff] %v589_v30  ;;  %592 = vst [vmem:[%s2119_s8 + $0x2f8] sm:$0xff] %v591_v31 }
  0x4a PF: > { %p1586_p7 = scmp.ge.s32.totalorder %s2031_s18, 1  ;;  %p605_p8 = scmp.lt.s32.totalorder %s2031_s18, 19 }
  0x4c   : > { %p606_p9 = pnand %p1586_p7, %p605_p8 }
  0x4d   : > { %s612_s9 = sand.u32 (!%p606_p9), 1, %s2007_s12   ;;  %s653_s10 = smul.u32 (!%p606_p9), 3, %s2015_s14 }
  0x4e   : > { %609 = sbr.rel (%p606_p9) target bundleno = 456 (0x1c8), region = 66  ;;  %s1589_s21 = sshll.u32 (!%p606_p9), %s2019_s15, 1 }
  0x4f   : > { %s1769_s11 = smul.u32 (!%p606_p9), 768, %s612_s9  ;;  %p654_p10 = scmp.lt.s32.totalorder (!%p606_p9), %s653_s10, 26 }
  0x50   : > { %p667_p11 = scmp.lt.s32.totalorder (!%p606_p9), %s1589_s21, 3  ;;  %p1592_p12 = scmp.ne.s32.totalorder (!%p606_p9), %s2015_s14, 0 }
  0x51   : > { %s2332_s5 = scalar_lea.vmem (!%p606_p9), [#allocation3], %s1769_s11 }
  0x55   : > { %s2485_s10 = smov (!%p654_p10, %s653_s10), 26  ;;  %s2487_s21 = smov (!%p667_p11, %s1589_s21), 3 }
  0x56   : > { %s1766_s22 = sshll.u32 %s2485_s10, 3  ;;  %s669_s12 = scalar_lea.vmem %s2470_s2, %s2487_s21  ;;  %v2033_v32 = vmov (!%p1592_p12), 0.0  }
  0x57   : > { %s2320_s26 = scalar_lea.vmem %s2468_s0, %s1766_s22  ;;  %s1591_s29 = sshll.u32 %s2487_s21, 2  ;;  %685 = vst [vmem:[#allocation2] sm:$0xff] (!%p1592_p12), %v2033_v32  ;;  %686 = vst [vmem:[#allocation2 + $0x8] sm:$0xff] (!%p1592_p12), %v2033_v32 }
  0x58   : > { %s2330_s4 = scalar_lea.vmem %s2471_s3, %s1591_s29  ;;  %684 = sbr.rel (%p1592_p12) target bundleno = 95 (0x5f), region = 74 }
  0x5f PF: > { %v1827_v33 = vld [vmem:[%s2332_s5 + $0x104] ss:$8 sps:$4 sm:$0xff]   ;;  %v1831_v35 = vld [vmem:[%s2332_s5 + $0x100] ss:$8 sps:$4 sm:$0xff]   ;;  %v1833_v37 = vld [vmem:[%s2332_s5 + $0x114] ss:$8 sps:$4 sm:$0xff]  }
  0x60   : > { %v1829_v34 = vld [vmem:[%s2332_s5 + $0x4] ss:$8 sps:$4 sm:$0xff]   ;;  %922 = vmatprep.subr.bf16.mxu0 %v1827_v33  ;;  %v1832_v36 = vld [vmem:[%s2332_s5] ss:$8 sps:$4 sm:$0xff]   ;;  %v1835_v38 = vld [vmem:[%s2332_s5 + $0x14] ss:$8 sps:$4 sm:$0xff]  }
  0x61   : > { %1130 = vmatprep.subr.bf16.mxu1 %v1829_v34  ;;  %923 = vmatpush1.bf16.msra.mxu0 %v1831_v35  ;;  %v1837_v39 = vld [vmem:[%s2332_s5 + $0x110] ss:$8 sps:$4 sm:$0xff]   ;;  %v1839_v41 = vld [vmem:[%s2332_s5 + $0x124] ss:$8 sps:$4 sm:$0xff]   ;;  %v1843_v43 = vld [vmem:[%s2332_s5 + $0x120] ss:$8 sps:$4 sm:$0xff]  }
  0x62   : > { %1131 = vmatpush1.bf16.msra.mxu1 %v1832_v36  ;;  %924 = vmatprep.subr.bf16.mxu0 %v1833_v37  ;;  %v1838_v40 = vld [vmem:[%s2332_s5 + $0x10] ss:$8 sps:$4 sm:$0xff]   ;;  %v1841_v42 = vld [vmem:[%s2332_s5 + $0x24] ss:$8 sps:$4 sm:$0xff]   ;;  %v1844_v44 = vld [vmem:[%s2332_s5 + $0x20] ss:$8 sps:$4 sm:$0xff]  }
  0x63   : > { %1132 = vmatprep.subr.bf16.mxu1 %v1835_v38  ;;  %v1845_v45 = vld [vmem:[%s2332_s5 + $0x134] ss:$8 sps:$4 sm:$0xff]   ;;  %v1849_v47 = vld [vmem:[%s2332_s5 + $0x130] ss:$8 sps:$4 sm:$0xff]   ;;  %v1851_v49 = vld [vmem:[%s2332_s5 + $0x144] ss:$8 sps:$4 sm:$0xff]  }
  0x64   : > { %v1847_v46 = vld [vmem:[%s2332_s5 + $0x34] ss:$8 sps:$4 sm:$0xff]   ;;  %v1850_v48 = vld [vmem:[%s2332_s5 + $0x30] ss:$8 sps:$4 sm:$0xff]   ;;  %v1853_v50 = vld [vmem:[%s2332_s5 + $0x44] ss:$8 sps:$4 sm:$0xff]  }
  0x65   : > { %925 = vmatpush1.bf16.msra.mxu0 %v1837_v39  ;;  %v1855_v51 = vld [vmem:[%s2332_s5 + $0x140] ss:$8 sps:$4 sm:$0xff]   ;;  %v1857_v53 = vld [vmem:[%s2332_s5 + $0x154] ss:$8 sps:$4 sm:$0xff]   ;;  %v1861_v55 = vld [vmem:[%s2332_s5 + $0x150] ss:$8 sps:$4 sm:$0xff]  }
  0x66   : > { %1133 = vmatpush1.bf16.msra.mxu1 %v1838_v40  ;;  %926 = vmatprep.subr.bf16.mxu0 %v1839_v41  ;;  %v1856_v52 = vld [vmem:[%s2332_s5 + $0x40] ss:$8 sps:$4 sm:$0xff]   ;;  %v1859_v54 = vld [vmem:[%s2332_s5 + $0x54] ss:$8 sps:$4 sm:$0xff]   ;;  %v1862_v56 = vld [vmem:[%s2332_s5 + $0x50] ss:$8 sps:$4 sm:$0xff]  }
  0x67   : > { %1134 = vmatprep.subr.bf16.mxu1 %v1841_v42  ;;  %v1863_v57 = vld [vmem:[%s2332_s5 + $0x164] ss:$8 sps:$4 sm:$0xff]   ;;  %v1867_v59 = vld [vmem:[%s2332_s5 + $0x160] ss:$8 sps:$4 sm:$0xff]   ;;  %v1869_v61 = vld [vmem:[%s2332_s5 + $0x174] ss:$8 sps:$4 sm:$0xff]  }
  0x68   : > { %v1865_v58 = vld [vmem:[%s2332_s5 + $0x64] ss:$8 sps:$4 sm:$0xff]   ;;  %v1868_v60 = vld [vmem:[%s2332_s5 + $0x60] ss:$8 sps:$4 sm:$0xff]   ;;  %v1871_v62 = vld [vmem:[%s2332_s5 + $0x74] ss:$8 sps:$4 sm:$0xff]  }
  0x69   : > { %927 = vmatpush1.bf16.msra.mxu0 %v1843_v43  ;;  %v1873_v63 = vld [vmem:[%s2332_s5 + $0x170] ss:$8 sps:$4 sm:$0xff]   ;;  %v1875_v1 = vld [vmem:[%s2332_s5 + $0x184] ss:$8 sps:$4 sm:$0xff]   ;;  %v1879_v3 = vld [vmem:[%s2332_s5 + $0x180] ss:$8 sps:$4 sm:$0xff]  }
  0x6a   : > { %1135 = vmatpush1.bf16.msra.mxu1 %v1844_v44  ;;  %928 = vmatprep.subr.bf16.mxu0 %v1845_v45  ;;  %v1874_v0 = vld [vmem:[%s2332_s5 + $0x70] ss:$8 sps:$4 sm:$0xff]   ;;  %v1877_v2 = vld [vmem:[%s2332_s5 + $0x84] ss:$8 sps:$4 sm:$0xff]   ;;  %v1880_v4 = vld [vmem:[%s2332_s5 + $0x80] ss:$8 sps:$4 sm:$0xff]  }
  0x6b   : > { %1136 = vmatprep.subr.bf16.mxu1 %v1847_v46  ;;  %v1881_v5 = vld [vmem:[%s2332_s5 + $0x194] ss:$8 sps:$4 sm:$0xff]   ;;  %v1885_v7 = vld [vmem:[%s2332_s5 + $0x190] ss:$8 sps:$4 sm:$0xff]   ;;  %v1887_v9 = vld [vmem:[%s2332_s5 + $0x1a4] ss:$8 sps:$4 sm:$0xff]  }
  0x6c   : > { %v1883_v6 = vld [vmem:[%s2332_s5 + $0x94] ss:$8 sps:$4 sm:$0xff]   ;;  %v1886_v8 = vld [vmem:[%s2332_s5 + $0x90] ss:$8 sps:$4 sm:$0xff]   ;;  %v1889_v10 = vld [vmem:[%s2332_s5 + $0xa4] ss:$8 sps:$4 sm:$0xff]  }
  0x6d   : > { %929 = vmatpush1.bf16.msra.mxu0 %v1849_v47  ;;  %v1891_v11 = vld [vmem:[%s2332_s5 + $0x1a0] ss:$8 sps:$4 sm:$0xff]   ;;  %v1893_v13 = vld [vmem:[%s2332_s5 + $0x1b4] ss:$8 sps:$4 sm:$0xff]   ;;  %v1897_v18 = vld [vmem:[%s2332_s5 + $0x1b0] ss:$8 sps:$4 sm:$0xff]  }
  0x6e   : > { %1137 = vmatpush1.bf16.msra.mxu1 %v1850_v48  ;;  %930 = vmatprep.subr.bf16.mxu0 %v1851_v49  ;;  %v1892_v12 = vld [vmem:[%s2332_s5 + $0xa0] ss:$8 sps:$4 sm:$0xff]   ;;  %v1895_v14 = vld [vmem:[%s2332_s5 + $0xb4] ss:$8 sps:$4 sm:$0xff]   ;;  %v1898_v19 = vld [vmem:[%s2332_s5 + $0xb0] ss:$8 sps:$4 sm:$0xff]  }
  0x6f   : > { %1138 = vmatprep.subr.bf16.mxu1 %v1853_v50  ;;  %v1593_v15 = vld [vmem:[%s2320_s26 + $0x8] sm:$0xff]  ;;  %v687_v17 = vld [vmem:[%s2320_s26] sm:$0xff]  ;;  %v1899_v21 = vld [vmem:[%s2332_s5 + $0x1c4] ss:$8 sps:$4 sm:$0xff]   ;;  %p1761_p13 = scmp.ne.s32.totalorder %s2015_s14, 8 }
  0x70   : > { %v1627_v16 = vcombine.high %v1593_v15, %v1593_v15  ;;  %v1661_v20 = vcombine.high %v687_v17, %v687_v17  ;;  %v1901_v22 = vld [vmem:[%s2332_s5 + $0xc4] ss:$8 sps:$4 sm:$0xff]   ;;  %v1903_v23 = vld [vmem:[%s2332_s5 + $0x1c0] ss:$8 sps:$4 sm:$0xff]   ;;  %v1905_v25 = vld [vmem:[%s2332_s5 + $0x1d4] ss:$8 sps:$4 sm:$0xff]   ;;  %v1626_v38 = vcombine.low %v1593_v15, %v1593_v15  ;;  %v1660_v39 = vcombine.low %v687_v17, %v687_v17 }
  0x71   : > { %931 = vmatpush1.bf16.msra.mxu0 %v1855_v51  ;;  %v1904_v24 = vld [vmem:[%s2332_s5 + $0xc0] ss:$8 sps:$4 sm:$0xff]   ;;  %v1907_v26 = vld [vmem:[%s2332_s5 + $0xd4] ss:$8 sps:$4 sm:$0xff]   ;;  %v1909_v27 = vld [vmem:[%s2332_s5 + $0x1d0] ss:$8 sps:$4 sm:$0xff]  }
  0x72   : > { %1139 = vmatpush1.bf16.msra.mxu1 %v1856_v52  ;;  %932 = vmatprep.subr.bf16.mxu0 %v1857_v53  ;;  %v1910_v28 = vld [vmem:[%s2332_s5 + $0xd0] ss:$8 sps:$4 sm:$0xff]   ;;  %v1911_v29 = vld [vmem:[%s2332_s5 + $0x1e4] ss:$8 sps:$4 sm:$0xff]   ;;  %v1915_v31 = vld [vmem:[%s2332_s5 + $0x1e0] ss:$8 sps:$4 sm:$0xff]  }
  0x73   : > { %1140 = vmatprep.subr.bf16.mxu1 %v1859_v54  ;;  %954 = vmatprep.mubr.bf16.mxu0 %v1627_v16  ;;  %v1913_v30 = vld [vmem:[%s2332_s5 + $0xe4] ss:$8 sps:$4 sm:$0xff]   ;;  %v1916_v32 = vld [vmem:[%s2332_s5 + $0xe0] ss:$8 sps:$4 sm:$0xff]   ;;  %v1917_v33 = vld [vmem:[%s2332_s5 + $0x1f4] ss:$8 sps:$4 sm:$0xff]  }
  0x74   : > { %1162 = vmatprep.mubr.bf16.mxu1 %v1661_v20  ;;  %v1919_v34 = vld [vmem:[%s2332_s5 + $0xf4] ss:$8 sps:$4 sm:$0xff]   ;;  %v1921_v35 = vld [vmem:[%s2332_s5 + $0x1f0] ss:$8 sps:$4 sm:$0xff]   ;;  %v1929_v37 = vld [vmem:[%s2332_s5 + $0x204] ss:$8 sps:$4 sm:$0xff]  }
  0x75   : > { %933 = vmatpush1.bf16.msra.mxu0 %v1861_v55  ;;  %v1922_v36 = vld [vmem:[%s2332_s5 + $0xf0] ss:$8 sps:$4 sm:$0xff]   ;;  %v1927_v40 = vld [vmem:[%s2332_s5 + $0x200] ss:$8 sps:$4 sm:$0xff]   ;;  %v1932_v42 = vld [vmem:[%s2332_s5 + $0x214] ss:$8 sps:$4 sm:$0xff]  }
  0x76   : > { %1141 = vmatpush1.bf16.msra.mxu1 %v1862_v56  ;;  %934 = vmatprep.subr.bf16.mxu0 %v1863_v57  ;;  %v2404_v41 = vld [vmem:[%s2320_s26 + $0x10] sm:$0xff]  ;;  %v1930_v44 = vld [vmem:[%s2332_s5 + $0x210] ss:$8 sps:$4 sm:$0xff]   ;;  %v1938_v47 = vld [vmem:[%s2332_s5 + $0x234] ss:$8 sps:$4 sm:$0xff]  }
  0x77   : > { %1142 = vmatprep.subr.bf16.mxu1 %v1865_v58  ;;  %v1728_v43 = vcombine.high %v2404_v41, %v2404_v41  ;;  %v1935_v45 = vld [vmem:[%s2332_s5 + $0x224] ss:$8 sps:$4 sm:$0xff]   ;;  %v1933_v46 = vld [vmem:[%s2332_s5 + $0x220] ss:$8 sps:$4 sm:$0xff]   ;;  %v1936_v48 = vld [vmem:[%s2332_s5 + $0x230] ss:$8 sps:$4 sm:$0xff]  }
  0x78   : > { %v1941_v49 = vld [vmem:[%s2332_s5 + $0x244] ss:$8 sps:$4 sm:$0xff]   ;;  %v1939_v50 = vld [vmem:[%s2332_s5 + $0x240] ss:$8 sps:$4 sm:$0xff]   ;;  %v1944_v51 = vld [vmem:[%s2332_s5 + $0x254] ss:$8 sps:$4 sm:$0xff]  }
  0x79   : > { %935 = vmatpush1.bf16.msra.mxu0 %v1867_v59  ;;  %v1942_v52 = vld [vmem:[%s2332_s5 + $0x250] ss:$8 sps:$4 sm:$0xff]   ;;  %v1947_v53 = vld [vmem:[%s2332_s5 + $0x264] ss:$8 sps:$4 sm:$0xff]   ;;  %v1945_v54 = vld [vmem:[%s2332_s5 + $0x260] ss:$8 sps:$4 sm:$0xff]  }
  0x7a   : > { %1143 = vmatpush1.bf16.msra.mxu1 %v1868_v60  ;;  %936 = vmatprep.subr.bf16.mxu0 %v1869_v61  ;;  %v1950_v55 = vld [vmem:[%s2332_s5 + $0x274] ss:$8 sps:$4 sm:$0xff]   ;;  %v1948_v56 = vld [vmem:[%s2332_s5 + $0x270] ss:$8 sps:$4 sm:$0xff]   ;;  %v1953_v57 = vld [vmem:[%s2332_s5 + $0x284] ss:$8 sps:$4 sm:$0xff]  }
  0x7b   : > { %1144 = vmatprep.subr.bf16.mxu1 %v1871_v62  ;;  %v1951_v58 = vld [vmem:[%s2332_s5 + $0x280] ss:$8 sps:$4 sm:$0xff]   ;;  %v1956_v59 = vld [vmem:[%s2332_s5 + $0x294] ss:$8 sps:$4 sm:$0xff]   ;;  %v1954_v60 = vld [vmem:[%s2332_s5 + $0x290] ss:$8 sps:$4 sm:$0xff]  }
  0x7c   : > { %v1959_v61 = vld [vmem:[%s2332_s5 + $0x2a4] ss:$8 sps:$4 sm:$0xff]   ;;  %v1957_v62 = vld [vmem:[%s2332_s5 + $0x2a0] ss:$8 sps:$4 sm:$0xff]  }
  0x7d   : > { %937 = vmatpush1.bf16.msra.mxu0 %v1873_v63  ;;  %v1962_v63 = vld [vmem:[%s2332_s5 + $0x2b4] ss:$8 sps:$4 sm:$0xff]  }
  0x7e   : > { %1145 = vmatpush1.bf16.msra.mxu1 %v1874_v0  ;;  %938 = vmatprep.subr.bf16.mxu0 %v1875_v1  ;;  %v1960_v0 = vld [vmem:[%s2332_s5 + $0x2b0] ss:$8 sps:$4 sm:$0xff]   ;;  %v1965_v1 = vld [vmem:[%s2332_s5 + $0x2c4] ss:$8 sps:$4 sm:$0xff]  }
  0x7f   : > { %1146 = vmatprep.subr.bf16.mxu1 %v1877_v2  ;;  %v1963_v2 = vld [vmem:[%s2332_s5 + $0x2c0] ss:$8 sps:$4 sm:$0xff]  }
  0x81   : > { %939 = vmatpush1.bf16.msra.mxu0 %v1879_v3  ;;  %v1968_v3 = vld [vmem:[%s2332_s5 + $0x2d4] ss:$8 sps:$4 sm:$0xff]  }
  0x82   : > { %1147 = vmatpush1.bf16.msra.mxu1 %v1880_v4  ;;  %940 = vmatprep.subr.bf16.mxu0 %v1881_v5  ;;  %v1966_v4 = vld [vmem:[%s2332_s5 + $0x2d0] ss:$8 sps:$4 sm:$0xff]   ;;  %v1971_v5 = vld [vmem:[%s2332_s5 + $0x2e4] ss:$8 sps:$4 sm:$0xff]  }
  0x83   : > { %1148 = vmatprep.subr.bf16.mxu1 %v1883_v6  ;;  %v1969_v6 = vld [vmem:[%s2332_s5 + $0x2e0] ss:$8 sps:$4 sm:$0xff]  }
  0x85   : > { %941 = vmatpush1.bf16.msra.mxu0 %v1885_v7  ;;  %v1974_v7 = vld [vmem:[%s2332_s5 + $0x2f4] ss:$8 sps:$4 sm:$0xff]  }
  0x86   : > { %1149 = vmatpush1.bf16.msra.mxu1 %v1886_v8  ;;  %942 = vmatprep.subr.bf16.mxu0 %v1887_v9  ;;  %v1972_v8 = vld [vmem:[%s2332_s5 + $0x2f0] ss:$8 sps:$4 sm:$0xff]   ;;  %v1727_v9 = vcombine.low %v2404_v41, %v2404_v41 }
  0x87   : > { %1150 = vmatprep.subr.bf16.mxu1 %v1889_v10 }
  0x89   : > { %943 = vmatpush1.bf16.msra.mxu0 %v1891_v11 }
  0x8a   : > { %1151 = vmatpush1.bf16.msra.mxu1 %v1892_v12  ;;  %944 = vmatprep.subr.bf16.mxu0 %v1893_v13 }
  0x8b   : > { %1152 = vmatprep.subr.bf16.mxu1 %v1895_v14 }
  0x8d   : > { %945 = vmatpush1.bf16.msra.mxu0 %v1897_v18 }
  0x8e   : > { %1153 = vmatpush1.bf16.msra.mxu1 %v1898_v19  ;;  %946 = vmatprep.subr.bf16.mxu0 %v1899_v21  ;;  %v1416_v21 = vld [vmem:[#allocation2] sm:$0xff] }
  0x8f   : > { %1154 = vmatprep.subr.bf16.mxu1 %v1901_v22 }
  0x91   : > { %947 = vmatpush1.bf16.msra.mxu0 %v1903_v23 }
  0x92   : > { %1155 = vmatpush1.bf16.msra.mxu1 %v1904_v24  ;;  %948 = vmatprep.subr.bf16.mxu0 %v1905_v25  ;;  %v1417_v24 = vld [vmem:[#allocation2 + $0x8] sm:$0xff] }
  0x93   : > { %1156 = vmatprep.subr.bf16.mxu1 %v1907_v26 }
  0x95   : > { %949 = vmatpush1.bf16.msra.mxu0 %v1909_v27 }
  0x96   : > { %1157 = vmatpush1.bf16.msra.mxu1 %v1910_v28  ;;  %950 = vmatprep.subr.bf16.mxu0 %v1911_v29 }
  0x97   : > { %1158 = vmatprep.subr.bf16.mxu1 %v1913_v30  ;;  %v1430_v30 = vlaneseq (!%p1761_p13) }
  0x99   : > { %951 = vmatpush1.bf16.msra.mxu0 %v1915_v31  ;;  %v1431_v31 = vshrl.u32 (!%p1761_p13), %v1430_v30, 7 }
  0x9a   : > { %1159 = vmatpush1.bf16.msra.mxu1 %v1916_v32  ;;  %952 = vmatprep.subr.bf16.mxu0 %v1917_v33  ;;  %v1428_v32 = vld [vmem:[%s669_s12] sm:$0x3] (!%p1761_p13) }
  0x9b   : > { %1160 = vmatprep.subr.bf16.mxu1 %v1919_v34  ;;  %v1432_v33 = vsub.s32 (!%p1761_p13), 0, %v1431_v31  ;;  %v1436_v34 = vsub.s32 (!%p1761_p13), 1, %v1431_v31 }
  0x9d   : > { %953 = vmatpush1.bf16.msra.mxu0 %v1921_v35 }
  0x9e   : > { %1161 = vmatpush1.bf16.msra.mxu1 %v1922_v36  ;;  %1373 = vmatprep.subr.bf16.mxu0 %v1929_v37  ;;  %v1433_v37 = vrot.slane (!%p1761_p13), %v1428_v32, %v1432_v33 }
  0xa0   : > { %955 = vmatmul.mubr.bf16.vlgmr.msra.gmra.mrb[0].mxu0 %v1626_v38  ;;  %v1437_v38 = vrot.slane (!%p1761_p13), %v1428_v32, %v1436_v34 }
  0xa1   : > { %1163 = vmatmul.mubr.bf16.vlgmr.msra.gmra.mrb[0].mxu1 %v1660_v39  ;;  %1374 = vmatpush1.bf16.msra.mxu0 %v1927_v40 }
  0xa2   : > { %1405 = vmatprep.mubr.bf16.mxu0 %v1728_v43  ;;  %1375 = vmatprep.subr.bf16.mxu0 %v1932_v42 }
  0xa5   : > { %1376 = vmatpush1.bf16.msra.mxu0 %v1930_v44 }
  0xa6   : > { %1377 = vmatprep.subr.bf16.mxu0 %v1935_v45 }
  0xa9   : > { %1378 = vmatpush1.bf16.msra.mxu0 %v1933_v46 }
  0xaa   : > { %1379 = vmatprep.subr.bf16.mxu0 %v1938_v47 }
  0xad   : > { %1380 = vmatpush1.bf16.msra.mxu0 %v1936_v48 }
  0xae   : > { %1381 = vmatprep.subr.bf16.mxu0 %v1941_v49 }
  0xb1   : > { %1382 = vmatpush1.bf16.msra.mxu0 %v1939_v50 }
  0xb2   : > { %1383 = vmatprep.subr.bf16.mxu0 %v1944_v51 }
  0xb5   : > { %1384 = vmatpush1.bf16.msra.mxu0 %v1942_v52 }
  0xb6   : > { %1385 = vmatprep.subr.bf16.mxu0 %v1947_v53 }
  0xb9   : > { %1386 = vmatpush1.bf16.msra.mxu0 %v1945_v54 }
  0xba   : > { %1387 = vmatprep.subr.bf16.mxu0 %v1950_v55 }
  0xbd   : > { %1388 = vmatpush1.bf16.msra.mxu0 %v1948_v56 }
  0xbe   : > { %1389 = vmatprep.subr.bf16.mxu0 %v1953_v57 }
  0xc1   : > { %1390 = vmatpush1.bf16.msra.mxu0 %v1951_v58 }
  0xc2   : > { %1391 = vmatprep.subr.bf16.mxu0 %v1956_v59 }
  0xc5   : > { %1392 = vmatpush1.bf16.msra.mxu0 %v1954_v60 }
  0xc6   : > { %1393 = vmatprep.subr.bf16.mxu0 %v1959_v61 }
  0xc9   : > { %1394 = vmatpush1.bf16.msra.mxu0 %v1957_v62 }
  0xca   : > { %1395 = vmatprep.subr.bf16.mxu0 %v1962_v63 }
  0xcd   : > { %1396 = vmatpush1.bf16.msra.mxu0 %v1960_v0 }
  0xce   : > { %1397 = vmatprep.subr.bf16.mxu0 %v1965_v1 }
  0xd1   : > { %1398 = vmatpush1.bf16.msra.mxu0 %v1963_v2 }
  0xd2   : > { %1399 = vmatprep.subr.bf16.mxu0 %v1968_v3 }
  0xd5   : > { %1400 = vmatpush1.bf16.msra.mxu0 %v1966_v4 }
  0xd6   : > { %1401 = vmatprep.subr.bf16.mxu0 %v1971_v5 }
  0xd9   : > { %1402 = vmatpush1.bf16.msra.mxu0 %v1969_v6 }
  0xda   : > { %1403 = vmatprep.subr.bf16.mxu0 %v1974_v7 }
  0xdd   : > { %1404 = vmatpush1.bf16.msra.mxu0 %v1972_v8 }
  0xe0   : > { %1406 = vmatmul.mubr.bf16.vlgmr.msra.gmra.mrb[4].mxu0 %v1727_v9 }
 0x173   : > { %v956_v10 = vpop.f32.mrb[0].mxu0 }
 0x174   : > { %v1164_v11 = vpop.f32.mrb[0].mxu1  ;;  %v958_v13 = vpop.f32.mrb[1].mxu0 }
 0x175   : > { %v1165_v12 = vadd.f32 %v1164_v11, %v956_v10  ;;  %v1166_v14 = vpop.f32.mrb[1].mxu1  ;;  %v960_v16 = vpop.f32.mrb[2].mxu0 }
 0x176   : > { %v1167_v15 = vadd.f32 %v1166_v14, %v958_v13  ;;  %v1168_v17 = vpop.f32.mrb[2].mxu1  ;;  %v961_v18 = vpop.f32.mrb[3].mxu0 }
 0x177   : > { %v1169_v19 = vpop.f32.mrb[3].mxu1 }
 0x1b3   : > { %v1407_v20 = vpop.f32.mrb[4].mxu0  ;;  %1425 = sbr.rel (%p1761_p13) target bundleno = 456 (0x1c8), region = 78 }
 0x1b4   : > { %v1414_v22 = vadd.f32 %v1407_v20, %v1165_v12  ;;  %v1409_v23 = vpop.f32.mrb[5].mxu0 }
 0x1b5   : > { %v1415_v25 = vadd.f32 %v1409_v23, %v1167_v15  ;;  %v1411_v26 = vpop.f32.mrb[6].mxu0 }
 0x1b6   : > { %v1418_v27 = vadd.f32 %v1416_v21, %v1414_v22  ;;  %v1412_v28 = vpop.f32.mrb[7].mxu0 }
 0x1b7   : > { %v1419_v29 = vadd.f32 %v1417_v24, %v1415_v25 }
 0x1b8   : > { %1420 = vst [vmem:[#allocation2] sm:$0xff] %v1418_v27 }
 0x1b9   : > { %1421 = vst [vmem:[#allocation2 + $0x8] sm:$0xff] %v1419_v29 }
 0x1bf   : > { %v1426_v35 = vld [vmem:[#allocation2] sm:$0xff] }
 0x1c0   : > { %v1427_v36 = vld [vmem:[#allocation2 + $0x8] sm:$0xff]  ;;  %v1440_v39 = vadd.f32 %v1433_v37, %v1426_v35 }
 0x1c1   : > { %v1441_v40 = vadd.f32 %v1437_v38, %v1427_v36 }
 0x1c2   : > { %v1442_v41 = vmax.f32 %v1440_v39, 0.0 }
 0x1c3   : > { %v1443_v42 = vmax.f32 %v1441_v40, 0.0 }
 0x1c5   : > { %v1767_v43 = vpack.c.bf16 %v1443_v42, %v1442_v41 }
 0x1c7   : > { %1452 = vst [vmem:[%s2330_s4] sm:$0xff] %v1767_v43 }
 0x1c8 PF: > { %s13_s18 = sadd.s32 1, %s2031_s18   ;;  %s2472_s12 = smov %s2011_s13 }
 0x1c9   : > { %p10_p0 = scmp.ge.s32.totalorder %s13_s18, 20   ;;  %s2473_s13 = smov %s2105_s25 }
 0x1ca   : > { %s2474_s14 = smov %s2023_s16  ;;  %s2475_s15 = smov %s2027_s17 }
 0x1cb   : > { %s2476_s16 = smov %s2479_s19  ;;  %s2477_s17 = smov %s2483_s20 }
 0x1cc   :  { %12 = sbr.rel (!%p10_p0) target bundleno = 4 (0x4), region = 123 }

// kernel: resnet3d_forward.26
= control target key start
LH: loop header
LB: loop body
LE: loop exit
PB: predicated region body
PF: predicated region fallthrough
CT: control target
= control target key end

     0   :  { %s1027_s12 = smov 0   ;;  %s1029_s13 = smov 0   ;;  %s1206_s0 = inlined_call_operand.vmem [shape: bf16[1,8,256], index: 0, kind: input, shape index: {}]   ;;  %s1207_s1 = inlined_call_operand.vmem [shape: bf16[1,256,512], index: 1, kind: input, shape index: {}]   ;;  %s1208_s2 = inlined_call_operand.vmem [shape: f32[1,512], index: 2, kind: input, shape index: {}]   ;;  %s1209_s3 = inlined_call_operand.vmem [shape: bf16[8,512], index: 3, kind: output, shape index: {}]  }
   0x1   :  { %s1031_s14 = smov 0   ;;  %s1033_s15 = smov 0  }
   0x2   :  { %s1035_s16 = smov 0  }
   0x3 LB: > { %s28_s17 = sadd.s32 1, %s1001_s15  ;;  %p76_p1 = scmp.ne.s32.totalorder %s993_s13, %s989_s12  ;;  %s1005_s16 = sphi %s1035_s16, %s13_s16   ;;  %s1001_s15 = sphi %s1033_s15, %s1213_s15   ;;  %s997_s14 = sphi %s1031_s14, %s1212_s14   ;;  %s993_s13 = sphi %s1029_s13, %s1211_s13   ;;  %s989_s12 = sphi %s1027_s12, %s1210_s12  }
   0x4   : > { %p30_p0 = scmp.ge.s32.totalorder %s28_s17, 2  ;;  %p77_p2 = scmp.eq.s32.totalorder %s1005_s16, 0 }
   0x5   : > { %s69_s19 = sadd.s32 1, %s993_s13  ;;  %p829_p5 = scmp.ge.s32.totalorder %s1005_s16, 2 }
   0x6   : > { %s1215_s17 = smov (%p30_p0, %s28_s17), 0  ;;  %p78_p3 = por %p77_p2, %p76_p1 }
   0x7   : > { %s65_s18 = ssub.s32 %s1001_s15, %s1215_s17  ;;  %168 = sbr.rel (%p829_p5) target bundleno = 34 (0x22), region = 20 }
   0x8   : > { %p67_p4 = scmp.eq.s32.totalorder %s65_s18, 0 }
   0xa   : > { %s1062_s20 = scalar_select %p67_p4, %s993_s13, %s69_s19  }
   0xe   : > { %171 = sbr.rel (!%p78_p3) target bundleno = 34 (0x22), region = 24  ;;  %s173_s21 = sand.u32 (%p78_p3), 1, %s993_s13  }
   0xf   : > { %s875_s22 = sshll.u32 (%p78_p3), %s1001_s15, 3  ;;  %s830_s23 = sshll.u32 (%p78_p3), %s173_s21, 8 }
  0x10   : > { %s1070_s26 = scalar_lea.vmem (%p78_p3), %s1207_s1, %s875_s22  ;;  %s1075_s27 = scalar_lea.vmem (%p78_p3), [#allocation3], %s830_s23 }
  0x11   : > { %v270_v0 = vld [vmem:[%s1070_s26] sm:$0xff] (%p78_p3)  ;;  %v272_v1 = vld [vmem:[%s1070_s26 + $0x10] sm:$0xff] (%p78_p3) }
  0x12   : > { %v274_v2 = vld [vmem:[%s1070_s26 + $0x20] sm:$0xff] (%p78_p3)  ;;  %271 = vst [vmem:[%s1075_s27] sm:$0xff] (%p78_p3), %v270_v0  ;;  %273 = vst [vmem:[%s1075_s27 + $0x8] sm:$0xff] (%p78_p3), %v272_v1  ;;  %v276_v3 = vld [vmem:[%s1070_s26 + $0x30] sm:$0xff] (%p78_p3) }
  0x13   : > { %275 = vst [vmem:[%s1075_s27 + $0x10] sm:$0xff] (%p78_p3), %v274_v2  ;;  %v278_v4 = vld [vmem:[%s1070_s26 + $0x40] sm:$0xff] (%p78_p3)  ;;  %v280_v5 = vld [vmem:[%s1070_s26 + $0x50] sm:$0xff] (%p78_p3)  ;;  %277 = vst [vmem:[%s1075_s27 + $0x18] sm:$0xff] (%p78_p3), %v276_v3 }
  0x14   : > { %279 = vst [vmem:[%s1075_s27 + $0x20] sm:$0xff] (%p78_p3), %v278_v4  ;;  %281 = vst [vmem:[%s1075_s27 + $0x28] sm:$0xff] (%p78_p3), %v280_v5  ;;  %v282_v6 = vld [vmem:[%s1070_s26 + $0x60] sm:$0xff] (%p78_p3)  ;;  %v284_v7 = vld [vmem:[%s1070_s26 + $0x70] sm:$0xff] (%p78_p3) }
  0x15   : > { %v286_v8 = vld [vmem:[%s1070_s26 + $0x80] sm:$0xff]  ;;  %283 = vst [vmem:[%s1075_s27 + $0x30] sm:$0xff] %v282_v6  ;;  %285 = vst [vmem:[%s1075_s27 + $0x38] sm:$0xff] %v284_v7  ;;  %v288_v9 = vld [vmem:[%s1070_s26 + $0x90] sm:$0xff] }
  0x16   : > { %287 = vst [vmem:[%s1075_s27 + $0x40] sm:$0xff] %v286_v8  ;;  %v290_v10 = vld [vmem:[%s1070_s26 + $0xa0] sm:$0xff]  ;;  %v292_v11 = vld [vmem:[%s1070_s26 + $0xb0] sm:$0xff]  ;;  %289 = vst [vmem:[%s1075_s27 + $0x48] sm:$0xff] %v288_v9 }
  0x17   : > { %291 = vst [vmem:[%s1075_s27 + $0x50] sm:$0xff] %v290_v10  ;;  %293 = vst [vmem:[%s1075_s27 + $0x58] sm:$0xff] %v292_v11  ;;  %v294_v12 = vld [vmem:[%s1070_s26 + $0xc0] sm:$0xff]  ;;  %v296_v13 = vld [vmem:[%s1070_s26 + $0xd0] sm:$0xff] }
  0x18   : > { %v298_v14 = vld [vmem:[%s1070_s26 + $0xe0] sm:$0xff]  ;;  %295 = vst [vmem:[%s1075_s27 + $0x60] sm:$0xff] %v294_v12  ;;  %297 = vst [vmem:[%s1075_s27 + $0x68] sm:$0xff] %v296_v13  ;;  %v300_v15 = vld [vmem:[%s1070_s26 + $0xf0] sm:$0xff] }
  0x19   : > { %299 = vst [vmem:[%s1075_s27 + $0x70] sm:$0xff] %v298_v14  ;;  %v302_v16 = vld [vmem:[%s1070_s26 + $0x100] sm:$0xff]  ;;  %v304_v17 = vld [vmem:[%s1070_s26 + $0x110] sm:$0xff]  ;;  %301 = vst [vmem:[%s1075_s27 + $0x78] sm:$0xff] %v300_v15 }
  0x1a   : > { %303 = vst [vmem:[%s1075_s27 + $0x80] sm:$0xff] %v302_v16  ;;  %305 = vst [vmem:[%s1075_s27 + $0x88] sm:$0xff] %v304_v17  ;;  %v306_v18 = vld [vmem:[%s1070_s26 + $0x120] sm:$0xff]  ;;  %v308_v19 = vld [vmem:[%s1070_s26 + $0x130] sm:$0xff] }
  0x1b   : > { %v310_v20 = vld [vmem:[%s1070_s26 + $0x140] sm:$0xff]  ;;  %307 = vst [vmem:[%s1075_s27 + $0x90] sm:$0xff] %v306_v18  ;;  %309 = vst [vmem:[%s1075_s27 + $0x98] sm:$0xff] %v308_v19  ;;  %v312_v21 = vld [vmem:[%s1070_s26 + $0x150] sm:$0xff] }
  0x1c   : > { %311 = vst [vmem:[%s1075_s27 + $0xa0] sm:$0xff] %v310_v20  ;;  %v314_v22 = vld [vmem:[%s1070_s26 + $0x160] sm:$0xff]  ;;  %v316_v23 = vld [vmem:[%s1070_s26 + $0x170] sm:$0xff]  ;;  %313 = vst [vmem:[%s1075_s27 + $0xa8] sm:$0xff] %v312_v21 }
  0x1d   : > { %315 = vst [vmem:[%s1075_s27 + $0xb0] sm:$0xff] %v314_v22  ;;  %317 = vst [vmem:[%s1075_s27 + $0xb8] sm:$0xff] %v316_v23  ;;  %v318_v24 = vld [vmem:[%s1070_s26 + $0x180] sm:$0xff]  ;;  %v320_v25 = vld [vmem:[%s1070_s26 + $0x190] sm:$0xff] }
  0x1e   : > { %v322_v26 = vld [vmem:[%s1070_s26 + $0x1a0] sm:$0xff]  ;;  %319 = vst [vmem:[%s1075_s27 + $0xc0] sm:$0xff] %v318_v24  ;;  %321 = vst [vmem:[%s1075_s27 + $0xc8] sm:$0xff] %v320_v25  ;;  %v324_v27 = vld [vmem:[%s1070_s26 + $0x1b0] sm:$0xff] }
  0x1f   : > { %323 = vst [vmem:[%s1075_s27 + $0xd0] sm:$0xff] %v322_v26  ;;  %v326_v28 = vld [vmem:[%s1070_s26 + $0x1c0] sm:$0xff]  ;;  %v328_v29 = vld [vmem:[%s1070_s26 + $0x1d0] sm:$0xff]  ;;  %325 = vst [vmem:[%s1075_s27 + $0xd8] sm:$0xff] %v324_v27 }
  0x20   : > { %327 = vst [vmem:[%s1075_s27 + $0xe0] sm:$0xff] %v326_v28  ;;  %329 = vst [vmem:[%s1075_s27 + $0xe8] sm:$0xff] %v328_v29  ;;  %v330_v30 = vld [vmem:[%s1070_s26 + $0x1e0] sm:$0xff]  ;;  %v332_v31 = vld [vmem:[%s1070_s26 + $0x1f0] sm:$0xff] }
  0x21   : > { %331 = vst [vmem:[%s1075_s27 + $0xf0] sm:$0xff] %v330_v30  ;;  %333 = vst [vmem:[%s1075_s27 + $0xf8] sm:$0xff] %v332_v31 }
  0x22 PF: > { %p833_p6 = scmp.ge.s32.totalorder %s1005_s16, 1  ;;  %p346_p7 = scmp.lt.s32.totalorder %s1005_s16, 3 }
  0x24   : > { %p347_p8 = pnand %p833_p6, %p346_p7 }
  0x25   : > { %s353_s28 = sand.u32 (!%p347_p8), 1, %s989_s12   ;;  %v1144_v32 = vld [vmem:[%s1206_s0] sm:$0xff] (!%p347_p8)  ;;  %s835_s6 = sshll.u32 (!%p347_p8), %s997_s14, 1  ;;  %v678_v3 = vlaneseq (!%p347_p8) }
  0x26   : > { %350 = sbr.rel (%p347_p8) target bundleno = 323 (0x143), region = 66  ;;  %s834_s4 = sshll.u32 (!%p347_p8), %s353_s28, 8  ;;  %v839_v33 = vcombine.high (!%p347_p8), %v1144_v32, %v1144_v32  ;;  %v838_v2 = vcombine.low (!%p347_p8), %v1144_v32, %v1144_v32 }
  0x27   : > { %s1148_s5 = scalar_lea.vmem (!%p347_p8), [#allocation3], %s834_s4  ;;  %p404_p9 = scmp.lt.s32.totalorder (!%p347_p8), %s835_s6, 3  ;;  %v679_v4 = vshrl.u32 (!%p347_p8), %v678_v3, 7 }
  0x28   : > { %v917_v34 = vld [vmem:[%s1148_s5 + $0x4] ss:$8 sps:$4 sm:$0xff] (!%p347_p8)   ;;  %656 = vmatprep.mubr.bf16.mxu0 (!%p347_p8), %v839_v33  ;;  %v919_v35 = vld [vmem:[%s1148_s5] ss:$8 sps:$4 sm:$0xff] (!%p347_p8)   ;;  %v920_v36 = vld [vmem:[%s1148_s5 + $0x14] ss:$8 sps:$4 sm:$0xff] (!%p347_p8)  }
  0x29   : > { %624 = vmatprep.subr.bf16.mxu0 (!%p347_p8), %v917_v34  ;;  %v922_v37 = vld [vmem:[%s1148_s5 + $0x10] ss:$8 sps:$4 sm:$0xff] (!%p347_p8)   ;;  %v923_v38 = vld [vmem:[%s1148_s5 + $0x24] ss:$8 sps:$4 sm:$0xff] (!%p347_p8)   ;;  %v925_v39 = vld [vmem:[%s1148_s5 + $0x20] ss:$8 sps:$4 sm:$0xff] (!%p347_p8)  }
  0x2a   : > { %625 = vmatpush1.bf16.msra.mxu0 (!%p347_p8), %v919_v35  ;;  %v926_v40 = vld [vmem:[%s1148_s5 + $0x34] ss:$8 sps:$4 sm:$0xff] (!%p347_p8)   ;;  %v928_v41 = vld [vmem:[%s1148_s5 + $0x30] ss:$8 sps:$4 sm:$0xff] (!%p347_p8)   ;;  %v929_v42 = vld [vmem:[%s1148_s5 + $0x44] ss:$8 sps:$4 sm:$0xff] (!%p347_p8)  }
  0x2b   : > { %626 = vmatprep.subr.bf16.mxu0 (!%p347_p8), %v920_v36  ;;  %v931_v43 = vld [vmem:[%s1148_s5 + $0x40] ss:$8 sps:$4 sm:$0xff] (!%p347_p8)   ;;  %v932_v44 = vld [vmem:[%s1148_s5 + $0x54] ss:$8 sps:$4 sm:$0xff] (!%p347_p8)   ;;  %v934_v45 = vld [vmem:[%s1148_s5 + $0x50] ss:$8 sps:$4 sm:$0xff] (!%p347_p8)  }
  0x2c   : > { %v935_v46 = vld [vmem:[%s1148_s5 + $0x64] ss:$8 sps:$4 sm:$0xff] (!%p347_p8)   ;;  %v937_v47 = vld [vmem:[%s1148_s5 + $0x60] ss:$8 sps:$4 sm:$0xff] (!%p347_p8)   ;;  %v938_v48 = vld [vmem:[%s1148_s5 + $0x74] ss:$8 sps:$4 sm:$0xff] (!%p347_p8)  }
  0x2d   : > { %v940_v49 = vld [vmem:[%s1148_s5 + $0x70] ss:$8 sps:$4 sm:$0xff]   ;;  %v941_v50 = vld [vmem:[%s1148_s5 + $0x84] ss:$8 sps:$4 sm:$0xff]   ;;  %v943_v51 = vld [vmem:[%s1148_s5 + $0x80] ss:$8 sps:$4 sm:$0xff]  }
  0x2e   : > { %627 = vmatpush1.bf16.msra.mxu0 %v922_v37  ;;  %v944_v52 = vld [vmem:[%s1148_s5 + $0x94] ss:$8 sps:$4 sm:$0xff]   ;;  %v946_v53 = vld [vmem:[%s1148_s5 + $0x90] ss:$8 sps:$4 sm:$0xff]   ;;  %v947_v54 = vld [vmem:[%s1148_s5 + $0xa4] ss:$8 sps:$4 sm:$0xff]  }
  0x2f   : > { %628 = vmatprep.subr.bf16.mxu0 %v923_v38  ;;  %v949_v55 = vld [vmem:[%s1148_s5 + $0xa0] ss:$8 sps:$4 sm:$0xff]   ;;  %v950_v56 = vld [vmem:[%s1148_s5 + $0xb4] ss:$8 sps:$4 sm:$0xff]   ;;  %v952_v57 = vld [vmem:[%s1148_s5 + $0xb0] ss:$8 sps:$4 sm:$0xff]  }
  0x30   : > { %v953_v58 = vld [vmem:[%s1148_s5 + $0xc4] ss:$8 sps:$4 sm:$0xff]   ;;  %v955_v59 = vld [vmem:[%s1148_s5 + $0xc0] ss:$8 sps:$4 sm:$0xff]   ;;  %v956_v60 = vld [vmem:[%s1148_s5 + $0xd4] ss:$8 sps:$4 sm:$0xff]  }
  0x31   : > { %v958_v61 = vld [vmem:[%s1148_s5 + $0xd0] ss:$8 sps:$4 sm:$0xff]   ;;  %v959_v62 = vld [vmem:[%s1148_s5 + $0xe4] ss:$8 sps:$4 sm:$0xff]   ;;  %v961_v63 = vld [vmem:[%s1148_s5 + $0xe0] ss:$8 sps:$4 sm:$0xff]  }
  0x32   : > { %629 = vmatpush1.bf16.msra.mxu0 %v925_v39  ;;  %v962_v0 = vld [vmem:[%s1148_s5 + $0xf4] ss:$8 sps:$4 sm:$0xff]   ;;  %v964_v1 = vld [vmem:[%s1148_s5 + $0xf0] ss:$8 sps:$4 sm:$0xff]   ;;  %s1217_s6 = smov (!%p404_p9, %s835_s6), 3  ;;  %v680_v5 = vsub.s32 0, %v679_v4 }
  0x33   : > { %630 = vmatprep.subr.bf16.mxu0 %v926_v40  ;;  %s406_s9 = scalar_lea.vmem %s1208_s2, %s1217_s6  ;;  %v684_v7 = vsub.s32 1, %v679_v4  ;;  %s837_s10 = sshll.u32 %s1217_s6, 2 }
  0x34   : > { %v676_v6 = vld [vmem:[%s406_s9] sm:$0x3]  ;;  %s416_s14 = scalar_lea.vmem %s1209_s3, %s837_s10 }
  0x35   : > { %v681_v8 = vrot.slane %v676_v6, %v680_v5  ;;  %v685_v9 = vrot.slane %v676_v6, %v684_v7 }
  0x36   : > { %631 = vmatpush1.bf16.msra.mxu0 %v928_v41 }
  0x37   : > { %632 = vmatprep.subr.bf16.mxu0 %v929_v42 }
  0x3a   : > { %633 = vmatpush1.bf16.msra.mxu0 %v931_v43 }
  0x3b   : > { %634 = vmatprep.subr.bf16.mxu0 %v932_v44 }
  0x3e   : > { %635 = vmatpush1.bf16.msra.mxu0 %v934_v45 }
  0x3f   : > { %636 = vmatprep.subr.bf16.mxu0 %v935_v46 }
  0x42   : > { %637 = vmatpush1.bf16.msra.mxu0 %v937_v47 }
  0x43   : > { %638 = vmatprep.subr.bf16.mxu0 %v938_v48 }
  0x46   : > { %639 = vmatpush1.bf16.msra.mxu0 %v940_v49 }
  0x47   : > { %640 = vmatprep.subr.bf16.mxu0 %v941_v50 }
  0x4a   : > { %641 = vmatpush1.bf16.msra.mxu0 %v943_v51 }
  0x4b   : > { %642 = vmatprep.subr.bf16.mxu0 %v944_v52 }
  0x4e   : > { %643 = vmatpush1.bf16.msra.mxu0 %v946_v53 }
  0x4f   : > { %644 = vmatprep.subr.bf16.mxu0 %v947_v54 }
  0x52   : > { %645 = vmatpush1.bf16.msra.mxu0 %v949_v55 }
  0x53   : > { %646 = vmatprep.subr.bf16.mxu0 %v950_v56 }
  0x56   : > { %647 = vmatpush1.bf16.msra.mxu0 %v952_v57 }
  0x57   : > { %648 = vmatprep.subr.bf16.mxu0 %v953_v58 }
  0x5a   : > { %649 = vmatpush1.bf16.msra.mxu0 %v955_v59 }
  0x5b   : > { %650 = vmatprep.subr.bf16.mxu0 %v956_v60 }
  0x5e   : > { %651 = vmatpush1.bf16.msra.mxu0 %v958_v61 }
  0x5f   : > { %652 = vmatprep.subr.bf16.mxu0 %v959_v62 }
  0x62   : > { %653 = vmatpush1.bf16.msra.mxu0 %v961_v63 }
  0x63   : > { %654 = vmatprep.subr.bf16.mxu0 %v962_v0 }
  0x66   : > { %655 = vmatpush1.bf16.msra.mxu0 %v964_v1 }
  0x69   : > { %657 = vmatmul.mubr.bf16.vlgmr.msra.gmra.mrb[0].mxu0 %v838_v2 }
 0x13c   : > { %v658_v10 = vpop.f32.mrb[0].mxu0 }
 0x13d   : > { %v688_v11 = vadd.f32 %v681_v8, %v658_v10  ;;  %v660_v12 = vpop.f32.mrb[1].mxu0 }
 0x13e   : > { %v689_v13 = vadd.f32 %v685_v9, %v660_v12  ;;  %v662_v14 = vpop.f32.mrb[2].mxu0 }
 0x13f   : > { %v663_v15 = vpop.f32.mrb[3].mxu0 }
 0x140   : > { %v876_v16 = vpack.c.bf16 %v689_v13, %v688_v11 }
 0x142   : > { %698 = vst [vmem:[%s416_s14] sm:$0xff] %v876_v16 }
 0x143 PF: > { %s13_s16 = sadd.s32 1, %s1005_s16   ;;  %s1210_s12 = smov %s993_s13 }
 0x144   : > { %p10_p10 = scmp.ge.s32.totalorder %s13_s16, 4   ;;  %s1211_s13 = smov %s1062_s20 }
 0x145   : > { %s1212_s14 = smov %s1001_s15  ;;  %s1213_s15 = smov %s1215_s17 }
 0x146   :  { %12 = sbr.rel (!%p10_p10) target bundleno = 3 (0x3), region = 119 }

// kernel: resnet3d_forward.28
= control target key start
LH: loop header
LB: loop body
LE: loop exit
PB: predicated region body
PF: predicated region fallthrough
CT: control target
= control target key end

     0   :  { %vm27_vm0 = vcmask 1041409   ;;  %vm29_vm1 = vcmask 1043459   ;;  %vm31_vm2 = vcmask 1045509   ;;  %vm33_vm3 = vcmask 1047559   ;;  %s67_s0 = inlined_call_operand.vmem [shape: bf16[2,1,512], index: 0, kind: input, shape index: {}]   ;;  %s68_s1 = inlined_call_operand.vmem [shape: f32[2,512], index: 1, kind: output, shape index: {}]  }
   0x1   :  { %v48_v0 = vld [vmem:[%s67_s0] sm:$0xff]  }
   0x2   :  { %v49_v1 = vunpack.c.l.bf16 %v48_v0  ;;  %v50_v2 = vunpack.c.h.bf16 %v48_v0 }
   0x4   :  { %v26_v3 = vrot.slane %v50_v2, 7 }
   0x6   :  { %v28_v4 = vsel %vm27_vm0, %v26_v3, %v49_v1 }
   0x7   :  { %v30_v5 = vsel %vm29_vm1, %v26_v3, %v28_v4 }
   0x8   :  { %v32_v6 = vsel %vm31_vm2, %v26_v3, %v30_v5 }
   0x9   :  { %v34_v7 = vsel %vm33_vm3, %v26_v3, %v32_v6 }
   0xa   :  { %42 = vst [vmem:[%s68_s1] sm:$0xff] %v34_v7 }

// kernel: resnet3d_forward.29
= control target key start
LH: loop header
LB: loop body
LE: loop exit
PB: predicated region body
PF: predicated region fallthrough
CT: control target
= control target key end

     0   :  { %vm19_vm0 = vcmask 39936   ;;  %v512_v38 = vmov 0.0   ;;  %s644_s1 = inlined_call_operand.vmem [shape: bf16[1,512,5], index: 1, kind: input, shape index: {}]   ;;  %s645_s0 = inlined_call_operand.vmem [shape: bf16[1,8,512], index: 0, kind: input, shape index: {}]   ;;  %s646_s2 = inlined_call_operand.vmem [shape: f32[1,5], index: 2, kind: input, shape index: {}]   ;;  %s647_s3 = inlined_call_operand.vmem [shape: f32[8,5], index: 3, kind: output, shape index: {}]  }
   0x1   :  { %v476_v0 = vld [vmem:[%s644_s1 + $0x40] sm:$0xff]   ;;  %v480_v4 = vld [vmem:[%s644_s1 + $0x48] sm:$0xff]   ;;  %v484_v8 = vld [vmem:[%s644_s1 + $0x50] sm:$0xff]   ;;  %20 = vst.msk [vmem:[#allocation2] sm:$0xff] %vm19_vm0, %v512_v38 }
   0x2   :  { %v477_v1 = vld [vmem:[%s644_s1 + $0xc0] sm:$0xff]   ;;  %431 = vmatprep.subr.bf16.mxu0 %v476_v0  ;;  %v481_v5 = vld [vmem:[%s644_s1 + $0xc8] sm:$0xff]   ;;  %v485_v9 = vld [vmem:[%s644_s1 + $0xd0] sm:$0xff]  }
   0x3   :  { %v478_v2 = vld [vmem:[%s644_s1] sm:$0xff]   ;;  %453 = vmatprep.subr.bf16.mxu1 %v477_v1  ;;  %v482_v6 = vld [vmem:[%s644_s1 + $0x8] sm:$0xff]   ;;  %v486_v10 = vld [vmem:[%s644_s1 + $0x10] sm:$0xff]  }
   0x4   :  { %v479_v3 = vld [vmem:[%s644_s1 + $0x80] sm:$0xff]   ;;  %432 = vmatpush3.bf16.msra.mxu0 %v478_v2  ;;  %v483_v7 = vld [vmem:[%s644_s1 + $0x88] sm:$0xff]   ;;  %v487_v11 = vld [vmem:[%s644_s1 + $0x90] sm:$0xff]  }
   0x5   :  { %454 = vmatpush3.bf16.msra.mxu1 %v479_v3  ;;  %433 = vmatprep.subr.bf16.mxu0 %v480_v4  ;;  %v488_v12 = vld [vmem:[%s644_s1 + $0x58] sm:$0xff]   ;;  %v492_v16 = vld [vmem:[%s644_s1 + $0x60] sm:$0xff]   ;;  %v496_v20 = vld [vmem:[%s644_s1 + $0x68] sm:$0xff]  }
   0x6   :  { %455 = vmatprep.subr.bf16.mxu1 %v481_v5  ;;  %v489_v13 = vld [vmem:[%s644_s1 + $0xd8] sm:$0xff]   ;;  %v493_v17 = vld [vmem:[%s644_s1 + $0xe0] sm:$0xff]   ;;  %v497_v21 = vld [vmem:[%s644_s1 + $0xe8] sm:$0xff]  }
   0x7   :  { %v490_v14 = vld [vmem:[%s644_s1 + $0x18] sm:$0xff]   ;;  %v494_v18 = vld [vmem:[%s644_s1 + $0x20] sm:$0xff]   ;;  %v498_v22 = vld [vmem:[%s644_s1 + $0x28] sm:$0xff]  }
   0x8   :  { %434 = vmatpush3.bf16.msra.mxu0 %v482_v6  ;;  %v491_v15 = vld [vmem:[%s644_s1 + $0x98] sm:$0xff]   ;;  %v495_v19 = vld [vmem:[%s644_s1 + $0xa0] sm:$0xff]   ;;  %v499_v23 = vld [vmem:[%s644_s1 + $0xa8] sm:$0xff]  }
   0x9   :  { %456 = vmatpush3.bf16.msra.mxu1 %v483_v7  ;;  %435 = vmatprep.subr.bf16.mxu0 %v484_v8  ;;  %v500_v24 = vld [vmem:[%s644_s1 + $0x70] sm:$0xff]   ;;  %v504_v28 = vld [vmem:[%s644_s1 + $0x78] sm:$0xff]   ;;  %v21_v32 = vld [vmem:[%s645_s0] sm:$0xff] }
   0xa   :  { %457 = vmatprep.subr.bf16.mxu1 %v485_v9  ;;  %v501_v25 = vld [vmem:[%s644_s1 + $0xf0] sm:$0xff]   ;;  %v505_v29 = vld [vmem:[%s644_s1 + $0xf8] sm:$0xff]   ;;  %v22_v33 = vld [vmem:[%s645_s0 + $0x8] sm:$0xff]  ;;  %v394_v34 = vcombine.low %v21_v32, %v21_v32  ;;  %v395_v35 = vcombine.high %v21_v32, %v21_v32 }
   0xb   :  { %v502_v26 = vld [vmem:[%s644_s1 + $0x30] sm:$0xff]   ;;  %v506_v30 = vld [vmem:[%s644_s1 + $0x38] sm:$0xff]   ;;  %v396_v36 = vcombine.low %v22_v33, %v22_v33  ;;  %v397_v37 = vcombine.high %v22_v33, %v22_v33  ;;  %v373_v47 = vld [vmem:[#allocation2] sm:$0xff] }
   0xc   :  { %436 = vmatpush3.bf16.msra.mxu0 %v486_v10  ;;  %v503_v27 = vld [vmem:[%s644_s1 + $0xb0] sm:$0xff]   ;;  %v507_v31 = vld [vmem:[%s644_s1 + $0xb8] sm:$0xff]   ;;  %325 = vmatprep.mubr.bf16.mxu0 %v395_v35  ;;  %v430_v52 = vld [vmem:[%s646_s2] ss:$0 sm:$0xff] }
   0xd   :  { %458 = vmatpush3.bf16.msra.mxu1 %v487_v11  ;;  %437 = vmatprep.subr.bf16.mxu0 %v488_v12 }
   0xe   :  { %459 = vmatprep.subr.bf16.mxu1 %v489_v13  ;;  %365 = vmatprep.mubr.bf16.mxu1 %v397_v37 }
  0x10   :  { %438 = vmatpush3.bf16.msra.mxu0 %v490_v14 }
  0x11   :  { %460 = vmatpush3.bf16.msra.mxu1 %v491_v15  ;;  %439 = vmatprep.subr.bf16.mxu0 %v492_v16 }
  0x12   :  { %461 = vmatprep.subr.bf16.mxu1 %v493_v17 }
  0x14   :  { %440 = vmatpush3.bf16.msra.mxu0 %v494_v18 }
  0x15   :  { %462 = vmatpush3.bf16.msra.mxu1 %v495_v19  ;;  %441 = vmatprep.subr.bf16.mxu0 %v496_v20 }
  0x16   :  { %463 = vmatprep.subr.bf16.mxu1 %v497_v21 }
  0x18   :  { %442 = vmatpush3.bf16.msra.mxu0 %v498_v22 }
  0x19   :  { %464 = vmatpush3.bf16.msra.mxu1 %v499_v23  ;;  %443 = vmatprep.subr.bf16.mxu0 %v500_v24 }
  0x1a   :  { %465 = vmatprep.subr.bf16.mxu1 %v501_v25 }
  0x1c   :  { %444 = vmatpush3.bf16.msra.mxu0 %v502_v26 }
  0x1d   :  { %466 = vmatpush3.bf16.msra.mxu1 %v503_v27  ;;  %445 = vmatprep.subr.bf16.mxu0 %v504_v28 }
  0x1e   :  { %467 = vmatprep.subr.bf16.mxu1 %v505_v29 }
  0x20   :  { %446 = vmatpush3.bf16.msra.mxu0 %v506_v30 }
  0x21   :  { %468 = vmatpush3.bf16.msra.mxu1 %v507_v31 }
  0x23   :  { %326 = vmatmul.mubr.bf16.vlgmr.msra.gmra.mrb[0].mxu0 %v394_v34 }
  0x24   :  { %366 = vmatmul.mubr.bf16.vlgmr.msra.gmra.mrb[0].mxu1 %v396_v36 }
  0xf6   :  { %v447_v39 = vpop.f32.mrb[0].mxu0 }
  0xf7   :  { %v469_v40 = vpop.f32.mrb[0].mxu1  ;;  %v448_v41 = vpop.f32.mrb[1].mxu0 }
  0xf8   :  { %v470_v42 = vpop.f32.mrb[1].mxu1  ;;  %v449_v43 = vadd.f32 %v448_v41, %v447_v39  ;;  %v450_v45 = vpop.f32.mrb[2].mxu0 }
  0xf9   :  { %v471_v44 = vadd.f32 %v470_v42, %v469_v40  ;;  %v472_v46 = vpop.f32.mrb[2].mxu1  ;;  %v451_v48 = vpop.f32.mrb[3].mxu0 }
  0xfa   :  { %v473_v49 = vpop.f32.mrb[3].mxu1 }
  0xfb   :  { %v368_v50 = vadd.f32 %v471_v44, %v449_v43 }
  0xfd   :  { %v374_v51 = vadd.f32 %v373_v47, %v368_v50 }
  0xff   :  { %376 = vst.msk [vmem:[#allocation2] sm:$0xff] %vm19_vm0, %v374_v51 }
 0x106   :  { %v380_v53 = vld [vmem:[#allocation2] sm:$0xff] }
 0x107   :  { %v388_v54 = vadd.f32 %v430_v52, %v380_v53 }
 0x109   :  { %389 = vst.msk [vmem:[%s647_s3] sm:$0xff] %vm19_vm0, %v388_v54 }

// kernel: resnet3d_forward.27
= control target key start
LH: loop header
LB: loop body
LE: loop exit
PB: predicated region body
PF: predicated region fallthrough
CT: control target
= control target key end

     0   :  { %s3572_s15 = smov 0   ;;  %s3574_s16 = smov 0   ;;  %s4301_s0 = inlined_call_operand.vmem [shape: bf16[27,8,512], index: 0, kind: input, shape index: {}]   ;;  %s4302_s1 = inlined_call_operand.vmem [shape: bf16[27,512,512], index: 1, kind: input, shape index: {}]   ;;  %s4303_s2 = inlined_call_operand.vmem [shape: f32[1,512], index: 2, kind: input, shape index: {}]   ;;  %s4304_s3 = inlined_call_operand.vmem [shape: bf16[8,512], index: 3, kind: input, shape index: {}]   ;;  %s4305_s4 = inlined_call_operand.vmem [shape: bf16[8,512], index: 4, kind: output, shape index: {}]  }
   0x1   :  { %s3576_s17 = smov 0   ;;  %s3578_s18 = smov 0  }
   0x2   :  { %s3580_s19 = smov 0   ;;  %s3582_s20 = smov 0  }
   0x3   :  { %s3584_s21 = smov 0  }
   0x4 LB: > { %s26_s22 = sadd.s32 1, %s3536_s19  ;;  %s29_s23 = sadd.s32 1, %s3540_s20  ;;  %s3544_s21 = sphi %s3584_s21, %s14_s21   ;;  %s3540_s20 = sphi %s3582_s20, %s4311_s20   ;;  %s3536_s19 = sphi %s3580_s19, %s4310_s19   ;;  %s3532_s18 = sphi %s3578_s18, %s4309_s18   ;;  %s3528_s17 = sphi %s3576_s17, %s4308_s17   ;;  %s3524_s16 = sphi %s3574_s16, %s4307_s16   ;;  %s3520_s15 = sphi %s3572_s15, %s4306_s15  }
   0x5   : > { %p27_p0 = scmp.ge.s32.totalorder %s26_s22, 9  ;;  %p77_p1 = scmp.ne.s32.totalorder %s3524_s16, %s3520_s15 }
   0x6   : > { %p78_p2 = scmp.eq.s32.totalorder %s3544_s21, 0  ;;  %s70_s27 = sadd.s32 1, %s3524_s16 }
   0x7   : > { %s4313_s22 = smov (%p27_p0, %s26_s22), 0  ;;  %s4315_s23 = smov (!%p27_p0, %s29_s23), %s3540_s20 }
   0x8   : > { %p79_p3 = por %p78_p2, %p77_p1  ;;  %p31_p4 = scmp.ge.s32.totalorder %s4315_s23, 2 }
   0x9   : > { %s65_s24 = ssub.s32 %s3536_s19, %s4313_s22  ;;  %p2775_p6 = scmp.ge.s32.totalorder %s3544_s21, 18 }
   0xa   : > { %s4317_s23 = smov (%p31_p4, %s4315_s23), 0 }
   0xb   : > { %s66_s25 = ssub.s32 %s3540_s20, %s4317_s23  ;;  %185 = sbr.rel (%p2775_p6) target bundleno = 122 (0x7a), region = 16 }
   0xc   : > { %s67_s26 = sor.u32 %s66_s25, %s65_s24 }
   0xd   : > { %p68_p5 = scmp.eq.s32.totalorder %s67_s26, 0 }
   0xf   : > { %s3623_s28 = scalar_select %p68_p5, %s3524_s16, %s70_s27  }
  0x12   : > { %202 = sbr.rel (!%p79_p3) target bundleno = 122 (0x7a), region = 24  ;;  %s204_s29 = sand.u32 (%p79_p3), 1, %s3524_s16  }
  0x13   : > { %s3131_s30 = smul.u32 (%p79_p3), 1536, %s204_s29  ;;  %s2776_s5 = sshll.u32 (%p79_p3), %s3540_s20, 1 }
  0x14   : > { %s3128_s6 = smul.u32 (%p79_p3), 768, %s3536_s19 }
  0x15   : > { %s3637_s12 = scalar_lea.vmem (%p79_p3), [#allocation3], %s3131_s30 }
  0x16   : > { %s210_s7 = sadd.s32 (%p79_p3), %s3128_s6, %s2776_s5 }
  0x17   : > { %s2778_s8 = sshll.u32 (%p79_p3), %s210_s7, 2 }
  0x18   : > { %s3632_s11 = scalar_lea.vmem (%p79_p3), %s4302_s1, %s2778_s8 }
  0x19   : > { %v622_v0 = vld [vmem:[%s3632_s11] sm:$0xff]  ;;  %v624_v1 = vld [vmem:[%s3632_s11 + $0x10] sm:$0xff] }
  0x1a   : > { %v626_v2 = vld [vmem:[%s3632_s11 + $0x20] sm:$0xff]  ;;  %623 = vst [vmem:[%s3637_s12] sm:$0xff] %v622_v0  ;;  %625 = vst [vmem:[%s3637_s12 + $0x8] sm:$0xff] %v624_v1  ;;  %v628_v3 = vld [vmem:[%s3632_s11 + $0x30] sm:$0xff] }
  0x1b   : > { %627 = vst [vmem:[%s3637_s12 + $0x10] sm:$0xff] %v626_v2  ;;  %v630_v4 = vld [vmem:[%s3632_s11 + $0x40] sm:$0xff]  ;;  %v632_v5 = vld [vmem:[%s3632_s11 + $0x50] sm:$0xff]  ;;  %629 = vst [vmem:[%s3637_s12 + $0x18] sm:$0xff] %v628_v3 }
  0x1c   : > { %631 = vst [vmem:[%s3637_s12 + $0x20] sm:$0xff] %v630_v4  ;;  %633 = vst [vmem:[%s3637_s12 + $0x28] sm:$0xff] %v632_v5  ;;  %v634_v6 = vld [vmem:[%s3632_s11 + $0x60] sm:$0xff]  ;;  %v636_v7 = vld [vmem:[%s3632_s11 + $0x70] sm:$0xff] }
  0x1d   : > { %v638_v8 = vld [vmem:[%s3632_s11 + $0x80] sm:$0xff]  ;;  %635 = vst [vmem:[%s3637_s12 + $0x30] sm:$0xff] %v634_v6  ;;  %637 = vst [vmem:[%s3637_s12 + $0x38] sm:$0xff] %v636_v7  ;;  %v640_v9 = vld [vmem:[%s3632_s11 + $0x90] sm:$0xff] }
  0x1e   : > { %639 = vst [vmem:[%s3637_s12 + $0x40] sm:$0xff] %v638_v8  ;;  %v642_v10 = vld [vmem:[%s3632_s11 + $0xa0] sm:$0xff]  ;;  %v644_v11 = vld [vmem:[%s3632_s11 + $0xb0] sm:$0xff]  ;;  %641 = vst [vmem:[%s3637_s12 + $0x48] sm:$0xff] %v640_v9 }
  0x1f   : > { %643 = vst [vmem:[%s3637_s12 + $0x50] sm:$0xff] %v642_v10  ;;  %645 = vst [vmem:[%s3637_s12 + $0x58] sm:$0xff] %v644_v11  ;;  %v646_v12 = vld [vmem:[%s3632_s11 + $0xc0] sm:$0xff]  ;;  %v648_v13 = vld [vmem:[%s3632_s11 + $0xd0] sm:$0xff] }
  0x20   : > { %v650_v14 = vld [vmem:[%s3632_s11 + $0xe0] sm:$0xff]  ;;  %647 = vst [vmem:[%s3637_s12 + $0x60] sm:$0xff] %v646_v12  ;;  %649 = vst [vmem:[%s3637_s12 + $0x68] sm:$0xff] %v648_v13  ;;  %v652_v15 = vld [vmem:[%s3632_s11 + $0xf0] sm:$0xff] }
  0x21   : > { %651 = vst [vmem:[%s3637_s12 + $0x70] sm:$0xff] %v650_v14  ;;  %v654_v16 = vld [vmem:[%s3632_s11 + $0x100] sm:$0xff]  ;;  %v656_v17 = vld [vmem:[%s3632_s11 + $0x110] sm:$0xff]  ;;  %653 = vst [vmem:[%s3637_s12 + $0x78] sm:$0xff] %v652_v15 }
  0x22   : > { %655 = vst [vmem:[%s3637_s12 + $0x80] sm:$0xff] %v654_v16  ;;  %657 = vst [vmem:[%s3637_s12 + $0x88] sm:$0xff] %v656_v17  ;;  %v658_v18 = vld [vmem:[%s3632_s11 + $0x120] sm:$0xff]  ;;  %v660_v19 = vld [vmem:[%s3632_s11 + $0x130] sm:$0xff] }
  0x23   : > { %v662_v20 = vld [vmem:[%s3632_s11 + $0x140] sm:$0xff]  ;;  %659 = vst [vmem:[%s3637_s12 + $0x90] sm:$0xff] %v658_v18  ;;  %661 = vst [vmem:[%s3637_s12 + $0x98] sm:$0xff] %v660_v19  ;;  %v664_v21 = vld [vmem:[%s3632_s11 + $0x150] sm:$0xff] }
  0x24   : > { %663 = vst [vmem:[%s3637_s12 + $0xa0] sm:$0xff] %v662_v20  ;;  %v666_v22 = vld [vmem:[%s3632_s11 + $0x160] sm:$0xff]  ;;  %v668_v23 = vld [vmem:[%s3632_s11 + $0x170] sm:$0xff]  ;;  %665 = vst [vmem:[%s3637_s12 + $0xa8] sm:$0xff] %v664_v21 }
  0x25   : > { %667 = vst [vmem:[%s3637_s12 + $0xb0] sm:$0xff] %v666_v22  ;;  %669 = vst [vmem:[%s3637_s12 + $0xb8] sm:$0xff] %v668_v23  ;;  %v670_v24 = vld [vmem:[%s3632_s11 + $0x180] sm:$0xff]  ;;  %v672_v25 = vld [vmem:[%s3632_s11 + $0x190] sm:$0xff] }
  0x26   : > { %v674_v26 = vld [vmem:[%s3632_s11 + $0x1a0] sm:$0xff]  ;;  %671 = vst [vmem:[%s3637_s12 + $0xc0] sm:$0xff] %v670_v24  ;;  %673 = vst [vmem:[%s3637_s12 + $0xc8] sm:$0xff] %v672_v25  ;;  %v676_v27 = vld [vmem:[%s3632_s11 + $0x1b0] sm:$0xff] }
  0x27   : > { %675 = vst [vmem:[%s3637_s12 + $0xd0] sm:$0xff] %v674_v26  ;;  %v678_v28 = vld [vmem:[%s3632_s11 + $0x1c0] sm:$0xff]  ;;  %v680_v29 = vld [vmem:[%s3632_s11 + $0x1d0] sm:$0xff]  ;;  %677 = vst [vmem:[%s3637_s12 + $0xd8] sm:$0xff] %v676_v27 }
  0x28   : > { %679 = vst [vmem:[%s3637_s12 + $0xe0] sm:$0xff] %v678_v28  ;;  %681 = vst [vmem:[%s3637_s12 + $0xe8] sm:$0xff] %v680_v29  ;;  %v682_v30 = vld [vmem:[%s3632_s11 + $0x1e0] sm:$0xff]  ;;  %v684_v31 = vld [vmem:[%s3632_s11 + $0x1f0] sm:$0xff] }
  0x29   : > { %v686_v32 = vld [vmem:[%s3632_s11 + $0x200] sm:$0xff]  ;;  %683 = vst [vmem:[%s3637_s12 + $0xf0] sm:$0xff] %v682_v30  ;;  %685 = vst [vmem:[%s3637_s12 + $0xf8] sm:$0xff] %v684_v31  ;;  %v688_v33 = vld [vmem:[%s3632_s11 + $0x210] sm:$0xff] }
  0x2a   : > { %687 = vst [vmem:[%s3637_s12 + $0x100] sm:$0xff] %v686_v32  ;;  %v690_v34 = vld [vmem:[%s3632_s11 + $0x220] sm:$0xff]  ;;  %v692_v35 = vld [vmem:[%s3632_s11 + $0x230] sm:$0xff]  ;;  %689 = vst [vmem:[%s3637_s12 + $0x108] sm:$0xff] %v688_v33 }
  0x2b   : > { %691 = vst [vmem:[%s3637_s12 + $0x110] sm:$0xff] %v690_v34  ;;  %693 = vst [vmem:[%s3637_s12 + $0x118] sm:$0xff] %v692_v35  ;;  %v694_v36 = vld [vmem:[%s3632_s11 + $0x240] sm:$0xff]  ;;  %v696_v37 = vld [vmem:[%s3632_s11 + $0x250] sm:$0xff] }
  0x2c   : > { %v698_v38 = vld [vmem:[%s3632_s11 + $0x260] sm:$0xff]  ;;  %695 = vst [vmem:[%s3637_s12 + $0x120] sm:$0xff] %v694_v36  ;;  %697 = vst [vmem:[%s3637_s12 + $0x128] sm:$0xff] %v696_v37  ;;  %v700_v39 = vld [vmem:[%s3632_s11 + $0x270] sm:$0xff] }
  0x2d   : > { %699 = vst [vmem:[%s3637_s12 + $0x130] sm:$0xff] %v698_v38  ;;  %v702_v40 = vld [vmem:[%s3632_s11 + $0x280] sm:$0xff]  ;;  %v704_v41 = vld [vmem:[%s3632_s11 + $0x290] sm:$0xff]  ;;  %701 = vst [vmem:[%s3637_s12 + $0x138] sm:$0xff] %v700_v39 }
  0x2e   : > { %703 = vst [vmem:[%s3637_s12 + $0x140] sm:$0xff] %v702_v40  ;;  %705 = vst [vmem:[%s3637_s12 + $0x148] sm:$0xff] %v704_v41  ;;  %v706_v42 = vld [vmem:[%s3632_s11 + $0x2a0] sm:$0xff]  ;;  %v708_v43 = vld [vmem:[%s3632_s11 + $0x2b0] sm:$0xff] }
  0x2f   : > { %v710_v44 = vld [vmem:[%s3632_s11 + $0x2c0] sm:$0xff]  ;;  %707 = vst [vmem:[%s3637_s12 + $0x150] sm:$0xff] %v706_v42  ;;  %709 = vst [vmem:[%s3637_s12 + $0x158] sm:$0xff] %v708_v43  ;;  %v712_v45 = vld [vmem:[%s3632_s11 + $0x2d0] sm:$0xff] }
  0x30   : > { %711 = vst [vmem:[%s3637_s12 + $0x160] sm:$0xff] %v710_v44  ;;  %v714_v46 = vld [vmem:[%s3632_s11 + $0x2e0] sm:$0xff]  ;;  %v716_v47 = vld [vmem:[%s3632_s11 + $0x2f0] sm:$0xff]  ;;  %713 = vst [vmem:[%s3637_s12 + $0x168] sm:$0xff] %v712_v45 }
  0x31   : > { %715 = vst [vmem:[%s3637_s12 + $0x170] sm:$0xff] %v714_v46  ;;  %717 = vst [vmem:[%s3637_s12 + $0x178] sm:$0xff] %v716_v47  ;;  %v718_v48 = vld [vmem:[%s3632_s11 + $0x300] sm:$0xff]  ;;  %v720_v49 = vld [vmem:[%s3632_s11 + $0x310] sm:$0xff] }
  0x32   : > { %v722_v50 = vld [vmem:[%s3632_s11 + $0x320] sm:$0xff]  ;;  %719 = vst [vmem:[%s3637_s12 + $0x180] sm:$0xff] %v718_v48  ;;  %721 = vst [vmem:[%s3637_s12 + $0x188] sm:$0xff] %v720_v49  ;;  %v724_v51 = vld [vmem:[%s3632_s11 + $0x330] sm:$0xff] }
  0x33   : > { %723 = vst [vmem:[%s3637_s12 + $0x190] sm:$0xff] %v722_v50  ;;  %v726_v52 = vld [vmem:[%s3632_s11 + $0x340] sm:$0xff]  ;;  %v728_v53 = vld [vmem:[%s3632_s11 + $0x350] sm:$0xff]  ;;  %725 = vst [vmem:[%s3637_s12 + $0x198] sm:$0xff] %v724_v51 }
  0x34   : > { %727 = vst [vmem:[%s3637_s12 + $0x1a0] sm:$0xff] %v726_v52  ;;  %729 = vst [vmem:[%s3637_s12 + $0x1a8] sm:$0xff] %v728_v53  ;;  %v730_v54 = vld [vmem:[%s3632_s11 + $0x360] sm:$0xff]  ;;  %v732_v55 = vld [vmem:[%s3632_s11 + $0x370] sm:$0xff] }
  0x35   : > { %v734_v56 = vld [vmem:[%s3632_s11 + $0x380] sm:$0xff]  ;;  %731 = vst [vmem:[%s3637_s12 + $0x1b0] sm:$0xff] %v730_v54  ;;  %733 = vst [vmem:[%s3637_s12 + $0x1b8] sm:$0xff] %v732_v55  ;;  %v736_v57 = vld [vmem:[%s3632_s11 + $0x390] sm:$0xff] }
  0x36   : > { %735 = vst [vmem:[%s3637_s12 + $0x1c0] sm:$0xff] %v734_v56  ;;  %v738_v58 = vld [vmem:[%s3632_s11 + $0x3a0] sm:$0xff]  ;;  %v740_v59 = vld [vmem:[%s3632_s11 + $0x3b0] sm:$0xff]  ;;  %737 = vst [vmem:[%s3637_s12 + $0x1c8] sm:$0xff] %v736_v57 }
  0x37   : > { %739 = vst [vmem:[%s3637_s12 + $0x1d0] sm:$0xff] %v738_v58  ;;  %741 = vst [vmem:[%s3637_s12 + $0x1d8] sm:$0xff] %v740_v59  ;;  %v742_v60 = vld [vmem:[%s3632_s11 + $0x3c0] sm:$0xff]  ;;  %v744_v61 = vld [vmem:[%s3632_s11 + $0x3d0] sm:$0xff] }
  0x38   : > { %v746_v62 = vld [vmem:[%s3632_s11 + $0x3e0] sm:$0xff]  ;;  %743 = vst [vmem:[%s3637_s12 + $0x1e0] sm:$0xff] %v742_v60  ;;  %745 = vst [vmem:[%s3637_s12 + $0x1e8] sm:$0xff] %v744_v61  ;;  %v748_v63 = vld [vmem:[%s3632_s11 + $0x3f0] sm:$0xff] }
  0x39   : > { %747 = vst [vmem:[%s3637_s12 + $0x1f0] sm:$0xff] %v746_v62  ;;  %v750_v0 = vld [vmem:[%s3632_s11 + $0x400] sm:$0xff]  ;;  %v752_v1 = vld [vmem:[%s3632_s11 + $0x410] sm:$0xff]  ;;  %749 = vst [vmem:[%s3637_s12 + $0x1f8] sm:$0xff] %v748_v63 }
  0x3a   : > { %751 = vst [vmem:[%s3637_s12 + $0x200] sm:$0xff] %v750_v0  ;;  %753 = vst [vmem:[%s3637_s12 + $0x208] sm:$0xff] %v752_v1  ;;  %v754_v2 = vld [vmem:[%s3632_s11 + $0x420] sm:$0xff]  ;;  %v756_v3 = vld [vmem:[%s3632_s11 + $0x430] sm:$0xff] }
  0x3b   : > { %v758_v4 = vld [vmem:[%s3632_s11 + $0x440] sm:$0xff]  ;;  %755 = vst [vmem:[%s3637_s12 + $0x210] sm:$0xff] %v754_v2  ;;  %757 = vst [vmem:[%s3637_s12 + $0x218] sm:$0xff] %v756_v3  ;;  %v760_v5 = vld [vmem:[%s3632_s11 + $0x450] sm:$0xff] }
  0x3c   : > { %759 = vst [vmem:[%s3637_s12 + $0x220] sm:$0xff] %v758_v4  ;;  %v762_v6 = vld [vmem:[%s3632_s11 + $0x460] sm:$0xff]  ;;  %v764_v7 = vld [vmem:[%s3632_s11 + $0x470] sm:$0xff]  ;;  %761 = vst [vmem:[%s3637_s12 + $0x228] sm:$0xff] %v760_v5 }
  0x3d   : > { %763 = vst [vmem:[%s3637_s12 + $0x230] sm:$0xff] %v762_v6  ;;  %765 = vst [vmem:[%s3637_s12 + $0x238] sm:$0xff] %v764_v7  ;;  %v766_v8 = vld [vmem:[%s3632_s11 + $0x480] sm:$0xff]  ;;  %v768_v9 = vld [vmem:[%s3632_s11 + $0x490] sm:$0xff] }
  0x3e   : > { %v770_v10 = vld [vmem:[%s3632_s11 + $0x4a0] sm:$0xff]  ;;  %767 = vst [vmem:[%s3637_s12 + $0x240] sm:$0xff] %v766_v8  ;;  %769 = vst [vmem:[%s3637_s12 + $0x248] sm:$0xff] %v768_v9  ;;  %v772_v11 = vld [vmem:[%s3632_s11 + $0x4b0] sm:$0xff] }
  0x3f   : > { %771 = vst [vmem:[%s3637_s12 + $0x250] sm:$0xff] %v770_v10  ;;  %v774_v12 = vld [vmem:[%s3632_s11 + $0x4c0] sm:$0xff]  ;;  %v776_v13 = vld [vmem:[%s3632_s11 + $0x4d0] sm:$0xff]  ;;  %773 = vst [vmem:[%s3637_s12 + $0x258] sm:$0xff] %v772_v11 }
  0x40   : > { %775 = vst [vmem:[%s3637_s12 + $0x260] sm:$0xff] %v774_v12  ;;  %777 = vst [vmem:[%s3637_s12 + $0x268] sm:$0xff] %v776_v13  ;;  %v778_v14 = vld [vmem:[%s3632_s11 + $0x4e0] sm:$0xff]  ;;  %v780_v15 = vld [vmem:[%s3632_s11 + $0x4f0] sm:$0xff] }
  0x41   : > { %v782_v16 = vld [vmem:[%s3632_s11 + $0x500] sm:$0xff]  ;;  %779 = vst [vmem:[%s3637_s12 + $0x270] sm:$0xff] %v778_v14  ;;  %781 = vst [vmem:[%s3637_s12 + $0x278] sm:$0xff] %v780_v15  ;;  %v784_v17 = vld [vmem:[%s3632_s11 + $0x510] sm:$0xff] }
  0x42   : > { %783 = vst [vmem:[%s3637_s12 + $0x280] sm:$0xff] %v782_v16  ;;  %v786_v18 = vld [vmem:[%s3632_s11 + $0x520] sm:$0xff]  ;;  %v788_v19 = vld [vmem:[%s3632_s11 + $0x530] sm:$0xff]  ;;  %785 = vst [vmem:[%s3637_s12 + $0x288] sm:$0xff] %v784_v17 }
  0x43   : > { %787 = vst [vmem:[%s3637_s12 + $0x290] sm:$0xff] %v786_v18  ;;  %789 = vst [vmem:[%s3637_s12 + $0x298] sm:$0xff] %v788_v19  ;;  %v790_v20 = vld [vmem:[%s3632_s11 + $0x540] sm:$0xff]  ;;  %v792_v21 = vld [vmem:[%s3632_s11 + $0x550] sm:$0xff] }
  0x44   : > { %v794_v22 = vld [vmem:[%s3632_s11 + $0x560] sm:$0xff]  ;;  %791 = vst [vmem:[%s3637_s12 + $0x2a0] sm:$0xff] %v790_v20  ;;  %793 = vst [vmem:[%s3637_s12 + $0x2a8] sm:$0xff] %v792_v21  ;;  %v796_v23 = vld [vmem:[%s3632_s11 + $0x570] sm:$0xff] }
  0x45   : > { %795 = vst [vmem:[%s3637_s12 + $0x2b0] sm:$0xff] %v794_v22  ;;  %v798_v24 = vld [vmem:[%s3632_s11 + $0x580] sm:$0xff]  ;;  %v800_v25 = vld [vmem:[%s3632_s11 + $0x590] sm:$0xff]  ;;  %797 = vst [vmem:[%s3637_s12 + $0x2b8] sm:$0xff] %v796_v23 }
  0x46   : > { %799 = vst [vmem:[%s3637_s12 + $0x2c0] sm:$0xff] %v798_v24  ;;  %801 = vst [vmem:[%s3637_s12 + $0x2c8] sm:$0xff] %v800_v25  ;;  %v802_v26 = vld [vmem:[%s3632_s11 + $0x5a0] sm:$0xff]  ;;  %v804_v27 = vld [vmem:[%s3632_s11 + $0x5b0] sm:$0xff] }
  0x47   : > { %v806_v28 = vld [vmem:[%s3632_s11 + $0x5c0] sm:$0xff]  ;;  %803 = vst [vmem:[%s3637_s12 + $0x2d0] sm:$0xff] %v802_v26  ;;  %805 = vst [vmem:[%s3637_s12 + $0x2d8] sm:$0xff] %v804_v27  ;;  %v808_v29 = vld [vmem:[%s3632_s11 + $0x5d0] sm:$0xff] }
  0x48   : > { %807 = vst [vmem:[%s3637_s12 + $0x2e0] sm:$0xff] %v806_v28  ;;  %v810_v30 = vld [vmem:[%s3632_s11 + $0x5e0] sm:$0xff]  ;;  %v812_v31 = vld [vmem:[%s3632_s11 + $0x5f0] sm:$0xff]  ;;  %809 = vst [vmem:[%s3637_s12 + $0x2e8] sm:$0xff] %v808_v29 }
  0x49   : > { %811 = vst [vmem:[%s3637_s12 + $0x2f0] sm:$0xff] %v810_v30  ;;  %813 = vst [vmem:[%s3637_s12 + $0x2f8] sm:$0xff] %v812_v31  ;;  %v814_v32 = vld [vmem:[%s3632_s11 + $0x600] sm:$0xff]  ;;  %v816_v33 = vld [vmem:[%s3632_s11 + $0x610] sm:$0xff] }
  0x4a   : > { %v818_v34 = vld [vmem:[%s3632_s11 + $0x620] sm:$0xff]  ;;  %815 = vst [vmem:[%s3637_s12 + $0x300] sm:$0xff] %v814_v32  ;;  %817 = vst [vmem:[%s3637_s12 + $0x308] sm:$0xff] %v816_v33  ;;  %v820_v35 = vld [vmem:[%s3632_s11 + $0x630] sm:$0xff] }
  0x4b   : > { %819 = vst [vmem:[%s3637_s12 + $0x310] sm:$0xff] %v818_v34  ;;  %v822_v36 = vld [vmem:[%s3632_s11 + $0x640] sm:$0xff]  ;;  %v824_v37 = vld [vmem:[%s3632_s11 + $0x650] sm:$0xff]  ;;  %821 = vst [vmem:[%s3637_s12 + $0x318] sm:$0xff] %v820_v35 }
  0x4c   : > { %823 = vst [vmem:[%s3637_s12 + $0x320] sm:$0xff] %v822_v36  ;;  %825 = vst [vmem:[%s3637_s12 + $0x328] sm:$0xff] %v824_v37  ;;  %v826_v38 = vld [vmem:[%s3632_s11 + $0x660] sm:$0xff]  ;;  %v828_v39 = vld [vmem:[%s3632_s11 + $0x670] sm:$0xff] }
  0x4d   : > { %v830_v40 = vld [vmem:[%s3632_s11 + $0x680] sm:$0xff]  ;;  %827 = vst [vmem:[%s3637_s12 + $0x330] sm:$0xff] %v826_v38  ;;  %829 = vst [vmem:[%s3637_s12 + $0x338] sm:$0xff] %v828_v39  ;;  %v832_v41 = vld [vmem:[%s3632_s11 + $0x690] sm:$0xff] }
  0x4e   : > { %831 = vst [vmem:[%s3637_s12 + $0x340] sm:$0xff] %v830_v40  ;;  %v834_v42 = vld [vmem:[%s3632_s11 + $0x6a0] sm:$0xff]  ;;  %v836_v43 = vld [vmem:[%s3632_s11 + $0x6b0] sm:$0xff]  ;;  %833 = vst [vmem:[%s3637_s12 + $0x348] sm:$0xff] %v832_v41 }
  0x4f   : > { %835 = vst [vmem:[%s3637_s12 + $0x350] sm:$0xff] %v834_v42  ;;  %837 = vst [vmem:[%s3637_s12 + $0x358] sm:$0xff] %v836_v43  ;;  %v838_v44 = vld [vmem:[%s3632_s11 + $0x6c0] sm:$0xff]  ;;  %v840_v45 = vld [vmem:[%s3632_s11 + $0x6d0] sm:$0xff] }
  0x50   : > { %v842_v46 = vld [vmem:[%s3632_s11 + $0x6e0] sm:$0xff]  ;;  %839 = vst [vmem:[%s3637_s12 + $0x360] sm:$0xff] %v838_v44  ;;  %841 = vst [vmem:[%s3637_s12 + $0x368] sm:$0xff] %v840_v45  ;;  %v844_v47 = vld [vmem:[%s3632_s11 + $0x6f0] sm:$0xff] }
  0x51   : > { %843 = vst [vmem:[%s3637_s12 + $0x370] sm:$0xff] %v842_v46  ;;  %v846_v48 = vld [vmem:[%s3632_s11 + $0x700] sm:$0xff]  ;;  %v848_v49 = vld [vmem:[%s3632_s11 + $0x710] sm:$0xff]  ;;  %845 = vst [vmem:[%s3637_s12 + $0x378] sm:$0xff] %v844_v47 }
  0x52   : > { %847 = vst [vmem:[%s3637_s12 + $0x380] sm:$0xff] %v846_v48  ;;  %849 = vst [vmem:[%s3637_s12 + $0x388] sm:$0xff] %v848_v49  ;;  %v850_v50 = vld [vmem:[%s3632_s11 + $0x720] sm:$0xff]  ;;  %v852_v51 = vld [vmem:[%s3632_s11 + $0x730] sm:$0xff] }
  0x53   : > { %v854_v52 = vld [vmem:[%s3632_s11 + $0x740] sm:$0xff]  ;;  %851 = vst [vmem:[%s3637_s12 + $0x390] sm:$0xff] %v850_v50  ;;  %853 = vst [vmem:[%s3637_s12 + $0x398] sm:$0xff] %v852_v51  ;;  %v856_v53 = vld [vmem:[%s3632_s11 + $0x750] sm:$0xff] }
  0x54   : > { %855 = vst [vmem:[%s3637_s12 + $0x3a0] sm:$0xff] %v854_v52  ;;  %v858_v54 = vld [vmem:[%s3632_s11 + $0x760] sm:$0xff]  ;;  %v860_v55 = vld [vmem:[%s3632_s11 + $0x770] sm:$0xff]  ;;  %857 = vst [vmem:[%s3637_s12 + $0x3a8] sm:$0xff] %v856_v53 }
  0x55   : > { %859 = vst [vmem:[%s3637_s12 + $0x3b0] sm:$0xff] %v858_v54  ;;  %861 = vst [vmem:[%s3637_s12 + $0x3b8] sm:$0xff] %v860_v55  ;;  %v862_v56 = vld [vmem:[%s3632_s11 + $0x780] sm:$0xff]  ;;  %v864_v57 = vld [vmem:[%s3632_s11 + $0x790] sm:$0xff] }
  0x56   : > { %v866_v58 = vld [vmem:[%s3632_s11 + $0x7a0] sm:$0xff]  ;;  %863 = vst [vmem:[%s3637_s12 + $0x3c0] sm:$0xff] %v862_v56  ;;  %865 = vst [vmem:[%s3637_s12 + $0x3c8] sm:$0xff] %v864_v57  ;;  %v868_v59 = vld [vmem:[%s3632_s11 + $0x7b0] sm:$0xff] }
  0x57   : > { %867 = vst [vmem:[%s3637_s12 + $0x3d0] sm:$0xff] %v866_v58  ;;  %v870_v60 = vld [vmem:[%s3632_s11 + $0x7c0] sm:$0xff]  ;;  %v872_v61 = vld [vmem:[%s3632_s11 + $0x7d0] sm:$0xff]  ;;  %869 = vst [vmem:[%s3637_s12 + $0x3d8] sm:$0xff] %v868_v59 }
  0x58   : > { %871 = vst [vmem:[%s3637_s12 + $0x3e0] sm:$0xff] %v870_v60  ;;  %873 = vst [vmem:[%s3637_s12 + $0x3e8] sm:$0xff] %v872_v61  ;;  %v874_v62 = vld [vmem:[%s3632_s11 + $0x7e0] sm:$0xff]  ;;  %v876_v63 = vld [vmem:[%s3632_s11 + $0x7f0] sm:$0xff] }
  0x59   : > { %v878_v0 = vld [vmem:[%s3632_s11 + $0x800] sm:$0xff]  ;;  %875 = vst [vmem:[%s3637_s12 + $0x3f0] sm:$0xff] %v874_v62  ;;  %877 = vst [vmem:[%s3637_s12 + $0x3f8] sm:$0xff] %v876_v63  ;;  %v880_v1 = vld [vmem:[%s3632_s11 + $0x810] sm:$0xff] }
  0x5a   : > { %879 = vst [vmem:[%s3637_s12 + $0x400] sm:$0xff] %v878_v0  ;;  %v882_v2 = vld [vmem:[%s3632_s11 + $0x820] sm:$0xff]  ;;  %v884_v3 = vld [vmem:[%s3632_s11 + $0x830] sm:$0xff]  ;;  %881 = vst [vmem:[%s3637_s12 + $0x408] sm:$0xff] %v880_v1 }
  0x5b   : > { %883 = vst [vmem:[%s3637_s12 + $0x410] sm:$0xff] %v882_v2  ;;  %885 = vst [vmem:[%s3637_s12 + $0x418] sm:$0xff] %v884_v3  ;;  %v886_v4 = vld [vmem:[%s3632_s11 + $0x840] sm:$0xff]  ;;  %v888_v5 = vld [vmem:[%s3632_s11 + $0x850] sm:$0xff] }
  0x5c   : > { %v890_v6 = vld [vmem:[%s3632_s11 + $0x860] sm:$0xff]  ;;  %887 = vst [vmem:[%s3637_s12 + $0x420] sm:$0xff] %v886_v4  ;;  %889 = vst [vmem:[%s3637_s12 + $0x428] sm:$0xff] %v888_v5  ;;  %v892_v7 = vld [vmem:[%s3632_s11 + $0x870] sm:$0xff] }
  0x5d   : > { %891 = vst [vmem:[%s3637_s12 + $0x430] sm:$0xff] %v890_v6  ;;  %v894_v8 = vld [vmem:[%s3632_s11 + $0x880] sm:$0xff]  ;;  %v896_v9 = vld [vmem:[%s3632_s11 + $0x890] sm:$0xff]  ;;  %893 = vst [vmem:[%s3637_s12 + $0x438] sm:$0xff] %v892_v7 }
  0x5e   : > { %895 = vst [vmem:[%s3637_s12 + $0x440] sm:$0xff] %v894_v8  ;;  %897 = vst [vmem:[%s3637_s12 + $0x448] sm:$0xff] %v896_v9  ;;  %v898_v10 = vld [vmem:[%s3632_s11 + $0x8a0] sm:$0xff]  ;;  %v900_v11 = vld [vmem:[%s3632_s11 + $0x8b0] sm:$0xff] }
  0x5f   : > { %v902_v12 = vld [vmem:[%s3632_s11 + $0x8c0] sm:$0xff]  ;;  %899 = vst [vmem:[%s3637_s12 + $0x450] sm:$0xff] %v898_v10  ;;  %901 = vst [vmem:[%s3637_s12 + $0x458] sm:$0xff] %v900_v11  ;;  %v904_v13 = vld [vmem:[%s3632_s11 + $0x8d0] sm:$0xff] }
  0x60   : > { %903 = vst [vmem:[%s3637_s12 + $0x460] sm:$0xff] %v902_v12  ;;  %v906_v14 = vld [vmem:[%s3632_s11 + $0x8e0] sm:$0xff]  ;;  %v908_v15 = vld [vmem:[%s3632_s11 + $0x8f0] sm:$0xff]  ;;  %905 = vst [vmem:[%s3637_s12 + $0x468] sm:$0xff] %v904_v13 }
  0x61   : > { %907 = vst [vmem:[%s3637_s12 + $0x470] sm:$0xff] %v906_v14  ;;  %909 = vst [vmem:[%s3637_s12 + $0x478] sm:$0xff] %v908_v15  ;;  %v910_v16 = vld [vmem:[%s3632_s11 + $0x900] sm:$0xff]  ;;  %v912_v17 = vld [vmem:[%s3632_s11 + $0x910] sm:$0xff] }
  0x62   : > { %v914_v18 = vld [vmem:[%s3632_s11 + $0x920] sm:$0xff]  ;;  %911 = vst [vmem:[%s3637_s12 + $0x480] sm:$0xff] %v910_v16  ;;  %913 = vst [vmem:[%s3637_s12 + $0x488] sm:$0xff] %v912_v17  ;;  %v916_v19 = vld [vmem:[%s3632_s11 + $0x930] sm:$0xff] }
  0x63   : > { %915 = vst [vmem:[%s3637_s12 + $0x490] sm:$0xff] %v914_v18  ;;  %v918_v20 = vld [vmem:[%s3632_s11 + $0x940] sm:$0xff]  ;;  %v920_v21 = vld [vmem:[%s3632_s11 + $0x950] sm:$0xff]  ;;  %917 = vst [vmem:[%s3637_s12 + $0x498] sm:$0xff] %v916_v19 }
  0x64   : > { %919 = vst [vmem:[%s3637_s12 + $0x4a0] sm:$0xff] %v918_v20  ;;  %921 = vst [vmem:[%s3637_s12 + $0x4a8] sm:$0xff] %v920_v21  ;;  %v922_v22 = vld [vmem:[%s3632_s11 + $0x960] sm:$0xff]  ;;  %v924_v23 = vld [vmem:[%s3632_s11 + $0x970] sm:$0xff] }
  0x65   : > { %v926_v24 = vld [vmem:[%s3632_s11 + $0x980] sm:$0xff]  ;;  %923 = vst [vmem:[%s3637_s12 + $0x4b0] sm:$0xff] %v922_v22  ;;  %925 = vst [vmem:[%s3637_s12 + $0x4b8] sm:$0xff] %v924_v23  ;;  %v928_v25 = vld [vmem:[%s3632_s11 + $0x990] sm:$0xff] }
  0x66   : > { %927 = vst [vmem:[%s3637_s12 + $0x4c0] sm:$0xff] %v926_v24  ;;  %v930_v26 = vld [vmem:[%s3632_s11 + $0x9a0] sm:$0xff]  ;;  %v932_v27 = vld [vmem:[%s3632_s11 + $0x9b0] sm:$0xff]  ;;  %929 = vst [vmem:[%s3637_s12 + $0x4c8] sm:$0xff] %v928_v25 }
  0x67   : > { %931 = vst [vmem:[%s3637_s12 + $0x4d0] sm:$0xff] %v930_v26  ;;  %933 = vst [vmem:[%s3637_s12 + $0x4d8] sm:$0xff] %v932_v27  ;;  %v934_v28 = vld [vmem:[%s3632_s11 + $0x9c0] sm:$0xff]  ;;  %v936_v29 = vld [vmem:[%s3632_s11 + $0x9d0] sm:$0xff] }
  0x68   : > { %v938_v30 = vld [vmem:[%s3632_s11 + $0x9e0] sm:$0xff]  ;;  %935 = vst [vmem:[%s3637_s12 + $0x4e0] sm:$0xff] %v934_v28  ;;  %937 = vst [vmem:[%s3637_s12 + $0x4e8] sm:$0xff] %v936_v29  ;;  %v940_v31 = vld [vmem:[%s3632_s11 + $0x9f0] sm:$0xff] }
  0x69   : > { %939 = vst [vmem:[%s3637_s12 + $0x4f0] sm:$0xff] %v938_v30  ;;  %v942_v32 = vld [vmem:[%s3632_s11 + $0xa00] sm:$0xff]  ;;  %v944_v33 = vld [vmem:[%s3632_s11 + $0xa10] sm:$0xff]  ;;  %941 = vst [vmem:[%s3637_s12 + $0x4f8] sm:$0xff] %v940_v31 }
  0x6a   : > { %943 = vst [vmem:[%s3637_s12 + $0x500] sm:$0xff] %v942_v32  ;;  %945 = vst [vmem:[%s3637_s12 + $0x508] sm:$0xff] %v944_v33  ;;  %v946_v34 = vld [vmem:[%s3632_s11 + $0xa20] sm:$0xff]  ;;  %v948_v35 = vld [vmem:[%s3632_s11 + $0xa30] sm:$0xff] }
  0x6b   : > { %v950_v36 = vld [vmem:[%s3632_s11 + $0xa40] sm:$0xff]  ;;  %947 = vst [vmem:[%s3637_s12 + $0x510] sm:$0xff] %v946_v34  ;;  %949 = vst [vmem:[%s3637_s12 + $0x518] sm:$0xff] %v948_v35  ;;  %v952_v37 = vld [vmem:[%s3632_s11 + $0xa50] sm:$0xff] }
  0x6c   : > { %951 = vst [vmem:[%s3637_s12 + $0x520] sm:$0xff] %v950_v36  ;;  %v954_v38 = vld [vmem:[%s3632_s11 + $0xa60] sm:$0xff]  ;;  %v956_v39 = vld [vmem:[%s3632_s11 + $0xa70] sm:$0xff]  ;;  %953 = vst [vmem:[%s3637_s12 + $0x528] sm:$0xff] %v952_v37 }
  0x6d   : > { %955 = vst [vmem:[%s3637_s12 + $0x530] sm:$0xff] %v954_v38  ;;  %957 = vst [vmem:[%s3637_s12 + $0x538] sm:$0xff] %v956_v39  ;;  %v958_v40 = vld [vmem:[%s3632_s11 + $0xa80] sm:$0xff]  ;;  %v960_v41 = vld [vmem:[%s3632_s11 + $0xa90] sm:$0xff] }
  0x6e   : > { %v962_v42 = vld [vmem:[%s3632_s11 + $0xaa0] sm:$0xff]  ;;  %959 = vst [vmem:[%s3637_s12 + $0x540] sm:$0xff] %v958_v40  ;;  %961 = vst [vmem:[%s3637_s12 + $0x548] sm:$0xff] %v960_v41  ;;  %v964_v43 = vld [vmem:[%s3632_s11 + $0xab0] sm:$0xff] }
  0x6f   : > { %963 = vst [vmem:[%s3637_s12 + $0x550] sm:$0xff] %v962_v42  ;;  %v966_v44 = vld [vmem:[%s3632_s11 + $0xac0] sm:$0xff]  ;;  %v968_v45 = vld [vmem:[%s3632_s11 + $0xad0] sm:$0xff]  ;;  %965 = vst [vmem:[%s3637_s12 + $0x558] sm:$0xff] %v964_v43 }
  0x70   : > { %967 = vst [vmem:[%s3637_s12 + $0x560] sm:$0xff] %v966_v44  ;;  %969 = vst [vmem:[%s3637_s12 + $0x568] sm:$0xff] %v968_v45  ;;  %v970_v46 = vld [vmem:[%s3632_s11 + $0xae0] sm:$0xff]  ;;  %v972_v47 = vld [vmem:[%s3632_s11 + $0xaf0] sm:$0xff] }
  0x71   : > { %v974_v48 = vld [vmem:[%s3632_s11 + $0xb00] sm:$0xff]  ;;  %971 = vst [vmem:[%s3637_s12 + $0x570] sm:$0xff] %v970_v46  ;;  %973 = vst [vmem:[%s3637_s12 + $0x578] sm:$0xff] %v972_v47  ;;  %v976_v49 = vld [vmem:[%s3632_s11 + $0xb10] sm:$0xff] }
  0x72   : > { %975 = vst [vmem:[%s3637_s12 + $0x580] sm:$0xff] %v974_v48  ;;  %v978_v50 = vld [vmem:[%s3632_s11 + $0xb20] sm:$0xff]  ;;  %v980_v51 = vld [vmem:[%s3632_s11 + $0xb30] sm:$0xff]  ;;  %977 = vst [vmem:[%s3637_s12 + $0x588] sm:$0xff] %v976_v49 }
  0x73   : > { %979 = vst [vmem:[%s3637_s12 + $0x590] sm:$0xff] %v978_v50  ;;  %981 = vst [vmem:[%s3637_s12 + $0x598] sm:$0xff] %v980_v51  ;;  %v982_v52 = vld [vmem:[%s3632_s11 + $0xb40] sm:$0xff]  ;;  %v984_v53 = vld [vmem:[%s3632_s11 + $0xb50] sm:$0xff] }
  0x74   : > { %v986_v54 = vld [vmem:[%s3632_s11 + $0xb60] sm:$0xff]  ;;  %983 = vst [vmem:[%s3637_s12 + $0x5a0] sm:$0xff] %v982_v52  ;;  %985 = vst [vmem:[%s3637_s12 + $0x5a8] sm:$0xff] %v984_v53  ;;  %v988_v55 = vld [vmem:[%s3632_s11 + $0xb70] sm:$0xff] }
  0x75   : > { %987 = vst [vmem:[%s3637_s12 + $0x5b0] sm:$0xff] %v986_v54  ;;  %v990_v56 = vld [vmem:[%s3632_s11 + $0xb80] sm:$0xff]  ;;  %v992_v57 = vld [vmem:[%s3632_s11 + $0xb90] sm:$0xff]  ;;  %989 = vst [vmem:[%s3637_s12 + $0x5b8] sm:$0xff] %v988_v55 }
  0x76   : > { %991 = vst [vmem:[%s3637_s12 + $0x5c0] sm:$0xff] %v990_v56  ;;  %993 = vst [vmem:[%s3637_s12 + $0x5c8] sm:$0xff] %v992_v57  ;;  %v994_v58 = vld [vmem:[%s3632_s11 + $0xba0] sm:$0xff]  ;;  %v996_v59 = vld [vmem:[%s3632_s11 + $0xbb0] sm:$0xff] }
  0x77   : > { %v998_v60 = vld [vmem:[%s3632_s11 + $0xbc0] sm:$0xff]  ;;  %995 = vst [vmem:[%s3637_s12 + $0x5d0] sm:$0xff] %v994_v58  ;;  %997 = vst [vmem:[%s3637_s12 + $0x5d8] sm:$0xff] %v996_v59  ;;  %v1000_v61 = vld [vmem:[%s3632_s11 + $0xbd0] sm:$0xff] }
  0x78   : > { %999 = vst [vmem:[%s3637_s12 + $0x5e0] sm:$0xff] %v998_v60  ;;  %v1002_v62 = vld [vmem:[%s3632_s11 + $0xbe0] sm:$0xff]  ;;  %v1004_v63 = vld [vmem:[%s3632_s11 + $0xbf0] sm:$0xff]  ;;  %1001 = vst [vmem:[%s3637_s12 + $0x5e8] sm:$0xff] %v1000_v61 }
  0x79   : > { %1003 = vst [vmem:[%s3637_s12 + $0x5f0] sm:$0xff] %v1002_v62  ;;  %1005 = vst [vmem:[%s3637_s12 + $0x5f8] sm:$0xff] %v1004_v63 }
  0x7a PF: > { %p2779_p7 = scmp.ge.s32.totalorder %s3544_s21, 1  ;;  %p1031_p8 = scmp.lt.s32.totalorder %s3544_s21, 19 }
  0x7c   : > { %p1032_p9 = pnand %p2779_p7, %p1031_p8 }
  0x7d   : > { %s1038_s13 = sand.u32 (!%p1032_p9), 1, %s3520_s15   ;;  %s1090_s14 = smul.u32 (!%p1032_p9), 3, %s3528_s17 }
  0x7e   : > { %1035 = sbr.rel (%p1032_p9) target bundleno = 574 (0x23e), region = 70  ;;  %s2782_s25 = sshll.u32 (!%p1032_p9), %s3532_s18, 1 }
  0x7f   : > { %s3132_s24 = smul.u32 (!%p1032_p9), 1536, %s1038_s13  ;;  %p1091_p10 = scmp.lt.s32.totalorder (!%p1032_p9), %s1090_s14, 26 }
  0x80   : > { %p1104_p11 = scmp.lt.s32.totalorder (!%p1032_p9), %s2782_s25, 3  ;;  %p2787_p12 = scmp.ne.s32.totalorder (!%p1032_p9), %s3528_s17, 0 }
  0x81   : > { %s4047_s13 = scalar_lea.vmem (!%p1032_p9), [#allocation3], %s3132_s24 }
  0x85   : > { %s4319_s14 = smov (!%p1091_p10, %s1090_s14), 26  ;;  %s4321_s25 = smov (!%p1104_p11, %s2782_s25), 3 }
  0x86   : > { %s3129_s26 = sshll.u32 %s4319_s14, 4  ;;  %s1106_s15 = scalar_lea.vmem %s4303_s2, %s4321_s25  ;;  %v3546_v0 = vmov (!%p2787_p12), 0.0  }
  0x87   : > { %s4030_s30 = scalar_lea.vmem %s4301_s0, %s3129_s26  ;;  %s2784_s7 = sshll.u32 %s4321_s25, 2  ;;  %1132 = vst [vmem:[#allocation2] sm:$0xff] (!%p2787_p12), %v3546_v0  ;;  %1133 = vst [vmem:[#allocation2 + $0x8] sm:$0xff] (!%p2787_p12), %v3546_v0 }
  0x88   : > { %s4040_s9 = scalar_lea.vmem %s4304_s3, %s2784_s7  ;;  %s4045_s12 = scalar_lea.vmem %s4305_s4, %s2784_s7 }
  0x89   : > { %1131 = sbr.rel (%p2787_p12) target bundleno = 144 (0x90), region = 78 }
  0x90 PF: > { %v3190_v1 = vld [vmem:[%s4047_s13 + $0x204] ss:$8 sps:$4 sm:$0xff]   ;;  %v3194_v3 = vld [vmem:[%s4047_s13 + $0x200] ss:$8 sps:$4 sm:$0xff]   ;;  %v3196_v5 = vld [vmem:[%s4047_s13 + $0x214] ss:$8 sps:$4 sm:$0xff]  }
  0x91   : > { %v3192_v2 = vld [vmem:[%s4047_s13 + $0x304] ss:$8 sps:$4 sm:$0xff]   ;;  %1602 = vmatprep.subr.bf16.mxu0 %v3190_v1  ;;  %v3195_v4 = vld [vmem:[%s4047_s13 + $0x300] ss:$8 sps:$4 sm:$0xff]   ;;  %v3198_v6 = vld [vmem:[%s4047_s13 + $0x314] ss:$8 sps:$4 sm:$0xff]  }
  0x92   : > { %1643 = vmatprep.subr.bf16.mxu1 %v3192_v2  ;;  %1603 = vmatpush1.bf16.msra.mxu0 %v3194_v3  ;;  %v3200_v7 = vld [vmem:[%s4047_s13 + $0x210] ss:$8 sps:$4 sm:$0xff]   ;;  %v3202_v9 = vld [vmem:[%s4047_s13 + $0x224] ss:$8 sps:$4 sm:$0xff]   ;;  %v3206_v11 = vld [vmem:[%s4047_s13 + $0x220] ss:$8 sps:$4 sm:$0xff]  }
  0x93   : > { %1644 = vmatpush1.bf16.msra.mxu1 %v3195_v4  ;;  %1604 = vmatprep.subr.bf16.mxu0 %v3196_v5  ;;  %v3201_v8 = vld [vmem:[%s4047_s13 + $0x310] ss:$8 sps:$4 sm:$0xff]   ;;  %v3204_v10 = vld [vmem:[%s4047_s13 + $0x324] ss:$8 sps:$4 sm:$0xff]   ;;  %v3207_v12 = vld [vmem:[%s4047_s13 + $0x320] ss:$8 sps:$4 sm:$0xff]  }
  0x94   : > { %1645 = vmatprep.subr.bf16.mxu1 %v3198_v6  ;;  %v3208_v13 = vld [vmem:[%s4047_s13 + $0x234] ss:$8 sps:$4 sm:$0xff]   ;;  %v3212_v15 = vld [vmem:[%s4047_s13 + $0x230] ss:$8 sps:$4 sm:$0xff]   ;;  %v3214_v17 = vld [vmem:[%s4047_s13 + $0x244] ss:$8 sps:$4 sm:$0xff]  }
  0x95   : > { %v3210_v14 = vld [vmem:[%s4047_s13 + $0x334] ss:$8 sps:$4 sm:$0xff]   ;;  %v3213_v16 = vld [vmem:[%s4047_s13 + $0x330] ss:$8 sps:$4 sm:$0xff]   ;;  %v3216_v18 = vld [vmem:[%s4047_s13 + $0x344] ss:$8 sps:$4 sm:$0xff]  }
  0x96   : > { %1605 = vmatpush1.bf16.msra.mxu0 %v3200_v7  ;;  %v3218_v19 = vld [vmem:[%s4047_s13 + $0x240] ss:$8 sps:$4 sm:$0xff]   ;;  %v3220_v21 = vld [vmem:[%s4047_s13 + $0x254] ss:$8 sps:$4 sm:$0xff]   ;;  %v3224_v23 = vld [vmem:[%s4047_s13 + $0x250] ss:$8 sps:$4 sm:$0xff]  }
  0x97   : > { %1646 = vmatpush1.bf16.msra.mxu1 %v3201_v8  ;;  %1606 = vmatprep.subr.bf16.mxu0 %v3202_v9  ;;  %v3219_v20 = vld [vmem:[%s4047_s13 + $0x340] ss:$8 sps:$4 sm:$0xff]   ;;  %v3222_v22 = vld [vmem:[%s4047_s13 + $0x354] ss:$8 sps:$4 sm:$0xff]   ;;  %v3225_v24 = vld [vmem:[%s4047_s13 + $0x350] ss:$8 sps:$4 sm:$0xff]  }
  0x98   : > { %1647 = vmatprep.subr.bf16.mxu1 %v3204_v10  ;;  %v3226_v25 = vld [vmem:[%s4047_s13 + $0x264] ss:$8 sps:$4 sm:$0xff]   ;;  %v3230_v27 = vld [vmem:[%s4047_s13 + $0x260] ss:$8 sps:$4 sm:$0xff]   ;;  %v3232_v29 = vld [vmem:[%s4047_s13 + $0x274] ss:$8 sps:$4 sm:$0xff]  }
  0x99   : > { %v3228_v26 = vld [vmem:[%s4047_s13 + $0x364] ss:$8 sps:$4 sm:$0xff]   ;;  %v3231_v28 = vld [vmem:[%s4047_s13 + $0x360] ss:$8 sps:$4 sm:$0xff]   ;;  %v3234_v30 = vld [vmem:[%s4047_s13 + $0x374] ss:$8 sps:$4 sm:$0xff]  }
  0x9a   : > { %1607 = vmatpush1.bf16.msra.mxu0 %v3206_v11  ;;  %v3236_v31 = vld [vmem:[%s4047_s13 + $0x270] ss:$8 sps:$4 sm:$0xff]   ;;  %v3238_v33 = vld [vmem:[%s4047_s13 + $0x284] ss:$8 sps:$4 sm:$0xff]   ;;  %v3242_v35 = vld [vmem:[%s4047_s13 + $0x280] ss:$8 sps:$4 sm:$0xff]  }
  0x9b   : > { %1648 = vmatpush1.bf16.msra.mxu1 %v3207_v12  ;;  %1608 = vmatprep.subr.bf16.mxu0 %v3208_v13  ;;  %v3237_v32 = vld [vmem:[%s4047_s13 + $0x370] ss:$8 sps:$4 sm:$0xff]   ;;  %v3240_v34 = vld [vmem:[%s4047_s13 + $0x384] ss:$8 sps:$4 sm:$0xff]   ;;  %v3243_v36 = vld [vmem:[%s4047_s13 + $0x380] ss:$8 sps:$4 sm:$0xff]  }
  0x9c   : > { %1649 = vmatprep.subr.bf16.mxu1 %v3210_v14  ;;  %v3244_v37 = vld [vmem:[%s4047_s13 + $0x294] ss:$8 sps:$4 sm:$0xff]   ;;  %v3248_v39 = vld [vmem:[%s4047_s13 + $0x290] ss:$8 sps:$4 sm:$0xff]   ;;  %v3250_v41 = vld [vmem:[%s4047_s13 + $0x2a4] ss:$8 sps:$4 sm:$0xff]  }
  0x9d   : > { %v3246_v38 = vld [vmem:[%s4047_s13 + $0x394] ss:$8 sps:$4 sm:$0xff]   ;;  %v3249_v40 = vld [vmem:[%s4047_s13 + $0x390] ss:$8 sps:$4 sm:$0xff]   ;;  %v3252_v42 = vld [vmem:[%s4047_s13 + $0x3a4] ss:$8 sps:$4 sm:$0xff]  }
  0x9e   : > { %1609 = vmatpush1.bf16.msra.mxu0 %v3212_v15  ;;  %v3254_v43 = vld [vmem:[%s4047_s13 + $0x2a0] ss:$8 sps:$4 sm:$0xff]   ;;  %v3256_v45 = vld [vmem:[%s4047_s13 + $0x2b4] ss:$8 sps:$4 sm:$0xff]   ;;  %v3260_v50 = vld [vmem:[%s4047_s13 + $0x2b0] ss:$8 sps:$4 sm:$0xff]  }
  0x9f   : > { %1650 = vmatpush1.bf16.msra.mxu1 %v3213_v16  ;;  %1610 = vmatprep.subr.bf16.mxu0 %v3214_v17  ;;  %v3255_v44 = vld [vmem:[%s4047_s13 + $0x3a0] ss:$8 sps:$4 sm:$0xff]   ;;  %v3258_v46 = vld [vmem:[%s4047_s13 + $0x3b4] ss:$8 sps:$4 sm:$0xff]   ;;  %v3261_v51 = vld [vmem:[%s4047_s13 + $0x3b0] ss:$8 sps:$4 sm:$0xff]  }
  0xa0   : > { %1651 = vmatprep.subr.bf16.mxu1 %v3216_v18  ;;  %v2788_v47 = vld [vmem:[%s4030_s30 + $0x10] sm:$0xff]  ;;  %v2789_v49 = vld [vmem:[%s4030_s30 + $0x18] sm:$0xff]  ;;  %v3268_v57 = vld [vmem:[%s4047_s13 + $0x2d4] ss:$8 sps:$4 sm:$0xff]   ;;  %p3124_p13 = scmp.ne.s32.totalorder %s3528_s17, 8 }
  0xa1   : > { %v2855_v48 = vcombine.high %v2788_v47, %v2788_v47  ;;  %v2857_v52 = vcombine.high %v2789_v49, %v2789_v49  ;;  %v3262_v53 = vld [vmem:[%s4047_s13 + $0x2c4] ss:$8 sps:$4 sm:$0xff]   ;;  %v3266_v55 = vld [vmem:[%s4047_s13 + $0x2c0] ss:$8 sps:$4 sm:$0xff]   ;;  %v3270_v58 = vld [vmem:[%s4047_s13 + $0x3d4] ss:$8 sps:$4 sm:$0xff]   ;;  %v2854_v7 = vcombine.low %v2788_v47, %v2788_v47  ;;  %v2856_v8 = vcombine.low %v2789_v49, %v2789_v49 }
  0xa2   : > { %1611 = vmatpush1.bf16.msra.mxu0 %v3218_v19  ;;  %v3264_v54 = vld [vmem:[%s4047_s13 + $0x3c4] ss:$8 sps:$4 sm:$0xff]   ;;  %v3267_v56 = vld [vmem:[%s4047_s13 + $0x3c0] ss:$8 sps:$4 sm:$0xff]   ;;  %v3272_v59 = vld [vmem:[%s4047_s13 + $0x2d0] ss:$8 sps:$4 sm:$0xff]  }
  0xa3   : > { %1652 = vmatpush1.bf16.msra.mxu1 %v3219_v20  ;;  %1612 = vmatprep.subr.bf16.mxu0 %v3220_v21  ;;  %v3273_v60 = vld [vmem:[%s4047_s13 + $0x3d0] ss:$8 sps:$4 sm:$0xff]   ;;  %v3274_v61 = vld [vmem:[%s4047_s13 + $0x2e4] ss:$8 sps:$4 sm:$0xff]   ;;  %v3278_v63 = vld [vmem:[%s4047_s13 + $0x2e0] ss:$8 sps:$4 sm:$0xff]  }
  0xa4   : > { %1653 = vmatprep.subr.bf16.mxu1 %v3222_v22  ;;  %1634 = vmatprep.mubr.bf16.mxu0 %v2855_v48  ;;  %v3276_v62 = vld [vmem:[%s4047_s13 + $0x3e4] ss:$8 sps:$4 sm:$0xff]   ;;  %v3279_v0 = vld [vmem:[%s4047_s13 + $0x3e0] ss:$8 sps:$4 sm:$0xff]   ;;  %v3280_v1 = vld [vmem:[%s4047_s13 + $0x2f4] ss:$8 sps:$4 sm:$0xff]  }
  0xa5   : > { %1675 = vmatprep.mubr.bf16.mxu1 %v2857_v52  ;;  %v3282_v2 = vld [vmem:[%s4047_s13 + $0x3f4] ss:$8 sps:$4 sm:$0xff]   ;;  %v3284_v3 = vld [vmem:[%s4047_s13 + $0x2f0] ss:$8 sps:$4 sm:$0xff]   ;;  %v3292_v5 = vld [vmem:[%s4047_s13 + $0x4] ss:$8 sps:$4 sm:$0xff]  }
  0xa6   : > { %1613 = vmatpush1.bf16.msra.mxu0 %v3224_v23  ;;  %v3285_v4 = vld [vmem:[%s4047_s13 + $0x3f0] ss:$8 sps:$4 sm:$0xff]   ;;  %v3295_v6 = vld [vmem:[%s4047_s13 + $0x104] ss:$8 sps:$4 sm:$0xff]   ;;  %v3290_v9 = vld [vmem:[%s4047_s13] ss:$8 sps:$4 sm:$0xff]  }
  0xa7   : > { %1654 = vmatpush1.bf16.msra.mxu1 %v3225_v24  ;;  %1614 = vmatprep.subr.bf16.mxu0 %v3226_v25  ;;  %v3293_v10 = vld [vmem:[%s4047_s13 + $0x100] ss:$8 sps:$4 sm:$0xff]   ;;  %v3298_v11 = vld [vmem:[%s4047_s13 + $0x14] ss:$8 sps:$4 sm:$0xff]   ;;  %v3296_v13 = vld [vmem:[%s4047_s13 + $0x10] ss:$8 sps:$4 sm:$0xff]  }
  0xa8   : > { %1655 = vmatprep.subr.bf16.mxu1 %v3228_v26  ;;  %v3301_v12 = vld [vmem:[%s4047_s13 + $0x114] ss:$8 sps:$4 sm:$0xff]   ;;  %v3299_v14 = vld [vmem:[%s4047_s13 + $0x110] ss:$8 sps:$4 sm:$0xff]   ;;  %v3304_v15 = vld [vmem:[%s4047_s13 + $0x24] ss:$8 sps:$4 sm:$0xff]  }
  0xa9   : > { %v3307_v16 = vld [vmem:[%s4047_s13 + $0x124] ss:$8 sps:$4 sm:$0xff]   ;;  %v3302_v17 = vld [vmem:[%s4047_s13 + $0x20] ss:$8 sps:$4 sm:$0xff]   ;;  %v3310_v19 = vld [vmem:[%s4047_s13 + $0x34] ss:$8 sps:$4 sm:$0xff]  }
  0xaa   : > { %1615 = vmatpush1.bf16.msra.mxu0 %v3230_v27  ;;  %v3305_v18 = vld [vmem:[%s4047_s13 + $0x120] ss:$8 sps:$4 sm:$0xff]   ;;  %v3313_v20 = vld [vmem:[%s4047_s13 + $0x134] ss:$8 sps:$4 sm:$0xff]   ;;  %v3308_v21 = vld [vmem:[%s4047_s13 + $0x30] ss:$8 sps:$4 sm:$0xff]  }
  0xab   : > { %1656 = vmatpush1.bf16.msra.mxu1 %v3231_v28  ;;  %1616 = vmatprep.subr.bf16.mxu0 %v3232_v29  ;;  %v3311_v22 = vld [vmem:[%s4047_s13 + $0x130] ss:$8 sps:$4 sm:$0xff]   ;;  %v3316_v23 = vld [vmem:[%s4047_s13 + $0x44] ss:$8 sps:$4 sm:$0xff]   ;;  %v3314_v25 = vld [vmem:[%s4047_s13 + $0x40] ss:$8 sps:$4 sm:$0xff]  }
  0xac   : > { %1657 = vmatprep.subr.bf16.mxu1 %v3234_v30  ;;  %v3319_v24 = vld [vmem:[%s4047_s13 + $0x144] ss:$8 sps:$4 sm:$0xff]   ;;  %v3317_v26 = vld [vmem:[%s4047_s13 + $0x140] ss:$8 sps:$4 sm:$0xff]   ;;  %v3322_v27 = vld [vmem:[%s4047_s13 + $0x54] ss:$8 sps:$4 sm:$0xff]  }
  0xad   : > { %v3325_v28 = vld [vmem:[%s4047_s13 + $0x154] ss:$8 sps:$4 sm:$0xff]   ;;  %v3320_v29 = vld [vmem:[%s4047_s13 + $0x50] ss:$8 sps:$4 sm:$0xff]   ;;  %v3355_v52 = vld [vmem:[%s4047_s13 + $0x1a4] ss:$8 sps:$4 sm:$0xff]  }
  0xae   : > { %1617 = vmatpush1.bf16.msra.mxu0 %v3236_v31  ;;  %v3323_v30 = vld [vmem:[%s4047_s13 + $0x150] ss:$8 sps:$4 sm:$0xff]   ;;  %v3328_v31 = vld [vmem:[%s4047_s13 + $0x64] ss:$8 sps:$4 sm:$0xff]   ;;  %v3346_v47 = vld [vmem:[%s4047_s13 + $0x94] ss:$8 sps:$4 sm:$0xff]  }
  0xaf   : > { %1658 = vmatpush1.bf16.msra.mxu1 %v3237_v32  ;;  %1618 = vmatprep.subr.bf16.mxu0 %v3238_v33  ;;  %v3331_v32 = vld [vmem:[%s4047_s13 + $0x164] ss:$8 sps:$4 sm:$0xff]   ;;  %v4143_v33 = vld [vmem:[%s4030_s30] sm:$0xff] }
  0xb0   : > { %1659 = vmatprep.subr.bf16.mxu1 %v3240_v34  ;;  %v4146_v34 = vld [vmem:[%s4030_s30 + $0x8] sm:$0xff] }
  0xb1   : > { %v3349_v48 = vld [vmem:[%s4047_s13 + $0x194] ss:$8 sps:$4 sm:$0xff]   ;;  %v3344_v49 = vld [vmem:[%s4047_s13 + $0x90] ss:$8 sps:$4 sm:$0xff]  }
  0xb2   : > { %1619 = vmatpush1.bf16.msra.mxu0 %v3242_v35  ;;  %v3326_v35 = vld [vmem:[%s4047_s13 + $0x60] ss:$8 sps:$4 sm:$0xff]  }
  0xb3   : > { %1660 = vmatpush1.bf16.msra.mxu1 %v3243_v36  ;;  %1620 = vmatprep.subr.bf16.mxu0 %v3244_v37  ;;  %v3329_v36 = vld [vmem:[%s4047_s13 + $0x160] ss:$8 sps:$4 sm:$0xff]   ;;  %v2923_v37 = vcombine.high %v4143_v33, %v4143_v33 }
  0xb4   : > { %1661 = vmatprep.subr.bf16.mxu1 %v3246_v38  ;;  %v2925_v38 = vcombine.high %v4146_v34, %v4146_v34 }
  0xb6   : > { %1621 = vmatpush1.bf16.msra.mxu0 %v3248_v39  ;;  %v3334_v39 = vld [vmem:[%s4047_s13 + $0x74] ss:$8 sps:$4 sm:$0xff]  }
  0xb7   : > { %1662 = vmatpush1.bf16.msra.mxu1 %v3249_v40  ;;  %1622 = vmatprep.subr.bf16.mxu0 %v3250_v41  ;;  %v3337_v40 = vld [vmem:[%s4047_s13 + $0x174] ss:$8 sps:$4 sm:$0xff]   ;;  %v3332_v41 = vld [vmem:[%s4047_s13 + $0x70] ss:$8 sps:$4 sm:$0xff]  }
  0xb8   : > { %1663 = vmatprep.subr.bf16.mxu1 %v3252_v42  ;;  %v3335_v42 = vld [vmem:[%s4047_s13 + $0x170] ss:$8 sps:$4 sm:$0xff]  }
  0xba   : > { %1623 = vmatpush1.bf16.msra.mxu0 %v3254_v43  ;;  %v3340_v43 = vld [vmem:[%s4047_s13 + $0x84] ss:$8 sps:$4 sm:$0xff]  }
  0xbb   : > { %1664 = vmatpush1.bf16.msra.mxu1 %v3255_v44  ;;  %1624 = vmatprep.subr.bf16.mxu0 %v3256_v45  ;;  %v3343_v44 = vld [vmem:[%s4047_s13 + $0x184] ss:$8 sps:$4 sm:$0xff]   ;;  %v3338_v45 = vld [vmem:[%s4047_s13 + $0x80] ss:$8 sps:$4 sm:$0xff]  }
  0xbc   : > { %1665 = vmatprep.subr.bf16.mxu1 %v3258_v46  ;;  %v3341_v46 = vld [vmem:[%s4047_s13 + $0x180] ss:$8 sps:$4 sm:$0xff]  }
  0xbe   : > { %1625 = vmatpush1.bf16.msra.mxu0 %v3260_v50  ;;  %v3347_v50 = vld [vmem:[%s4047_s13 + $0x190] ss:$8 sps:$4 sm:$0xff]  }
  0xbf   : > { %1666 = vmatpush1.bf16.msra.mxu1 %v3261_v51  ;;  %1626 = vmatprep.subr.bf16.mxu0 %v3262_v53  ;;  %v3352_v51 = vld [vmem:[%s4047_s13 + $0xa4] ss:$8 sps:$4 sm:$0xff]   ;;  %v3350_v53 = vld [vmem:[%s4047_s13 + $0xa0] ss:$8 sps:$4 sm:$0xff]  }
  0xc0   : > { %1667 = vmatprep.subr.bf16.mxu1 %v3264_v54  ;;  %v3353_v54 = vld [vmem:[%s4047_s13 + $0x1a0] ss:$8 sps:$4 sm:$0xff]  }
  0xc2   : > { %1627 = vmatpush1.bf16.msra.mxu0 %v3266_v55  ;;  %v3358_v55 = vld [vmem:[%s4047_s13 + $0xb4] ss:$8 sps:$4 sm:$0xff]  }
  0xc3   : > { %1668 = vmatpush1.bf16.msra.mxu1 %v3267_v56  ;;  %1628 = vmatprep.subr.bf16.mxu0 %v3268_v57  ;;  %v3361_v56 = vld [vmem:[%s4047_s13 + $0x1b4] ss:$8 sps:$4 sm:$0xff]   ;;  %v3356_v57 = vld [vmem:[%s4047_s13 + $0xb0] ss:$8 sps:$4 sm:$0xff]  }
  0xc4   : > { %1669 = vmatprep.subr.bf16.mxu1 %v3270_v58  ;;  %v3359_v58 = vld [vmem:[%s4047_s13 + $0x1b0] ss:$8 sps:$4 sm:$0xff]  }
  0xc6   : > { %1629 = vmatpush1.bf16.msra.mxu0 %v3272_v59  ;;  %v3364_v59 = vld [vmem:[%s4047_s13 + $0xc4] ss:$8 sps:$4 sm:$0xff]  }
  0xc7   : > { %1670 = vmatpush1.bf16.msra.mxu1 %v3273_v60  ;;  %1630 = vmatprep.subr.bf16.mxu0 %v3274_v61  ;;  %v3367_v60 = vld [vmem:[%s4047_s13 + $0x1c4] ss:$8 sps:$4 sm:$0xff]   ;;  %v3362_v61 = vld [vmem:[%s4047_s13 + $0xc0] ss:$8 sps:$4 sm:$0xff]  }
  0xc8   : > { %1671 = vmatprep.subr.bf16.mxu1 %v3276_v62  ;;  %v3365_v62 = vld [vmem:[%s4047_s13 + $0x1c0] ss:$8 sps:$4 sm:$0xff]  }
  0xca   : > { %1631 = vmatpush1.bf16.msra.mxu0 %v3278_v63  ;;  %v3370_v63 = vld [vmem:[%s4047_s13 + $0xd4] ss:$8 sps:$4 sm:$0xff]  }
  0xcb   : > { %1672 = vmatpush1.bf16.msra.mxu1 %v3279_v0  ;;  %1632 = vmatprep.subr.bf16.mxu0 %v3280_v1  ;;  %v3373_v0 = vld [vmem:[%s4047_s13 + $0x1d4] ss:$8 sps:$4 sm:$0xff]   ;;  %v3368_v1 = vld [vmem:[%s4047_s13 + $0xd0] ss:$8 sps:$4 sm:$0xff]  }
  0xcc   : > { %1673 = vmatprep.subr.bf16.mxu1 %v3282_v2  ;;  %v3371_v2 = vld [vmem:[%s4047_s13 + $0x1d0] ss:$8 sps:$4 sm:$0xff]  }
  0xce   : > { %1633 = vmatpush1.bf16.msra.mxu0 %v3284_v3  ;;  %v3376_v3 = vld [vmem:[%s4047_s13 + $0xe4] ss:$8 sps:$4 sm:$0xff]  }
  0xcf   : > { %1674 = vmatpush1.bf16.msra.mxu1 %v3285_v4  ;;  %2018 = vmatprep.subr.bf16.mxu0 %v3292_v5  ;;  %v3379_v4 = vld [vmem:[%s4047_s13 + $0x1e4] ss:$8 sps:$4 sm:$0xff]   ;;  %v3374_v5 = vld [vmem:[%s4047_s13 + $0xe0] ss:$8 sps:$4 sm:$0xff]  }
  0xd0   : > { %2059 = vmatprep.subr.bf16.mxu1 %v3295_v6  ;;  %v3377_v6 = vld [vmem:[%s4047_s13 + $0x1e0] ss:$8 sps:$4 sm:$0xff]  }
  0xd1   : > { %1635 = vmatmul.mubr.bf16.vlgmr.msra.gmra.mrb[0].mxu0 %v2854_v7  ;;  %v3382_v7 = vld [vmem:[%s4047_s13 + $0xf4] ss:$8 sps:$4 sm:$0xff]  }
  0xd2   : > { %1676 = vmatmul.mubr.bf16.vlgmr.msra.gmra.mrb[0].mxu1 %v2856_v8  ;;  %2019 = vmatpush1.bf16.msra.mxu0 %v3290_v9  ;;  %v3385_v8 = vld [vmem:[%s4047_s13 + $0x1f4] ss:$8 sps:$4 sm:$0xff]   ;;  %v3380_v9 = vld [vmem:[%s4047_s13 + $0xf0] ss:$8 sps:$4 sm:$0xff]  }
  0xd3   : > { %2060 = vmatpush1.bf16.msra.mxu1 %v3293_v10  ;;  %2020 = vmatprep.subr.bf16.mxu0 %v3298_v11  ;;  %v3383_v10 = vld [vmem:[%s4047_s13 + $0x1f0] ss:$8 sps:$4 sm:$0xff]   ;;  %v3392_v11 = vld [vmem:[%s4047_s13 + $0x404] ss:$8 sps:$4 sm:$0xff]  }
  0xd4   : > { %2061 = vmatprep.subr.bf16.mxu1 %v3301_v12  ;;  %2050 = vmatprep.mubr.bf16.mxu0 %v2923_v37  ;;  %v3395_v12 = vld [vmem:[%s4047_s13 + $0x504] ss:$8 sps:$4 sm:$0xff]   ;;  %v3422_v37 = vld [vmem:[%s4047_s13 + $0x454] ss:$8 sps:$4 sm:$0xff]  }
  0xd5   : > { %2091 = vmatprep.mubr.bf16.mxu1 %v2925_v38  ;;  %v3425_v38 = vld [vmem:[%s4047_s13 + $0x554] ss:$8 sps:$4 sm:$0xff]  }
  0xd6   : > { %2021 = vmatpush1.bf16.msra.mxu0 %v3296_v13  ;;  %v2922_v13 = vcombine.low %v4143_v33, %v4143_v33  ;;  %v3416_v33 = vld [vmem:[%s4047_s13 + $0x444] ss:$8 sps:$4 sm:$0xff]  }
  0xd7   : > { %2062 = vmatpush1.bf16.msra.mxu1 %v3299_v14  ;;  %2022 = vmatprep.subr.bf16.mxu0 %v3304_v15  ;;  %v2924_v14 = vcombine.low %v4146_v34, %v4146_v34  ;;  %v3390_v15 = vld [vmem:[%s4047_s13 + $0x400] ss:$8 sps:$4 sm:$0xff]   ;;  %v3419_v34 = vld [vmem:[%s4047_s13 + $0x544] ss:$8 sps:$4 sm:$0xff]  }
  0xd8   : > { %2063 = vmatprep.subr.bf16.mxu1 %v3307_v16  ;;  %v3393_v16 = vld [vmem:[%s4047_s13 + $0x500] ss:$8 sps:$4 sm:$0xff]  }
  0xda   : > { %2023 = vmatpush1.bf16.msra.mxu0 %v3302_v17  ;;  %v3398_v17 = vld [vmem:[%s4047_s13 + $0x414] ss:$8 sps:$4 sm:$0xff]  }
  0xdb   : > { %2064 = vmatpush1.bf16.msra.mxu1 %v3305_v18  ;;  %2024 = vmatprep.subr.bf16.mxu0 %v3310_v19  ;;  %v3401_v18 = vld [vmem:[%s4047_s13 + $0x514] ss:$8 sps:$4 sm:$0xff]  }
  0xdc   : > { %2065 = vmatprep.subr.bf16.mxu1 %v3313_v20  ;;  %v4201_v19 = vld [vmem:[%s4030_s30 + $0x20] sm:$0xff]  ;;  %v4204_v20 = vld [vmem:[%s4030_s30 + $0x28] sm:$0xff] }
  0xde   : > { %2025 = vmatpush1.bf16.msra.mxu0 %v3308_v21  ;;  %v3057_v21 = vcombine.high %v4201_v19, %v4201_v19 }
  0xdf   : > { %2066 = vmatpush1.bf16.msra.mxu1 %v3311_v22  ;;  %2026 = vmatprep.subr.bf16.mxu0 %v3316_v23  ;;  %v3059_v22 = vcombine.high %v4204_v20, %v4204_v20  ;;  %v3396_v23 = vld [vmem:[%s4047_s13 + $0x410] ss:$8 sps:$4 sm:$0xff]  }
  0xe0   : > { %2067 = vmatprep.subr.bf16.mxu1 %v3319_v24  ;;  %v3399_v24 = vld [vmem:[%s4047_s13 + $0x510] ss:$8 sps:$4 sm:$0xff]  }
  0xe2   : > { %2027 = vmatpush1.bf16.msra.mxu0 %v3314_v25  ;;  %v3404_v25 = vld [vmem:[%s4047_s13 + $0x424] ss:$8 sps:$4 sm:$0xff]  }
  0xe3   : > { %2068 = vmatpush1.bf16.msra.mxu1 %v3317_v26  ;;  %2028 = vmatprep.subr.bf16.mxu0 %v3322_v27  ;;  %v3407_v26 = vld [vmem:[%s4047_s13 + $0x524] ss:$8 sps:$4 sm:$0xff]   ;;  %v3402_v27 = vld [vmem:[%s4047_s13 + $0x420] ss:$8 sps:$4 sm:$0xff]  }
  0xe4   : > { %2069 = vmatprep.subr.bf16.mxu1 %v3325_v28  ;;  %v3405_v28 = vld [vmem:[%s4047_s13 + $0x520] ss:$8 sps:$4 sm:$0xff]  }
  0xe6   : > { %2029 = vmatpush1.bf16.msra.mxu0 %v3320_v29  ;;  %v3410_v29 = vld [vmem:[%s4047_s13 + $0x434] ss:$8 sps:$4 sm:$0xff]  }
  0xe7   : > { %2070 = vmatpush1.bf16.msra.mxu1 %v3323_v30  ;;  %2030 = vmatprep.subr.bf16.mxu0 %v3328_v31  ;;  %v3413_v30 = vld [vmem:[%s4047_s13 + $0x534] ss:$8 sps:$4 sm:$0xff]   ;;  %v3408_v31 = vld [vmem:[%s4047_s13 + $0x430] ss:$8 sps:$4 sm:$0xff]  }
  0xe8   : > { %2071 = vmatprep.subr.bf16.mxu1 %v3331_v32  ;;  %v3411_v32 = vld [vmem:[%s4047_s13 + $0x530] ss:$8 sps:$4 sm:$0xff]  }
  0xea   : > { %2031 = vmatpush1.bf16.msra.mxu0 %v3326_v35  ;;  %v3414_v35 = vld [vmem:[%s4047_s13 + $0x440] ss:$8 sps:$4 sm:$0xff]  }
  0xeb   : > { %2072 = vmatpush1.bf16.msra.mxu1 %v3329_v36  ;;  %2032 = vmatprep.subr.bf16.mxu0 %v3334_v39  ;;  %v3417_v36 = vld [vmem:[%s4047_s13 + $0x540] ss:$8 sps:$4 sm:$0xff]   ;;  %v3420_v39 = vld [vmem:[%s4047_s13 + $0x450] ss:$8 sps:$4 sm:$0xff]  }
  0xec   : > { %2073 = vmatprep.subr.bf16.mxu1 %v3337_v40  ;;  %v3423_v40 = vld [vmem:[%s4047_s13 + $0x550] ss:$8 sps:$4 sm:$0xff]  }
  0xee   : > { %2033 = vmatpush1.bf16.msra.mxu0 %v3332_v41  ;;  %v3428_v41 = vld [vmem:[%s4047_s13 + $0x464] ss:$8 sps:$4 sm:$0xff]  }
  0xef   : > { %2074 = vmatpush1.bf16.msra.mxu1 %v3335_v42  ;;  %2034 = vmatprep.subr.bf16.mxu0 %v3340_v43  ;;  %v3431_v42 = vld [vmem:[%s4047_s13 + $0x564] ss:$8 sps:$4 sm:$0xff]   ;;  %v3426_v43 = vld [vmem:[%s4047_s13 + $0x460] ss:$8 sps:$4 sm:$0xff]  }
  0xf0   : > { %2075 = vmatprep.subr.bf16.mxu1 %v3343_v44  ;;  %v3429_v44 = vld [vmem:[%s4047_s13 + $0x560] ss:$8 sps:$4 sm:$0xff]  }
  0xf2   : > { %2035 = vmatpush1.bf16.msra.mxu0 %v3338_v45  ;;  %v3434_v45 = vld [vmem:[%s4047_s13 + $0x474] ss:$8 sps:$4 sm:$0xff]  }
  0xf3   : > { %2076 = vmatpush1.bf16.msra.mxu1 %v3341_v46  ;;  %2036 = vmatprep.subr.bf16.mxu0 %v3346_v47  ;;  %v3437_v46 = vld [vmem:[%s4047_s13 + $0x574] ss:$8 sps:$4 sm:$0xff]   ;;  %v3432_v47 = vld [vmem:[%s4047_s13 + $0x470] ss:$8 sps:$4 sm:$0xff]  }
  0xf4   : > { %2077 = vmatprep.subr.bf16.mxu1 %v3349_v48  ;;  %v3435_v48 = vld [vmem:[%s4047_s13 + $0x570] ss:$8 sps:$4 sm:$0xff]  }
  0xf6   : > { %2037 = vmatpush1.bf16.msra.mxu0 %v3344_v49  ;;  %v3440_v49 = vld [vmem:[%s4047_s13 + $0x484] ss:$8 sps:$4 sm:$0xff]  }
  0xf7   : > { %2078 = vmatpush1.bf16.msra.mxu1 %v3347_v50  ;;  %2038 = vmatprep.subr.bf16.mxu0 %v3352_v51  ;;  %v3443_v50 = vld [vmem:[%s4047_s13 + $0x584] ss:$8 sps:$4 sm:$0xff]   ;;  %v3438_v51 = vld [vmem:[%s4047_s13 + $0x480] ss:$8 sps:$4 sm:$0xff]  }
  0xf8   : > { %2079 = vmatprep.subr.bf16.mxu1 %v3355_v52  ;;  %v3441_v52 = vld [vmem:[%s4047_s13 + $0x580] ss:$8 sps:$4 sm:$0xff]  }
  0xfa   : > { %2039 = vmatpush1.bf16.msra.mxu0 %v3350_v53  ;;  %v3446_v53 = vld [vmem:[%s4047_s13 + $0x494] ss:$8 sps:$4 sm:$0xff]  }
  0xfb   : > { %2080 = vmatpush1.bf16.msra.mxu1 %v3353_v54  ;;  %2040 = vmatprep.subr.bf16.mxu0 %v3358_v55  ;;  %v3449_v54 = vld [vmem:[%s4047_s13 + $0x594] ss:$8 sps:$4 sm:$0xff]   ;;  %v3444_v55 = vld [vmem:[%s4047_s13 + $0x490] ss:$8 sps:$4 sm:$0xff]  }
  0xfc   : > { %2081 = vmatprep.subr.bf16.mxu1 %v3361_v56  ;;  %v3447_v56 = vld [vmem:[%s4047_s13 + $0x590] ss:$8 sps:$4 sm:$0xff]  }
  0xfe   : > { %2041 = vmatpush1.bf16.msra.mxu0 %v3356_v57  ;;  %v3452_v57 = vld [vmem:[%s4047_s13 + $0x4a4] ss:$8 sps:$4 sm:$0xff]  }
  0xff   : > { %2082 = vmatpush1.bf16.msra.mxu1 %v3359_v58  ;;  %2042 = vmatprep.subr.bf16.mxu0 %v3364_v59  ;;  %v3455_v58 = vld [vmem:[%s4047_s13 + $0x5a4] ss:$8 sps:$4 sm:$0xff]   ;;  %v3450_v59 = vld [vmem:[%s4047_s13 + $0x4a0] ss:$8 sps:$4 sm:$0xff]  }
 0x100   : > { %2083 = vmatprep.subr.bf16.mxu1 %v3367_v60  ;;  %v3453_v60 = vld [vmem:[%s4047_s13 + $0x5a0] ss:$8 sps:$4 sm:$0xff]  }
 0x102   : > { %2043 = vmatpush1.bf16.msra.mxu0 %v3362_v61  ;;  %v3458_v61 = vld [vmem:[%s4047_s13 + $0x4b4] ss:$8 sps:$4 sm:$0xff]  }
 0x103   : > { %2084 = vmatpush1.bf16.msra.mxu1 %v3365_v62  ;;  %2044 = vmatprep.subr.bf16.mxu0 %v3370_v63  ;;  %v3461_v62 = vld [vmem:[%s4047_s13 + $0x5b4] ss:$8 sps:$4 sm:$0xff]   ;;  %v3456_v63 = vld [vmem:[%s4047_s13 + $0x4b0] ss:$8 sps:$4 sm:$0xff]  }
 0x104   : > { %2085 = vmatprep.subr.bf16.mxu1 %v3373_v0  ;;  %v3459_v0 = vld [vmem:[%s4047_s13 + $0x5b0] ss:$8 sps:$4 sm:$0xff]  }
 0x106   : > { %2045 = vmatpush1.bf16.msra.mxu0 %v3368_v1  ;;  %v3464_v1 = vld [vmem:[%s4047_s13 + $0x4c4] ss:$8 sps:$4 sm:$0xff]  }
 0x107   : > { %2086 = vmatpush1.bf16.msra.mxu1 %v3371_v2  ;;  %2046 = vmatprep.subr.bf16.mxu0 %v3376_v3  ;;  %v3467_v2 = vld [vmem:[%s4047_s13 + $0x5c4] ss:$8 sps:$4 sm:$0xff]   ;;  %v3462_v3 = vld [vmem:[%s4047_s13 + $0x4c0] ss:$8 sps:$4 sm:$0xff]  }
 0x108   : > { %2087 = vmatprep.subr.bf16.mxu1 %v3379_v4  ;;  %v3465_v4 = vld [vmem:[%s4047_s13 + $0x5c0] ss:$8 sps:$4 sm:$0xff]  }
 0x10a   : > { %2047 = vmatpush1.bf16.msra.mxu0 %v3374_v5  ;;  %v3470_v5 = vld [vmem:[%s4047_s13 + $0x4d4] ss:$8 sps:$4 sm:$0xff]  }
 0x10b   : > { %2088 = vmatpush1.bf16.msra.mxu1 %v3377_v6  ;;  %2048 = vmatprep.subr.bf16.mxu0 %v3382_v7  ;;  %v3473_v6 = vld [vmem:[%s4047_s13 + $0x5d4] ss:$8 sps:$4 sm:$0xff]   ;;  %v3468_v7 = vld [vmem:[%s4047_s13 + $0x4d0] ss:$8 sps:$4 sm:$0xff]  }
 0x10c   : > { %2089 = vmatprep.subr.bf16.mxu1 %v3385_v8  ;;  %v3471_v8 = vld [vmem:[%s4047_s13 + $0x5d0] ss:$8 sps:$4 sm:$0xff]  }
 0x10e   : > { %2049 = vmatpush1.bf16.msra.mxu0 %v3380_v9  ;;  %v3476_v9 = vld [vmem:[%s4047_s13 + $0x4e4] ss:$8 sps:$4 sm:$0xff]  }
 0x10f   : > { %2090 = vmatpush1.bf16.msra.mxu1 %v3383_v10  ;;  %2502 = vmatprep.subr.bf16.mxu0 %v3392_v11  ;;  %v3479_v10 = vld [vmem:[%s4047_s13 + $0x5e4] ss:$8 sps:$4 sm:$0xff]   ;;  %v3474_v11 = vld [vmem:[%s4047_s13 + $0x4e0] ss:$8 sps:$4 sm:$0xff]  }
 0x110   : > { %2543 = vmatprep.subr.bf16.mxu1 %v3395_v12  ;;  %v3477_v12 = vld [vmem:[%s4047_s13 + $0x5e0] ss:$8 sps:$4 sm:$0xff]  }
 0x111   : > { %2051 = vmatmul.mubr.bf16.vlgmr.msra.gmra.mrb[4].mxu0 %v2922_v13  ;;  %v3482_v13 = vld [vmem:[%s4047_s13 + $0x4f4] ss:$8 sps:$4 sm:$0xff]  }
 0x112   : > { %2092 = vmatmul.mubr.bf16.vlgmr.msra.gmra.mrb[4].mxu1 %v2924_v14  ;;  %2503 = vmatpush1.bf16.msra.mxu0 %v3390_v15  ;;  %v3485_v14 = vld [vmem:[%s4047_s13 + $0x5f4] ss:$8 sps:$4 sm:$0xff]   ;;  %v3480_v15 = vld [vmem:[%s4047_s13 + $0x4f0] ss:$8 sps:$4 sm:$0xff]  }
 0x113   : > { %2544 = vmatpush1.bf16.msra.mxu1 %v3393_v16  ;;  %2504 = vmatprep.subr.bf16.mxu0 %v3398_v17  ;;  %v3483_v16 = vld [vmem:[%s4047_s13 + $0x5f0] ss:$8 sps:$4 sm:$0xff]   ;;  %v3056_v17 = vcombine.low %v4201_v19, %v4201_v19 }
 0x114   : > { %2545 = vmatprep.subr.bf16.mxu1 %v3401_v18  ;;  %2534 = vmatprep.mubr.bf16.mxu0 %v3057_v21  ;;  %v3058_v18 = vcombine.low %v4204_v20, %v4204_v20 }
 0x115   : > { %2575 = vmatprep.mubr.bf16.mxu1 %v3059_v22 }
 0x116   : > { %2505 = vmatpush1.bf16.msra.mxu0 %v3396_v23 }
 0x117   : > { %2546 = vmatpush1.bf16.msra.mxu1 %v3399_v24  ;;  %2506 = vmatprep.subr.bf16.mxu0 %v3404_v25 }
 0x118   : > { %2547 = vmatprep.subr.bf16.mxu1 %v3407_v26 }
 0x11a   : > { %2507 = vmatpush1.bf16.msra.mxu0 %v3402_v27 }
 0x11b   : > { %2548 = vmatpush1.bf16.msra.mxu1 %v3405_v28  ;;  %2508 = vmatprep.subr.bf16.mxu0 %v3410_v29 }
 0x11c   : > { %2549 = vmatprep.subr.bf16.mxu1 %v3413_v30 }
 0x11e   : > { %2509 = vmatpush1.bf16.msra.mxu0 %v3408_v31 }
 0x11f   : > { %2550 = vmatpush1.bf16.msra.mxu1 %v3411_v32  ;;  %2510 = vmatprep.subr.bf16.mxu0 %v3416_v33 }
 0x120   : > { %2551 = vmatprep.subr.bf16.mxu1 %v3419_v34 }
 0x122   : > { %2511 = vmatpush1.bf16.msra.mxu0 %v3414_v35 }
 0x123   : > { %2552 = vmatpush1.bf16.msra.mxu1 %v3417_v36  ;;  %2512 = vmatprep.subr.bf16.mxu0 %v3422_v37 }
 0x124   : > { %2553 = vmatprep.subr.bf16.mxu1 %v3425_v38 }
 0x126   : > { %2513 = vmatpush1.bf16.msra.mxu0 %v3420_v39 }
 0x127   : > { %2554 = vmatpush1.bf16.msra.mxu1 %v3423_v40  ;;  %2514 = vmatprep.subr.bf16.mxu0 %v3428_v41 }
 0x128   : > { %2555 = vmatprep.subr.bf16.mxu1 %v3431_v42 }
 0x12a   : > { %2515 = vmatpush1.bf16.msra.mxu0 %v3426_v43 }
 0x12b   : > { %2556 = vmatpush1.bf16.msra.mxu1 %v3429_v44  ;;  %2516 = vmatprep.subr.bf16.mxu0 %v3434_v45 }
 0x12c   : > { %2557 = vmatprep.subr.bf16.mxu1 %v3437_v46  ;;  %v2586_v46 = vld [vmem:[#allocation2] sm:$0xff] }
 0x12e   : > { %2517 = vmatpush1.bf16.msra.mxu0 %v3432_v47 }
 0x12f   : > { %2558 = vmatpush1.bf16.msra.mxu1 %v3435_v48  ;;  %2518 = vmatprep.subr.bf16.mxu0 %v3440_v49 }
 0x130   : > { %2559 = vmatprep.subr.bf16.mxu1 %v3443_v50 }
 0x132   : > { %2519 = vmatpush1.bf16.msra.mxu0 %v3438_v51  ;;  %v2587_v51 = vld [vmem:[#allocation2 + $0x8] sm:$0xff] }
 0x133   : > { %2560 = vmatpush1.bf16.msra.mxu1 %v3441_v52  ;;  %2520 = vmatprep.subr.bf16.mxu0 %v3446_v53 }
 0x134   : > { %2561 = vmatprep.subr.bf16.mxu1 %v3449_v54 }
 0x136   : > { %2521 = vmatpush1.bf16.msra.mxu0 %v3444_v55 }
 0x137   : > { %2562 = vmatpush1.bf16.msra.mxu1 %v3447_v56  ;;  %2522 = vmatprep.subr.bf16.mxu0 %v3452_v57  ;;  %v2600_v57 = vlaneseq (!%p3124_p13) }
 0x138   : > { %2563 = vmatprep.subr.bf16.mxu1 %v3455_v58 }
 0x139   : > { %v2601_v58 = vshrl.u32 (!%p3124_p13), %v2600_v57, 7 }
 0x13a   : > { %2523 = vmatpush1.bf16.msra.mxu0 %v3450_v59  ;;  %v2598_v59 = vld [vmem:[%s1106_s15] sm:$0x3] (!%p3124_p13) }
 0x13b   : > { %2564 = vmatpush1.bf16.msra.mxu1 %v3453_v60  ;;  %2524 = vmatprep.subr.bf16.mxu0 %v3458_v61  ;;  %v2612_v60 = vld [vmem:[%s4040_s9] sm:$0xff] (!%p3124_p13)  ;;  %v2602_v61 = vsub.s32 (!%p3124_p13), 0, %v2601_v58 }
 0x13c   : > { %2565 = vmatprep.subr.bf16.mxu1 %v3461_v62  ;;  %v2606_v62 = vsub.s32 (!%p3124_p13), 1, %v2601_v58 }
 0x13e   : > { %2525 = vmatpush1.bf16.msra.mxu0 %v3456_v63 }
 0x13f   : > { %2566 = vmatpush1.bf16.msra.mxu1 %v3459_v0  ;;  %2526 = vmatprep.subr.bf16.mxu0 %v3464_v1  ;;  %v2603_v1 = vrot.slane (!%p3124_p13), %v2598_v59, %v2602_v61 }
 0x140   : > { %2567 = vmatprep.subr.bf16.mxu1 %v3467_v2  ;;  %v2607_v2 = vrot.slane (!%p3124_p13), %v2598_v59, %v2606_v62 }
 0x142   : > { %2527 = vmatpush1.bf16.msra.mxu0 %v3462_v3  ;;  %v2613_v3 = vunpack.c.l.bf16 (!%p3124_p13), %v2612_v60 }
 0x143   : > { %2568 = vmatpush1.bf16.msra.mxu1 %v3465_v4  ;;  %2528 = vmatprep.subr.bf16.mxu0 %v3470_v5  ;;  %v2614_v4 = vunpack.c.h.bf16 (!%p3124_p13), %v2612_v60 }
 0x144   : > { %2569 = vmatprep.subr.bf16.mxu1 %v3473_v6 }
 0x146   : > { %2529 = vmatpush1.bf16.msra.mxu0 %v3468_v7 }
 0x147   : > { %2570 = vmatpush1.bf16.msra.mxu1 %v3471_v8  ;;  %2530 = vmatprep.subr.bf16.mxu0 %v3476_v9 }
 0x148   : > { %2571 = vmatprep.subr.bf16.mxu1 %v3479_v10 }
 0x14a   : > { %2531 = vmatpush1.bf16.msra.mxu0 %v3474_v11 }
 0x14b   : > { %2572 = vmatpush1.bf16.msra.mxu1 %v3477_v12  ;;  %2532 = vmatprep.subr.bf16.mxu0 %v3482_v13 }
 0x14c   : > { %2573 = vmatprep.subr.bf16.mxu1 %v3485_v14 }
 0x14e   : > { %2533 = vmatpush1.bf16.msra.mxu0 %v3480_v15 }
 0x14f   : > { %2574 = vmatpush1.bf16.msra.mxu1 %v3483_v16 }
 0x151   : > { %2535 = vmatmul.mubr.bf16.vlgmr.msra.gmra.mrb[8].mxu0 %v3056_v17 }
 0x152   : > { %2576 = vmatmul.mubr.bf16.vlgmr.msra.gmra.mrb[8].mxu1 %v3058_v18 }
 0x1a4   : > { %v1636_v21 = vpop.f32.mrb[0].mxu0 }
 0x1a5   : > { %v1677_v22 = vpop.f32.mrb[0].mxu1  ;;  %v1638_v24 = vpop.f32.mrb[1].mxu0 }
 0x1a6   : > { %v1678_v23 = vadd.f32 %v1677_v22, %v1636_v21  ;;  %v1679_v25 = vpop.f32.mrb[1].mxu1  ;;  %v1640_v27 = vpop.f32.mrb[2].mxu0 }
 0x1a7   : > { %v1680_v26 = vadd.f32 %v1679_v25, %v1638_v24  ;;  %v1681_v28 = vpop.f32.mrb[2].mxu1  ;;  %v1641_v29 = vpop.f32.mrb[3].mxu0 }
 0x1a8   : > { %v1682_v30 = vpop.f32.mrb[3].mxu1 }
 0x1e4   : > { %v2052_v31 = vpop.f32.mrb[4].mxu0 }
 0x1e5   : > { %v2093_v32 = vpop.f32.mrb[4].mxu1  ;;  %v2053_v19 = vadd.f32 %v2052_v31, %v1678_v23  ;;  %v2054_v33 = vpop.f32.mrb[5].mxu0 }
 0x1e6   : > { %v2095_v34 = vpop.f32.mrb[5].mxu1  ;;  %v2055_v20 = vadd.f32 %v2054_v33, %v1680_v26  ;;  %v2056_v35 = vpop.f32.mrb[6].mxu0 }
 0x1e7   : > { %v2097_v36 = vpop.f32.mrb[6].mxu1  ;;  %v2094_v37 = vadd.f32 %v2093_v32, %v2053_v19  ;;  %v2057_v38 = vpop.f32.mrb[7].mxu0 }
 0x1e8   : > { %v2098_v39 = vpop.f32.mrb[7].mxu1  ;;  %v2096_v40 = vadd.f32 %v2095_v34, %v2055_v20 }
 0x224   : > { %v2536_v41 = vpop.f32.mrb[8].mxu0 }
 0x225   : > { %v2577_v42 = vpop.f32.mrb[8].mxu1  ;;  %v2538_v44 = vpop.f32.mrb[9].mxu0 }
 0x226   : > { %v2578_v43 = vadd.f32 %v2577_v42, %v2536_v41  ;;  %v2579_v45 = vpop.f32.mrb[9].mxu1  ;;  %v2540_v48 = vpop.f32.mrb[10].mxu0 }
 0x227   : > { %v2580_v47 = vadd.f32 %v2579_v45, %v2538_v44  ;;  %v2581_v49 = vpop.f32.mrb[10].mxu1  ;;  %v2541_v52 = vpop.f32.mrb[11].mxu0  ;;  %2595 = sbr.rel (%p3124_p13) target bundleno = 574 (0x23e), region = 82 }
 0x228   : > { %v2584_v50 = vadd.f32 %v2578_v43, %v2094_v37  ;;  %v2582_v53 = vpop.f32.mrb[11].mxu1 }
 0x229   : > { %v2585_v54 = vadd.f32 %v2580_v47, %v2096_v40 }
 0x22a   : > { %v2588_v55 = vadd.f32 %v2586_v46, %v2584_v50 }
 0x22b   : > { %v2589_v56 = vadd.f32 %v2587_v51, %v2585_v54 }
 0x22c   : > { %2590 = vst [vmem:[#allocation2] sm:$0xff] %v2588_v55 }
 0x22d   : > { %2591 = vst [vmem:[#allocation2 + $0x8] sm:$0xff] %v2589_v56 }
 0x233   : > { %v2596_v63 = vld [vmem:[#allocation2] sm:$0xff] }
 0x234   : > { %v2597_v0 = vld [vmem:[#allocation2 + $0x8] sm:$0xff]  ;;  %v2610_v5 = vadd.f32 %v2603_v1, %v2596_v63 }
 0x235   : > { %v2611_v6 = vadd.f32 %v2607_v2, %v2597_v0 }
 0x236   : > { %v2615_v7 = vadd.f32 %v2613_v3, %v2610_v5 }
 0x237   : > { %v2616_v8 = vadd.f32 %v2614_v4, %v2611_v6 }
 0x238   : > { %v2617_v9 = vmax.f32 %v2615_v7, 0.0 }
 0x239   : > { %v2618_v10 = vmax.f32 %v2616_v8, 0.0 }
 0x23b   : > { %v3130_v11 = vpack.c.bf16 %v2618_v10, %v2617_v9 }
 0x23d   : > { %2627 = vst [vmem:[%s4045_s12] sm:$0xff] %v3130_v11 }
 0x23e PF: > { %s14_s21 = sadd.s32 1, %s3544_s21   ;;  %s4306_s15 = smov %s3524_s16 }
 0x23f   : > { %p11_p0 = scmp.ge.s32.totalorder %s14_s21, 20   ;;  %s4307_s16 = smov %s3623_s28 }
 0x240   : > { %s4308_s17 = smov %s3536_s19  ;;  %s4309_s18 = smov %s3540_s20 }
 0x241   : > { %s4310_s19 = smov %s4313_s22  ;;  %s4311_s20 = smov %s4317_s23 }
 0x242   :  { %13 = sbr.rel (!%p11_p0) target bundleno = 4 (0x4), region = 130 }

</bundles_post_ra>
